<compile_context>
chip_gen: v5e
topology: v5e:2x2
jax: 0.10.0
libtpu: 0.0.40
codegen_flags: <defaults>
</compile_context>

<pallas_src>
import functools

import jax
import jax.numpy as jnp
import numpy as np
from jax.experimental import pallas as pl
from jax.experimental.pallas import tpu as pltpu

IN_DIM = 300          # LSTM input_size (hard-coded to 300 in the PyTorch module)
K_PAD = 384           # 300 padded to 3 x 128 lanes
HID = 128             # LSTM hidden_size == Linear in/out width
GATES = 4 * HID       # 512

# bf16 gate nonlinearities: ~2x fewer EUP issues on v6e/v7x (bf16 EUP). Still
# compiles on v5e (lowered through f32); set False there to skip the converts.
BF16_GATE_NONLIN = True


def _sigmoid(z):
    # sigmoid(x) = 0.5*(tanh(0.5*x)+1): one EUP op instead of exp + reciprocal,
    # and no approximate-reciprocal error fed back into the recurrent c state.
    return 0.5 * jnp.tanh(0.5 * z).astype(jnp.float32) + 0.5


def _cell(z, c_prev):
    # PyTorch gate order i, f, g, o. Nonlinearities on (optionally bf16) gate
    # pre-activations; state update math stays f32 on the VPU.
    zg = z.astype(jnp.bfloat16) if BF16_GATE_NONLIN else z
    i = _sigmoid(zg[:, 0 * HID:1 * HID])
    f = _sigmoid(zg[:, 1 * HID:2 * HID])
    g = jnp.tanh(zg[:, 2 * HID:3 * HID]).astype(jnp.float32)
    o = _sigmoid(zg[:, 3 * HID:4 * HID])
    c_new = f * c_prev + i * g
    h_new = o * jnp.tanh(c_new)          # tanh on the carried cell state kept f32
    return h_new, c_new


def rnn_net_kernel(x_ref, wih1_ref, wf_ref, b1_ref, b2_ref, wnn_ref, bnn_ref,
                   out_ref,
                   gx_ref, r1_ref, c1_ref, h2_ref, c2_ref,
                   *, t_chunk, m_rows, n_ctx, t_total):
    # x_ref : (t_chunk*m_rows, K_PAD) bf16, time-major chunk of the folded batch
    # wf_ref: (256, 1024) bf16 fused recurrent weight [[whh1^T, wih2^T],[0, whh2^T]]
    # gx_ref: (t_chunk*m_rows, GATES) f32 scratch (per-chunk hoisted input proj)
    # r1/c1/h2/c2: carried LSTM state scratch (persist across grid steps)
    chunk = pl.program_id(0)

    @pl.when(chunk == 0)
    def _():
        r1_ref[...] = jnp.zeros_like(r1_ref)
        c1_ref[...] = jnp.zeros_like(c1_ref)
        h2_ref[...] = jnp.zeros_like(h2_ref)
        c2_ref[...] = jnp.zeros_like(c2_ref)

    # (1) Hoisted layer-1 input projection for this time chunk: one big MXU matmul,
    #     staged in VMEM scratch and sliced per step (keeps vreg pressure low).
    gx_ref[...] = (jnp.dot(x_ref[...], wih1_ref[...],
                           preferred_element_type=jnp.float32)
                   + b1_ref[...])

    # Hoisted bias broadcast (JAX does not CSE broadcast_in_dim inside the loop).
    b2 = jnp.broadcast_to(b2_ref[...], (m_rows, GATES))

    r1 = r1_ref[...]          # h1_{t-1} @ whh1^T, carried from the previous step
    c1 = c1_ref[...]
    h2 = h2_ref[...]
    c2 = c2_ref[...]

    # (2) Serial recurrence: ONE fused (m_rows,256)@(256,1024) bf16 matmul per step.
    for t in range(t_chunk):                       # static unroll, t_chunk is small
        z1 = gx_ref[t * m_rows:(t + 1) * m_rows, :] + r1
        h1, c1 = _cell(z1, c1)

        lhs = jnp.concatenate([h1.astype(jnp.bfloat16), h2.astype(jnp.bfloat16)],
                              axis=1)              # (m_rows, 256)
        fused = jnp.dot(lhs, wf_ref[...], preferred_element_type=jnp.float32)
        r1 = fused[:, :GATES]                      # h1_t @ whh1^T  (for z1_{t+1})
        z2 = fused[:, GATES:] + b2                 # h1_t@wih2^T + h2_{t-1}@whh2^T + b2
        h2, c2 = _cell(z2, c2)

        # (3) Epilogue at the true last timestep (padded trailing steps never write):
        #     relu for all rows, Linear only for the context rows, one lane-dense store.
        @pl.when(chunk * t_chunk + t == t_total - 1)
        def _():
            u = jnp.maximum(h2, 0.0)
            ctx_lin = (jnp.dot(u.astype(jnp.bfloat16), wnn_ref[...],
                               preferred_element_type=jnp.float32)
                       + bnn_ref[...])
            row = jax.lax.broadcasted_iota(jnp.int32, (m_rows, HID), 0)
            out_ref[...] = jnp.where(row < n_ctx, ctx_lin, u)

    # Carry state to the next time chunk.
    r1_ref[...] = r1
    c1_ref[...] = c1
    h2_ref[...] = h2
    c2_ref[...] = c2


def init_params(key):
    """Deterministic synthetic parameters matching torch.nn.LSTM/Linear shapes."""
    ks = jax.random.split(key, 10)
    bound = 1.0 / np.sqrt(HID)

    def u(k, shape):
        return jax.random.uniform(k, shape, jnp.float32, -bound, bound)

    return dict(
        w_ih1=u(ks[0], (4 * HID, IN_DIM)),   # weight_ih_l0
        w_hh1=u(ks[1], (4 * HID, HID)),      # weight_hh_l0
        b_ih1=u(ks[2], (4 * HID,)),
        b_hh1=u(ks[3], (4 * HID,)),
        w_ih2=u(ks[4], (4 * HID, HID)),      # weight_ih_l1
        w_hh2=u(ks[5], (4 * HID, HID)),      # weight_hh_l1
        b_ih2=u(ks[6], (4 * HID,)),
        b_hh2=u(ks[7], (4 * HID,)),
        w_nn=u(ks[8], (HID, HID)),           # Linear(128, 128)
        b_nn=u(ks[9], (HID,)),
    )


def rnn_net_forward(params, context, context_lens, options, option_lens, *, t_chunk=4):
    """context: (B, T, 300), options: (B, N, T, 300) -> logits (B, N)."""
    del context_lens, option_lens          # unused, exactly like the PyTorch forward
    B, T, D = context.shape
    _, N, To, Do = options.shape
    assert D == IN_DIM and Do == IN_DIM and To == T

    M = (N + 1) * B                        # all sequences folded into the batch
    M_pad = ((M + 15) // 16) * 16          # full bf16 sublane tile (16 rows)

    t_chunk = max(1, min(t_chunk, T))
    num_chunks = (T + t_chunk - 1) // t_chunk
    T_pad = num_chunks * t_chunk

    # Stack [context ; option_0 ; ... ; option_{N-1}] along batch -> (M, T, 300).
    xs = jnp.concatenate(
        [context.astype(jnp.float32),
         jnp.transpose(options, (1, 0, 2, 3)).reshape(N * B, T, D).astype(jnp.float32)],
        axis=0)
    # Zero-pad rows -> M_pad, time -> T_pad, features -> K_PAD; go time-major, flatten.
    xs = jnp.pad(xs, ((0, M_pad - M), (0, T_pad - T), (0, K_PAD - D)))
    x_flat = jnp.transpose(xs, (1, 0, 2)).reshape(T_pad * M_pad, K_PAD).astype(jnp.bfloat16)

    # Pre-transposed weights: bf16 MXU inputs, f32 biases.
    wih1T = jnp.pad(params["w_ih1"].T, ((0, K_PAD - IN_DIM), (0, 0))).astype(jnp.bfloat16)
    # Fused recurrent weight: [h1 | h2] @ wf = [h1@whh1^T, h1@wih2^T + h2@whh2^T]
    wf = jnp.concatenate(
        [jnp.concatenate([params["w_hh1"].T, params["w_ih2"].T], axis=1),
         jnp.concatenate([jnp.zeros((HID, GATES), jnp.float32),
                          params["w_hh2"].T], axis=1)],
        axis=0).astype(jnp.bfloat16)                                # (256, 1024)
    b1 = (params["b_ih1"] + params["b_hh1"])[None, :].astype(jnp.float32)
    b2 = (params["b_ih2"] + params["b_hh2"])[None, :].astype(jnp.float32)
    wnnT = params["w_nn"].T.astype(jnp.bfloat16)                    # (128, 128)
    bnn = params["b_nn"][None, :].astype(jnp.float32)               # (1, 128)

    def full(arr):
        nd = arr.ndim
        return pl.BlockSpec(arr.shape, lambda i, _nd=nd: (0,) * _nd)

    kernel = functools.partial(rnn_net_kernel, t_chunk=t_chunk, m_rows=M_pad,
                               n_ctx=B, t_total=T)

    out = pl.pallas_call(
        kernel,
        out_shape=jax.ShapeDtypeStruct((M_pad, HID), jnp.float32),
        grid=(num_chunks,),
        in_specs=[pl.BlockSpec((t_chunk * M_pad, K_PAD), lambda i: (i, 0)),
                  full(wih1T), full(wf), full(b1), full(b2), full(wnnT), full(bnn)],
        out_specs=pl.BlockSpec((M_pad, HID), lambda i: (0, 0)),
        scratch_shapes=[pltpu.VMEM((t_chunk * M_pad, GATES), jnp.float32),  # gx
                        pltpu.VMEM((M_pad, GATES), jnp.float32),            # r1 carry
                        pltpu.VMEM((M_pad, HID), jnp.float32),              # c1 carry
                        pltpu.VMEM((M_pad, HID), jnp.float32),              # h2 carry
                        pltpu.VMEM((M_pad, HID), jnp.float32)],             # c2 carry
        compiler_params=pltpu.CompilerParams(
            dimension_semantics=("arbitrary",)),   # serial time recurrence
    )(x_flat, wih1T, wf, b1, b2, wnnT, bnn)

    # Tiny epilogue (O(B*N*128) flops) in plain JAX: per-option dot products.
    ctx = out[:B]                                     # Linear(relu(h_ctx_T)), (B, 128)
    opt = out[B:B + N * B].reshape(N, B, HID)         # relu(h_opt_T)
    logits = jnp.einsum('bh,nbh->bn', ctx, opt)       # (B, N)
    return logits


# ---------------- pure-JAX f32 reference (mirrors the PyTorch forward) ----------------
def _lstm_ref(x, p):
    B, T, _ = x.shape

    def sig(z):
        return 1.0 / (1.0 + jnp.exp(-z))

    def cell(xt, h, c, w_ih, w_hh, b_ih, b_hh):
        gates = xt @ w_ih.T + b_ih + h @ w_hh.T + b_hh
        i, f, g, o = jnp.split(gates, 4, axis=-1)
        c = sig(f) * c + sig(i) * jnp.tanh(g)
        h = sig(o) * jnp.tanh(c)
        return h, c

    h1 = c1 = h2 = c2 = jnp.zeros((B, HID), jnp.float32)
    outs = []
    for t in range(T):
        h1, c1 = cell(x[:, t], h1, c1, p["w_ih1"], p["w_hh1"], p["b_ih1"], p["b_hh1"])
        h2, c2 = cell(h1, h2, c2, p["w_ih2"], p["w_hh2"], p["b_ih2"], p["b_hh2"])
        outs.append(h2)
    return jnp.stack(outs, axis=1)  # (B, T, HID)


def forward_ref(p, context, options):
    c_out = _lstm_ref(context, p)
    u = jnp.maximum(c_out, 0.0)
    uW = u @ p["w_nn"].T + p["b_nn"]
    out_context = uW[:, -1, :]
    logits = []
    for i in range(options.shape[1]):
        o_out = _lstm_ref(options[:, i], p)
        out_option = jnp.maximum(o_out, 0.0)[:, -1, :]
        logits.append(jnp.sum(out_context * out_option, axis=-1))
    return jnp.stack(logits, axis=1)


if __name__ == "__main__":
    key = jax.random.PRNGKey(0)
    pkey, ckey, okey = jax.random.split(key, 3)

    B, T, N = 2, 8, 5  # small shapes: batch=2, seq=8, 5 candidate options
    params = init_params(pkey)
    context = jax.random.normal(ckey, (B, T, IN_DIM), jnp.float32)
    options = jax.random.normal(okey, (B, N, T, IN_DIM), jnp.float32)
    context_lens = [T] * B
    option_lens = [[T] * N for _ in range(B)]

    logits = rnn_net_forward(params, context, context_lens, options, option_lens)
    logits = jax.block_until_ready(logits)

    ref = forward_ref(params, context, options)
    assert logits.shape == (B, N), logits.shape
    np.testing.assert_allclose(np.asarray(logits), np.asarray(ref),
                               rtol=2e-2, atol=2e-2)
    print("KERNEL_OK")
</pallas_src>

<mosaic_0001>
module attributes {stable_mosaic.version = 11 : i64} {
  func.func @rnn_net_kernel(%arg0: i32, %arg1: memref<64x384xbf16, #tpu.memory_space<vmem>>, %arg2: memref<384x512xbf16, #tpu.memory_space<vmem>>, %arg3: memref<256x1024xbf16, #tpu.memory_space<vmem>>, %arg4: memref<1x512xf32, #tpu.memory_space<vmem>>, %arg5: memref<1x512xf32, #tpu.memory_space<vmem>>, %arg6: memref<128x128xbf16, #tpu.memory_space<vmem>>, %arg7: memref<1x128xf32, #tpu.memory_space<vmem>>, %arg8: memref<16x128xf32, #tpu.memory_space<vmem>>, %arg9: memref<64x512xf32, #tpu.memory_space<vmem>>, %arg10: memref<16x512xf32, #tpu.memory_space<vmem>>, %arg11: memref<16x128xf32, #tpu.memory_space<vmem>>, %arg12: memref<16x128xf32, #tpu.memory_space<vmem>>, %arg13: memref<16x128xf32, #tpu.memory_space<vmem>>) attributes {dimension_semantics = [#tpu.dimension_semantics<arbitrary>], iteration_bounds = array<i64: 2>, scalar_prefetch = 0 : i64, scratch_operands = 5 : i64, tpu.core_type = #tpu.core_type<tc>, window_params = [{transform_indices = @transform_0, window_bounds = array<i64: 64, 384>}, {pipeline_mode = #tpu.pipeline_mode<synchronous>, transform_indices = @transform_1, window_bounds = array<i64: 384, 512>}, {pipeline_mode = #tpu.pipeline_mode<synchronous>, transform_indices = @transform_2, window_bounds = array<i64: 256, 1024>}, {pipeline_mode = #tpu.pipeline_mode<synchronous>, transform_indices = @transform_3, window_bounds = array<i64: 1, 512>}, {pipeline_mode = #tpu.pipeline_mode<synchronous>, transform_indices = @transform_4, window_bounds = array<i64: 1, 512>}, {pipeline_mode = #tpu.pipeline_mode<synchronous>, transform_indices = @transform_5, window_bounds = array<i64: 128, 128>}, {pipeline_mode = #tpu.pipeline_mode<synchronous>, transform_indices = @transform_6, window_bounds = array<i64: 1, 128>}, {pipeline_mode = #tpu.pipeline_mode<synchronous>, transform_indices = @transform_7, window_bounds = array<i64: 16, 128>}]} {
    %c0_i32 = arith.constant 0 : i32
    %0 = arith.cmpi eq, %arg0, %c0_i32 : i32
    %1 = arith.extui %0 : i1 to i32
    %c0_i32_0 = arith.constant 0 : i32
    %2 = arith.cmpi ne, %1, %c0_i32_0 : i32
    scf.if %2 {
      %cst_126 = arith.constant 0.000000e+00 : f32
      %369 = vector.broadcast %cst_126 : f32 to vector<16x512xf32>
      %c0_127 = arith.constant 0 : index
      %c0_128 = arith.constant 0 : index
      %370 = vector.load %arg10[%c0_127, %c0_128] : memref<16x512xf32, #tpu.memory_space<vmem>>, vector<16x512xf32>
      tpu.vector_store %arg10[%c0_127, %c0_128], %369 {strides = array<i32>} : memref<16x512xf32, #tpu.memory_space<vmem>>, vector<16x512xf32>,
      %cst_129 = arith.constant 0.000000e+00 : f32
      %371 = vector.broadcast %cst_129 : f32 to vector<16x128xf32>
      %c0_130 = arith.constant 0 : index
      %c0_131 = arith.constant 0 : index
      %372 = vector.load %arg11[%c0_130, %c0_131] : memref<16x128xf32, #tpu.memory_space<vmem>>, vector<16x128xf32>
      tpu.vector_store %arg11[%c0_130, %c0_131], %371 {strides = array<i32>} : memref<16x128xf32, #tpu.memory_space<vmem>>, vector<16x128xf32>,
      %cst_132 = arith.constant 0.000000e+00 : f32
      %373 = vector.broadcast %cst_132 : f32 to vector<16x128xf32>
      %c0_133 = arith.constant 0 : index
      %c0_134 = arith.constant 0 : index
      %374 = vector.load %arg12[%c0_133, %c0_134] : memref<16x128xf32, #tpu.memory_space<vmem>>, vector<16x128xf32>
      tpu.vector_store %arg12[%c0_133, %c0_134], %373 {strides = array<i32>} : memref<16x128xf32, #tpu.memory_space<vmem>>, vector<16x128xf32>,
      %cst_135 = arith.constant 0.000000e+00 : f32
      %375 = vector.broadcast %cst_135 : f32 to vector<16x128xf32>
      %c0_136 = arith.constant 0 : index
      %c0_137 = arith.constant 0 : index
      %376 = vector.load %arg13[%c0_136, %c0_137] : memref<16x128xf32, #tpu.memory_space<vmem>>, vector<16x128xf32>
      tpu.vector_store %arg13[%c0_136, %c0_137], %375 {strides = array<i32>} : memref<16x128xf32, #tpu.memory_space<vmem>>, vector<16x128xf32>,
    } else {
    }
    %c0 = arith.constant 0 : index
    %c0_1 = arith.constant 0 : index
    %3 = vector.load %arg1[%c0, %c0_1] : memref<64x384xbf16, #tpu.memory_space<vmem>>, vector<64x384xbf16>
    %c0_2 = arith.constant 0 : index
    %c0_3 = arith.constant 0 : index
    %4 = vector.load %arg2[%c0_2, %c0_3] : memref<384x512xbf16, #tpu.memory_space<vmem>>, vector<384x512xbf16>
    %cst = arith.constant dense<0.000000e+00> : vector<64x512xf32>
    %5 = tpu.matmul %3, %4, %cst {dimension_numbers = #tpu.dot_dimension_numbers<[1], [0], [0], [1], [0, 0, 1, 1], [], []>} : vector<64x384xbf16>, vector<384x512xbf16>, vector<64x512xf32> -> vector<64x512xf32>
    %c0_4 = arith.constant 0 : index
    %c0_5 = arith.constant 0 : index
    %6 = vector.load %arg4[%c0_4, %c0_5] : memref<1x512xf32, #tpu.memory_space<vmem>>, vector<1x512xf32>
    %7 = vector.broadcast %6 : vector<1x512xf32> to vector<64x512xf32>
    %8 = arith.addf %5, %7 : vector<64x512xf32>
    %c0_6 = arith.constant 0 : index
    %c0_7 = arith.constant 0 : index
    %9 = vector.load %arg9[%c0_6, %c0_7] : memref<64x512xf32, #tpu.memory_space<vmem>>, vector<64x512xf32>
    tpu.vector_store %arg9[%c0_6, %c0_7], %8 {strides = array<i32>} : memref<64x512xf32, #tpu.memory_space<vmem>>, vector<64x512xf32>,
    %c0_8 = arith.constant 0 : index
    %c0_9 = arith.constant 0 : index
    %10 = vector.load %arg5[%c0_8, %c0_9] : memref<1x512xf32, #tpu.memory_space<vmem>>, vector<1x512xf32>
    %11 = vector.shape_cast %10 : vector<1x512xf32> to vector<1x512xf32>
    %12 = vector.broadcast %11 : vector<1x512xf32> to vector<16x512xf32>
    %c0_10 = arith.constant 0 : index
    %c0_11 = arith.constant 0 : index
    %13 = vector.load %arg10[%c0_10, %c0_11] : memref<16x512xf32, #tpu.memory_space<vmem>>, vector<16x512xf32>
    %c0_12 = arith.constant 0 : index
    %c0_13 = arith.constant 0 : index
    %14 = vector.load %arg11[%c0_12, %c0_13] : memref<16x128xf32, #tpu.memory_space<vmem>>, vector<16x128xf32>
    %c0_14 = arith.constant 0 : index
    %c0_15 = arith.constant 0 : index
    %15 = vector.load %arg12[%c0_14, %c0_15] : memref<16x128xf32, #tpu.memory_space<vmem>>, vector<16x128xf32>
    %c0_16 = arith.constant 0 : index
    %c0_17 = arith.constant 0 : index
    %16 = vector.load %arg13[%c0_16, %c0_17] : memref<16x128xf32, #tpu.memory_space<vmem>>, vector<16x128xf32>
    %c0_18 = arith.constant 0 : index
    %c0_19 = arith.constant 0 : index
    %17 = vector.load %arg9[%c0_18, %c0_19] : memref<64x512xf32, #tpu.memory_space<vmem>>, vector<16x512xf32>
    %18 = arith.addf %17, %13 : vector<16x512xf32>
    %19 = arith.truncf %18 : vector<16x512xf32> to vector<16x512xbf16>
    %20 = vector.extract_strided_slice %19 {offsets = [0, 0], sizes = [16, 128], strides = [1, 1]} : vector<16x512xbf16> to vector<16x128xbf16>
    %cst_20 = arith.constant 5.000000e-01 : bf16
    %21 = vector.broadcast %cst_20 : bf16 to vector<16x128xbf16>
    %22 = arith.mulf %21, %20 : vector<16x128xbf16>
    %23 = math.tanh %22 : vector<16x128xbf16>
    %24 = arith.extf %23 : vector<16x128xbf16> to vector<16x128xf32>
    %cst_21 = arith.constant 5.000000e-01 : f32
    %25 = vector.broadcast %cst_21 : f32 to vector<16x128xf32>
    %26 = arith.mulf %25, %24 : vector<16x128xf32>
    %cst_22 = arith.constant 5.000000e-01 : f32
    %27 = vector.broadcast %cst_22 : f32 to vector<16x128xf32>
    %28 = arith.addf %26, %27 : vector<16x128xf32>
    %29 = vector.extract_strided_slice %19 {offsets = [0, 128], sizes = [16, 128], strides = [1, 1]} : vector<16x512xbf16> to vector<16x128xbf16>
    %cst_23 = arith.constant 5.000000e-01 : bf16
    %30 = vector.broadcast %cst_23 : bf16 to vector<16x128xbf16>
    %31 = arith.mulf %30, %29 : vector<16x128xbf16>
    %32 = math.tanh %31 : vector<16x128xbf16>
    %33 = arith.extf %32 : vector<16x128xbf16> to vector<16x128xf32>
    %cst_24 = arith.constant 5.000000e-01 : f32
    %34 = vector.broadcast %cst_24 : f32 to vector<16x128xf32>
    %35 = arith.mulf %34, %33 : vector<16x128xf32>
    %cst_25 = arith.constant 5.000000e-01 : f32
    %36 = vector.broadcast %cst_25 : f32 to vector<16x128xf32>
    %37 = arith.addf %35, %36 : vector<16x128xf32>
    %38 = vector.extract_strided_slice %19 {offsets = [0, 256], sizes = [16, 128], strides = [1, 1]} : vector<16x512xbf16> to vector<16x128xbf16>
    %39 = math.tanh %38 : vector<16x128xbf16>
    %40 = arith.extf %39 : vector<16x128xbf16> to vector<16x128xf32>
    %41 = vector.extract_strided_slice %19 {offsets = [0, 384], sizes = [16, 128], strides = [1, 1]} : vector<16x512xbf16> to vector<16x128xbf16>
    %cst_26 = arith.constant 5.000000e-01 : bf16
    %42 = vector.broadcast %cst_26 : bf16 to vector<16x128xbf16>
    %43 = arith.mulf %42, %41 : vector<16x128xbf16>
    %44 = math.tanh %43 : vector<16x128xbf16>
    %45 = arith.extf %44 : vector<16x128xbf16> to vector<16x128xf32>
    %cst_27 = arith.constant 5.000000e-01 : f32
    %46 = vector.broadcast %cst_27 : f32 to vector<16x128xf32>
    %47 = arith.mulf %46, %45 : vector<16x128xf32>
    %cst_28 = arith.constant 5.000000e-01 : f32
    %48 = vector.broadcast %cst_28 : f32 to vector<16x128xf32>
    %49 = arith.addf %47, %48 : vector<16x128xf32>
    %50 = arith.mulf %37, %14 : vector<16x128xf32>
    %51 = arith.mulf %28, %40 : vector<16x128xf32>
    %52 = arith.addf %50, %51 : vector<16x128xf32>
    %53 = math.tanh %52 : vector<16x128xf32>
    %54 = arith.mulf %49, %53 : vector<16x128xf32>
    %55 = arith.truncf %54 : vector<16x128xf32> to vector<16x128xbf16>
    %56 = arith.truncf %15 : vector<16x128xf32> to vector<16x128xbf16>
    %57 = tpu.concatenate %55, %56 in 1 : vector<16x128xbf16>, vector<16x128xbf16> -> vector<16x256xbf16>
    %c0_29 = arith.constant 0 : index
    %c0_30 = arith.constant 0 : index
    %58 = vector.load %arg3[%c0_29, %c0_30] : memref<256x1024xbf16, #tpu.memory_space<vmem>>, vector<256x1024xbf16>
    %cst_31 = arith.constant dense<0.000000e+00> : vector<16x1024xf32>
    %59 = tpu.matmul %57, %58, %cst_31 {dimension_numbers = #tpu.dot_dimension_numbers<[1], [0], [0], [1], [0, 0, 1, 1], [], []>} : vector<16x256xbf16>, vector<256x1024xbf16>, vector<16x1024xf32> -> vector<16x1024xf32>
    %60 = vector.extract_strided_slice %59 {offsets = [0, 0], sizes = [16, 512], strides = [1, 1]} : vector<16x1024xf32> to vector<16x512xf32>
    %61 = vector.extract_strided_slice %59 {offsets = [0, 512], sizes = [16, 512], strides = [1, 1]} : vector<16x1024xf32> to vector<16x512xf32>
    %62 = arith.addf %61, %12 : vector<16x512xf32>
    %63 = arith.truncf %62 : vector<16x512xf32> to vector<16x512xbf16>
    %64 = vector.extract_strided_slice %63 {offsets = [0, 0], sizes = [16, 128], strides = [1, 1]} : vector<16x512xbf16> to vector<16x128xbf16>
    %cst_32 = arith.constant 5.000000e-01 : bf16
    %65 = vector.broadcast %cst_32 : bf16 to vector<16x128xbf16>
    %66 = arith.mulf %65, %64 : vector<16x128xbf16>
    %67 = math.tanh %66 : vector<16x128xbf16>
    %68 = arith.extf %67 : vector<16x128xbf16> to vector<16x128xf32>
    %cst_33 = arith.constant 5.000000e-01 : f32
    %69 = vector.broadcast %cst_33 : f32 to vector<16x128xf32>
    %70 = arith.mulf %69, %68 : vector<16x128xf32>
    %cst_34 = arith.constant 5.000000e-01 : f32
    %71 = vector.broadcast %cst_34 : f32 to vector<16x128xf32>
    %72 = arith.addf %70, %71 : vector<16x128xf32>
    %73 = vector.extract_strided_slice %63 {offsets = [0, 128], sizes = [16, 128], strides = [1, 1]} : vector<16x512xbf16> to vector<16x128xbf16>
    %cst_35 = arith.constant 5.000000e-01 : bf16
    %74 = vector.broadcast %cst_35 : bf16 to vector<16x128xbf16>
    %75 = arith.mulf %74, %73 : vector<16x128xbf16>
    %76 = math.tanh %75 : vector<16x128xbf16>
    %77 = arith.extf %76 : vector<16x128xbf16> to vector<16x128xf32>
    %cst_36 = arith.constant 5.000000e-01 : f32
    %78 = vector.broadcast %cst_36 : f32 to vector<16x128xf32>
    %79 = arith.mulf %78, %77 : vector<16x128xf32>
    %cst_37 = arith.constant 5.000000e-01 : f32
    %80 = vector.broadcast %cst_37 : f32 to vector<16x128xf32>
    %81 = arith.addf %79, %80 : vector<16x128xf32>
    %82 = vector.extract_strided_slice %63 {offsets = [0, 256], sizes = [16, 128], strides = [1, 1]} : vector<16x512xbf16> to vector<16x128xbf16>
    %83 = math.tanh %82 : vector<16x128xbf16>
    %84 = arith.extf %83 : vector<16x128xbf16> to vector<16x128xf32>
    %85 = vector.extract_strided_slice %63 {offsets = [0, 384], sizes = [16, 128], strides = [1, 1]} : vector<16x512xbf16> to vector<16x128xbf16>
    %cst_38 = arith.constant 5.000000e-01 : bf16
    %86 = vector.broadcast %cst_38 : bf16 to vector<16x128xbf16>
    %87 = arith.mulf %86, %85 : vector<16x128xbf16>
    %88 = math.tanh %87 : vector<16x128xbf16>
    %89 = arith.extf %88 : vector<16x128xbf16> to vector<16x128xf32>
    %cst_39 = arith.constant 5.000000e-01 : f32
    %90 = vector.broadcast %cst_39 : f32 to vector<16x128xf32>
    %91 = arith.mulf %90, %89 : vector<16x128xf32>
    %cst_40 = arith.constant 5.000000e-01 : f32
    %92 = vector.broadcast %cst_40 : f32 to vector<16x128xf32>
    %93 = arith.addf %91, %92 : vector<16x128xf32>
    %94 = arith.mulf %81, %16 : vector<16x128xf32>
    %95 = arith.mulf %72, %84 : vector<16x128xf32>
    %96 = arith.addf %94, %95 : vector<16x128xf32>
    %97 = math.tanh %96 : vector<16x128xf32>
    %98 = arith.mulf %93, %97 : vector<16x128xf32>
    %c4_i32 = arith.constant 4 : i32
    %99 = arith.muli %arg0, %c4_i32 : i32
    %c0_i32_41 = arith.constant 0 : i32
    %100 = arith.addi %99, %c0_i32_41 : i32
    %c7_i32 = arith.constant 7 : i32
    %101 = arith.cmpi eq, %100, %c7_i32 : i32
    %102 = arith.extui %101 : i1 to i32
    %c0_i32_42 = arith.constant 0 : i32
    %103 = arith.cmpi ne, %102, %c0_i32_42 : i32
    scf.if %103 {
      %cst_126 = arith.constant 0.000000e+00 : f32
      %369 = vector.broadcast %cst_126 : f32 to vector<16x128xf32>
      %370 = arith.maximumf %98, %369 : vector<16x128xf32>
      %371 = arith.truncf %370 : vector<16x128xf32> to vector<16x128xbf16>
      %c0_127 = arith.constant 0 : index
      %c0_128 = arith.constant 0 : index
      %372 = vector.load %arg6[%c0_127, %c0_128] : memref<128x128xbf16, #tpu.memory_space<vmem>>, vector<128x128xbf16>
      %cst_129 = arith.constant dense<0.000000e+00> : vector<16x128xf32>
      %373 = tpu.matmul %371, %372, %cst_129 {dimension_numbers = #tpu.dot_dimension_numbers<[1], [0], [0], [1], [0, 0, 1, 1], [], []>} : vector<16x128xbf16>, vector<128x128xbf16>, vector<16x128xf32> -> vector<16x128xf32>
      %c0_130 = arith.constant 0 : index
      %c0_131 = arith.constant 0 : index
      %374 = vector.load %arg7[%c0_130, %c0_131] : memref<1x128xf32, #tpu.memory_space<vmem>>, vector<1x128xf32>
      %375 = vector.broadcast %374 : vector<1x128xf32> to vector<16x128xf32>
      %376 = arith.addf %373, %375 : vector<16x128xf32>
      %377 = tpu.iota {dimensions = array<i32: 0>} : vector<16x128xi32>
      %c2_i32_132 = arith.constant 2 : i32
      %378 = vector.broadcast %c2_i32_132 : i32 to vector<16x128xi32>
      %379 = arith.cmpi slt, %377, %378 : vector<16x128xi32>
      %380 = arith.select %379, %376, %370 : vector<16x128xi1>, vector<16x128xf32>
      %c0_133 = arith.constant 0 : index
      %c0_134 = arith.constant 0 : index
      %381 = vector.load %arg8[%c0_133, %c0_134] : memref<16x128xf32, #tpu.memory_space<vmem>>, vector<16x128xf32>
      tpu.vector_store %arg8[%c0_133, %c0_134], %380 {strides = array<i32>} : memref<16x128xf32, #tpu.memory_space<vmem>>, vector<16x128xf32>,
    } else {
    }
    %c16 = arith.constant 16 : index
    %c0_43 = arith.constant 0 : index
    %104 = vector.load %arg9[%c16, %c0_43] : memref<64x512xf32, #tpu.memory_space<vmem>>, vector<16x512xf32>
    %105 = arith.addf %104, %60 : vector<16x512xf32>
    %106 = arith.truncf %105 : vector<16x512xf32> to vector<16x512xbf16>
    %107 = vector.extract_strided_slice %106 {offsets = [0, 0], sizes = [16, 128], strides = [1, 1]} : vector<16x512xbf16> to vector<16x128xbf16>
    %cst_44 = arith.constant 5.000000e-01 : bf16
    %108 = vector.broadcast %cst_44 : bf16 to vector<16x128xbf16>
    %109 = arith.mulf %108, %107 : vector<16x128xbf16>
    %110 = math.tanh %109 : vector<16x128xbf16>
    %111 = arith.extf %110 : vector<16x128xbf16> to vector<16x128xf32>
    %cst_45 = arith.constant 5.000000e-01 : f32
    %112 = vector.broadcast %cst_45 : f32 to vector<16x128xf32>
    %113 = arith.mulf %112, %111 : vector<16x128xf32>
    %cst_46 = arith.constant 5.000000e-01 : f32
    %114 = vector.broadcast %cst_46 : f32 to vector<16x128xf32>
    %115 = arith.addf %113, %114 : vector<16x128xf32>
    %116 = vector.extract_strided_slice %106 {offsets = [0, 128], sizes = [16, 128], strides = [1, 1]} : vector<16x512xbf16> to vector<16x128xbf16>
    %cst_47 = arith.constant 5.000000e-01 : bf16
    %117 = vector.broadcast %cst_47 : bf16 to vector<16x128xbf16>
    %118 = arith.mulf %117, %116 : vector<16x128xbf16>
    %119 = math.tanh %118 : vector<16x128xbf16>
    %120 = arith.extf %119 : vector<16x128xbf16> to vector<16x128xf32>
    %cst_48 = arith.constant 5.000000e-01 : f32
    %121 = vector.broadcast %cst_48 : f32 to vector<16x128xf32>
    %122 = arith.mulf %121, %120 : vector<16x128xf32>
    %cst_49 = arith.constant 5.000000e-01 : f32
    %123 = vector.broadcast %cst_49 : f32 to vector<16x128xf32>
    %124 = arith.addf %122, %123 : vector<16x128xf32>
    %125 = vector.extract_strided_slice %106 {offsets = [0, 256], sizes = [16, 128], strides = [1, 1]} : vector<16x512xbf16> to vector<16x128xbf16>
    %126 = math.tanh %125 : vector<16x128xbf16>
    %127 = arith.extf %126 : vector<16x128xbf16> to vector<16x128xf32>
    %128 = vector.extract_strided_slice %106 {offsets = [0, 384], sizes = [16, 128], strides = [1, 1]} : vector<16x512xbf16> to vector<16x128xbf16>
    %cst_50 = arith.constant 5.000000e-01 : bf16
    %129 = vector.broadcast %cst_50 : bf16 to vector<16x128xbf16>
    %130 = arith.mulf %129, %128 : vector<16x128xbf16>
    %131 = math.tanh %130 : vector<16x128xbf16>
    %132 = arith.extf %131 : vector<16x128xbf16> to vector<16x128xf32>
    %cst_51 = arith.constant 5.000000e-01 : f32
    %133 = vector.broadcast %cst_51 : f32 to vector<16x128xf32>
    %134 = arith.mulf %133, %132 : vector<16x128xf32>
    %cst_52 = arith.constant 5.000000e-01 : f32
    %135 = vector.broadcast %cst_52 : f32 to vector<16x128xf32>
    %136 = arith.addf %134, %135 : vector<16x128xf32>
    %137 = arith.mulf %124, %52 : vector<16x128xf32>
    %138 = arith.mulf %115, %127 : vector<16x128xf32>
    %139 = arith.addf %137, %138 : vector<16x128xf32>
    %140 = math.tanh %139 : vector<16x128xf32>
    %141 = arith.mulf %136, %140 : vector<16x128xf32>
    %142 = arith.truncf %141 : vector<16x128xf32> to vector<16x128xbf16>
    %143 = arith.truncf %98 : vector<16x128xf32> to vector<16x128xbf16>
    %144 = tpu.concatenate %142, %143 in 1 : vector<16x128xbf16>, vector<16x128xbf16> -> vector<16x256xbf16>
    %c0_53 = arith.constant 0 : index
    %c0_54 = arith.constant 0 : index
    %145 = vector.load %arg3[%c0_53, %c0_54] : memref<256x1024xbf16, #tpu.memory_space<vmem>>, vector<256x1024xbf16>
    %cst_55 = arith.constant dense<0.000000e+00> : vector<16x1024xf32>
    %146 = tpu.matmul %144, %145, %cst_55 {dimension_numbers = #tpu.dot_dimension_numbers<[1], [0], [0], [1], [0, 0, 1, 1], [], []>} : vector<16x256xbf16>, vector<256x1024xbf16>, vector<16x1024xf32> -> vector<16x1024xf32>
    %147 = vector.extract_strided_slice %146 {offsets = [0, 0], sizes = [16, 512], strides = [1, 1]} : vector<16x1024xf32> to vector<16x512xf32>
    %148 = vector.extract_strided_slice %146 {offsets = [0, 512], sizes = [16, 512], strides = [1, 1]} : vector<16x1024xf32> to vector<16x512xf32>
    %149 = arith.addf %148, %12 : vector<16x512xf32>
    %150 = arith.truncf %149 : vector<16x512xf32> to vector<16x512xbf16>
    %151 = vector.extract_strided_slice %150 {offsets = [0, 0], sizes = [16, 128], strides = [1, 1]} : vector<16x512xbf16> to vector<16x128xbf16>
    %cst_56 = arith.constant 5.000000e-01 : bf16
    %152 = vector.broadcast %cst_56 : bf16 to vector<16x128xbf16>
    %153 = arith.mulf %152, %151 : vector<16x128xbf16>
    %154 = math.tanh %153 : vector<16x128xbf16>
    %155 = arith.extf %154 : vector<16x128xbf16> to vector<16x128xf32>
    %cst_57 = arith.constant 5.000000e-01 : f32
    %156 = vector.broadcast %cst_57 : f32 to vector<16x128xf32>
    %157 = arith.mulf %156, %155 : vector<16x128xf32>
    %cst_58 = arith.constant 5.000000e-01 : f32
    %158 = vector.broadcast %cst_58 : f32 to vector<16x128xf32>
    %159 = arith.addf %157, %158 : vector<16x128xf32>
    %160 = vector.extract_strided_slice %150 {offsets = [0, 128], sizes = [16, 128], strides = [1, 1]} : vector<16x512xbf16> to vector<16x128xbf16>
    %cst_59 = arith.constant 5.000000e-01 : bf16
    %161 = vector.broadcast %cst_59 : bf16 to vector<16x128xbf16>
    %162 = arith.mulf %161, %160 : vector<16x128xbf16>
    %163 = math.tanh %162 : vector<16x128xbf16>
    %164 = arith.extf %163 : vector<16x128xbf16> to vector<16x128xf32>
    %cst_60 = arith.constant 5.000000e-01 : f32
    %165 = vector.broadcast %cst_60 : f32 to vector<16x128xf32>
    %166 = arith.mulf %165, %164 : vector<16x128xf32>
    %cst_61 = arith.constant 5.000000e-01 : f32
    %167 = vector.broadcast %cst_61 : f32 to vector<16x128xf32>
    %168 = arith.addf %166, %167 : vector<16x128xf32>
    %169 = vector.extract_strided_slice %150 {offsets = [0, 256], sizes = [16, 128], strides = [1, 1]} : vector<16x512xbf16> to vector<16x128xbf16>
    %170 = math.tanh %169 : vector<16x128xbf16>
    %171 = arith.extf %170 : vector<16x128xbf16> to vector<16x128xf32>
    %172 = vector.extract_strided_slice %150 {offsets = [0, 384], sizes = [16, 128], strides = [1, 1]} : vector<16x512xbf16> to vector<16x128xbf16>
    %cst_62 = arith.constant 5.000000e-01 : bf16
    %173 = vector.broadcast %cst_62 : bf16 to vector<16x128xbf16>
    %174 = arith.mulf %173, %172 : vector<16x128xbf16>
    %175 = math.tanh %174 : vector<16x128xbf16>
    %176 = arith.extf %175 : vector<16x128xbf16> to vector<16x128xf32>
    %cst_63 = arith.constant 5.000000e-01 : f32
    %177 = vector.broadcast %cst_63 : f32 to vector<16x128xf32>
    %178 = arith.mulf %177, %176 : vector<16x128xf32>
    %cst_64 = arith.constant 5.000000e-01 : f32
    %179 = vector.broadcast %cst_64 : f32 to vector<16x128xf32>
    %180 = arith.addf %178, %179 : vector<16x128xf32>
    %181 = arith.mulf %168, %96 : vector<16x128xf32>
    %182 = arith.mulf %159, %171 : vector<16x128xf32>
    %183 = arith.addf %181, %182 : vector<16x128xf32>
    %184 = math.tanh %183 : vector<16x128xf32>
    %185 = arith.mulf %180, %184 : vector<16x128xf32>
    %c4_i32_65 = arith.constant 4 : i32
    %186 = arith.muli %arg0, %c4_i32_65 : i32
    %c1_i32 = arith.constant 1 : i32
    %187 = arith.addi %186, %c1_i32 : i32
    %c7_i32_66 = arith.constant 7 : i32
    %188 = arith.cmpi eq, %187, %c7_i32_66 : i32
    %189 = arith.extui %188 : i1 to i32
    %c0_i32_67 = arith.constant 0 : i32
    %190 = arith.cmpi ne, %189, %c0_i32_67 : i32
    scf.if %190 {
      %cst_126 = arith.constant 0.000000e+00 : f32
      %369 = vector.broadcast %cst_126 : f32 to vector<16x128xf32>
      %370 = arith.maximumf %185, %369 : vector<16x128xf32>
      %371 = arith.truncf %370 : vector<16x128xf32> to vector<16x128xbf16>
      %c0_127 = arith.constant 0 : index
      %c0_128 = arith.constant 0 : index
      %372 = vector.load %arg6[%c0_127, %c0_128] : memref<128x128xbf16, #tpu.memory_space<vmem>>, vector<128x128xbf16>
      %cst_129 = arith.constant dense<0.000000e+00> : vector<16x128xf32>
      %373 = tpu.matmul %371, %372, %cst_129 {dimension_numbers = #tpu.dot_dimension_numbers<[1], [0], [0], [1], [0, 0, 1, 1], [], []>} : vector<16x128xbf16>, vector<128x128xbf16>, vector<16x128xf32> -> vector<16x128xf32>
      %c0_130 = arith.constant 0 : index
      %c0_131 = arith.constant 0 : index
      %374 = vector.load %arg7[%c0_130, %c0_131] : memref<1x128xf32, #tpu.memory_space<vmem>>, vector<1x128xf32>
      %375 = vector.broadcast %374 : vector<1x128xf32> to vector<16x128xf32>
      %376 = arith.addf %373, %375 : vector<16x128xf32>
      %377 = tpu.iota {dimensions = array<i32: 0>} : vector<16x128xi32>
      %c2_i32_132 = arith.constant 2 : i32
      %378 = vector.broadcast %c2_i32_132 : i32 to vector<16x128xi32>
      %379 = arith.cmpi slt, %377, %378 : vector<16x128xi32>
      %380 = arith.select %379, %376, %370 : vector<16x128xi1>, vector<16x128xf32>
      %c0_133 = arith.constant 0 : index
      %c0_134 = arith.constant 0 : index
      %381 = vector.load %arg8[%c0_133, %c0_134] : memref<16x128xf32, #tpu.memory_space<vmem>>, vector<16x128xf32>
      tpu.vector_store %arg8[%c0_133, %c0_134], %380 {strides = array<i32>} : memref<16x128xf32, #tpu.memory_space<vmem>>, vector<16x128xf32>,
    } else {
    }
    %c32 = arith.constant 32 : index
    %c0_68 = arith.constant 0 : index
    %191 = vector.load %arg9[%c32, %c0_68] : memref<64x512xf32, #tpu.memory_space<vmem>>, vector<16x512xf32>
    %192 = arith.addf %191, %147 : vector<16x512xf32>
    %193 = arith.truncf %192 : vector<16x512xf32> to vector<16x512xbf16>
    %194 = vector.extract_strided_slice %193 {offsets = [0, 0], sizes = [16, 128], strides = [1, 1]} : vector<16x512xbf16> to vector<16x128xbf16>
    %cst_69 = arith.constant 5.000000e-01 : bf16
    %195 = vector.broadcast %cst_69 : bf16 to vector<16x128xbf16>
    %196 = arith.mulf %195, %194 : vector<16x128xbf16>
    %197 = math.tanh %196 : vector<16x128xbf16>
    %198 = arith.extf %197 : vector<16x128xbf16> to vector<16x128xf32>
    %cst_70 = arith.constant 5.000000e-01 : f32
    %199 = vector.broadcast %cst_70 : f32 to vector<16x128xf32>
    %200 = arith.mulf %199, %198 : vector<16x128xf32>
    %cst_71 = arith.constant 5.000000e-01 : f32
    %201 = vector.broadcast %cst_71 : f32 to vector<16x128xf32>
    %202 = arith.addf %200, %201 : vector<16x128xf32>
    %203 = vector.extract_strided_slice %193 {offsets = [0, 128], sizes = [16, 128], strides = [1, 1]} : vector<16x512xbf16> to vector<16x128xbf16>
    %cst_72 = arith.constant 5.000000e-01 : bf16
    %204 = vector.broadcast %cst_72 : bf16 to vector<16x128xbf16>
    %205 = arith.mulf %204, %203 : vector<16x128xbf16>
    %206 = math.tanh %205 : vector<16x128xbf16>
    %207 = arith.extf %206 : vector<16x128xbf16> to vector<16x128xf32>
    %cst_73 = arith.constant 5.000000e-01 : f32
    %208 = vector.broadcast %cst_73 : f32 to vector<16x128xf32>
    %209 = arith.mulf %208, %207 : vector<16x128xf32>
    %cst_74 = arith.constant 5.000000e-01 : f32
    %210 = vector.broadcast %cst_74 : f32 to vector<16x128xf32>
    %211 = arith.addf %209, %210 : vector<16x128xf32>
    %212 = vector.extract_strided_slice %193 {offsets = [0, 256], sizes = [16, 128], strides = [1, 1]} : vector<16x512xbf16> to vector<16x128xbf16>
    %213 = math.tanh %212 : vector<16x128xbf16>
    %214 = arith.extf %213 : vector<16x128xbf16> to vector<16x128xf32>
    %215 = vector.extract_strided_slice %193 {offsets = [0, 384], sizes = [16, 128], strides = [1, 1]} : vector<16x512xbf16> to vector<16x128xbf16>
    %cst_75 = arith.constant 5.000000e-01 : bf16
    %216 = vector.broadcast %cst_75 : bf16 to vector<16x128xbf16>
    %217 = arith.mulf %216, %215 : vector<16x128xbf16>
    %218 = math.tanh %217 : vector<16x128xbf16>
    %219 = arith.extf %218 : vector<16x128xbf16> to vector<16x128xf32>
    %cst_76 = arith.constant 5.000000e-01 : f32
    %220 = vector.broadcast %cst_76 : f32 to vector<16x128xf32>
    %221 = arith.mulf %220, %219 : vector<16x128xf32>
    %cst_77 = arith.constant 5.000000e-01 : f32
    %222 = vector.broadcast %cst_77 : f32 to vector<16x128xf32>
    %223 = arith.addf %221, %222 : vector<16x128xf32>
    %224 = arith.mulf %211, %139 : vector<16x128xf32>
    %225 = arith.mulf %202, %214 : vector<16x128xf32>
    %226 = arith.addf %224, %225 : vector<16x128xf32>
    %227 = math.tanh %226 : vector<16x128xf32>
    %228 = arith.mulf %223, %227 : vector<16x128xf32>
    %229 = arith.truncf %228 : vector<16x128xf32> to vector<16x128xbf16>
    %230 = arith.truncf %185 : vector<16x128xf32> to vector<16x128xbf16>
    %231 = tpu.concatenate %229, %230 in 1 : vector<16x128xbf16>, vector<16x128xbf16> -> vector<16x256xbf16>
    %c0_78 = arith.constant 0 : index
    %c0_79 = arith.constant 0 : index
    %232 = vector.load %arg3[%c0_78, %c0_79] : memref<256x1024xbf16, #tpu.memory_space<vmem>>, vector<256x1024xbf16>
    %cst_80 = arith.constant dense<0.000000e+00> : vector<16x1024xf32>
    %233 = tpu.matmul %231, %232, %cst_80 {dimension_numbers = #tpu.dot_dimension_numbers<[1], [0], [0], [1], [0, 0, 1, 1], [], []>} : vector<16x256xbf16>, vector<256x1024xbf16>, vector<16x1024xf32> -> vector<16x1024xf32>
    %234 = vector.extract_strided_slice %233 {offsets = [0, 0], sizes = [16, 512], strides = [1, 1]} : vector<16x1024xf32> to vector<16x512xf32>
    %235 = vector.extract_strided_slice %233 {offsets = [0, 512], sizes = [16, 512], strides = [1, 1]} : vector<16x1024xf32> to vector<16x512xf32>
    %236 = arith.addf %235, %12 : vector<16x512xf32>
    %237 = arith.truncf %236 : vector<16x512xf32> to vector<16x512xbf16>
    %238 = vector.extract_strided_slice %237 {offsets = [0, 0], sizes = [16, 128], strides = [1, 1]} : vector<16x512xbf16> to vector<16x128xbf16>
    %cst_81 = arith.constant 5.000000e-01 : bf16
    %239 = vector.broadcast %cst_81 : bf16 to vector<16x128xbf16>
    %240 = arith.mulf %239, %238 : vector<16x128xbf16>
    %241 = math.tanh %240 : vector<16x128xbf16>
    %242 = arith.extf %241 : vector<16x128xbf16> to vector<16x128xf32>
    %cst_82 = arith.constant 5.000000e-01 : f32
    %243 = vector.broadcast %cst_82 : f32 to vector<16x128xf32>
    %244 = arith.mulf %243, %242 : vector<16x128xf32>
    %cst_83 = arith.constant 5.000000e-01 : f32
    %245 = vector.broadcast %cst_83 : f32 to vector<16x128xf32>
    %246 = arith.addf %244, %245 : vector<16x128xf32>
    %247 = vector.extract_strided_slice %237 {offsets = [0, 128], sizes = [16, 128], strides = [1, 1]} : vector<16x512xbf16> to vector<16x128xbf16>
    %cst_84 = arith.constant 5.000000e-01 : bf16
    %248 = vector.broadcast %cst_84 : bf16 to vector<16x128xbf16>
    %249 = arith.mulf %248, %247 : vector<16x128xbf16>
    %250 = math.tanh %249 : vector<16x128xbf16>
    %251 = arith.extf %250 : vector<16x128xbf16> to vector<16x128xf32>
    %cst_85 = arith.constant 5.000000e-01 : f32
    %252 = vector.broadcast %cst_85 : f32 to vector<16x128xf32>
    %253 = arith.mulf %252, %251 : vector<16x128xf32>
    %cst_86 = arith.constant 5.000000e-01 : f32
    %254 = vector.broadcast %cst_86 : f32 to vector<16x128xf32>
    %255 = arith.addf %253, %254 : vector<16x128xf32>
    %256 = vector.extract_strided_slice %237 {offsets = [0, 256], sizes = [16, 128], strides = [1, 1]} : vector<16x512xbf16> to vector<16x128xbf16>
    %257 = math.tanh %256 : vector<16x128xbf16>
    %258 = arith.extf %257 : vector<16x128xbf16> to vector<16x128xf32>
    %259 = vector.extract_strided_slice %237 {offsets = [0, 384], sizes = [16, 128], strides = [1, 1]} : vector<16x512xbf16> to vector<16x128xbf16>
    %cst_87 = arith.constant 5.000000e-01 : bf16
    %260 = vector.broadcast %cst_87 : bf16 to vector<16x128xbf16>
    %261 = arith.mulf %260, %259 : vector<16x128xbf16>
    %262 = math.tanh %261 : vector<16x128xbf16>
    %263 = arith.extf %262 : vector<16x128xbf16> to vector<16x128xf32>
    %cst_88 = arith.constant 5.000000e-01 : f32
    %264 = vector.broadcast %cst_88 : f32 to vector<16x128xf32>
    %265 = arith.mulf %264, %263 : vector<16x128xf32>
    %cst_89 = arith.constant 5.000000e-01 : f32
    %266 = vector.broadcast %cst_89 : f32 to vector<16x128xf32>
    %267 = arith.addf %265, %266 : vector<16x128xf32>
    %268 = arith.mulf %255, %183 : vector<16x128xf32>
    %269 = arith.mulf %246, %258 : vector<16x128xf32>
    %270 = arith.addf %268, %269 : vector<16x128xf32>
    %271 = math.tanh %270 : vector<16x128xf32>
    %272 = arith.mulf %267, %271 : vector<16x128xf32>
    %c4_i32_90 = arith.constant 4 : i32
    %273 = arith.muli %arg0, %c4_i32_90 : i32
    %c2_i32 = arith.constant 2 : i32
    %274 = arith.addi %273, %c2_i32 : i32
    %c7_i32_91 = arith.constant 7 : i32
    %275 = arith.cmpi eq, %274, %c7_i32_91 : i32
    %276 = arith.extui %275 : i1 to i32
    %c0_i32_92 = arith.constant 0 : i32
    %277 = arith.cmpi ne, %276, %c0_i32_92 : i32
    scf.if %277 {
      %cst_126 = arith.constant 0.000000e+00 : f32
      %369 = vector.broadcast %cst_126 : f32 to vector<16x128xf32>
      %370 = arith.maximumf %272, %369 : vector<16x128xf32>
      %371 = arith.truncf %370 : vector<16x128xf32> to vector<16x128xbf16>
      %c0_127 = arith.constant 0 : index
      %c0_128 = arith.constant 0 : index
      %372 = vector.load %arg6[%c0_127, %c0_128] : memref<128x128xbf16, #tpu.memory_space<vmem>>, vector<128x128xbf16>
      %cst_129 = arith.constant dense<0.000000e+00> : vector<16x128xf32>
      %373 = tpu.matmul %371, %372, %cst_129 {dimension_numbers = #tpu.dot_dimension_numbers<[1], [0], [0], [1], [0, 0, 1, 1], [], []>} : vector<16x128xbf16>, vector<128x128xbf16>, vector<16x128xf32> -> vector<16x128xf32>
      %c0_130 = arith.constant 0 : index
      %c0_131 = arith.constant 0 : index
      %374 = vector.load %arg7[%c0_130, %c0_131] : memref<1x128xf32, #tpu.memory_space<vmem>>, vector<1x128xf32>
      %375 = vector.broadcast %374 : vector<1x128xf32> to vector<16x128xf32>
      %376 = arith.addf %373, %375 : vector<16x128xf32>
      %377 = tpu.iota {dimensions = array<i32: 0>} : vector<16x128xi32>
      %c2_i32_132 = arith.constant 2 : i32
      %378 = vector.broadcast %c2_i32_132 : i32 to vector<16x128xi32>
      %379 = arith.cmpi slt, %377, %378 : vector<16x128xi32>
      %380 = arith.select %379, %376, %370 : vector<16x128xi1>, vector<16x128xf32>
      %c0_133 = arith.constant 0 : index
      %c0_134 = arith.constant 0 : index
      %381 = vector.load %arg8[%c0_133, %c0_134] : memref<16x128xf32, #tpu.memory_space<vmem>>, vector<16x128xf32>
      tpu.vector_store %arg8[%c0_133, %c0_134], %380 {strides = array<i32>} : memref<16x128xf32, #tpu.memory_space<vmem>>, vector<16x128xf32>,
    } else {
    }
    %c48 = arith.constant 48 : index
    %c0_93 = arith.constant 0 : index
    %278 = vector.load %arg9[%c48, %c0_93] : memref<64x512xf32, #tpu.memory_space<vmem>>, vector<16x512xf32>
    %279 = arith.addf %278, %234 : vector<16x512xf32>
    %280 = arith.truncf %279 : vector<16x512xf32> to vector<16x512xbf16>
    %281 = vector.extract_strided_slice %280 {offsets = [0, 0], sizes = [16, 128], strides = [1, 1]} : vector<16x512xbf16> to vector<16x128xbf16>
    %cst_94 = arith.constant 5.000000e-01 : bf16
    %282 = vector.broadcast %cst_94 : bf16 to vector<16x128xbf16>
    %283 = arith.mulf %282, %281 : vector<16x128xbf16>
    %284 = math.tanh %283 : vector<16x128xbf16>
    %285 = arith.extf %284 : vector<16x128xbf16> to vector<16x128xf32>
    %cst_95 = arith.constant 5.000000e-01 : f32
    %286 = vector.broadcast %cst_95 : f32 to vector<16x128xf32>
    %287 = arith.mulf %286, %285 : vector<16x128xf32>
    %cst_96 = arith.constant 5.000000e-01 : f32
    %288 = vector.broadcast %cst_96 : f32 to vector<16x128xf32>
    %289 = arith.addf %287, %288 : vector<16x128xf32>
    %290 = vector.extract_strided_slice %280 {offsets = [0, 128], sizes = [16, 128], strides = [1, 1]} : vector<16x512xbf16> to vector<16x128xbf16>
    %cst_97 = arith.constant 5.000000e-01 : bf16
    %291 = vector.broadcast %cst_97 : bf16 to vector<16x128xbf16>
    %292 = arith.mulf %291, %290 : vector<16x128xbf16>
    %293 = math.tanh %292 : vector<16x128xbf16>
    %294 = arith.extf %293 : vector<16x128xbf16> to vector<16x128xf32>
    %cst_98 = arith.constant 5.000000e-01 : f32
    %295 = vector.broadcast %cst_98 : f32 to vector<16x128xf32>
    %296 = arith.mulf %295, %294 : vector<16x128xf32>
    %cst_99 = arith.constant 5.000000e-01 : f32
    %297 = vector.broadcast %cst_99 : f32 to vector<16x128xf32>
    %298 = arith.addf %296, %297 : vector<16x128xf32>
    %299 = vector.extract_strided_slice %280 {offsets = [0, 256], sizes = [16, 128], strides = [1, 1]} : vector<16x512xbf16> to vector<16x128xbf16>
    %300 = math.tanh %299 : vector<16x128xbf16>
    %301 = arith.extf %300 : vector<16x128xbf16> to vector<16x128xf32>
    %302 = vector.extract_strided_slice %280 {offsets = [0, 384], sizes = [16, 128], strides = [1, 1]} : vector<16x512xbf16> to vector<16x128xbf16>
    %cst_100 = arith.constant 5.000000e-01 : bf16
    %303 = vector.broadcast %cst_100 : bf16 to vector<16x128xbf16>
    %304 = arith.mulf %303, %302 : vector<16x128xbf16>
    %305 = math.tanh %304 : vector<16x128xbf16>
    %306 = arith.extf %305 : vector<16x128xbf16> to vector<16x128xf32>
    %cst_101 = arith.constant 5.000000e-01 : f32
    %307 = vector.broadcast %cst_101 : f32 to vector<16x128xf32>
    %308 = arith.mulf %307, %306 : vector<16x128xf32>
    %cst_102 = arith.constant 5.000000e-01 : f32
    %309 = vector.broadcast %cst_102 : f32 to vector<16x128xf32>
    %310 = arith.addf %308, %309 : vector<16x128xf32>
    %311 = arith.mulf %298, %226 : vector<16x128xf32>
    %312 = arith.mulf %289, %301 : vector<16x128xf32>
    %313 = arith.addf %311, %312 : vector<16x128xf32>
    %314 = math.tanh %313 : vector<16x128xf32>
    %315 = arith.mulf %310, %314 : vector<16x128xf32>
    %316 = arith.truncf %315 : vector<16x128xf32> to vector<16x128xbf16>
    %317 = arith.truncf %272 : vector<16x128xf32> to vector<16x128xbf16>
    %318 = tpu.concatenate %316, %317 in 1 : vector<16x128xbf16>, vector<16x128xbf16> -> vector<16x256xbf16>
    %c0_103 = arith.constant 0 : index
    %c0_104 = arith.constant 0 : index
    %319 = vector.load %arg3[%c0_103, %c0_104] : memref<256x1024xbf16, #tpu.memory_space<vmem>>, vector<256x1024xbf16>
    %cst_105 = arith.constant dense<0.000000e+00> : vector<16x1024xf32>
    %320 = tpu.matmul %318, %319, %cst_105 {dimension_numbers = #tpu.dot_dimension_numbers<[1], [0], [0], [1], [0, 0, 1, 1], [], []>} : vector<16x256xbf16>, vector<256x1024xbf16>, vector<16x1024xf32> -> vector<16x1024xf32>
    %321 = vector.extract_strided_slice %320 {offsets = [0, 0], sizes = [16, 512], strides = [1, 1]} : vector<16x1024xf32> to vector<16x512xf32>
    %322 = vector.extract_strided_slice %320 {offsets = [0, 512], sizes = [16, 512], strides = [1, 1]} : vector<16x1024xf32> to vector<16x512xf32>
    %323 = arith.addf %322, %12 : vector<16x512xf32>
    %324 = arith.truncf %323 : vector<16x512xf32> to vector<16x512xbf16>
    %325 = vector.extract_strided_slice %324 {offsets = [0, 0], sizes = [16, 128], strides = [1, 1]} : vector<16x512xbf16> to vector<16x128xbf16>
    %cst_106 = arith.constant 5.000000e-01 : bf16
    %326 = vector.broadcast %cst_106 : bf16 to vector<16x128xbf16>
    %327 = arith.mulf %326, %325 : vector<16x128xbf16>
    %328 = math.tanh %327 : vector<16x128xbf16>
    %329 = arith.extf %328 : vector<16x128xbf16> to vector<16x128xf32>
    %cst_107 = arith.constant 5.000000e-01 : f32
    %330 = vector.broadcast %cst_107 : f32 to vector<16x128xf32>
    %331 = arith.mulf %330, %329 : vector<16x128xf32>
    %cst_108 = arith.constant 5.000000e-01 : f32
    %332 = vector.broadcast %cst_108 : f32 to vector<16x128xf32>
    %333 = arith.addf %331, %332 : vector<16x128xf32>
    %334 = vector.extract_strided_slice %324 {offsets = [0, 128], sizes = [16, 128], strides = [1, 1]} : vector<16x512xbf16> to vector<16x128xbf16>
    %cst_109 = arith.constant 5.000000e-01 : bf16
    %335 = vector.broadcast %cst_109 : bf16 to vector<16x128xbf16>
    %336 = arith.mulf %335, %334 : vector<16x128xbf16>
    %337 = math.tanh %336 : vector<16x128xbf16>
    %338 = arith.extf %337 : vector<16x128xbf16> to vector<16x128xf32>
    %cst_110 = arith.constant 5.000000e-01 : f32
    %339 = vector.broadcast %cst_110 : f32 to vector<16x128xf32>
    %340 = arith.mulf %339, %338 : vector<16x128xf32>
    %cst_111 = arith.constant 5.000000e-01 : f32
    %341 = vector.broadcast %cst_111 : f32 to vector<16x128xf32>
    %342 = arith.addf %340, %341 : vector<16x128xf32>
    %343 = vector.extract_strided_slice %324 {offsets = [0, 256], sizes = [16, 128], strides = [1, 1]} : vector<16x512xbf16> to vector<16x128xbf16>
    %344 = math.tanh %343 : vector<16x128xbf16>
    %345 = arith.extf %344 : vector<16x128xbf16> to vector<16x128xf32>
    %346 = vector.extract_strided_slice %324 {offsets = [0, 384], sizes = [16, 128], strides = [1, 1]} : vector<16x512xbf16> to vector<16x128xbf16>
    %cst_112 = arith.constant 5.000000e-01 : bf16
    %347 = vector.broadcast %cst_112 : bf16 to vector<16x128xbf16>
    %348 = arith.mulf %347, %346 : vector<16x128xbf16>
    %349 = math.tanh %348 : vector<16x128xbf16>
    %350 = arith.extf %349 : vector<16x128xbf16> to vector<16x128xf32>
    %cst_113 = arith.constant 5.000000e-01 : f32
    %351 = vector.broadcast %cst_113 : f32 to vector<16x128xf32>
    %352 = arith.mulf %351, %350 : vector<16x128xf32>
    %cst_114 = arith.constant 5.000000e-01 : f32
    %353 = vector.broadcast %cst_114 : f32 to vector<16x128xf32>
    %354 = arith.addf %352, %353 : vector<16x128xf32>
    %355 = arith.mulf %342, %270 : vector<16x128xf32>
    %356 = arith.mulf %333, %345 : vector<16x128xf32>
    %357 = arith.addf %355, %356 : vector<16x128xf32>
    %358 = math.tanh %357 : vector<16x128xf32>
    %359 = arith.mulf %354, %358 : vector<16x128xf32>
    %c4_i32_115 = arith.constant 4 : i32
    %360 = arith.muli %arg0, %c4_i32_115 : i32
    %c3_i32 = arith.constant 3 : i32
    %361 = arith.addi %360, %c3_i32 : i32
    %c7_i32_116 = arith.constant 7 : i32
    %362 = arith.cmpi eq, %361, %c7_i32_116 : i32
    %363 = arith.extui %362 : i1 to i32
    %c0_i32_117 = arith.constant 0 : i32
    %364 = arith.cmpi ne, %363, %c0_i32_117 : i32
    scf.if %364 {
      %cst_126 = arith.constant 0.000000e+00 : f32
      %369 = vector.broadcast %cst_126 : f32 to vector<16x128xf32>
      %370 = arith.maximumf %359, %369 : vector<16x128xf32>
      %371 = arith.truncf %370 : vector<16x128xf32> to vector<16x128xbf16>
      %c0_127 = arith.constant 0 : index
      %c0_128 = arith.constant 0 : index
      %372 = vector.load %arg6[%c0_127, %c0_128] : memref<128x128xbf16, #tpu.memory_space<vmem>>, vector<128x128xbf16>
      %cst_129 = arith.constant dense<0.000000e+00> : vector<16x128xf32>
      %373 = tpu.matmul %371, %372, %cst_129 {dimension_numbers = #tpu.dot_dimension_numbers<[1], [0], [0], [1], [0, 0, 1, 1], [], []>} : vector<16x128xbf16>, vector<128x128xbf16>, vector<16x128xf32> -> vector<16x128xf32>
      %c0_130 = arith.constant 0 : index
      %c0_131 = arith.constant 0 : index
      %374 = vector.load %arg7[%c0_130, %c0_131] : memref<1x128xf32, #tpu.memory_space<vmem>>, vector<1x128xf32>
      %375 = vector.broadcast %374 : vector<1x128xf32> to vector<16x128xf32>
      %376 = arith.addf %373, %375 : vector<16x128xf32>
      %377 = tpu.iota {dimensions = array<i32: 0>} : vector<16x128xi32>
      %c2_i32_132 = arith.constant 2 : i32
      %378 = vector.broadcast %c2_i32_132 : i32 to vector<16x128xi32>
      %379 = arith.cmpi slt, %377, %378 : vector<16x128xi32>
      %380 = arith.select %379, %376, %370 : vector<16x128xi1>, vector<16x128xf32>
      %c0_133 = arith.constant 0 : index
      %c0_134 = arith.constant 0 : index
      %381 = vector.load %arg8[%c0_133, %c0_134] : memref<16x128xf32, #tpu.memory_space<vmem>>, vector<16x128xf32>
      tpu.vector_store %arg8[%c0_133, %c0_134], %380 {strides = array<i32>} : memref<16x128xf32, #tpu.memory_space<vmem>>, vector<16x128xf32>,
    } else {
    }
    %c0_118 = arith.constant 0 : index
    %c0_119 = arith.constant 0 : index
    %365 = vector.load %arg10[%c0_118, %c0_119] : memref<16x512xf32, #tpu.memory_space<vmem>>, vector<16x512xf32>
    tpu.vector_store %arg10[%c0_118, %c0_119], %321 {strides = array<i32>} : memref<16x512xf32, #tpu.memory_space<vmem>>, vector<16x512xf32>,
    %c0_120 = arith.constant 0 : index
    %c0_121 = arith.constant 0 : index
    %366 = vector.load %arg11[%c0_120, %c0_121] : memref<16x128xf32, #tpu.memory_space<vmem>>, vector<16x128xf32>
    tpu.vector_store %arg11[%c0_120, %c0_121], %313 {strides = array<i32>} : memref<16x128xf32, #tpu.memory_space<vmem>>, vector<16x128xf32>,
    %c0_122 = arith.constant 0 : index
    %c0_123 = arith.constant 0 : index
    %367 = vector.load %arg12[%c0_122, %c0_123] : memref<16x128xf32, #tpu.memory_space<vmem>>, vector<16x128xf32>
    tpu.vector_store %arg12[%c0_122, %c0_123], %359 {strides = array<i32>} : memref<16x128xf32, #tpu.memory_space<vmem>>, vector<16x128xf32>,
    %c0_124 = arith.constant 0 : index
    %c0_125 = arith.constant 0 : index
    %368 = vector.load %arg13[%c0_124, %c0_125] : memref<16x128xf32, #tpu.memory_space<vmem>>, vector<16x128xf32>
    tpu.vector_store %arg13[%c0_124, %c0_125], %357 {strides = array<i32>} : memref<16x128xf32, #tpu.memory_space<vmem>>, vector<16x128xf32>,
    return
  }
  func.func @transform_0(%arg0: i32) -> (i32, i32) {
    %c0_i32 = arith.constant 0 : i32
    %c0_i32_0 = arith.constant 0 : i32
    return %arg0, %c0_i32 : i32, i32
  }
  func.func @transform_1(%arg0: i32) -> (i32, i32) {
    %c0_i32 = arith.constant 0 : i32
    %c0_i32_0 = arith.constant 0 : i32
    %c0_i32_1 = arith.constant 0 : i32
    return %c0_i32, %c0_i32_0 : i32, i32
  }
  func.func @transform_2(%arg0: i32) -> (i32, i32) {
    %c0_i32 = arith.constant 0 : i32
    %c0_i32_0 = arith.constant 0 : i32
    %c0_i32_1 = arith.constant 0 : i32
    return %c0_i32, %c0_i32_0 : i32, i32
  }
  func.func @transform_3(%arg0: i32) -> (i32, i32) {
    %c0_i32 = arith.constant 0 : i32
    %c0_i32_0 = arith.constant 0 : i32
    %c0_i32_1 = arith.constant 0 : i32
    return %c0_i32, %c0_i32_0 : i32, i32
  }
  func.func @transform_4(%arg0: i32) -> (i32, i32) {
    %c0_i32 = arith.constant 0 : i32
    %c0_i32_0 = arith.constant 0 : i32
    %c0_i32_1 = arith.constant 0 : i32
    return %c0_i32, %c0_i32_0 : i32, i32
  }
  func.func @transform_5(%arg0: i32) -> (i32, i32) {
    %c0_i32 = arith.constant 0 : i32
    %c0_i32_0 = arith.constant 0 : i32
    %c0_i32_1 = arith.constant 0 : i32
    return %c0_i32, %c0_i32_0 : i32, i32
  }
  func.func @transform_6(%arg0: i32) -> (i32, i32) {
    %c0_i32 = arith.constant 0 : i32
    %c0_i32_0 = arith.constant 0 : i32
    %c0_i32_1 = arith.constant 0 : i32
    return %c0_i32, %c0_i32_0 : i32, i32
  }
  func.func @transform_7(%arg0: i32) -> (i32, i32) {
    %c0_i32 = arith.constant 0 : i32
    %c0_i32_0 = arith.constant 0 : i32
    %c0_i32_1 = arith.constant 0 : i32
    return %c0_i32, %c0_i32_0 : i32, i32
  }
}

</mosaic_0001>

<bundles_post_ra>
// kernel: tpu_custom_call.1
= control target key start
LH: loop header
LB: loop body
LE: loop exit
PB: predicated region body
PF: predicated region fallthrough
CT: control target
= control target key end

     0   :  { %12 = vsyncpa [#allocation8], 0  ;;  %s11657_s0 = inlined_call_operand.hbm [shape: bf16[128,384], index: 0, kind: input, shape index: {}]   ;;  %s11658_s1 = inlined_call_operand.hbm [shape: bf16[384,512], index: 1, kind: input, shape index: {}]   ;;  %s11659_s2 = inlined_call_operand.hbm [shape: bf16[256,1024], index: 2, kind: input, shape index: {}]   ;;  %s11660_s3 = inlined_call_operand.hbm [shape: f32[1,512], index: 3, kind: input, shape index: {}]   ;;  %s11661_s4 = inlined_call_operand.hbm [shape: f32[1,512], index: 4, kind: input, shape index: {}]   ;;  %s11662_s5 = inlined_call_operand.hbm [shape: bf16[128,128], index: 5, kind: input, shape index: {}]   ;;  %s11663_s6 = inlined_call_operand.vmem [shape: f32[1,128], index: 6, kind: input, shape index: {}]   ;;  %s11664_s7 = inlined_call_operand.hbm [shape: f32[16,128], index: 7, kind: output, shape index: {}]  }
   0x1   :  { %14 = vsyncpa [#allocation8 + $0x1], 0 }
   0x2   :  { %15 = vsyncpa [#allocation11], 0 }
   0x3   :  { %16 = vsyncpa [#allocation14], 0 }
   0x4   :  { %17 = vsyncpa [#allocation17], 0 }
   0x5   :  { %18 = vsyncpa [#allocation9], 0  ;;  %s10686_s24 = smov 0   ;;  %s10688_s25 = smov 0  }
   0x6   :  { %s10690_s26 = smov 0   ;;  %s10692_s27 = smov 0  }
   0x7 LB: > { %s213_s30 = sshll.u32 %s11658_s1, 4  ;;  %s10710_s8 = sadd.s32 4294967295, %s10627_s27   ;;  %s10627_s27 = sphi %s10692_s27, %s11672_s27   ;;  %s10623_s26 = sphi %s10690_s26, %s11671_s26   ;;  %s10619_s25 = sphi %s10688_s25, %s11670_s25   ;;  %s10615_s24 = sphi %s10686_s24, %s11669_s24   ;;  %s214_s30 = int_to_ptr.hbm [resolvable:$true] %s213_s30 }
   0x8   : > { %p6808_p0 = scmp.ge.s32.totalorder %s10627_s27, 1  ;;  %p45_p1 = scmp.eq.s32.totalorder %s10710_s8, 0 }
   0x9   : > { %p202_p2 = scmp.lt.s32.totalorder %s10627_s27, 3  ;;  %p6809_p3 = scmp.ne.s32.totalorder %s10710_s8, 0 }
   0xa   : > { %s10629_s10 = smov [#allocation10]   ;;  %s242_s14 = sshll.u32 %s11660_s3, 4  ;;  %s243_s14 = int_to_ptr.hbm [resolvable:$true] %s242_s14 }
   0xb   : > { %p10716_p4 = pnand %p6808_p0, %p202_p2  ;;  %s215_s11 = sshll.u32 %s10629_s10, 4  ;;  %s216_s11 = int_to_ptr.vmem [resolvable:$true] %s215_s11 }
   0xc   : > { %s227_s18 = sshll.u32 %s11659_s2, 4  ;;  %s10630_s19 = smov [#allocation13]   ;;  %s228_s18 = int_to_ptr.hbm [resolvable:$true] %s227_s18 }
   0xd   : > { %p10123_p5 = pneg %p10716_p4  ;;  %s244_s20 = sshll.u32 %s10630_s19, 4  ;;  %s245_s20 = int_to_ptr.vmem [resolvable:$true] %s244_s20 }
   0xe   : > { %s10631_s21 = smov 256   ;;  %s10632_s22 = smov 16  }
   0xf   : > { %p10727_p6 = pnand %p10123_p5, %p45_p1  ;;  %s10633_s23 = smov [#allocation12]  }
  0x10   : > { %s229_s28 = sshll.u32 %s10633_s23, 4  ;;  %s254_s12 = sshll.u32 %s11661_s4, 4  ;;  %s230_s28 = int_to_ptr.vmem [resolvable:$true] %s229_s28  ;;  %s255_s12 = int_to_ptr.hbm [resolvable:$true] %s254_s12 }
  0x11   : > { %10126 = dma.hbm_to_vmem [thread:$0]  (!%p10727_p6), %s214_s30, 12288, %s216_s11, [#allocation11], %s10631_s21, %s10631_s21, %s10632_s22  }
  0x12   : > { %10132 = dma.hbm_to_vmem [thread:$0]  (!%p10727_p6), %s243_s14, 64, %s245_s20, [#allocation14]  }
  0x13   : > { %s10634_s13 = smov 512   ;;  %s10635_s16 = smov 32  }
  0x14   : > { %10129 = dma.hbm_to_vmem [thread:$0]  (!%p10727_p6), %s228_s18, 16384, %s230_s28, [#allocation11], %s10634_s13, %s10634_s13, %s10635_s16  }
  0x15   : > { %s10636_s30 = smov [#allocation15]   ;;  %s265_s19 = sshll.u32 %s11662_s5, 4  ;;  %s266_s19 = int_to_ptr.hbm [resolvable:$true] %s265_s19 }
  0x16   : > { %s256_s11 = sshll.u32 %s10636_s30, 4  ;;  %s10637_s18 = smov [#allocation16]   ;;  %s257_s11 = int_to_ptr.vmem [resolvable:$true] %s256_s11 }
  0x17   : > { %10135 = dma.hbm_to_vmem [thread:$0]  (!%p10727_p6), %s255_s12, 64, %s257_s11, [#allocation14]  }
  0x18   : > { %s267_s20 = sshll.u32 %s10637_s18, 4  ;;  %s10638_s21 = smov 64   ;;  %s268_s20 = int_to_ptr.vmem [resolvable:$true] %s267_s20 }
  0x19   : > { %s10639_s22 = smov 4   ;;  %s10751_s23 = sadd.s32 1, %s10627_s27  }
  0x1a   : > { %10138 = dma.hbm_to_vmem [thread:$0]  (!%p10727_p6), %s266_s19, 1024, %s268_s20, [#allocation17], %s10638_s21, %s10638_s21, %s10639_s22  }
  0x1b   : > { %s28_s28 = ssub.s32 %s10627_s27, %s10751_s23  ;;  %s31_s29 = sadd.s32 1, %s10623_s26 }
  0x1c   : > { %p29_p7 = scmp.eq.s32.totalorder %s28_s28, 0  ;;  %p38_p8 = scmp.ne.s32.totalorder %s10623_s26, %s10619_s25 }
  0x1d   : > { %p39_p9 = scmp.eq.s32.totalorder %s10627_s27, 0  ;;  %p44_p10 = scmp.ne.s32.totalorder %s10619_s25, %s10615_s24 }
  0x1e   : > { %s10762_s10 = scalar_select %p29_p7, %s10623_s26, %s31_s29  }
  0x1f   : > { %p40_p11 = por %p39_p9, %p38_p8  ;;  %p10766_p12 = por %p45_p1, %p44_p10 }
  0x20   : > { %p10148_p13 = scmp.lt.s32.totalorder %s10627_s27, 2  ;;  %s284_s15 = sand.u32 1, %s10623_s26  }
  0x21   : > { %s10094_s13 = smul.u32 96, %s284_s15  ;;  %s285_s20 = scalar_lea.sflag [#allocation8], %s284_s15 }
  0x22   : > { %s10095_s16 = smul.u32 96, %s10627_s27  ;;  %p10773_p0 = pnand %p10148_p13, %p40_p11 }
  0x23   : > { %s288_s17 = scalar_lea.vmem [#allocation7], %s10094_s13  ;;  %s10526_s29 = scalar_lea.hbm %s11657_s0, 192 }
  0x24   : > { %s294_s24 = scalar_lea.hbm %s11657_s0, %s10095_s16  ;;  %s297_s19 = sshll.u32 %s288_s17, 4  ;;  %s298_s19 = int_to_ptr.vmem [resolvable:$true] %s297_s19 }
  0x25   : > { %s295_s18 = sshll.u32 %s294_s24, 4  ;;  %p10523_p5 = pneg %p10773_p0  ;;  %s296_s18 = int_to_ptr.hbm [resolvable:$true] %s295_s18 }
  0x26   : > { %s10519_s21 = sshra.s32 %s296_s18, 4  ;;  %s10520_s21 = int_to_ptr.hbm [resolvable:$true] %s10519_s21 }
  0x27   : > { %s10521_s22 = scalar_lea.hbm %s10520_s21, 96  ;;  %p10527_p8 = scmp.lt.s32.totalorder %s10520_s21, %s11657_s0 }
  0x28   : > { %p10522_p2 = scmp.ne.s32.totalorder %s10520_s21, %s10521_s22  ;;  %p10528_p9 = scmp.lt.s32.totalorder %s10526_s29, %s10521_s22 }
  0x2a   : > { %p10524_p6 = pnand %p10523_p5, %p10522_p2  ;;  %p10529_p10 = por %p10528_p9, %p10527_p8 }
  0x2c   : > { %p10525_p7 = pneg %p10524_p6 }
  0x2e   : > { %p10530_p11 = pnand %p10529_p10, %p10525_p7 }
  0x30   : > { %10533 = shalt.err (!%p10530_p11)
}
  0x31   : > { %s10640_s15 = smov 192   ;;  %s10641_s13 = smov 12  }
  0x32   : > { %10142 = dma.hbm_to_vmem [thread:$0]  (!%p10773_p0), %s296_s18, 1536, %s298_s19, %s285_s20, %s10640_s15, %s10640_s15, %s10641_s13  }
  0x33   : > { %309 = sbr.rel (%p10716_p4) target bundleno = 2331 (0x91b), region = 48  ;;  %s311_s14 = sand.u32 (!%p10716_p4), 1, %s10619_s25  }
  0x34   : > { %s10096_s24 = smul.u32 (!%p10716_p4), 96, %s311_s14  ;;  %s312_s17 = scalar_lea.sflag (!%p10716_p4), [#allocation8], %s311_s14 }
  0x36   : > { %s10793_s27 = scalar_lea.vmem (!%p10716_p4), [#allocation7], %s10096_s24 }
  0x38   : > { %10594 = dma.done.wait (%p10766_p12), %s312_s17, 1536  }
  0x39   : > { %10596 = vsyncadd (%p10766_p12), %s312_s17, 4294965760 }
  0x3a   : > { %10598 = dma.done.wait (%p45_p1), [#allocation11], 28672  }
  0x3b   : > { %10600 = vsyncadd (%p45_p1), [#allocation11], 4294938624 }
  0x3c   : > { %10602 = dma.done.wait (%p45_p1), [#allocation14], 128  }
  0x3d   : > { %10604 = vsyncadd (%p45_p1), [#allocation14], 4294967168 }
  0x3e   : > { %10606 = dma.done.wait (%p45_p1), [#allocation17], 1024  }
  0x3f   : > { %10608 = vsyncadd (%p45_p1), [#allocation17], 4294966272  ;;  %371 = sbr.rel (%p6809_p3) target bundleno = 83 (0x53), region = 76 }
  0x44   : > { %v10642_v0 = vmov 0.0  }
  0x45   : > { %372 = vst [vmem:[#allocation3] sm:$0xff] %v10642_v0 }
  0x46   : > { %373 = vst [vmem:[#allocation3 + $0x8] sm:$0xff] %v10642_v0 }
  0x47   : > { %374 = vst [vmem:[#allocation3 + $0x28] sm:$0xff] %v10642_v0 }
  0x48   : > { %375 = vst [vmem:[#allocation3 + $0x38] sm:$0xff] %v10642_v0 }
  0x49   : > { %376 = vst [vmem:[#allocation3 + $0x10] sm:$0xff] %v10642_v0 }
  0x4a   : > { %377 = vst [vmem:[#allocation3 + $0x30] sm:$0xff] %v10642_v0 }
  0x4b   : > { %378 = vst [vmem:[#allocation3 + $0x18] sm:$0xff] %v10642_v0 }
  0x4c   : > { %379 = vst [vmem:[#allocation3 + $0x20] sm:$0xff] %v10642_v0 }
  0x4d   : > { %380 = vst [vmem:[#allocation4] sm:$0xff] %v10642_v0 }
  0x4e   : > { %381 = vst [vmem:[#allocation4 + $0x8] sm:$0xff] %v10642_v0 }
  0x4f   : > { %382 = vst [vmem:[#allocation5] sm:$0xff] %v10642_v0 }
  0x50   : > { %383 = vst [vmem:[#allocation5 + $0x8] sm:$0xff] %v10642_v0 }
  0x51   : > { %384 = vst [vmem:[#allocation6] sm:$0xff] %v10642_v0 }
  0x52   : > { %385 = vst [vmem:[#allocation6 + $0x8] sm:$0xff] %v10642_v0 }
  0x53 PF: > { %v6987_v1 = vld [vmem:[#allocation10 + $0xe0] sm:$0xf]  ;;  %v9484_v2 = vld [vmem:[#allocation10 + $0xec] sm:$0xf0]  ;;  %v9482_v10 = vld [vmem:[#allocation10 + $0xe4] sm:$0xf] }
  0x54   : > { %v7115_v3 = vld [vmem:[#allocation10 + $0x1e0] sm:$0xf]  ;;  %v6988_v4 = vor.u32 %v9484_v2, %v6987_v1  ;;  %v9516_v5 = vld [vmem:[#allocation10 + $0x1ec] sm:$0xf0]  ;;  %v6989_v11 = vld [vmem:[#allocation10 + $0xf0] sm:$0xf0] }
  0x55   : > { %v7243_v6 = vld [vmem:[#allocation10 + $0x2e0] sm:$0xf]  ;;  %v9548_v7 = vld [vmem:[#allocation10 + $0x2ec] sm:$0xf0]  ;;  %v7116_v8 = vor.u32 %v9516_v5, %v7115_v3  ;;  %v6992_v13 = vor.u32 %v9482_v10, %v6989_v11  ;;  %v9478_v21 = vld [vmem:[#allocation10 + $0xc4] sm:$0xf] }
  0x56   : > { %v7244_v9 = vor.u32 %v9548_v7, %v7243_v6  ;;  %v6971_v12 = vld [vmem:[#allocation10 + $0xc0] sm:$0xf]  ;;  %1052 = vmatpush.bf16.msra.mxu0 %v6988_v4  ;;  %v9480_v14 = vld [vmem:[#allocation10 + $0xcc] sm:$0xf0]  ;;  %v6973_v23 = vld [vmem:[#allocation10 + $0xd0] sm:$0xf0] }
  0x57   : > { %v7099_v15 = vld [vmem:[#allocation10 + $0x1c0] sm:$0xf]  ;;  %v9512_v16 = vld [vmem:[#allocation10 + $0x1cc] sm:$0xf0]  ;;  %1081 = vmatpush.bf16.msra.mxu1 %v7116_v8  ;;  %v6972_v17 = vor.u32 %v9480_v14, %v6971_v12  ;;  %1139 = vmatpush.bf16.msra.mxu3 %v6992_v13  ;;  %v6976_v26 = vor.u32 %v9478_v21, %v6973_v23  ;;  %v9474_v32 = vld [vmem:[#allocation10 + $0xa4] sm:$0xf] }
  0x58   : > { %1110 = vmatpush.bf16.msra.mxu2 %v7244_v9  ;;  %v7100_v18 = vor.u32 %v9512_v16, %v7099_v15  ;;  %v7227_v19 = vld [vmem:[#allocation10 + $0x2c0] sm:$0xf]  ;;  %v9544_v20 = vld [vmem:[#allocation10 + $0x2cc] sm:$0xf0]  ;;  %v6957_v33 = vld [vmem:[#allocation10 + $0xb0] sm:$0xf0] }
  0x59   : > { %v7228_v22 = vor.u32 %v9544_v20, %v7227_v19  ;;  %v6955_v24 = vld [vmem:[#allocation10 + $0xa0] sm:$0xf]  ;;  %v9476_v25 = vld [vmem:[#allocation10 + $0xac] sm:$0xf0]  ;;  %v6960_v39 = vor.u32 %v9474_v32, %v6957_v33  ;;  %v9470_v43 = vld [vmem:[#allocation10 + $0x84] sm:$0xf] }
  0x5a   : > { %v7083_v27 = vld [vmem:[#allocation10 + $0x1a0] sm:$0xf]  ;;  %v9508_v28 = vld [vmem:[#allocation10 + $0x1ac] sm:$0xf0]  ;;  %1053 = vmatpush.bf16.msra.mxu0 %v6972_v17  ;;  %v6956_v30 = vor.u32 %v9476_v25, %v6955_v24  ;;  %v6941_v44 = vld [vmem:[#allocation10 + $0x90] sm:$0xf0] }
  0x5b   : > { %v7211_v29 = vld [vmem:[#allocation10 + $0x2a0] sm:$0xf]  ;;  %v9540_v31 = vld [vmem:[#allocation10 + $0x2ac] sm:$0xf0]  ;;  %1082 = vmatpush.bf16.msra.mxu1 %v7100_v18  ;;  %v7084_v34 = vor.u32 %v9508_v28, %v7083_v27  ;;  %1140 = vmatpush.bf16.msra.mxu3 %v6976_v26  ;;  %v6944_v51 = vor.u32 %v9470_v43, %v6941_v44  ;;  %v9466_v55 = vld [vmem:[#allocation10 + $0x64] sm:$0xf] }
  0x5c   : > { %1111 = vmatpush.bf16.msra.mxu2 %v7228_v22  ;;  %v7212_v35 = vor.u32 %v9540_v31, %v7211_v29  ;;  %v6939_v36 = vld [vmem:[#allocation10 + $0x80] sm:$0xf]  ;;  %v9472_v37 = vld [vmem:[#allocation10 + $0x8c] sm:$0xf0]  ;;  %v6925_v56 = vld [vmem:[#allocation10 + $0x70] sm:$0xf0] }
  0x5d   : > { %v7067_v38 = vld [vmem:[#allocation10 + $0x180] sm:$0xf]  ;;  %v9504_v40 = vld [vmem:[#allocation10 + $0x18c] sm:$0xf0]  ;;  %v6940_v45 = vor.u32 %v9472_v37, %v6939_v36  ;;  %v6928_v63 = vor.u32 %v9466_v55, %v6925_v56  ;;  %v9462_v3 = vld [vmem:[#allocation10 + $0x44] sm:$0xf] }
  0x5e   : > { %v7195_v41 = vld [vmem:[#allocation10 + $0x280] sm:$0xf]  ;;  %v9536_v42 = vld [vmem:[#allocation10 + $0x28c] sm:$0xf0]  ;;  %1054 = vmatpush.bf16.msra.mxu0 %v6956_v30  ;;  %v7068_v46 = vor.u32 %v9504_v40, %v7067_v38  ;;  %v6909_v4 = vld [vmem:[#allocation10 + $0x50] sm:$0xf0] }
  0x5f   : > { %1083 = vmatpush.bf16.msra.mxu1 %v7084_v34  ;;  %v7196_v47 = vor.u32 %v9536_v42, %v7195_v41  ;;  %v6923_v48 = vld [vmem:[#allocation10 + $0x60] sm:$0xf]  ;;  %v9468_v49 = vld [vmem:[#allocation10 + $0x6c] sm:$0xf0]  ;;  %1141 = vmatpush.bf16.msra.mxu3 %v6960_v39  ;;  %v6912_v11 = vor.u32 %v9462_v3, %v6909_v4  ;;  %v9458_v15 = vld [vmem:[#allocation10 + $0x24] sm:$0xf] }
  0x60   : > { %1112 = vmatpush.bf16.msra.mxu2 %v7212_v35  ;;  %v7051_v50 = vld [vmem:[#allocation10 + $0x160] sm:$0xf]  ;;  %v9500_v52 = vld [vmem:[#allocation10 + $0x16c] sm:$0xf0]  ;;  %v6924_v57 = vor.u32 %v9468_v49, %v6923_v48  ;;  %v6893_v16 = vld [vmem:[#allocation10 + $0x30] sm:$0xf0] }
  0x61   : > { %v7179_v53 = vld [vmem:[#allocation10 + $0x260] sm:$0xf]  ;;  %v9532_v54 = vld [vmem:[#allocation10 + $0x26c] sm:$0xf0]  ;;  %v7052_v58 = vor.u32 %v9500_v52, %v7051_v50  ;;  %v6896_v26 = vor.u32 %v9458_v15, %v6893_v16  ;;  %v9454_v27 = vld [vmem:[#allocation10 + $0x4] sm:$0xf] }
  0x62   : > { %1055 = vmatpush.bf16.msra.mxu0 %v6940_v45  ;;  %v7180_v59 = vor.u32 %v9532_v54, %v7179_v53  ;;  %v6907_v60 = vld [vmem:[#allocation10 + $0x40] sm:$0xf]  ;;  %v9464_v61 = vld [vmem:[#allocation10 + $0x4c] sm:$0xf0]  ;;  %v6877_v28 = vld [vmem:[#allocation10 + $0x10] sm:$0xf0] }
  0x63   : > { %1084 = vmatpush.bf16.msra.mxu1 %v7068_v46  ;;  %v7035_v62 = vld [vmem:[#allocation10 + $0x140] sm:$0xf]  ;;  %1142 = vmatpush.bf16.msra.mxu3 %v6944_v51  ;;  %v9496_v0 = vld [vmem:[#allocation10 + $0x14c] sm:$0xf0]  ;;  %v6908_v5 = vor.u32 %v9464_v61, %v6907_v60  ;;  %v9443_v30 = vld [vmem:[%s10793_s27 + $0x8] sm:$0xf0]  ;;  %v6880_v42 = vor.u32 %v9454_v27, %v6877_v28 }
  0x64   : > { %1113 = vmatpush.bf16.msra.mxu2 %v7196_v47  ;;  %v7163_v1 = vld [vmem:[#allocation10 + $0x240] sm:$0xf]  ;;  %v9528_v2 = vld [vmem:[#allocation10 + $0x24c] sm:$0xf0]  ;;  %v7036_v6 = vor.u32 %v9496_v0, %v7035_v62  ;;  %v6995_v31 = vld [vmem:[#allocation10 + $0xe8] sm:$0xf] }
  0x65   : > { %v7164_v7 = vor.u32 %v9528_v2, %v7163_v1  ;;  %v6891_v8 = vld [vmem:[#allocation10 + $0x20] sm:$0xf]  ;;  %v9460_v9 = vld [vmem:[#allocation10 + $0x2c] sm:$0xf0]  ;;  %v9485_v32 = vld [vmem:[#allocation10 + $0xf4] sm:$0xf0] }
  0x66   : > { %1056 = vmatpush.bf16.msra.mxu0 %v6924_v57  ;;  %v7019_v10 = vld [vmem:[#allocation10 + $0x120] sm:$0xf]  ;;  %v9492_v12 = vld [vmem:[#allocation10 + $0x12c] sm:$0xf0]  ;;  %v6892_v17 = vor.u32 %v9460_v9, %v6891_v8  ;;  %v9442_v34 = vld [vmem:[%s10793_s27 + $0x4] sm:$0xf]  ;;  %v6996_v43 = vor.u32 %v9485_v32, %v6995_v31 }
  0x67   : > { %1085 = vmatpush.bf16.msra.mxu1 %v7052_v58  ;;  %1143 = vmatpush.bf16.msra.mxu3 %v6928_v63  ;;  %v7147_v13 = vld [vmem:[#allocation10 + $0x220] sm:$0xf]  ;;  %v9524_v14 = vld [vmem:[#allocation10 + $0x22c] sm:$0xf0]  ;;  %v7020_v21 = vor.u32 %v9492_v12, %v7019_v10  ;;  %v7123_v35 = vld [vmem:[#allocation10 + $0x1e8] sm:$0xf] }
  0x68   : > { %1114 = vmatpush.bf16.msra.mxu2 %v7180_v59  ;;  %v6875_v18 = vld [vmem:[#allocation10] sm:$0xf]  ;;  %v9456_v19 = vld [vmem:[#allocation10 + $0xc] sm:$0xf0]  ;;  %v7148_v22 = vor.u32 %v9524_v14, %v7147_v13  ;;  %v9517_v36 = vld [vmem:[#allocation10 + $0x1f4] sm:$0xf0] }
  0x69   : > { %v7003_v20 = vld [vmem:[#allocation10 + $0x100] sm:$0xf]  ;;  %v9488_v23 = vld [vmem:[#allocation10 + $0x10c] sm:$0xf0]  ;;  %v6876_v33 = vor.u32 %v9456_v19, %v6875_v18  ;;  %v6835_v40 = vld [vmem:[%s10793_s27 + $0x8] sm:$0xf]  ;;  %v7124_v48 = vor.u32 %v9517_v36, %v7123_v35 }
  0x6a   : > { %1057 = vmatpush.bf16.msra.mxu0 %v6908_v5  ;;  %v7131_v24 = vld [vmem:[#allocation10 + $0x200] sm:$0xf]  ;;  %v9520_v25 = vld [vmem:[#allocation10 + $0x20c] sm:$0xf0]  ;;  %v7004_v37 = vor.u32 %v9488_v23, %v7003_v20  ;;  %v9444_v41 = vld [vmem:[%s10793_s27 + $0x10] sm:$0xf0] }
  0x6b   : > { %1086 = vmatpush.bf16.msra.mxu1 %v7036_v6  ;;  %1144 = vmatpush.bf16.msra.mxu3 %v6912_v11  ;;  %v6827_v29 = vld [vmem:[%s10793_s27] sm:$0xf]  ;;  %v7132_v38 = vor.u32 %v9520_v25, %v7131_v24  ;;  %v6829_v39 = vld [vmem:[%s10793_s27 + $0xc] sm:$0xf0]  ;;  %v9546_v44 = vld [vmem:[#allocation10 + $0x2e4] sm:$0xf]  ;;  %v10823_v53 = vor.u32 %v9444_v41, %v6835_v40 }
  0x6c   : > { %1115 = vmatpush.bf16.msra.mxu2 %v7164_v7  ;;  %v7245_v45 = vld [vmem:[#allocation10 + $0x2f0] sm:$0xf0]  ;;  %v9514_v46 = vld [vmem:[#allocation10 + $0x1e4] sm:$0xf]  ;;  %v10819_v47 = vor.u32 %v9443_v30, %v6827_v29  ;;  %v6979_v50 = vld [vmem:[#allocation10 + $0xc8] sm:$0xf]  ;;  %v10821_v52 = vor.u32 %v9442_v34, %v6829_v39 }
  0x6d   : > { %v7117_v49 = vld [vmem:[#allocation10 + $0x1f0] sm:$0xf0]  ;;  %v9481_v51 = vld [vmem:[#allocation10 + $0xd4] sm:$0xf0]  ;;  %v7107_v54 = vld [vmem:[#allocation10 + $0x1c8] sm:$0xf]  ;;  %v7248_v56 = vor.u32 %v9546_v44, %v7245_v45 }
  0x6e   : > { %1058 = vmatpush.bf16.msra.mxu0 %v6892_v17  ;;  %v9513_v55 = vld [vmem:[#allocation10 + $0x1d4] sm:$0xf0]  ;;  %v7120_v57 = vor.u32 %v9514_v46, %v7117_v49  ;;  %v6980_v58 = vor.u32 %v9481_v51, %v6979_v50  ;;  %v9542_v59 = vld [vmem:[#allocation10 + $0x2c4] sm:$0xf]  ;;  %v7229_v60 = vld [vmem:[#allocation10 + $0x2d0] sm:$0xf0] }
  0x6f   : > { %1087 = vmatpush.bf16.msra.mxu1 %v7020_v21  ;;  %1145 = vmatpush.bf16.msra.mxu3 %v6896_v26  ;;  %v9510_v61 = vld [vmem:[#allocation10 + $0x1c4] sm:$0xf]  ;;  %v7108_v62 = vor.u32 %v9513_v55, %v7107_v54  ;;  %v7101_v63 = vld [vmem:[#allocation10 + $0x1d0] sm:$0xf0]  ;;  %v6963_v0 = vld [vmem:[#allocation10 + $0xa8] sm:$0xf]  ;;  %v7232_v4 = vor.u32 %v9542_v59, %v7229_v60 }
  0x70   : > { %1116 = vmatpush.bf16.msra.mxu2 %v7148_v22  ;;  %v9477_v1 = vld [vmem:[#allocation10 + $0xb4] sm:$0xf0]  ;;  %v7091_v2 = vld [vmem:[#allocation10 + $0x1a8] sm:$0xf]  ;;  %v7104_v5 = vor.u32 %v9510_v61, %v7101_v63  ;;  %v9538_v7 = vld [vmem:[#allocation10 + $0x2a4] sm:$0xf] }
  0x71   : > { %v9509_v3 = vld [vmem:[#allocation10 + $0x1b4] sm:$0xf0]  ;;  %v6964_v6 = vor.u32 %v9477_v1, %v6963_v0  ;;  %v7213_v8 = vld [vmem:[#allocation10 + $0x2b0] sm:$0xf0]  ;;  %v9506_v9 = vld [vmem:[#allocation10 + $0x1a4] sm:$0xf] }
  0x72   : > { %1059 = vmatpush.bf16.msra.mxu0 %v6876_v33  ;;  %v7092_v10 = vor.u32 %v9509_v3, %v7091_v2  ;;  %v7085_v11 = vld [vmem:[#allocation10 + $0x1b0] sm:$0xf0]  ;;  %v6947_v12 = vld [vmem:[#allocation10 + $0x88] sm:$0xf]  ;;  %v9473_v13 = vld [vmem:[#allocation10 + $0x94] sm:$0xf0]  ;;  %v7216_v16 = vor.u32 %v9538_v7, %v7213_v8 }
  0x73   : > { %1088 = vmatpush.bf16.msra.mxu1 %v7004_v37  ;;  %1146 = vmatpush.bf16.msra.mxu3 %v6880_v42  ;;  %v7075_v14 = vld [vmem:[#allocation10 + $0x188] sm:$0xf]  ;;  %v9505_v15 = vld [vmem:[#allocation10 + $0x194] sm:$0xf0]  ;;  %v9446_v18 = vld [vmem:[%s10793_s27 + $0x20] sm:$0xf0]  ;;  %v7088_v19 = vor.u32 %v9506_v9, %v7085_v11  ;;  %v6948_v20 = vor.u32 %v9473_v13, %v6947_v12 }
  0x74   : > { %1117 = vmatpush.bf16.msra.mxu2 %v7132_v38  ;;  %v6839_v17 = vld [vmem:[%s10793_s27 + $0x18] sm:$0xf]  ;;  %v9534_v21 = vld [vmem:[#allocation10 + $0x284] sm:$0xf]  ;;  %v7197_v22 = vld [vmem:[#allocation10 + $0x290] sm:$0xf0]  ;;  %v7076_v24 = vor.u32 %v9505_v15, %v7075_v14 }
  0x75   : > { %1060 = vmatmul.bf16.vlgmr.msra.gmra.mxu0 %v10819_v47  ;;  %v9502_v23 = vld [vmem:[#allocation10 + $0x184] sm:$0xf]  ;;  %v7069_v25 = vld [vmem:[#allocation10 + $0x190] sm:$0xf0]  ;;  %v6931_v26 = vld [vmem:[#allocation10 + $0x68] sm:$0xf]  ;;  %v7200_v34 = vor.u32 %v9534_v21, %v7197_v22  ;;  %v10835_v37 = vor.u32 %v9446_v18, %v6839_v17 }
  0x76   : > { %1089 = vmatmul.bf16.vlgmr.msra.gmra.mxu1 %v10821_v52  ;;  %1147 = vmatmul.bf16.vlgmr.msra.gmra.mxu3 %v10819_v47  ;;  %v9469_v27 = vld [vmem:[#allocation10 + $0x74] sm:$0xf0]  ;;  %v9445_v28 = vld [vmem:[%s10793_s27 + $0x1c] sm:$0xf]  ;;  %v7059_v29 = vld [vmem:[#allocation10 + $0x168] sm:$0xf]  ;;  %v7072_v35 = vor.u32 %v9502_v23, %v7069_v25 }
  0x77   : > { %1255 = vmatpush.bf16.msrb.mxu3 %v7124_v48  ;;  %1118 = vmatmul.bf16.vlgmr.msra.gmra.mxu2 %v10823_v53  ;;  %v9501_v30 = vld [vmem:[#allocation10 + $0x174] sm:$0xf0]  ;;  %v6841_v31 = vld [vmem:[%s10793_s27 + $0x24] sm:$0xf0]  ;;  %v6847_v32 = vld [vmem:[%s10793_s27 + $0x20] sm:$0xf]  ;;  %v6932_v36 = vor.u32 %v9469_v27, %v6931_v26 }
  0x78   : > { %1226 = vmatpush.bf16.msrb.mxu2 %v6996_v43  ;;  %1197 = vmatpush.bf16.msrb.mxu1 %v7248_v56  ;;  %v9447_v33 = vld [vmem:[%s10793_s27 + $0x28] sm:$0xf0]  ;;  %v7060_v38 = vor.u32 %v9501_v30, %v7059_v29  ;;  %v10837_v39 = vor.u32 %v9445_v28, %v6841_v31  ;;  %v9530_v41 = vld [vmem:[#allocation10 + $0x264] sm:$0xf]  ;;  %v7181_v42 = vld [vmem:[#allocation10 + $0x270] sm:$0xf0] }
  0x79   : > { %1168 = vmatpush.bf16.msrb.mxu0 %v7120_v57  ;;  %v10839_v40 = vor.u32 %v9447_v33, %v6847_v32  ;;  %v7184_v43 = vor.u32 %v9530_v41, %v7181_v42  ;;  %v9498_v44 = vld [vmem:[#allocation10 + $0x164] sm:$0xf]  ;;  %v7053_v45 = vld [vmem:[#allocation10 + $0x170] sm:$0xf0]  ;;  %v6915_v48 = vld [vmem:[#allocation10 + $0x48] sm:$0xf] }
  0x7a   : > { %v7056_v46 = vor.u32 %v9498_v44, %v7053_v45  ;;  %v9465_v49 = vld [vmem:[#allocation10 + $0x54] sm:$0xf0]  ;;  %v9494_v50 = vld [vmem:[#allocation10 + $0x144] sm:$0xf]  ;;  %v7037_v54 = vld [vmem:[#allocation10 + $0x150] sm:$0xf0] }
  0x7b   : > { %1256 = vmatpush.bf16.msrb.mxu3 %v7108_v62  ;;  %v6916_v51 = vor.u32 %v9465_v49, %v6915_v48  ;;  %v9526_v55 = vld [vmem:[#allocation10 + $0x244] sm:$0xf]  ;;  %v7165_v56 = vld [vmem:[#allocation10 + $0x250] sm:$0xf0]  ;;  %v7040_v57 = vor.u32 %v9494_v50, %v7037_v54  ;;  %v7043_v59 = vld [vmem:[#allocation10 + $0x148] sm:$0xf] }
  0x7c   : > { %1227 = vmatpush.bf16.msrb.mxu2 %v6980_v58  ;;  %1198 = vmatpush.bf16.msrb.mxu1 %v7232_v4  ;;  %v7168_v58 = vor.u32 %v9526_v55, %v7165_v56  ;;  %v9497_v60 = vld [vmem:[#allocation10 + $0x154] sm:$0xf0]  ;;  %v9490_v61 = vld [vmem:[#allocation10 + $0x124] sm:$0xf]  ;;  %v7021_v63 = vld [vmem:[#allocation10 + $0x130] sm:$0xf0] }
  0x7d   : > { %1169 = vmatpush.bf16.msrb.mxu0 %v7104_v5  ;;  %v7044_v62 = vor.u32 %v9497_v60, %v7043_v59  ;;  %v9522_v0 = vld [vmem:[#allocation10 + $0x224] sm:$0xf]  ;;  %v7149_v1 = vld [vmem:[#allocation10 + $0x230] sm:$0xf0]  ;;  %v6899_v2 = vld [vmem:[#allocation10 + $0x28] sm:$0xf]  ;;  %v7024_v11 = vor.u32 %v9490_v61, %v7021_v63 }
  0x7e   : > { %v9461_v3 = vld [vmem:[#allocation10 + $0x34] sm:$0xf0]  ;;  %v7027_v4 = vld [vmem:[#allocation10 + $0x128] sm:$0xf]  ;;  %v6851_v5 = vld [vmem:[%s10793_s27 + $0x30] sm:$0xf]  ;;  %v7152_v7 = vor.u32 %v9522_v0, %v7149_v1 }
  0x7f   : > { %1257 = vmatpush.bf16.msrb.mxu3 %v7092_v10  ;;  %v6900_v8 = vor.u32 %v9461_v3, %v6899_v2  ;;  %v9493_v9 = vld [vmem:[#allocation10 + $0x134] sm:$0xf0]  ;;  %v9448_v10 = vld [vmem:[%s10793_s27 + $0x34] sm:$0xf]  ;;  %v9518_v13 = vld [vmem:[#allocation10 + $0x204] sm:$0xf] }
  0x80   : > { %1228 = vmatpush.bf16.msrb.mxu2 %v6964_v6  ;;  %1199 = vmatpush.bf16.msrb.mxu1 %v7216_v16  ;;  %v9449_v6 = vld [vmem:[%s10793_s27 + $0x38] sm:$0xf0]  ;;  %v7028_v12 = vor.u32 %v9493_v9, %v7027_v4  ;;  %v7133_v14 = vld [vmem:[#allocation10 + $0x210] sm:$0xf0]  ;;  %v6883_v15 = vld [vmem:[#allocation10 + $0x8] sm:$0xf] }
  0x81   : > { %1170 = vmatpush.bf16.msrb.mxu0 %v7088_v19  ;;  %v9457_v16 = vld [vmem:[#allocation10 + $0x14] sm:$0xf0]  ;;  %v7011_v17 = vld [vmem:[#allocation10 + $0x108] sm:$0xf]  ;;  %v6853_v19 = vld [vmem:[%s10793_s27 + $0x3c] sm:$0xf0]  ;;  %v7136_v25 = vor.u32 %v9518_v13, %v7133_v14  ;;  %v10851_v27 = vor.u32 %v9449_v6, %v6851_v5 }
  0x82   : > { %v9489_v18 = vld [vmem:[#allocation10 + $0x114] sm:$0xf0]  ;;  %v9450_v21 = vld [vmem:[%s10793_s27 + $0x40] sm:$0xf0]  ;;  %v6884_v22 = vor.u32 %v9457_v16, %v6883_v15  ;;  %v10853_v28 = vor.u32 %v9448_v10, %v6853_v19  ;;  %v9515_v31 = vld [vmem:[#allocation10 + $0x1ec] sm:$0xf] }
  0x83   : > { %1258 = vmatpush.bf16.msrb.mxu3 %v7076_v24  ;;  %v9486_v23 = vld [vmem:[#allocation10 + $0x104] sm:$0xf]  ;;  %v7005_v24 = vld [vmem:[#allocation10 + $0x110] sm:$0xf0]  ;;  %v7012_v26 = vor.u32 %v9489_v18, %v7011_v17  ;;  %v7125_v32 = vld [vmem:[#allocation10 + $0x1f8] sm:$0xf0] }
  0x84   : > { %1229 = vmatpush.bf16.msrb.mxu2 %v6948_v20  ;;  %1200 = vmatpush.bf16.msrb.mxu1 %v7200_v34  ;;  %v6859_v20 = vld [vmem:[%s10793_s27 + $0x38] sm:$0xf]  ;;  %v7008_v30 = vor.u32 %v9486_v23, %v7005_v24  ;;  %v9547_v33 = vld [vmem:[#allocation10 + $0x2ec] sm:$0xf]  ;;  %v7128_v34 = vor.u32 %v9515_v31, %v7125_v32  ;;  %v9452_v41 = vld [vmem:[%s10793_s27 + $0x50] sm:$0xf0] }
  0x85   : > { %1171 = vmatpush.bf16.msrb.mxu0 %v7072_v35  ;;  %v10855_v29 = vor.u32 %v9450_v21, %v6859_v20  ;;  %v7253_v35 = vld [vmem:[#allocation10 + $0x2f8] sm:$0xf0]  ;;  %v9451_v42 = vld [vmem:[%s10793_s27 + $0x4c] sm:$0xf]  ;;  %v6871_v44 = vld [vmem:[%s10793_s27 + $0x50] sm:$0xf] }
  0x86   : > { %1065 = vmatmul.bf16.gmra.mxu0 %v10835_v37  ;;  %1094 = vmatmul.bf16.gmra.mxu1 %v10837_v39  ;;  %v9453_v45 = vld [vmem:[%s10793_s27 + $0x58] sm:$0xf0]  ;;  %v9483_v50 = vld [vmem:[#allocation10 + $0xec] sm:$0xf]  ;;  %v7251_v54 = vld [vmem:[#allocation10 + $0x2e8] sm:$0xf] }
  0x87   : > { %1259 = vmatpush.bf16.msrb.mxu3 %v7060_v38  ;;  %1123 = vmatmul.bf16.gmra.mxu2 %v10839_v40  ;;  %v6863_v38 = vld [vmem:[%s10793_s27 + $0x48] sm:$0xf]  ;;  %v10871_v49 = vor.u32 %v9453_v45, %v6871_v44  ;;  %v9549_v56 = vld [vmem:[#allocation10 + $0x2f4] sm:$0xf0]  ;;  %v9543_v61 = vld [vmem:[#allocation10 + $0x2cc] sm:$0xf] }
  0x88   : > { %1230 = vmatpush.bf16.msrb.mxu2 %v6932_v36  ;;  %1152 = vmatmul.bf16.gmra.mxu3 %v10835_v37  ;;  %v7256_v36 = vor.u32 %v9547_v33, %v7253_v35  ;;  %v7252_v59 = vor.u32 %v9549_v56, %v7251_v54  ;;  %v9479_v63 = vld [vmem:[#allocation10 + $0xcc] sm:$0xf]  ;;  %v6981_v1 = vld [vmem:[#allocation10 + $0xd8] sm:$0xf0]  ;;  %v7235_v2 = vld [vmem:[#allocation10 + $0x2c8] sm:$0xf] }
  0x89   : > { %1201 = vmatpush.bf16.msrb.mxu1 %v7184_v43  ;;  %1172 = vmatpush.bf16.msrb.mxu0 %v7056_v46  ;;  %v6865_v43 = vld [vmem:[%s10793_s27 + $0x54] sm:$0xf0]  ;;  %v10867_v46 = vor.u32 %v9452_v41, %v6863_v38  ;;  %v6984_v4 = vor.u32 %v9479_v63, %v6981_v1  ;;  %v9507_v6 = vld [vmem:[#allocation10 + $0x1ac] sm:$0xf]  ;;  %v7221_v10 = vld [vmem:[#allocation10 + $0x2b8] sm:$0xf0] }
  0x8a   : > { %v10869_v48 = vor.u32 %v9451_v42, %v6865_v43  ;;  %v9545_v3 = vld [vmem:[#allocation10 + $0x2d4] sm:$0xf0]  ;;  %v6965_v13 = vld [vmem:[#allocation10 + $0xb8] sm:$0xf0]  ;;  %v7219_v14 = vld [vmem:[#allocation10 + $0x2a8] sm:$0xf] }
  0x8b   : > { %1260 = vmatpush.bf16.msrb.mxu3 %v7044_v62  ;;  %v7237_v62 = vld [vmem:[#allocation10 + $0x2d8] sm:$0xf0]  ;;  %v7236_v5 = vor.u32 %v9545_v3, %v7235_v2  ;;  %v9541_v16 = vld [vmem:[#allocation10 + $0x2b4] sm:$0xf0]  ;;  %v9503_v17 = vld [vmem:[#allocation10 + $0x18c] sm:$0xf] }
  0x8c   : > { %1231 = vmatpush.bf16.msrb.mxu2 %v6916_v51  ;;  %v6997_v51 = vld [vmem:[#allocation10 + $0xf8] sm:$0xf0]  ;;  %v7240_v0 = vor.u32 %v9543_v61, %v7237_v62  ;;  %v7220_v19 = vor.u32 %v9541_v16, %v7219_v14  ;;  %v9535_v21 = vld [vmem:[#allocation10 + $0x28c] sm:$0xf]  ;;  %v7187_v44 = vld [vmem:[#allocation10 + $0x268] sm:$0xf] }
  0x8d   : > { %1202 = vmatpush.bf16.msrb.mxu1 %v7168_v58  ;;  %1173 = vmatpush.bf16.msrb.mxu0 %v7040_v57  ;;  %v7000_v55 = vor.u32 %v9483_v50, %v6997_v51  ;;  %v9511_v57 = vld [vmem:[#allocation10 + $0x1cc] sm:$0xf]  ;;  %v7109_v58 = vld [vmem:[#allocation10 + $0x1d8] sm:$0xf0]  ;;  %v9533_v50 = vld [vmem:[#allocation10 + $0x274] sm:$0xf0] }
  0x8e   : > { %v7112_v60 = vor.u32 %v9511_v57, %v7109_v58  ;;  %v7077_v18 = vld [vmem:[#allocation10 + $0x198] sm:$0xf0]  ;;  %v9471_v23 = vld [vmem:[#allocation10 + $0x8c] sm:$0xf]  ;;  %v7188_v51 = vor.u32 %v9533_v50, %v7187_v44  ;;  %v7171_v56 = vld [vmem:[#allocation10 + $0x248] sm:$0xf] }
  0x8f   : > { %1261 = vmatpush.bf16.msrb.mxu3 %v7028_v12  ;;  %v9475_v12 = vld [vmem:[#allocation10 + $0xac] sm:$0xf]  ;;  %v7080_v20 = vor.u32 %v9503_v17, %v7077_v18  ;;  %v7189_v38 = vld [vmem:[#allocation10 + $0x278] sm:$0xf0]  ;;  %v9529_v58 = vld [vmem:[#allocation10 + $0x254] sm:$0xf0] }
  0x90   : > { %1232 = vmatpush.bf16.msrb.mxu2 %v6900_v8  ;;  %v9539_v8 = vld [vmem:[#allocation10 + $0x2ac] sm:$0xf]  ;;  %v6968_v15 = vor.u32 %v9475_v12, %v6965_v13  ;;  %v6933_v43 = vld [vmem:[#allocation10 + $0x78] sm:$0xf0]  ;;  %v7172_v61 = vor.u32 %v9529_v58, %v7171_v56  ;;  %v7155_v1 = vld [vmem:[#allocation10 + $0x228] sm:$0xf] }
  0x91   : > { %1203 = vmatpush.bf16.msrb.mxu1 %v7152_v7  ;;  %1174 = vmatpush.bf16.msrb.mxu0 %v7024_v11  ;;  %v7093_v7 = vld [vmem:[#allocation10 + $0x1b8] sm:$0xf0]  ;;  %v7224_v11 = vor.u32 %v9539_v8, %v7221_v10  ;;  %v9499_v33 = vld [vmem:[#allocation10 + $0x16c] sm:$0xf]  ;;  %v9525_v3 = vld [vmem:[#allocation10 + $0x234] sm:$0xf0] }
  0x92   : > { %v7096_v9 = vor.u32 %v9507_v6, %v7093_v7  ;;  %v9531_v35 = vld [vmem:[#allocation10 + $0x26c] sm:$0xf]  ;;  %v7029_v7 = vld [vmem:[#allocation10 + $0x138] sm:$0xf0]  ;;  %v7156_v12 = vor.u32 %v9525_v3, %v7155_v1  ;;  %v7139_v14 = vld [vmem:[#allocation10 + $0x208] sm:$0xf] }
  0x93   : > { %1262 = vmatpush.bf16.msrb.mxu3 %v7012_v26  ;;  %v7203_v26 = vld [vmem:[#allocation10 + $0x288] sm:$0xf]  ;;  %v7192_v41 = vor.u32 %v9531_v35, %v7189_v38  ;;  %v9467_v42 = vld [vmem:[#allocation10 + $0x6c] sm:$0xf]  ;;  %v6885_v17 = vld [vmem:[#allocation10 + $0x18] sm:$0xf0] }
  0x94   : > { %1233 = vmatpush.bf16.msrb.mxu2 %v6884_v22  ;;  %v7205_v22 = vld [vmem:[#allocation10 + $0x298] sm:$0xf0]  ;;  %v6936_v45 = vor.u32 %v9467_v42, %v6933_v43  ;;  %v9495_v54 = vld [vmem:[#allocation10 + $0x14c] sm:$0xf]  ;;  %s11083_s9 = sshll.u32 %s10710_s8, 2 }
  0x95   : > { %1204 = vmatpush.bf16.msrb.mxu1 %v7136_v25  ;;  %1175 = vmatpush.bf16.msrb.mxu0 %v7008_v30  ;;  %v7208_v24 = vor.u32 %v9535_v21, %v7205_v22  ;;  %v6949_v25 = vld [vmem:[#allocation10 + $0x98] sm:$0xf0]  ;;  %v9537_v30 = vld [vmem:[#allocation10 + $0x294] sm:$0xf0]  ;;  %v9527_v63 = vld [vmem:[#allocation10 + $0x24c] sm:$0xf] }
  0x96   : > { %1070 = vmatmul.bf16.gmra.mxu0 %v10851_v27  ;;  %1099 = vmatmul.bf16.gmra.mxu1 %v10853_v28  ;;  %v6952_v31 = vor.u32 %v9471_v23, %v6949_v25  ;;  %v7204_v32 = vor.u32 %v9537_v30, %v7203_v26  ;;  %v9491_v6 = vld [vmem:[#allocation10 + $0x12c] sm:$0xf]  ;;  %v7141_v23 = vld [vmem:[#allocation10 + $0x218] sm:$0xf0]  ;;  %v10893_v26 = vld [vmem:[#allocation13] sm:$0xf] }
  0x97   : > { %1128 = vmatmul.bf16.gmra.mxu2 %v10855_v29  ;;  %1371 = vmatpush.bf16.msra.mxu3 %v7256_v36  ;;  %v9523_v8 = vld [vmem:[#allocation10 + $0x22c] sm:$0xf]  ;;  %v7032_v10 = vor.u32 %v9491_v6, %v7029_v7  ;;  %v10896_v30 = vperm.slane %v10893_v26, 0  ;;  %p7770_p1 = scmp.ne.s32.totalorder %s11083_s9, 7 }
  0x98   : > { %1157 = vmatmul.bf16.gmra.mxu3 %v10851_v27  ;;  %1342 = vmatpush.bf16.msra.mxu2 %v7128_v34  ;;  %v7061_v34 = vld [vmem:[#allocation10 + $0x178] sm:$0xf0]  ;;  %v9455_v16 = vld [vmem:[#allocation10 + $0xc] sm:$0xf] }
  0x99   : > { %1313 = vmatpush.bf16.msra.mxu1 %v7000_v55  ;;  %1284 = vmatpush.bf16.msra.mxu0 %v7252_v59  ;;  %v7064_v36 = vor.u32 %v9499_v33, %v7061_v34  ;;  %v7045_v55 = vld [vmem:[#allocation10 + $0x158] sm:$0xf0]  ;;  %v9463_v59 = vld [vmem:[#allocation10 + $0x4c] sm:$0xf]  ;;  %v6888_v21 = vor.u32 %v9455_v16, %v6885_v17 }
  0x9a   : > { %v7048_v57 = vor.u32 %v9495_v54, %v7045_v55  ;;  %v9487_v18 = vld [vmem:[#allocation10 + $0x10c] sm:$0xf] }
  0x9b   : > { %1372 = vmatpush.bf16.msra.mxu3 %v7240_v0  ;;  %v7173_v0 = vld [vmem:[#allocation10 + $0x258] sm:$0xf0]  ;;  %v9519_v22 = vld [vmem:[#allocation10 + $0x20c] sm:$0xf] }
  0x9c   : > { %1343 = vmatpush.bf16.msra.mxu2 %v7112_v60  ;;  %v6917_v60 = vld [vmem:[#allocation10 + $0x58] sm:$0xf0]  ;;  %v7176_v2 = vor.u32 %v9527_v63, %v7173_v0  ;;  %v7144_v25 = vor.u32 %v9519_v22, %v7141_v23 }
  0x9d   : > { %1314 = vmatpush.bf16.msra.mxu1 %v6984_v4  ;;  %1285 = vmatpush.bf16.msra.mxu0 %v7236_v5  ;;  %v6920_v62 = vor.u32 %v9463_v59, %v6917_v60  ;;  %v9459_v4 = vld [vmem:[#allocation10 + $0x2c] sm:$0xf]  ;;  %v6901_v5 = vld [vmem:[#allocation10 + $0x38] sm:$0xf0] }
  0x9f   : > { %1373 = vmatpush.bf16.msra.mxu3 %v7224_v11  ;;  %v7157_v11 = vld [vmem:[#allocation10 + $0x238] sm:$0xf0] }
  0xa0   : > { %1344 = vmatpush.bf16.msra.mxu2 %v7096_v9  ;;  %v6904_v9 = vor.u32 %v9459_v4, %v6901_v5  ;;  %v7160_v13 = vor.u32 %v9523_v8, %v7157_v11 }
  0xa1   : > { %1315 = vmatpush.bf16.msra.mxu1 %v6968_v15  ;;  %1286 = vmatpush.bf16.msra.mxu0 %v7220_v19  ;;  %v9521_v15 = vld [vmem:[#allocation10 + $0x214] sm:$0xf0]  ;;  %v7013_v19 = vld [vmem:[#allocation10 + $0x118] sm:$0xf0] }
  0xa3   : > { %1374 = vmatpush.bf16.msra.mxu3 %v7208_v24  ;;  %v7016_v24 = vor.u32 %v9487_v18, %v7013_v19  ;;  %v10941_v19 = vperm.slane %v10893_v26, 1 }
  0xa4   : > { %1345 = vmatpush.bf16.msra.mxu2 %v7080_v20  ;;  %v7140_v20 = vor.u32 %v9521_v15, %v7139_v14 }
  0xa5   : > { %1316 = vmatpush.bf16.msra.mxu1 %v6952_v31  ;;  %1287 = vmatpush.bf16.msra.mxu0 %v7204_v32 }
  0xa6   : > { %1075 = vmatmul.bf16.gmra.mxu0 %v10867_v46  ;;  %1104 = vmatmul.bf16.gmra.mxu1 %v10869_v48 }
  0xa7   : > { %1133 = vmatmul.bf16.gmra.mxu2 %v10871_v49  ;;  %1375 = vmatpush.bf16.msra.mxu3 %v7192_v41 }
  0xa8   : > { %1162 = vmatmul.bf16.gmra.mxu3 %v10867_v46  ;;  %1346 = vmatpush.bf16.msra.mxu2 %v7064_v36 }
  0xa9   : > { %1317 = vmatpush.bf16.msra.mxu1 %v6936_v45  ;;  %1288 = vmatpush.bf16.msra.mxu0 %v7188_v51 }
  0xab   : > { %1376 = vmatpush.bf16.msra.mxu3 %v7176_v2 }
  0xac   : > { %1347 = vmatpush.bf16.msra.mxu2 %v7048_v57 }
  0xad   : > { %1318 = vmatpush.bf16.msra.mxu1 %v6920_v62  ;;  %1289 = vmatpush.bf16.msra.mxu0 %v7172_v61 }
  0xaf   : > { %1377 = vmatpush.bf16.msra.mxu3 %v7160_v13 }
  0xb0   : > { %1348 = vmatpush.bf16.msra.mxu2 %v7032_v10 }
  0xb1   : > { %1319 = vmatpush.bf16.msra.mxu1 %v6904_v9  ;;  %1290 = vmatpush.bf16.msra.mxu0 %v7156_v12 }
  0xb3   : > { %1378 = vmatpush.bf16.msra.mxu3 %v7144_v25  ;;  %v1442_v25 = vld [vmem:[#allocation3] sm:$0xff] }
  0xb4   : > { %1349 = vmatpush.bf16.msra.mxu2 %v7016_v24 }
  0xb5   : > { %1320 = vmatpush.bf16.msra.mxu1 %v6888_v21  ;;  %1291 = vmatpush.bf16.msra.mxu0 %v7140_v20 }
  0xb6   : > { %1176 = vmatmul.bf16.vlgmr.msrb.gmra.mxu0 %v10821_v52  ;;  %1205 = vmatmul.bf16.vlgmr.msrb.gmra.mxu1 %v10823_v53 }
  0xb7   : > { %1234 = vmatmul.bf16.vlgmr.msrb.gmra.mxu2 %v10819_v47 }
  0xb8   : > { %1263 = vmatmul.bf16.vlgmr.msrb.gmra.mxu3 %v10821_v52 }
  0xc6   : > { %1181 = vmatmul.bf16.gmra.mxu0 %v10837_v39  ;;  %1210 = vmatmul.bf16.gmra.mxu1 %v10839_v40 }
  0xc7   : > { %1239 = vmatmul.bf16.gmra.mxu2 %v10835_v37 }
  0xc8   : > { %1268 = vmatmul.bf16.gmra.mxu3 %v10837_v39 }
  0xd6   : > { %1186 = vmatmul.bf16.gmra.mxu0 %v10853_v28  ;;  %1215 = vmatmul.bf16.gmra.mxu1 %v10855_v29 }
  0xd7   : > { %1244 = vmatmul.bf16.gmra.mxu2 %v10851_v27 }
  0xd8   : > { %1273 = vmatmul.bf16.gmra.mxu3 %v10853_v28 }
  0xe6   : > { %1191 = vmatmul.bf16.gmra.mxu0 %v10869_v48  ;;  %1220 = vmatmul.bf16.gmra.mxu1 %v10871_v49 }
  0xe7   : > { %1249 = vmatmul.bf16.gmra.mxu2 %v10867_v46 }
  0xe8   : > { %1278 = vmatmul.bf16.gmra.mxu3 %v10869_v48 }
  0xf2   : > { %v1061_v31 = vpop.f32.mrf.mxu0 }
  0xf3   : > { %v1062_v32 = vadd.f32 %v1061_v31, %v10896_v30  ;;  %v1090_v33 = vpop.f32.mrf.mxu1  ;;  %v1443_v31 = vld [vmem:[#allocation3 + $0x8] sm:$0xff] }
  0xf5   : > { %v1091_v34 = vadd.f32 %v1090_v33, %v1062_v32 }
  0xf6   : > { %1292 = vmatmul.bf16.vlgmr.msra.gmra.mxu0 %v10823_v53  ;;  %1321 = vmatmul.bf16.vlgmr.msra.gmra.mxu1 %v10819_v47 }
  0xf7   : > { %1350 = vmatmul.bf16.vlgmr.msra.gmra.mxu2 %v10821_v52 }
  0xf8   : > { %1379 = vmatmul.bf16.vlgmr.msra.gmra.mxu3 %v10823_v53 }
  0xf9   : > { %v10905_v38 = vpop.f32.mrf.mxu3 }
  0xfa   : > { %v1119_v35 = vpop.f32.mrf.mxu2  ;;  %v1063_v41 = vpop.f32.mrf.mxu0 }
  0xfb   : > { %v10903_v36 = vadd.f32 %v1119_v35, %v1091_v34  ;;  %v1092_v42 = vpop.f32.mrf.mxu1  ;;  %v1064_v43 = vadd.f32 %v1063_v41, %v10896_v30 }
  0xfd   : > { %v1093_v44 = vadd.f32 %v1092_v42, %v1064_v43 }
 0x101   : > { %v10910_v51 = vpop.f32.mrf.mxu3 }
 0x102   : > { %v1121_v45 = vpop.f32.mrf.mxu2  ;;  %v1151_v34 = vadd.f32 %v10910_v51, %v10941_v19 }
 0x103   : > { %v10908_v50 = vadd.f32 %v1121_v45, %v1093_v44  ;;  %v1066_v47 = vpop.f32.mrf.mxu0  ;;  %v1095_v54 = vpop.f32.mrf.mxu1 }
 0x104   : > { %v1067_v52 = vadd.f32 %v1066_v47, %v10896_v30 }
 0x106   : > { %1297 = vmatmul.bf16.gmra.mxu0 %v10839_v40  ;;  %v1096_v53 = vadd.f32 %v1095_v54, %v1067_v52  ;;  %1326 = vmatmul.bf16.gmra.mxu1 %v10835_v37 }
 0x107   : > { %1355 = vmatmul.bf16.gmra.mxu2 %v10837_v39 }
 0x108   : > { %1384 = vmatmul.bf16.gmra.mxu3 %v10839_v40 }
 0x10a   : > { %v1124_v55 = vpop.f32.mrf.mxu2 }
 0x10b   : > { %v1125_v56 = vadd.f32 %v1124_v55, %v1096_v53  ;;  %v10917_v57 = vpop.f32.mrf.mxu3  ;;  %v1068_v58 = vpop.f32.mrf.mxu0 }
 0x10c   : > { %v1097_v59 = vpop.f32.mrf.mxu1  ;;  %v1069_v60 = vadd.f32 %v1068_v58, %v10896_v30  ;;  %v7741_v58 = vld [vmem:[#allocation12 + $0x3e0] sm:$0xf0] }
 0x10d   : > { %1408 = vst [vmem:[#allocation2 + $0x80] sm:$0xff] %v1125_v56  ;;  %v9670_v56 = vld [vmem:[#allocation12 + $0x3c4] sm:$0xf] }
 0x10e   : > { %v1098_v61 = vadd.f32 %v1097_v59, %v1069_v60  ;;  %v7744_v59 = vor.u32 %v9670_v56, %v7741_v58 }
 0x110   : > { %2386 = vmatpush.bf16.msrb.mxu3 %v7744_v59 }
 0x112   : > { %v1126_v62 = vpop.f32.mrf.mxu2 }
 0x113   : > { %v1127_v63 = vadd.f32 %v1126_v62, %v1098_v61  ;;  %v10920_v0 = vpop.f32.mrf.mxu3  ;;  %v1071_v1 = vpop.f32.mrf.mxu0 }
 0x114   : > { %v1072_v39 = vadd.f32 %v1071_v1, %v10896_v30  ;;  %v1100_v37 = vpop.f32.mrf.mxu1  ;;  %v1156_v60 = vadd.f32 %v10920_v0, %v10941_v19 }
 0x115   : > { %1412 = vst [vmem:[#allocation2 + $0x60] sm:$0xff] %v1127_v63 }
 0x116   : > { %1302 = vmatmul.bf16.gmra.mxu0 %v10855_v29  ;;  %v1101_v40 = vadd.f32 %v1100_v37, %v1072_v39  ;;  %1331 = vmatmul.bf16.gmra.mxu1 %v10851_v27  ;;  %v9662_v39 = vld [vmem:[#allocation12 + $0x384] sm:$0xf] }
 0x117   : > { %1360 = vmatmul.bf16.gmra.mxu2 %v10853_v28  ;;  %v7709_v37 = vld [vmem:[#allocation12 + $0x3a0] sm:$0xf0] }
 0x118   : > { %1389 = vmatmul.bf16.gmra.mxu3 %v10855_v29 }
 0x11a   : > { %v1129_v2 = vpop.f32.mrf.mxu2 }
 0x11b   : > { %v1130_v3 = vadd.f32 %v1129_v2, %v1101_v40  ;;  %v10927_v4 = vpop.f32.mrf.mxu3  ;;  %v1073_v5 = vpop.f32.mrf.mxu0  ;;  %v7712_v40 = vor.u32 %v9662_v39, %v7709_v37  ;;  %v1447_v37 = vld [vmem:[#allocation3 + $0x30] sm:$0xff] }
 0x11c   : > { %v1102_v6 = vpop.f32.mrf.mxu1  ;;  %v1074_v7 = vadd.f32 %v1073_v5, %v10896_v30  ;;  %v9674_v5 = vld [vmem:[#allocation12 + $0x3dc] sm:$0xf0] }
 0x11d   : > { %1416 = vst [vmem:[#allocation2 + $0x38] sm:$0xff] %v1130_v3  ;;  %v7739_v3 = vld [vmem:[#allocation12 + $0x3c0] sm:$0xf]  ;;  %2387 = vmatpush.bf16.msrb.mxu3 %v7712_v40 }
 0x11e   : > { %v1103_v8 = vadd.f32 %v1102_v6, %v1074_v7  ;;  %v7740_v6 = vor.u32 %v9674_v5, %v7739_v3  ;;  %v7483_v7 = vld [vmem:[#allocation12 + $0x1c0] sm:$0xf] }
 0x11f   : > { %v9650_v5 = vld [vmem:[#allocation12 + $0x31c] sm:$0xf0] }
 0x120   : > { %2358 = vmatpush.bf16.msrb.mxu1 %v7740_v6 }
 0x122   : > { %v1131_v9 = vpop.f32.mrf.mxu2 }
 0x123   : > { %v1132_v10 = vadd.f32 %v1131_v9, %v1103_v8  ;;  %v10930_v11 = vpop.f32.mrf.mxu3  ;;  %v1076_v12 = vpop.f32.mrf.mxu0  ;;  %v9610_v8 = vld [vmem:[#allocation12 + $0x1dc] sm:$0xf0]  ;;  %v9606_v9 = vld [vmem:[#allocation12 + $0x1c4] sm:$0xf] }
 0x124   : > { %v1077_v28 = vadd.f32 %v1076_v12, %v10896_v30  ;;  %v1105_v27 = vpop.f32.mrf.mxu1  ;;  %v7484_v0 = vor.u32 %v9610_v8, %v7483_v7  ;;  %v1159_v12 = vadd.f32 %v10927_v4, %v10941_v19  ;;  %v1161_v56 = vadd.f32 %v10930_v11, %v10941_v19  ;;  %v7387_v8 = vld [vmem:[#allocation12 + $0x100] sm:$0xf] }
 0x125   : > { %1420 = vst [vmem:[#allocation2 + $0xe0] sm:$0xff] %v1132_v10  ;;  %v7485_v10 = vld [vmem:[#allocation12 + $0x1e0] sm:$0xf0] }
 0x126   : > { %1307 = vmatmul.bf16.gmra.mxu0 %v10871_v49  ;;  %v1106_v29 = vadd.f32 %v1105_v27, %v1077_v28  ;;  %1336 = vmatmul.bf16.gmra.mxu1 %v10867_v46  ;;  %v7488_v27 = vor.u32 %v9606_v9, %v7485_v10  ;;  %v9582_v9 = vld [vmem:[#allocation12 + $0x104] sm:$0xf] }
 0x127   : > { %1365 = vmatmul.bf16.gmra.mxu2 %v10869_v48  ;;  %v1149_v48 = vadd.f32 %v10905_v38, %v10941_v19  ;;  %2344 = vmatpush.bf16.msrb.mxu0 %v7484_v0  ;;  %v9586_v0 = vld [vmem:[#allocation12 + $0x11c] sm:$0xf0] }
 0x128   : > { %1394 = vmatmul.bf16.gmra.mxu3 %v10871_v49  ;;  %2372 = vmatpush.bf16.msrb.mxu2 %v7488_v27  ;;  %v7388_v10 = vor.u32 %v9586_v0, %v7387_v8  ;;  %v9630_v27 = vld [vmem:[#allocation12 + $0x284] sm:$0xf]  ;;  %v7547_v8 = vld [vmem:[#allocation12 + $0x240] sm:$0xf] }
 0x12a   : > { %v1134_v13 = vpop.f32.mrf.mxu2 }
 0x12b   : > { %v1135_v14 = vadd.f32 %v1134_v13, %v1106_v29  ;;  %v10937_v15 = vpop.f32.mrf.mxu3  ;;  %v1078_v16 = vpop.f32.mrf.mxu0  ;;  %v9654_v29 = vld [vmem:[#allocation12 + $0x344] sm:$0xf] }
 0x12c   : > { %v1107_v17 = vpop.f32.mrf.mxu1  ;;  %v1079_v18 = vadd.f32 %v1078_v16, %v10896_v30  ;;  %v1464_v30 = vadd.f32 %v1442_v25, %v10903_v36  ;;  %v1154_v36 = vadd.f32 %v10917_v57, %v10941_v19  ;;  %v7677_v13 = vld [vmem:[#allocation12 + $0x360] sm:$0xf0] }
 0x12d   : > { %1424 = vst [vmem:[#allocation2 + $0xa8] sm:$0xff] %v1135_v14  ;;  %v7707_v14 = vld [vmem:[#allocation12 + $0x380] sm:$0xf]  ;;  %v7453_v25 = vld [vmem:[#allocation12 + $0x1a0] sm:$0xf0] }
 0x12e   : > { %v1108_v20 = vadd.f32 %v1107_v17, %v1079_v18  ;;  %v7680_v18 = vor.u32 %v9654_v29, %v7677_v13  ;;  %v7581_v29 = vld [vmem:[#allocation12 + $0x2a0] sm:$0xf0] }
 0x130   : > { %2388 = vmatpush.bf16.msrb.mxu3 %v7680_v18  ;;  %v9642_v18 = vld [vmem:[#allocation12 + $0x2dc] sm:$0xf0] }
 0x132   : > { %v1136_v21 = vpop.f32.mrf.mxu2 }
 0x133   : > { %v1137_v46 = vadd.f32 %v1136_v21, %v1108_v20  ;;  %v10945_v22 = vpop.f32.mrf.mxu3  ;;  %v1177_v49 = vpop.f32.mrf.mxu0  ;;  %v9666_v20 = vld [vmem:[#allocation12 + $0x39c] sm:$0xf0] }
 0x134   : > { %v1178_v23 = vadd.f32 %v1177_v49, %v1149_v48  ;;  %v1206_v24 = vpop.f32.mrf.mxu1  ;;  %v7451_v49 = vld [vmem:[#allocation12 + $0x180] sm:$0xf] }
 0x135   : > { %1428 = vst [vmem:[#allocation2 + $0xa0] sm:$0xff] %v1137_v46  ;;  %v7708_v46 = vor.u32 %v9666_v20, %v7707_v14  ;;  %v7584_v14 = vor.u32 %v9630_v27, %v7581_v29  ;;  %v1446_v20 = vld [vmem:[#allocation3 + $0x10] sm:$0xff] }
 0x136   : > { %v1207_v32 = vadd.f32 %v1206_v24, %v1178_v23  ;;  %v9602_v23 = vld [vmem:[#allocation12 + $0x19c] sm:$0xf0]  ;;  %v9598_v24 = vld [vmem:[#allocation12 + $0x184] sm:$0xf] }
 0x137   : > { %v7452_v4 = vor.u32 %v9602_v23, %v7451_v49  ;;  %2359 = vmatpush.bf16.msrb.mxu1 %v7708_v46  ;;  %v7355_v23 = vld [vmem:[#allocation12 + $0xc0] sm:$0xf] }
 0x138   : > { %v1465_v33 = vadd.f32 %v1443_v31, %v1207_v32  ;;  %v9646_v31 = vld [vmem:[#allocation12 + $0x304] sm:$0xf]  ;;  %v9626_v27 = vld [vmem:[#allocation12 + $0x25c] sm:$0xf0] }
 0x139   : > { %v7645_v32 = vld [vmem:[#allocation12 + $0x320] sm:$0xf0]  ;;  %2345 = vmatpush.bf16.msrb.mxu0 %v7452_v4 }
 0x13a   : > { %v10950_v35 = vpack.c.bf16 %v1465_v33, %v1464_v30  ;;  %v10952_v38 = vpop.f32.mrf.mxu2  ;;  %v7456_v33 = vor.u32 %v9598_v24, %v7453_v25  ;;  %v9578_v24 = vld [vmem:[#allocation12 + $0xdc] sm:$0xf0]  ;;  %v9574_v25 = vld [vmem:[#allocation12 + $0xc4] sm:$0xf] }
 0x13b   : > { %v10954_v41 = vpop.f32.mrf.mxu3  ;;  %v1179_v42 = vpop.f32.mrf.mxu0  ;;  %v7356_v4 = vor.u32 %v9578_v24, %v7355_v23  ;;  %v7717_v23 = vld [vmem:[#allocation12 + $0x3a8] sm:$0xf0]  ;;  %v7515_v24 = vld [vmem:[#allocation12 + $0x200] sm:$0xf] }
 0x13c   : > { %v1180_v43 = vadd.f32 %v1179_v42, %v1151_v34  ;;  %v1208_v44 = vpop.f32.mrf.mxu1  ;;  %v7648_v34 = vor.u32 %v9646_v31, %v7645_v32  ;;  %v7675_v42 = vld [vmem:[#allocation12 + $0x340] sm:$0xf]  ;;  %2373 = vmatpush.bf16.msrb.mxu2 %v7456_v33  ;;  %v1496_v39 = vrot.slane %v10950_v35, 4  ;;  %v7357_v31 = vld [vmem:[#allocation12 + $0xe0] sm:$0xf0]  ;;  %v1164_v33 = vadd.f32 %v10937_v15, %v10941_v19 }
 0x13d   : > { %v9622_v32 = vld [vmem:[#allocation12 + $0x244] sm:$0xf]  ;;  %v7323_v15 = vld [vmem:[#allocation12 + $0x80] sm:$0xf] }
 0x13e   : > { %v10956_v45 = vadd.f32 %v1208_v44, %v1180_v43  ;;  %v9658_v43 = vld [vmem:[#allocation12 + $0x35c] sm:$0xf0]  ;;  %2389 = vmatpush.bf16.msrb.mxu3 %v7648_v34 }
 0x13f   : > { %v7676_v44 = vor.u32 %v9658_v43, %v7675_v42  ;;  %v7360_v42 = vor.u32 %v9574_v25, %v7357_v31  ;;  %v7549_v43 = vld [vmem:[#allocation12 + $0x260] sm:$0xf0] }
 0x140   : > { %v1469_v49 = vadd.f32 %v1447_v37, %v10956_v45  ;;  %v7579_v45 = vld [vmem:[#allocation12 + $0x280] sm:$0xf]  ;;  %v9614_v37 = vld [vmem:[#allocation12 + $0x204] sm:$0xf] }
 0x141   : > { %2360 = vmatpush.bf16.msrb.mxu1 %v7676_v44  ;;  %v9634_v44 = vld [vmem:[#allocation12 + $0x29c] sm:$0xf0] }
 0x142   : > { %v10958_v47 = vpop.f32.mrf.mxu2 }
 0x143   : > { %v10962_v52 = vpop.f32.mrf.mxu3  ;;  %v1182_v54 = vpop.f32.mrf.mxu0 }
 0x144   : > { %v1211_v51 = vpop.f32.mrf.mxu1  ;;  %v1183_v53 = vadd.f32 %v1182_v54, %v1154_v36  ;;  %v7419_v36 = vld [vmem:[#allocation12 + $0x140] sm:$0xf] }
 0x145   : > { %v9594_v54 = vld [vmem:[#allocation12 + $0x15c] sm:$0xf0] }
 0x146   : > { %v1212_v55 = vadd.f32 %v1211_v51, %v1183_v53  ;;  %v7420_v51 = vor.u32 %v9594_v54, %v7419_v36  ;;  %v9590_v53 = vld [vmem:[#allocation12 + $0x144] sm:$0xf] }
 0x148   : > { %1409 = vst [vmem:[#allocation2 + $0x88] sm:$0xff] %v1212_v55  ;;  %v7421_v55 = vld [vmem:[#allocation12 + $0x160] sm:$0xf0]  ;;  %2346 = vmatpush.bf16.msrb.mxu0 %v7420_v51 }
 0x149   : > { %v7424_v59 = vor.u32 %v9590_v53, %v7421_v55  ;;  %v7552_v55 = vor.u32 %v9622_v32, %v7549_v43  ;;  %v9675_v43 = vld [vmem:[#allocation12 + $0x3e4] sm:$0xf0] }
 0x14a   : > { %v10966_v61 = vpop.f32.mrf.mxu2 }
 0x14b   : > { %v10968_v62 = vpop.f32.mrf.mxu3  ;;  %v1184_v63 = vpop.f32.mrf.mxu0  ;;  %2374 = vmatpush.bf16.msrb.mxu2 %v7424_v59 }
 0x14c   : > { %v1185_v57 = vadd.f32 %v1184_v63, %v1156_v60  ;;  %v1213_v1 = vpop.f32.mrf.mxu1  ;;  %v9638_v60 = vld [vmem:[#allocation12 + $0x2c4] sm:$0xf]  ;;  %2347 = vmatpush.bf16.msrb.mxu0 %v7388_v10  ;;  %v10995_v10 = vperm.slane %v10893_v26, 2 }
 0x14d   : > { %v7613_v63 = vld [vmem:[#allocation12 + $0x2e0] sm:$0xf0] }
 0x14e   : > { %v1214_v2 = vadd.f32 %v1213_v1, %v1185_v57  ;;  %v7643_v57 = vld [vmem:[#allocation12 + $0x300] sm:$0xf]  ;;  %v1476_v1 = vunpack.c.l.bf16 %v10950_v35  ;;  %v7616_v3 = vor.u32 %v9638_v60, %v7613_v63 }
 0x14f   : > { %v7644_v7 = vor.u32 %v9650_v5, %v7643_v57  ;;  %v9570_v63 = vld [vmem:[#allocation12 + $0x9c] sm:$0xf0]  ;;  %v9566_v57 = vld [vmem:[#allocation12 + $0x84] sm:$0xf] }
 0x150   : > { %1413 = vst [vmem:[#allocation2 + $0xf0] sm:$0xff] %v1214_v2  ;;  %2390 = vmatpush.bf16.msrb.mxu3 %v7616_v3  ;;  %2348 = vmatpush.bf16.msrb.mxu0 %v7356_v4  ;;  %v9618_v4 = vld [vmem:[#allocation12 + $0x21c] sm:$0xf0] }
 0x151   : > { %2361 = vmatpush.bf16.msrb.mxu1 %v7644_v7  ;;  %v7749_v7 = vld [vmem:[#allocation12 + $0x3e8] sm:$0xf0] }
 0x152   : > { %v10972_v28 = vpop.f32.mrf.mxu2 }
 0x153   : > { %v10974_v16 = vpop.f32.mrf.mxu3  ;;  %v1187_v17 = vpop.f32.mrf.mxu0 }
 0x154   : > { %v1188_v48 = vadd.f32 %v1187_v17, %v1159_v12  ;;  %v1216_v21 = vpop.f32.mrf.mxu1  ;;  %v7389_v12 = vld [vmem:[#allocation12 + $0x120] sm:$0xf0]  ;;  %v7611_v17 = vld [vmem:[#allocation12 + $0x2c0] sm:$0xf]  ;;  %2391 = vmatpush.bf16.msrb.mxu3 %v7584_v14 }
 0x155   : > { %v7392_v13 = vor.u32 %v9582_v9, %v7389_v12  ;;  %v7612_v46 = vor.u32 %v9642_v18, %v7611_v17  ;;  %v9562_v14 = vld [vmem:[#allocation12 + $0x5c] sm:$0xf0]  ;;  %v9558_v18 = vld [vmem:[#allocation12 + $0x44] sm:$0xf] }
 0x156   : > { %v1217_v30 = vadd.f32 %v1216_v21, %v1188_v48  ;;  %v1478_v48 = vmul.f32 0.5, %v1476_v1  ;;  %v1500_v21 = vunpack.c.l.bf16 %v1496_v39  ;;  %v7324_v1 = vor.u32 %v9570_v63, %v7323_v15  ;;  %v7325_v39 = vld [vmem:[#allocation12 + $0xa0] sm:$0xf0]  ;;  %v9611_v15 = vld [vmem:[#allocation12 + $0x1e4] sm:$0xf0] }
 0x157   : > { %2375 = vmatpush.bf16.msrb.mxu2 %v7392_v13  ;;  %2362 = vmatpush.bf16.msrb.mxu1 %v7612_v46  ;;  %v7328_v5 = vor.u32 %v9566_v57, %v7325_v39  ;;  %v7291_v13 = vld [vmem:[#allocation12 + $0x40] sm:$0xf]  ;;  %v9607_v39 = vld [vmem:[#allocation12 + $0x1cc] sm:$0xf] }
 0x158   : > { %1417 = vst [vmem:[#allocation2 + $0x58] sm:$0xff] %v1217_v30  ;;  %v1468_v30 = vadd.f32 %v1446_v20, %v10908_v50  ;;  %v1480_v36 = vpack.c.bf16 %v1478_v48, %v1478_v48  ;;  %v1502_v54 = vmul.f32 0.5, %v1500_v21  ;;  %2392 = vmatpush.bf16.msrb.mxu3 %v7552_v55  ;;  %2349 = vmatpush.bf16.msrb.mxu0 %v7324_v1  ;;  %v7293_v20 = vld [vmem:[#allocation12 + $0x60] sm:$0xf0]  ;;  %v9663_v48 = vld [vmem:[#allocation12 + $0x38c] sm:$0xf] }
 0x159   : > { %v7292_v17 = vor.u32 %v9562_v14, %v7291_v13  ;;  %v1166_v21 = vadd.f32 %v10945_v22, %v10941_v19  ;;  %v1236_v55 = vadd.f32 %v10952_v38, %v10995_v10  ;;  %v7715_v38 = vld [vmem:[#allocation12 + $0x388] sm:$0xf]  ;;  %v7461_v14 = vld [vmem:[#allocation12 + $0x1a8] sm:$0xf0] }
 0x15a   : > { %v10978_v58 = vpop.f32.mrf.mxu2  ;;  %v10992_v59 = vpack.c.bf16 %v1469_v49, %v1468_v30  ;;  %v1482_v0 = vunpack.c.l.bf16 %v1480_v36  ;;  %v1504_v9 = vpack.c.bf16 %v1502_v54, %v1502_v54  ;;  %v7296_v49 = vor.u32 %v9558_v18, %v7293_v20  ;;  %v7259_v36 = vld [vmem:[#allocation12] sm:$0xf]  ;;  %v7653_v18 = vld [vmem:[#allocation12 + $0x328] sm:$0xf0] }
 0x15b   : > { %v10982_v40 = vpop.f32.mrf.mxu3  ;;  %v1189_v2 = vpop.f32.mrf.mxu0  ;;  %2376 = vmatpush.bf16.msrb.mxu2 %v7360_v42  ;;  %v7720_v30 = vor.u32 %v9663_v48, %v7717_v23  ;;  %v7747_v42 = vld [vmem:[#allocation12 + $0x3c8] sm:$0xf]  ;;  %v9554_v54 = vld [vmem:[#allocation12 + $0x1c] sm:$0xf0] }
 0x15c   : > { %v1190_v6 = vadd.f32 %v1189_v2, %v1161_v56  ;;  %v1218_v11 = vpop.f32.mrf.mxu1  ;;  %v7580_v56 = vor.u32 %v9634_v44, %v7579_v45  ;;  %v7517_v2 = vld [vmem:[#allocation12 + $0x220] sm:$0xf0]  ;;  %v1497_v29 = vrot.slane %v10992_v59, 4  ;;  %10205 = vtanh.f32 %v1482_v0  ;;  %2350 = vmatpush.bf16.msrb.mxu0 %v7292_v17  ;;  %v9647_v17 = vld [vmem:[#allocation12 + $0x30c] sm:$0xf] }
 0x15d   : > { %v1506_v25 = vunpack.c.l.bf16 %v1504_v9  ;;  %v7748_v44 = vor.u32 %v9675_v43, %v7747_v42 }
 0x15e   : > { %v1219_v35 = vadd.f32 %v1218_v11, %v1190_v6  ;;  %2363 = vmatpush.bf16.msrb.mxu1 %v7580_v56  ;;  %v7520_v6 = vor.u32 %v9614_v37, %v7517_v2  ;;  %v9671_v11 = vld [vmem:[#allocation12 + $0x3cc] sm:$0xf]  ;;  %v1501_v45 = vunpack.c.l.bf16 %v1497_v29  ;;  %v7260_v56 = vor.u32 %v9554_v54, %v7259_v36 }
 0x15f   : > { %v7752_v12 = vor.u32 %v9671_v11, %v7749_v7  ;;  %2377 = vmatpush.bf16.msrb.mxu2 %v7328_v5  ;;  %v7493_v37 = vld [vmem:[#allocation12 + $0x1e8] sm:$0xf0]  ;;  %10207 = vtanh.f32 %v1506_v25  ;;  %v9667_v11 = vld [vmem:[#allocation12 + $0x3a4] sm:$0xf0] }
 0x160   : > { %1421 = vst [vmem:[#allocation2 + $0x90] sm:$0xff] %v1219_v35  ;;  %v7548_v35 = vor.u32 %v9626_v27, %v7547_v8  ;;  %2393 = vmatpush.bf16.msrb.mxu3 %v7520_v6  ;;  %v9655_v2 = vld [vmem:[#allocation12 + $0x34c] sm:$0xf]  ;;  %2351 = vmatpush.bf16.msrb.mxu0 %v7260_v56  ;;  %v7496_v5 = vor.u32 %v9607_v39, %v7493_v37  ;;  %v1503_v7 = vmul.f32 0.5, %v1501_v45  ;;  %v9603_v27 = vld [vmem:[#allocation12 + $0x1a4] sm:$0xf0] }
 0x161   : > { %v7685_v6 = vld [vmem:[#allocation12 + $0x368] sm:$0xf0]  ;;  %v7716_v0 = vor.u32 %v9667_v11, %v7715_v38  ;;  %v9659_v25 = vld [vmem:[#allocation12 + $0x364] sm:$0xf0] }
 0x162   : > { %v10988_v34 = vpop.f32.mrf.mxu2  ;;  %2364 = vmatpush.bf16.msrb.mxu1 %v7548_v35  ;;  %v7688_v8 = vor.u32 %v9655_v2, %v7685_v6  ;;  %v10206_v9 = vpop.eup %10205  ;;  %v9599_v29 = vld [vmem:[#allocation12 + $0x18c] sm:$0xf]  ;;  %v1265_v35 = vadd.f32 %v10954_v41, %v1236_v55  ;;  %v1505_v43 = vpack.c.bf16 %v1503_v7, %v1503_v7  ;;  %v7427_v45 = vld [vmem:[#allocation12 + $0x148] sm:$0xf] }
 0x163   : > { %v10990_v51 = vpop.f32.mrf.mxu3  ;;  %v1192_v53 = vpop.f32.mrf.mxu0  ;;  %2378 = vmatpush.bf16.msrb.mxu2 %v7296_v49  ;;  %v11013_v49 = vperm.slane %v10893_v26, 3  ;;  %v7464_v23 = vor.u32 %v9599_v29, %v7461_v14  ;;  %v1486_v41 = vpack.c.bf16 %v10206_v9, %v10206_v9  ;;  %v1238_v26 = vadd.f32 %v10958_v47, %v10995_v10  ;;  %v7429_v36 = vld [vmem:[#allocation12 + $0x168] sm:$0xf0]  ;;  %v7395_v47 = vld [vmem:[#allocation12 + $0x108] sm:$0xf]  ;;  %v1444_v9 = vld [vmem:[#allocation3 + $0x28] sm:$0xff] }
 0x164   : > { %v1193_v50 = vadd.f32 %v1192_v53, %v1164_v33  ;;  %v1221_v60 = vpop.f32.mrf.mxu1  ;;  %2442 = vmatpush.bf16.msra.mxu3 %v7752_v12  ;;  %v7516_v33 = vor.u32 %v9618_v4, %v7515_v24  ;;  %v9550_v53 = vld [vmem:[#allocation12 + $0x4] sm:$0xf]  ;;  %v7459_v12 = vld [vmem:[#allocation12 + $0x188] sm:$0xf]  ;;  %v7656_v24 = vor.u32 %v9647_v17, %v7653_v18  ;;  %v9639_v54 = vld [vmem:[#allocation12 + $0x2cc] sm:$0xf]  ;;  %v1507_v37 = vunpack.c.l.bf16 %v1505_v43 }
 0x165   : > { %v7460_v13 = vor.u32 %v9603_v27, %v7459_v12  ;;  %v7683_v4 = vld [vmem:[#allocation12 + $0x348] sm:$0xf]  ;;  %v10208_v42 = vpop.eup %10207  ;;  %v7397_v11 = vld [vmem:[#allocation12 + $0x128] sm:$0xf0] }
 0x166   : > { %v1222_v3 = vadd.f32 %v1221_v60, %v1193_v50  ;;  %v7261_v50 = vld [vmem:[#allocation12 + $0x20] sm:$0xf0]  ;;  %v7491_v60 = vld [vmem:[#allocation12 + $0x1c8] sm:$0xf]  ;;  %2365 = vmatpush.bf16.msrb.mxu1 %v7516_v33  ;;  %v7684_v33 = vor.u32 %v9659_v25, %v7683_v4  ;;  %v9631_v7 = vld [vmem:[#allocation12 + $0x28c] sm:$0xf]  ;;  %10209 = vtanh.f32 %v1507_v37 }
 0x167   : > { %v7264_v57 = vor.u32 %v9550_v53, %v7261_v50  ;;  %v7492_v1 = vor.u32 %v9611_v15, %v7491_v60  ;;  %v7621_v50 = vld [vmem:[#allocation12 + $0x2e8] sm:$0xf0]  ;;  %v7651_v60 = vld [vmem:[#allocation12 + $0x308] sm:$0xf] }
 0x168   : > { %1425 = vst [vmem:[#allocation2 + $0xd0] sm:$0xff] %v1222_v3  ;;  %2443 = vmatpush.bf16.msra.mxu3 %v7720_v30  ;;  %v1477_v3 = vunpack.c.l.bf16 %v10992_v59  ;;  %v9651_v15 = vld [vmem:[#allocation12 + $0x324] sm:$0xf0]  ;;  %v9567_v37 = vld [vmem:[#allocation12 + $0x8c] sm:$0xf] }
 0x169   : > { %2379 = vmatpush.bf16.msrb.mxu2 %v7264_v57  ;;  %2400 = vmatpush.bf16.msra.mxu0 %v7492_v1  ;;  %v1510_v57 = vpack.c.bf16 %v10208_v42, %v10208_v42  ;;  %v7624_v1 = vor.u32 %v9639_v54, %v7621_v50  ;;  %v7652_v39 = vor.u32 %v9651_v15, %v7651_v60  ;;  %v9587_v2 = vld [vmem:[#allocation12 + $0x124] sm:$0xf0] }
 0x16a   : > { %v11000_v46 = vpop.f32.mrf.mxu2  ;;  %2414 = vmatpush.bf16.msra.mxu1 %v7748_v44  ;;  %v1479_v20 = vmul.f32 0.5, %v1477_v3  ;;  %v9583_v3 = vld [vmem:[#allocation12 + $0x10c] sm:$0xf]  ;;  %v7396_v38 = vor.u32 %v9587_v2, %v7395_v47  ;;  %v7619_v14 = vld [vmem:[#allocation12 + $0x2c8] sm:$0xf] }
 0x16b   : > { %v11002_v31 = vpop.f32.mrf.mxu3  ;;  %v1194_v32 = vpop.f32.mrf.mxu0  ;;  %v9643_v17 = vld [vmem:[#allocation12 + $0x2e4] sm:$0xf0] }
 0x16c   : > { %v1195_v19 = vadd.f32 %v1194_v32, %v1166_v21  ;;  %v1223_v22 = vpop.f32.mrf.mxu1  ;;  %2444 = vmatpush.bf16.msra.mxu3 %v7688_v8  ;;  %v1481_v53 = vpack.c.bf16 %v1479_v20, %v1479_v20  ;;  %v7589_v8 = vld [vmem:[#allocation12 + $0x2a8] sm:$0xf0]  ;;  %v1512_v20 = vunpack.c.l.bf16 %v1510_v57  ;;  %v7363_v4 = vld [vmem:[#allocation12 + $0xc8] sm:$0xf] }
 0x16d   : > { %2428 = vmatpush.bf16.msra.mxu2 %v7496_v5  ;;  %2401 = vmatpush.bf16.msra.mxu0 %v7460_v13  ;;  %v1267_v5 = vadd.f32 %v10962_v52, %v1238_v26  ;;  %v7592_v13 = vor.u32 %v9631_v7, %v7589_v8  ;;  %v9579_v25 = vld [vmem:[#allocation12 + $0xe4] sm:$0xf0]  ;;  %v7525_v7 = vld [vmem:[#allocation12 + $0x228] sm:$0xf0] }
 0x16e   : > { %v1224_v63 = vadd.f32 %v1223_v22, %v1195_v19  ;;  %2415 = vmatpush.bf16.msra.mxu1 %v7716_v0  ;;  %v9595_v19 = vld [vmem:[#allocation12 + $0x164] sm:$0xf0]  ;;  %v9591_v22 = vld [vmem:[#allocation12 + $0x14c] sm:$0xf]  ;;  %v1483_v0 = vunpack.c.l.bf16 %v1481_v53  ;;  %v7364_v43 = vor.u32 %v9579_v25, %v7363_v4  ;;  %v11025_v50 = vmul.f32 0.5, %v1512_v20 }
 0x16f   : > { %v7428_v44 = vor.u32 %v9595_v19, %v7427_v45  ;;  %v7432_v56 = vor.u32 %v9591_v22, %v7429_v36  ;;  %v7365_v45 = vld [vmem:[#allocation12 + $0xe8] sm:$0xf0]  ;;  %v1452_v22 = vld [vmem:[#allocation5] sm:$0xff]  ;;  %v7587_v54 = vld [vmem:[#allocation12 + $0x288] sm:$0xf] }
 0x170   : > { %1429 = vst [vmem:[#allocation2 + $0xf8] sm:$0xff] %v1224_v63  ;;  %2445 = vmatpush.bf16.msra.mxu3 %v7656_v24  ;;  %v1488_v63 = vunpack.c.l.bf16 %v1486_v41  ;;  %v9575_v41 = vld [vmem:[#allocation12 + $0xcc] sm:$0xf]  ;;  %10211 = vtanh.f32 %v1483_v0  ;;  %v10210_v0 = vpop.eup %10209  ;;  %v9627_v4 = vld [vmem:[#allocation12 + $0x264] sm:$0xf0] }
 0x171   : > { %2429 = vmatpush.bf16.msra.mxu2 %v7464_v23  ;;  %2402 = vmatpush.bf16.msra.mxu0 %v7428_v44  ;;  %v7620_v23 = vor.u32 %v9643_v17, %v7619_v14  ;;  %v9623_v19 = vld [vmem:[#allocation12 + $0x24c] sm:$0xf]  ;;  %v7368_v44 = vor.u32 %v9575_v41, %v7365_v45  ;;  %v7757_v14 = vld [vmem:[#allocation12 + $0x3f0] sm:$0xf0] }
 0x172   : > { %v11008_v59 = vpop.f32.mrf.mxu2  ;;  %2416 = vmatpush.bf16.msra.mxu1 %v7684_v33  ;;  %v1490_v18 = vmul.f32 0.5, %v1488_v63  ;;  %v7557_v36 = vld [vmem:[#allocation12 + $0x268] sm:$0xf0] }
 0x173   : > { %v11010_v48 = vpop.f32.mrf.mxu3  ;;  %v1293_v21 = vpop.f32.mrf.mxu0  ;;  %v1453_v53 = vld [vmem:[#allocation5 + $0x8] sm:$0xff] }
 0x174   : > { %v1294_v32 = vadd.f32 %v1293_v21, %v1265_v35  ;;  %v1322_v30 = vpop.f32.mrf.mxu1  ;;  %2446 = vmatpush.bf16.msra.mxu3 %v7624_v1  ;;  %v7400_v35 = vor.u32 %v9583_v3, %v7397_v11  ;;  %v1445_v21 = vld [vmem:[#allocation3 + $0x38] sm:$0xff]  ;;  %v1563_v60 = vpack.c.bf16 %v1453_v53, %v1453_v53  ;;  %v11031_v3 = vadd.f32 %v10972_v28, %v10995_v10  ;;  %v1449_v28 = vld [vmem:[#allocation3 + $0x20] sm:$0xff] }
 0x175   : > { %v1323_v55 = vadd.f32 %v1322_v30, %v11013_v49  ;;  %2430 = vmatpush.bf16.msra.mxu2 %v7432_v56  ;;  %2403 = vmatpush.bf16.msra.mxu0 %v7396_v38  ;;  %v1241_v30 = vadd.f32 %v10966_v61, %v10995_v10  ;;  %v11023_v56 = vadd.f32 0.5, %v1490_v18  ;;  %v7560_v61 = vor.u32 %v9623_v19, %v7557_v36  ;;  %v7331_v1 = vld [vmem:[#allocation12 + $0x88] sm:$0xf]  ;;  %v7333_v38 = vld [vmem:[#allocation12 + $0xa8] sm:$0xf0] }
 0x176   : > { %2417 = vmatpush.bf16.msra.mxu1 %v7652_v39  ;;  %v1466_v33 = vadd.f32 %v1444_v9, %v1294_v32  ;;  %v9635_v32 = vld [vmem:[#allocation12 + $0x2a4] sm:$0xf0]  ;;  %v9615_v11 = vld [vmem:[#allocation12 + $0x20c] sm:$0xf]  ;;  %v1573_v8 = vunpack.c.l.b16 %v1563_v60  ;;  %v10212_v25 = vpop.eup %10211  ;;  %v1511_v19 = vpack.c.bf16 %v10210_v0, %v10210_v0  ;;  %v9664_v36 = vld [vmem:[#allocation12 + $0x394] sm:$0xf] }
 0x177   : > { %v7588_v57 = vor.u32 %v9635_v32, %v7587_v54  ;;  %v9571_v39 = vld [vmem:[#allocation12 + $0xa4] sm:$0xf0]  ;;  %v1270_v2 = vadd.f32 %v10968_v62, %v1241_v30  ;;  %v9672_v62 = vld [vmem:[#allocation12 + $0x3d4] sm:$0xf]  ;;  %v7528_v20 = vor.u32 %v9615_v11, %v7525_v7  ;;  %v9559_v45 = vld [vmem:[#allocation12 + $0x4c] sm:$0xf]  ;;  %v1487_v60 = vpack.c.bf16 %v10212_v25, %v10212_v25 }
 0x178   : > { %2447 = vmatpush.bf16.msra.mxu3 %v7592_v13  ;;  %v7336_v13 = vor.u32 %v9567_v37, %v7333_v38  ;;  %v7523_v32 = vld [vmem:[#allocation12 + $0x208] sm:$0xf]  ;;  %v1516_v38 = vadd.f32 0.5, %v11025_v50  ;;  %v1513_v11 = vunpack.c.l.bf16 %v1511_v19  ;;  %v1272_v7 = vadd.f32 %v10974_v16, %v11031_v3  ;;  %v7269_v0 = vld [vmem:[#allocation12 + $0x28] sm:$0xf0] }
 0x179   : > { %2431 = vmatpush.bf16.msra.mxu2 %v7400_v35  ;;  %2404 = vmatpush.bf16.msra.mxu0 %v7364_v43  ;;  %v9563_v43 = vld [vmem:[#allocation12 + $0x64] sm:$0xf0]  ;;  %v7723_v50 = vld [vmem:[#allocation12 + $0x390] sm:$0xf] }
 0x17a   : > { %v1351_v6 = vpop.f32.mrf.mxu2  ;;  %2418 = vmatpush.bf16.msra.mxu1 %v7620_v23  ;;  %v7760_v23 = vor.u32 %v9672_v62, %v7757_v14  ;;  %v9668_v3 = vld [vmem:[#allocation12 + $0x3ac] sm:$0xf0] }
 0x17b   : > { %v1352_v12 = vadd.f32 %v1351_v6, %v1323_v55  ;;  %v1380_v27 = vpop.f32.mrf.mxu3  ;;  %v1295_v29 = vpop.f32.mrf.mxu0  ;;  %v1562_v55 = vpack.c.bf16 %v1452_v22, %v1452_v22  ;;  %v7332_v6 = vor.u32 %v9571_v39, %v7331_v1  ;;  %v7724_v25 = vor.u32 %v9668_v3, %v7723_v50  ;;  %v9624_v50 = vld [vmem:[#allocation12 + $0x254] sm:$0xf]  ;;  %v7595_v3 = vld [vmem:[#allocation12 + $0x290] sm:$0xf] }
 0x17c   : > { %v11019_v52 = vadd.f32 %v1295_v29, %v1267_v5  ;;  %v1324_v42 = vpop.f32.mrf.mxu1  ;;  %2448 = vmatpush.bf16.msra.mxu3 %v7560_v61  ;;  %v7725_v61 = vld [vmem:[#allocation12 + $0x3b0] sm:$0xf0] }
 0x17d   : > { %v1381_v24 = vadd.f32 %v1380_v27, %v1352_v12  ;;  %v1325_v63 = vadd.f32 %v1324_v42, %v11013_v49  ;;  %2432 = vmatpush.bf16.msra.mxu2 %v7368_v44  ;;  %v1572_v47 = vunpack.c.l.b16 %v1562_v55  ;;  %v1448_v27 = vld [vmem:[#allocation3 + $0x18] sm:$0xff]  ;;  %2405 = vmatpush.bf16.msra.mxu0 %v7332_v6 }
 0x17e   : > { %2419 = vmatpush.bf16.msra.mxu1 %v7588_v57  ;;  %v7299_v42 = vld [vmem:[#allocation12 + $0x48] sm:$0xf]  ;;  %v1470_v22 = vadd.f32 %v1448_v27, %v11019_v52  ;;  %v7301_v44 = vld [vmem:[#allocation12 + $0x68] sm:$0xf0]  ;;  %v9676_v57 = vld [vmem:[#allocation12 + $0x3ec] sm:$0xf0] }
 0x17f   : > { %v1467_v26 = vadd.f32 %v1445_v21, %v1381_v24  ;;  %v11033_v21 = vpack.c.b16 %v1573_v8, %v1572_v47  ;;  %v7555_v24 = vld [vmem:[#allocation12 + $0x248] sm:$0xf]  ;;  %v7304_v55 = vor.u32 %v9559_v45, %v7301_v44  ;;  %v9551_v6 = vld [vmem:[#allocation12 + $0xc] sm:$0xf]  ;;  %v7691_v45 = vld [vmem:[#allocation12 + $0x350] sm:$0xf] }
 0x180   : > { %2449 = vmatpush.bf16.msra.mxu3 %v7528_v20  ;;  %v9619_v52 = vld [vmem:[#allocation12 + $0x224] sm:$0xf0]  ;;  %v9660_v44 = vld [vmem:[#allocation12 + $0x36c] sm:$0xf0] }
 0x181   : > { %v1473_v15 = vpack.c.bf16 %v1467_v26, %v1466_v33  ;;  %2433 = vmatpush.bf16.msra.mxu2 %v7336_v13  ;;  %v7556_v33 = vor.u32 %v9627_v4, %v7555_v24  ;;  %v7300_v26 = vor.u32 %v9563_v43, %v7299_v42  ;;  %2366 = vmatmul.bf16.vlgmr.msrb.gmra.mxu1 %v11033_v21  ;;  %v1450_v4 = vld [vmem:[#allocation4] sm:$0xff] }
 0x182   : > { %v1353_v5 = vpop.f32.mrf.mxu2  ;;  %2394 = vmatmul.bf16.vlgmr.msrb.gmra.mxu3 %v11033_v21  ;;  %v7524_v37 = vor.u32 %v9619_v52, %v7523_v32  ;;  %v7272_v13 = vor.u32 %v9551_v6, %v7269_v0  ;;  %v9648_v42 = vld [vmem:[#allocation12 + $0x314] sm:$0xf]  ;;  %v1248_v6 = vadd.f32 %v10988_v34, %v10995_v10 }
 0x183   : > { %v1518_v9 = vunpack.c.l.bf16 %v1473_v15  ;;  %v1528_v12 = vrot.slane %v1473_v15, 4  ;;  %v1354_v29 = vadd.f32 %v1353_v5, %v1325_v63  ;;  %v1298_v35 = vpop.f32.mrf.mxu0  ;;  %v1382_v17 = vpop.f32.mrf.mxu3  ;;  %2420 = vmatpush.bf16.msra.mxu1 %v7556_v33  ;;  %2406 = vmatpush.bf16.msra.mxu0 %v7300_v26  ;;  %v7728_v15 = vor.u32 %v9664_v36, %v7725_v61  ;;  %v7755_v63 = vld [vmem:[#allocation12 + $0x3d0] sm:$0xf]  ;;  %v9555_v5 = vld [vmem:[#allocation12 + $0x24] sm:$0xf0] }
 0x184   : > { %v1299_v18 = vadd.f32 %v1298_v35, %v1270_v2  ;;  %2498 = vmatpush.bf16.msrb.mxu3 %v7760_v23  ;;  %v7756_v47 = vor.u32 %v9676_v57, %v7755_v63  ;;  %v7267_v2 = vld [vmem:[#allocation12 + $0x8] sm:$0xf]  ;;  %v1246_v23 = vadd.f32 %v10978_v58, %v10995_v10  ;;  %v7661_v43 = vld [vmem:[#allocation12 + $0x330] sm:$0xf0] }
 0x185   : > { %10213 = vtanh.f32 %v1518_v9  ;;  %v1532_v41 = vunpack.c.l.bf16 %v1528_v12  ;;  %v1383_v30 = vadd.f32 %v1382_v17, %v1354_v29  ;;  %2434 = vmatpush.bf16.msra.mxu2 %v7304_v55  ;;  %v7268_v8 = vor.u32 %v9555_v5, %v7267_v2  ;;  %v9656_v17 = vld [vmem:[#allocation12 + $0x354] sm:$0xf] }
 0x186   : > { %1410 = vst [vmem:[#allocation2 + $0xe8] sm:$0xff] %v1299_v18  ;;  %v1489_v18 = vunpack.c.l.bf16 %v1487_v60  ;;  %v7664_v26 = vor.u32 %v9648_v42, %v7661_v43  ;;  %v1275_v58 = vadd.f32 %v10982_v40, %v1246_v23  ;;  %v9636_v23 = vld [vmem:[#allocation12 + $0x2ac] sm:$0xf0]  ;;  %v9673_v42 = vld [vmem:[#allocation12 + $0x3dc] sm:$0xf] }
 0x187   : > { %v1534_v54 = vmul.f32 0.5, %v1532_v41  ;;  %v1471_v53 = vadd.f32 %v1449_v28, %v1383_v30  ;;  %2421 = vmatpush.bf16.msra.mxu1 %v7524_v37  ;;  %v7693_v28 = vld [vmem:[#allocation12 + $0x370] sm:$0xf0]  ;;  %2407 = vmatpush.bf16.msra.mxu0 %v7268_v8  ;;  %v1515_v41 = vmul.f32 0.5, %v1513_v11  ;;  %v9652_v37 = vld [vmem:[#allocation12 + $0x32c] sm:$0xf0] }
 0x188   : > { %2499 = vmatpush.bf16.msrb.mxu3 %v7728_v15  ;;  %v7696_v16 = vor.u32 %v9656_v17, %v7693_v28  ;;  %v1491_v36 = vmul.f32 0.5, %v1489_v18  ;;  %v7597_v8 = vld [vmem:[#allocation12 + $0x2b0] sm:$0xf0] }
 0x189   : > { %v1536_v1 = vpack.c.bf16 %v1534_v54, %v1534_v54  ;;  %v1475_v39 = vpack.c.bf16 %v1471_v53, %v1470_v22  ;;  %2435 = vmatpush.bf16.msra.mxu2 %v7272_v13  ;;  %v1550_v22 = vmul.f32 %v1516_v38, %v1450_v4  ;;  %v7692_v54 = vor.u32 %v9660_v44, %v7691_v45  ;;  %v9640_v53 = vld [vmem:[#allocation12 + $0x2d4] sm:$0xf] }
 0x18a   : > { %v1517_v52 = vadd.f32 0.5, %v1515_v41  ;;  %v1493_v5 = vadd.f32 0.5, %v1491_v36  ;;  %v1277_v13 = vadd.f32 %v10990_v51, %v1248_v6  ;;  %v1251_v51 = vadd.f32 %v11000_v46, %v10995_v10  ;;  %v9628_v36 = vld [vmem:[#allocation12 + $0x26c] sm:$0xf0]  ;;  %v9608_v6 = vld [vmem:[#allocation12 + $0x1d4] sm:$0xf] }
 0x18b   : > { %v10214_v9 = vpop.eup %10213  ;;  %v1538_v12 = vunpack.c.l.bf16 %v1536_v1  ;;  %v1519_v27 = vunpack.c.l.bf16 %v1475_v39  ;;  %v1529_v29 = vrot.slane %v1475_v39, 4  ;;  %v1300_v35 = vpop.f32.mrf.mxu0  ;;  %2470 = vmatpush.bf16.msrb.mxu1 %v7756_v47  ;;  %v7659_v39 = vld [vmem:[#allocation12 + $0x310] sm:$0xf]  ;;  %v1451_v47 = vld [vmem:[#allocation4 + $0x8] sm:$0xff] }
 0x18c   : > { %v1522_v62 = vpack.c.bf16 %v10214_v9, %v10214_v9  ;;  %v1301_v14 = vadd.f32 %v1300_v35, %v1272_v7  ;;  %2500 = vmatpush.bf16.msrb.mxu3 %v7696_v16  ;;  %v7660_v2 = vor.u32 %v9652_v37, %v7659_v39  ;;  %v9632_v7 = vld [vmem:[#allocation12 + $0x294] sm:$0xf]  ;;  %v1551_v9 = vmul.f32 %v1517_v52, %v1451_v47  ;;  %v9612_v39 = vld [vmem:[#allocation12 + $0x1ec] sm:$0xf0] }
 0x18d   : > { %10215 = vtanh.f32 %v1519_v27  ;;  %v1533_v20 = vunpack.c.l.bf16 %v1529_v29  ;;  %v7627_v27 = vld [vmem:[#allocation12 + $0x2d0] sm:$0xf]  ;;  %v7565_v16 = vld [vmem:[#allocation12 + $0x270] sm:$0xf0] }
 0x18e   : > { %v1524_v24 = vunpack.c.l.bf16 %v1522_v62  ;;  %1414 = vst [vmem:[#allocation2 + $0x8] sm:$0xff] %v1301_v14  ;;  %10217 = vtanh.f32 %v1538_v12  ;;  %v7600_v12 = vor.u32 %v9632_v7, %v7597_v8  ;;  %v9644_v29 = vld [vmem:[#allocation12 + $0x2ec] sm:$0xf0]  ;;  %v7568_v4 = vor.u32 %v9624_v50, %v7565_v16 }
 0x18f   : > { %v1535_v30 = vmul.f32 0.5, %v1533_v20  ;;  %2471 = vmatpush.bf16.msrb.mxu1 %v7724_v25  ;;  %v7628_v34 = vor.u32 %v9644_v29, %v7627_v27  ;;  %v7596_v25 = vor.u32 %v9636_v23, %v7595_v3  ;;  %v7701_v29 = vld [vmem:[#allocation12 + $0x378] sm:$0xf0]  ;;  %v7435_v16 = vld [vmem:[#allocation12 + $0x150] sm:$0xf] }
 0x190   : > { %v1552_v33 = vmul.f32 %v1524_v24, %v11023_v56  ;;  %v7629_v56 = vld [vmem:[#allocation12 + $0x2f0] sm:$0xf0]  ;;  %2501 = vmatpush.bf16.msrb.mxu3 %v7664_v26  ;;  %v7563_v26 = vld [vmem:[#allocation12 + $0x250] sm:$0xf]  ;;  %v9649_v3 = vld [vmem:[#allocation12 + $0x31c] sm:$0xf] }
 0x191   : > { %v1537_v19 = vpack.c.bf16 %v1535_v30, %v1535_v30  ;;  %v7632_v1 = vor.u32 %v9640_v53, %v7629_v56  ;;  %2422 = vmatmul.bf16.vlgmr.msra.gmra.mxu1 %v11033_v21  ;;  %v9616_v30 = vld [vmem:[#allocation12 + $0x214] sm:$0xf]  ;;  %v7669_v23 = vld [vmem:[#allocation12 + $0x338] sm:$0xf0] }
 0x192   : > { %v11045_v60 = vadd.f32 %v1552_v33, %v1550_v22  ;;  %2450 = vmatmul.bf16.vlgmr.msra.gmra.mxu3 %v11033_v21  ;;  %v7533_v33 = vld [vmem:[#allocation12 + $0x230] sm:$0xf0]  ;;  %v7765_v22 = vld [vmem:[#allocation12 + $0x3f8] sm:$0xf0] }
 0x193   : > { %v10216_v55 = vpop.eup %10215  ;;  %v1539_v61 = vunpack.c.l.bf16 %v1537_v19  ;;  %v1303_v32 = vpop.f32.mrf.mxu0  ;;  %2472 = vmatpush.bf16.msrb.mxu1 %v7692_v54  ;;  %v7536_v19 = vor.u32 %v9616_v30, %v7533_v33  ;;  %v7768_v44 = vor.u32 %v9673_v42, %v7765_v22  ;;  %v1280_v54 = vadd.f32 %v11002_v31, %v1251_v51  ;;  %v9661_v51 = vld [vmem:[#allocation12 + $0x374] sm:$0xf0]  ;;  %v7437_v30 = vld [vmem:[#allocation12 + $0x170] sm:$0xf0] }
 0x194   : > { %v10218_v15 = vpop.eup %10217  ;;  %v1523_v63 = vpack.c.bf16 %v10216_v55, %v10216_v55  ;;  %v1304_v57 = vadd.f32 %v1303_v32, %v1275_v58  ;;  %2502 = vmatpush.bf16.msrb.mxu3 %v7632_v1  ;;  %v7564_v55 = vor.u32 %v9628_v36, %v7563_v26  ;;  %v7733_v32 = vld [vmem:[#allocation12 + $0x3b8] sm:$0xf0]  ;;  %v9620_v1 = vld [vmem:[#allocation12 + $0x22c] sm:$0xf0]  ;;  %v1253_v31 = vadd.f32 %v11008_v59, %v10995_v10  ;;  %v9653_v36 = vld [vmem:[#allocation12 + $0x334] sm:$0xf0] }
 0x195   : > { %10219 = vtanh.f32 %v1539_v61  ;;  %v1542_v40 = vpack.c.bf16 %v10218_v15, %v10218_v15  ;;  %v9665_v61 = vld [vmem:[#allocation12 + $0x39c] sm:$0xf]  ;;  %v7672_v33 = vor.u32 %v9649_v3, %v7669_v23  ;;  %v7403_v26 = vld [vmem:[#allocation12 + $0x110] sm:$0xf] }
 0x196   : > { %v1525_v38 = vunpack.c.l.bf16 %v1523_v63  ;;  %1418 = vst [vmem:[#allocation2 + $0x40] sm:$0xff] %v1304_v57  ;;  %10221 = vtanh.f32 %v11045_v60  ;;  %v7499_v63 = vld [vmem:[#allocation12 + $0x1d0] sm:$0xf]  ;;  %v7736_v37 = vor.u32 %v9665_v61, %v7733_v32  ;;  %v1282_v10 = vadd.f32 %v11010_v48, %v1253_v31  ;;  %v9633_v61 = vld [vmem:[#allocation12 + $0x29c] sm:$0xf] }
 0x197   : > { %v1544_v11 = vunpack.c.l.bf16 %v1542_v40  ;;  %2473 = vmatpush.bf16.msrb.mxu1 %v7660_v2  ;;  %v7531_v57 = vld [vmem:[#allocation12 + $0x210] sm:$0xf]  ;;  %v7763_v40 = vld [vmem:[#allocation12 + $0x3d8] sm:$0xf]  ;;  %v7605_v32 = vld [vmem:[#allocation12 + $0x2b8] sm:$0xf0] }
 0x198   : > { %v1553_v0 = vmul.f32 %v1525_v38, %v1493_v5  ;;  %2503 = vmatpush.bf16.msrb.mxu3 %v7600_v12  ;;  %v7532_v47 = vor.u32 %v9620_v1, %v7531_v57  ;;  %v9677_v2 = vld [vmem:[#allocation12 + $0x3f4] sm:$0xf0]  ;;  %v7501_v38 = vld [vmem:[#allocation12 + $0x1f0] sm:$0xf0]  ;;  %v7500_v12 = vor.u32 %v9612_v39, %v7499_v63  ;;  %v9580_v1 = vld [vmem:[#allocation12 + $0xec] sm:$0xf0] }
 0x199   : > { %v1546_v35 = vmul.f32 0.5, %v1544_v11  ;;  %v7764_v11 = vor.u32 %v9677_v2, %v7763_v40  ;;  %v7504_v27 = vor.u32 %v9608_v6, %v7501_v38  ;;  %v7635_v63 = vld [vmem:[#allocation12 + $0x2d8] sm:$0xf]  ;;  %v9576_v39 = vld [vmem:[#allocation12 + $0xd4] sm:$0xf] }
 0x19a   : > { %v11053_v62 = vadd.f32 %v1553_v0, %v1551_v9  ;;  %v7467_v0 = vld [vmem:[#allocation12 + $0x190] sm:$0xf]  ;;  %v9657_v9 = vld [vmem:[#allocation12 + $0x35c] sm:$0xf]  ;;  %v9645_v57 = vld [vmem:[#allocation12 + $0x2f4] sm:$0xf0] }
 0x19b   : > { %v10220_v14 = vpop.eup %10219  ;;  %v1305_v17 = vpop.f32.mrf.mxu0  ;;  %v1548_v28 = vadd.f32 0.5, %v1546_v35  ;;  %2474 = vmatpush.bf16.msrb.mxu1 %v7628_v34  ;;  %v7731_v35 = vld [vmem:[#allocation12 + $0x398] sm:$0xf]  ;;  %v7636_v40 = vor.u32 %v9645_v57, %v7635_v63  ;;  %v9625_v2 = vld [vmem:[#allocation12 + $0x25c] sm:$0xf] }
 0x19c   : > { %v1306_v18 = vadd.f32 %v1305_v17, %v1277_v13  ;;  %v1543_v20 = vpack.c.bf16 %v10220_v14, %v10220_v14  ;;  %10223 = vtanh.f32 %v11053_v62  ;;  %v10222_v24 = vpop.eup %10221  ;;  %2504 = vmatpush.bf16.msrb.mxu3 %v7568_v4  ;;  %v9669_v34 = vld [vmem:[#allocation12 + $0x3b4] sm:$0xf0]  ;;  %v9604_v13 = vld [vmem:[#allocation12 + $0x1ac] sm:$0xf0]  ;;  %v9600_v14 = vld [vmem:[#allocation12 + $0x194] sm:$0xf] }
 0x19d   : > { %v1558_v45 = vmul.f32 %v10222_v24, %v1548_v28  ;;  %v7469_v17 = vld [vmem:[#allocation12 + $0x1b0] sm:$0xf0]  ;;  %v7704_v28 = vor.u32 %v9657_v9, %v7701_v29  ;;  %v7732_v50 = vor.u32 %v9669_v34, %v7731_v35  ;;  %v7468_v48 = vor.u32 %v9604_v13, %v7467_v0  ;;  %v9596_v4 = vld [vmem:[#allocation12 + $0x16c] sm:$0xf0]  ;;  %v7573_v31 = vld [vmem:[#allocation12 + $0x278] sm:$0xf0] }
 0x19e   : > { %1422 = vst [vmem:[#allocation2 + $0x70] sm:$0xff] %v1306_v18  ;;  %v1545_v41 = vunpack.c.l.bf16 %v1543_v20  ;;  %v7472_v24 = vor.u32 %v9600_v14, %v7469_v17  ;;  %v7339_v38 = vld [vmem:[#allocation12 + $0x90] sm:$0xf]  ;;  %v9568_v0 = vld [vmem:[#allocation12 + $0x94] sm:$0xf] }
 0x19f   : > { %2475 = vmatpush.bf16.msrb.mxu1 %v7596_v25  ;;  %v1560_v52 = vpack.c.bf16 %v1558_v45, %v1558_v45  ;;  %v7699_v25 = vld [vmem:[#allocation12 + $0x358] sm:$0xf]  ;;  %v7637_v45 = vld [vmem:[#allocation12 + $0x2f8] sm:$0xf0]  ;;  %v7341_v9 = vld [vmem:[#allocation12 + $0xb0] sm:$0xf0] }
 0x1a0   : > { %v1547_v43 = vmul.f32 0.5, %v1545_v41  ;;  %2505 = vmatpush.bf16.msrb.mxu3 %v7536_v19  ;;  %v9592_v41 = vld [vmem:[#allocation12 + $0x154] sm:$0xf]  ;;  %v7700_v42 = vor.u32 %v9661_v51, %v7699_v25  ;;  %v7436_v19 = vor.u32 %v9596_v4, %v7435_v16  ;;  %v9617_v29 = vld [vmem:[#allocation12 + $0x21c] sm:$0xf] }
 0x1a1   : > { %v1566_v7 = vunpack.c.l.b16 %v1560_v52  ;;  %v7440_v22 = vor.u32 %v9592_v41, %v7437_v30  ;;  %v7371_v52 = vld [vmem:[#allocation12 + $0xd0] sm:$0xf]  ;;  %v7541_v35 = vld [vmem:[#allocation12 + $0x238] sm:$0xf0]  ;;  %v7571_v14 = vld [vmem:[#allocation12 + $0x258] sm:$0xf] }
 0x1a2   : > { %v10224_v58 = vpop.eup %10223  ;;  %v1549_v53 = vadd.f32 0.5, %v1547_v43  ;;  %v9641_v43 = vld [vmem:[#allocation12 + $0x2dc] sm:$0xf]  ;;  %v7307_v13 = vld [vmem:[#allocation12 + $0x50] sm:$0xf] }
 0x1a3   : > { %v1308_v46 = vpop.f32.mrf.mxu0  ;;  %2476 = vmatpush.bf16.msrb.mxu1 %v7564_v55  ;;  %2506 = vmatmul.bf16.vlgmr.msrb.gmra.mxu3 %v11033_v21  ;;  %v7640_v55 = vor.u32 %v9641_v43, %v7637_v45  ;;  %v9629_v17 = vld [vmem:[#allocation12 + $0x274] sm:$0xf0]  ;;  %v7275_v3 = vld [vmem:[#allocation12 + $0x10] sm:$0xf]  ;;  %v9552_v51 = vld [vmem:[#allocation12 + $0x14] sm:$0xf] }
 0x1a4   : > { %v1309_v56 = vadd.f32 %v1308_v46, %v1280_v54  ;;  %v1559_v15 = vmul.f32 %v10224_v58, %v1549_v53  ;;  %2554 = vmatpush.bf16.msra.mxu3 %v7768_v44  ;;  %v7667_v44 = vld [vmem:[#allocation12 + $0x318] sm:$0xf]  ;;  %v9588_v58 = vld [vmem:[#allocation12 + $0x12c] sm:$0xf0]  ;;  %v9584_v54 = vld [vmem:[#allocation12 + $0x114] sm:$0xf]  ;;  %v7572_v16 = vor.u32 %v9629_v17, %v7571_v14 }
 0x1a5   : > { %v7405_v53 = vld [vmem:[#allocation12 + $0x130] sm:$0xf0]  ;;  %v7668_v46 = vor.u32 %v9653_v36, %v7667_v44  ;;  %v7539_v4 = vld [vmem:[#allocation12 + $0x218] sm:$0xf]  ;;  %v9609_v43 = vld [vmem:[#allocation12 + $0x1dc] sm:$0xf] }
 0x1a6   : > { %1426 = vst [vmem:[#allocation2 + $0x10] sm:$0xff] %v1309_v56  ;;  %v1561_v5 = vpack.c.bf16 %v1559_v15, %v1559_v15  ;;  %v7404_v56 = vor.u32 %v9588_v58, %v7403_v26  ;;  %v7408_v15 = vor.u32 %v9584_v54, %v7405_v53  ;;  %v9621_v25 = vld [vmem:[#allocation12 + $0x234] sm:$0xf0]  ;;  %v7277_v41 = vld [vmem:[#allocation12 + $0x30] sm:$0xf0] }
 0x1a7   : > { %2477 = vmatpush.bf16.msrb.mxu1 %v7532_v47  ;;  %v7608_v47 = vor.u32 %v9633_v61, %v7605_v32  ;;  %v7507_v30 = vld [vmem:[#allocation12 + $0x1d8] sm:$0xf]  ;;  %v7509_v45 = vld [vmem:[#allocation12 + $0x1f8] sm:$0xf0] }
 0x1a8   : > { %v1567_v8 = vunpack.c.l.b16 %v1561_v5  ;;  %2555 = vmatpush.bf16.msra.mxu3 %v7736_v37  ;;  %v7373_v37 = vld [vmem:[#allocation12 + $0xf0] sm:$0xf0]  ;;  %v7372_v5 = vor.u32 %v9580_v1, %v7371_v52  ;;  %v7512_v44 = vor.u32 %v9609_v43, %v7509_v45  ;;  %v7475_v36 = vld [vmem:[#allocation12 + $0x198] sm:$0xf]  ;;  %v9601_v54 = vld [vmem:[#allocation12 + $0x19c] sm:$0xf]  ;;  %v1385_v52 = vpop.f32.mrf.mxu3 }
 0x1a9   : > { %v7376_v6 = vor.u32 %v9576_v39, %v7373_v37  ;;  %v9605_v58 = vld [vmem:[#allocation12 + $0x1b4] sm:$0xf0]  ;;  %v7477_v53 = vld [vmem:[#allocation12 + $0x1b8] sm:$0xf0] }
 0x1aa   : > { %v11063_v59 = vpack.c.b16 %v1567_v8, %v1566_v7  ;;  %2478 = vmatmul.bf16.vlgmr.msrb.gmra.mxu1 %v11033_v21  ;;  %v9637_v7 = vld [vmem:[#allocation12 + $0x2b4] sm:$0xf0]  ;;  %v9572_v8 = vld [vmem:[#allocation12 + $0xac] sm:$0xf0]  ;;  %v7476_v61 = vor.u32 %v9605_v58, %v7475_v36  ;;  %v7480_v32 = vor.u32 %v9601_v54, %v7477_v53  ;;  %v9593_v57 = vld [vmem:[#allocation12 + $0x15c] sm:$0xf] }
 0x1ab   : > { %2526 = vmatpush.bf16.msra.mxu1 %v7764_v11  ;;  %v1310_v18 = vpop.f32.mrf.mxu0  ;;  %v7603_v11 = vld [vmem:[#allocation12 + $0x298] sm:$0xf]  ;;  %v7340_v34 = vor.u32 %v9572_v8, %v7339_v38  ;;  %v7445_v1 = vld [vmem:[#allocation12 + $0x178] sm:$0xf0] }
 0x1ac   : > { %v1311_v20 = vadd.f32 %v1310_v18, %v1282_v10  ;;  %2352 = vmatmul.bf16.vlgmr.msrb.gmra.mxu0 %v11063_v59  ;;  %2380 = vmatmul.bf16.vlgmr.msrb.gmra.mxu2 %v11063_v59  ;;  %v7344_v10 = vor.u32 %v9568_v0, %v7341_v9  ;;  %v7309_v18 = vld [vmem:[#allocation12 + $0x70] sm:$0xf0]  ;;  %v9597_v63 = vld [vmem:[#allocation12 + $0x174] sm:$0xf0] }
 0x1ad   : > { %2456 = vmatpush.bf16.msrb.mxu0 %v7500_v12  ;;  %2484 = vmatpush.bf16.msrb.mxu2 %v7504_v27  ;;  %v7576_v12 = vor.u32 %v9625_v2, %v7573_v31  ;;  %v7604_v27 = vor.u32 %v9637_v7, %v7603_v11  ;;  %v9589_v31 = vld [vmem:[#allocation12 + $0x134] sm:$0xf0] }
 0x1ae   : > { %1430 = vst [vmem:[#allocation2 + $0x20] sm:$0xff] %v1311_v20  ;;  %2556 = vmatpush.bf16.msra.mxu3 %v7704_v28  ;;  %v9564_v28 = vld [vmem:[#allocation12 + $0x6c] sm:$0xf0]  ;;  %v7544_v20 = vor.u32 %v9617_v29, %v7541_v35  ;;  %v7379_v8 = vld [vmem:[#allocation12 + $0xd8] sm:$0xf] }
 0x1af   : > { %2527 = vmatpush.bf16.msra.mxu1 %v7732_v50  ;;  %v9560_v50 = vld [vmem:[#allocation12 + $0x54] sm:$0xf]  ;;  %v7308_v23 = vor.u32 %v9564_v28, %v7307_v13  ;;  %v7381_v29 = vld [vmem:[#allocation12 + $0xf8] sm:$0xf0]  ;;  %v7347_v13 = vld [vmem:[#allocation12 + $0x98] sm:$0xf] }
 0x1b0   : > { %v1387_v9 = vpop.f32.mrf.mxu3  ;;  %v9573_v17 = vld [vmem:[#allocation12 + $0xb4] sm:$0xf0]  ;;  %v9569_v28 = vld [vmem:[#allocation12 + $0x9c] sm:$0xf] }
 0x1b1   : > { %2457 = vmatpush.bf16.msrb.mxu0 %v7468_v48  ;;  %2485 = vmatpush.bf16.msrb.mxu2 %v7472_v24  ;;  %v7312_v48 = vor.u32 %v9560_v50, %v7309_v18  ;;  %v9556_v24 = vld [vmem:[#allocation12 + $0x2c] sm:$0xf0]  ;;  %v7349_v50 = vld [vmem:[#allocation12 + $0xb8] sm:$0xf0]  ;;  %v9557_v45 = vld [vmem:[#allocation12 + $0x34] sm:$0xf0] }
 0x1b2   : > { %2557 = vmatpush.bf16.msra.mxu3 %v7672_v33  ;;  %v7540_v33 = vor.u32 %v9621_v25, %v7539_v4  ;;  %v9565_v4 = vld [vmem:[#allocation12 + $0x74] sm:$0xf0]  ;;  %v9561_v25 = vld [vmem:[#allocation12 + $0x5c] sm:$0xf] }
 0x1b3   : > { %2528 = vmatpush.bf16.msra.mxu1 %v7700_v42  ;;  %v9613_v42 = vld [vmem:[#allocation12 + $0x1f4] sm:$0xf0] }
 0x1b4   : > { %v7508_v26 = vor.u32 %v9613_v42, %v7507_v30  ;;  %v7283_v42 = vld [vmem:[#allocation12 + $0x18] sm:$0xf] }
 0x1b5   : > { %2458 = vmatpush.bf16.msrb.mxu0 %v7436_v19  ;;  %2486 = vmatpush.bf16.msrb.mxu2 %v7440_v22  ;;  %v7276_v19 = vor.u32 %v9556_v24, %v7275_v3  ;;  %v7280_v22 = vor.u32 %v9552_v51, %v7277_v41  ;;  %v7352_v3 = vor.u32 %v9569_v28, %v7349_v50  ;;  %v7317_v51 = vld [vmem:[#allocation12 + $0x78] sm:$0xf0] }
 0x1b6   : > { %2558 = vmatpush.bf16.msra.mxu3 %v7640_v55  ;;  %v1327_v55 = vpop.f32.mrf.mxu1  ;;  %v7284_v36 = vor.u32 %v9557_v45, %v7283_v42 }
 0x1b7   : > { %2529 = vmatpush.bf16.msra.mxu1 %v7668_v46  ;;  %v1356_v46 = vpop.f32.mrf.mxu2 }
 0x1b8   : > { %v1390_v24 = vpop.f32.mrf.mxu3 }
 0x1b9   : > { %2459 = vmatpush.bf16.msrb.mxu0 %v7404_v56  ;;  %2487 = vmatpush.bf16.msrb.mxu2 %v7408_v15  ;;  %v7443_v56 = vld [vmem:[#allocation12 + $0x158] sm:$0xf]  ;;  %v1328_v15 = vadd.f32 %v1327_v55, %v11013_v49 }
 0x1ba   : > { %2559 = vmatpush.bf16.msra.mxu3 %v7608_v47  ;;  %v7444_v37 = vor.u32 %v9597_v63, %v7443_v56  ;;  %v7448_v47 = vor.u32 %v9593_v57, %v7445_v1 }
 0x1bb   : > { %2530 = vmatpush.bf16.msra.mxu1 %v7636_v40  ;;  %v1357_v39 = vadd.f32 %v1356_v46, %v1328_v15  ;;  %v7411_v40 = vld [vmem:[#allocation12 + $0x118] sm:$0xf] }
 0x1bc   : > { %2408 = vmatmul.bf16.vlgmr.msra.gmra.mxu0 %v11063_v59  ;;  %2436 = vmatmul.bf16.vlgmr.msra.gmra.mxu2 %v11063_v59 }
 0x1bd   : > { %2460 = vmatpush.bf16.msrb.mxu0 %v7372_v5  ;;  %2488 = vmatpush.bf16.msrb.mxu2 %v7376_v6  ;;  %v1386_v2 = vadd.f32 %v1385_v52, %v1357_v39  ;;  %v9585_v5 = vld [vmem:[#allocation12 + $0x11c] sm:$0xf] }
 0x1be   : > { %2560 = vmatpush.bf16.msra.mxu3 %v7576_v12  ;;  %v7413_v6 = vld [vmem:[#allocation12 + $0x138] sm:$0xf0]  ;;  %v1329_v38 = vpop.f32.mrf.mxu1  ;;  %v9581_v12 = vld [vmem:[#allocation12 + $0xf4] sm:$0xf0] }
 0x1bf   : > { %2531 = vmatpush.bf16.msra.mxu1 %v7604_v27  ;;  %1411 = vst [vmem:[#allocation2 + $0xb8] sm:$0xff] %v1386_v2  ;;  %v1358_v11 = vpop.f32.mrf.mxu2  ;;  %v7416_v7 = vor.u32 %v9585_v5, %v7413_v6  ;;  %v1330_v0 = vadd.f32 %v1329_v38, %v11013_v49  ;;  %v9577_v27 = vld [vmem:[#allocation12 + $0xdc] sm:$0xf] }
 0x1c0   : > { %v1392_v53 = vpop.f32.mrf.mxu3 }
 0x1c1   : > { %2461 = vmatpush.bf16.msrb.mxu0 %v7340_v34  ;;  %2489 = vmatpush.bf16.msrb.mxu2 %v7344_v10  ;;  %v1359_v35 = vadd.f32 %v1358_v11, %v1330_v0  ;;  %v7380_v34 = vor.u32 %v9581_v12, %v7379_v8  ;;  %v7384_v10 = vor.u32 %v9577_v27, %v7381_v29 }
 0x1c2   : > { %2561 = vmatpush.bf16.msra.mxu3 %v7544_v20 }
 0x1c3   : > { %2532 = vmatpush.bf16.msra.mxu1 %v7572_v16  ;;  %v1388_v14 = vadd.f32 %v1387_v9, %v1359_v35  ;;  %v7348_v16 = vor.u32 %v9573_v17, %v7347_v13 }
 0x1c5   : > { %2462 = vmatpush.bf16.msrb.mxu0 %v7308_v23  ;;  %2490 = vmatpush.bf16.msrb.mxu2 %v7312_v48  ;;  %1415 = vst [vmem:[#allocation2 + $0x78] sm:$0xff] %v1388_v14  ;;  %v7315_v23 = vld [vmem:[#allocation12 + $0x58] sm:$0xf] }
 0x1c6   : > { %2562 = vmatmul.bf16.vlgmr.msra.gmra.mxu3 %v11033_v21  ;;  %v1332_v18 = vpop.f32.mrf.mxu1  ;;  %v7316_v30 = vor.u32 %v9565_v4, %v7315_v23 }
 0x1c7   : > { %2533 = vmatpush.bf16.msra.mxu1 %v7540_v33  ;;  %v1361_v20 = vpop.f32.mrf.mxu2  ;;  %v1333_v48 = vadd.f32 %v1332_v18, %v11013_v49  ;;  %v7320_v33 = vor.u32 %v9561_v25, %v7317_v51 }
 0x1c8   : > { %v1395_v15 = vpop.f32.mrf.mxu3 }
 0x1c9   : > { %2463 = vmatpush.bf16.msrb.mxu0 %v7276_v19  ;;  %2491 = vmatpush.bf16.msrb.mxu2 %v7280_v22  ;;  %v1362_v41 = vadd.f32 %v1361_v20, %v1333_v48  ;;  %v9553_v19 = vld [vmem:[#allocation12 + $0x1c] sm:$0xf] }
 0x1ca   : > { %2534 = vmatmul.bf16.vlgmr.msra.gmra.mxu1 %v11033_v21  ;;  %v7412_v21 = vor.u32 %v9589_v31, %v7411_v40  ;;  %v7285_v22 = vld [vmem:[#allocation12 + $0x38] sm:$0xf0] }
 0x1cb   : > { %v1391_v43 = vadd.f32 %v1390_v24, %v1362_v41  ;;  %v7288_v58 = vor.u32 %v9553_v19, %v7285_v22 }
 0x1cc   : > { %2464 = vmatmul.bf16.vlgmr.msrb.gmra.mxu0 %v11063_v59  ;;  %2492 = vmatmul.bf16.vlgmr.msrb.gmra.mxu2 %v11063_v59 }
 0x1cd   : > { %2512 = vmatpush.bf16.msra.mxu0 %v7508_v26  ;;  %2540 = vmatpush.bf16.msra.mxu2 %v7512_v44  ;;  %1419 = vst [vmem:[#allocation2 + $0xc8] sm:$0xff] %v1391_v43 }
 0x1ce   : > { %v1334_v26 = vpop.f32.mrf.mxu1 }
 0x1cf   : > { %v1363_v44 = vpop.f32.mrf.mxu2  ;;  %v1335_v54 = vadd.f32 %v1334_v26, %v11013_v49 }
 0x1d1   : > { %2513 = vmatpush.bf16.msra.mxu0 %v7476_v61  ;;  %2541 = vmatpush.bf16.msra.mxu2 %v7480_v32  ;;  %v1364_v55 = vadd.f32 %v1363_v44, %v1335_v54 }
 0x1d3   : > { %v1393_v46 = vadd.f32 %v1392_v53, %v1364_v55 }
 0x1d5   : > { %2514 = vmatpush.bf16.msra.mxu0 %v7444_v37  ;;  %2542 = vmatpush.bf16.msra.mxu2 %v7448_v47  ;;  %1423 = vst [vmem:[#allocation2 + $0xc0] sm:$0xff] %v1393_v46  ;;  %v1397_v37 = vpop.f32.mrf.mxu3 }
 0x1d6   : > { %v1337_v61 = vpop.f32.mrf.mxu1 }
 0x1d7   : > { %v1366_v32 = vpop.f32.mrf.mxu2  ;;  %v1338_v56 = vadd.f32 %v1337_v61, %v11013_v49 }
 0x1d9   : > { %2515 = vmatpush.bf16.msra.mxu0 %v7412_v21  ;;  %2543 = vmatpush.bf16.msra.mxu2 %v7416_v7  ;;  %v1367_v52 = vadd.f32 %v1366_v32, %v1338_v56 }
 0x1db   : > { %v1396_v63 = vadd.f32 %v1395_v15, %v1367_v52 }
 0x1dd   : > { %2516 = vmatpush.bf16.msra.mxu0 %v7380_v34  ;;  %2544 = vmatpush.bf16.msra.mxu2 %v7384_v10  ;;  %1427 = vst [vmem:[#allocation2 + $0x28] sm:$0xff] %v1396_v63 }
 0x1de   : > { %v1339_v57 = vpop.f32.mrf.mxu1 }
 0x1df   : > { %v1368_v1 = vpop.f32.mrf.mxu2  ;;  %v1340_v39 = vadd.f32 %v1339_v57, %v11013_v49 }
 0x1e1   : > { %2517 = vmatpush.bf16.msra.mxu0 %v7348_v16  ;;  %2545 = vmatpush.bf16.msra.mxu2 %v7352_v3  ;;  %v1369_v47 = vadd.f32 %v1368_v1, %v1340_v39  ;;  %v1432_v16 = vld [vmem:[#allocation15] sm:$0xf] }
 0x1e2   : > { %v11101_v23 = vperm.slane %v1432_v16, 0  ;;  %v11103_v24 = vperm.slane %v1432_v16, 1 }
 0x1e3   : > { %v1398_v40 = vadd.f32 %v1397_v37, %v1369_v47 }
 0x1e5   : > { %2518 = vmatpush.bf16.msra.mxu0 %v7316_v30  ;;  %2546 = vmatpush.bf16.msra.mxu2 %v7320_v33  ;;  %1431 = vst [vmem:[#allocation2 + $0x98] sm:$0xff] %v1398_v40 }
 0x1e9   : > { %2519 = vmatpush.bf16.msra.mxu0 %v7284_v36  ;;  %2547 = vmatpush.bf16.msra.mxu2 %v7288_v58 }
 0x1ec   : > { %2520 = vmatmul.bf16.vlgmr.msra.gmra.mxu0 %v11063_v59  ;;  %2548 = vmatmul.bf16.vlgmr.msra.gmra.mxu2 %v11063_v59 }
 0x1fe   : > { %v2367_v2 = vpop.f32.mrf.mxu1 }
 0x205   : > { %v2395_v59 = vpop.f32.mrf.mxu3 }
 0x206   : > { %v2369_v6 = vpop.f32.mrf.mxu1 }
 0x20d   : > { %v2397_v11 = vpop.f32.mrf.mxu3 }
 0x20e   : > { %v2423_v49 = vpop.f32.mrf.mxu1 }
 0x215   : > { %v2451_v9 = vpop.f32.mrf.mxu3 }
 0x216   : > { %v2425_v34 = vpop.f32.mrf.mxu1 }
 0x21d   : > { %v2453_v14 = vpop.f32.mrf.mxu3 }
 0x226   : > { %v2507_v3 = vpop.f32.mrf.mxu3 }
 0x227   : > { %v2479_v20 = vpop.f32.mrf.mxu1 }
 0x229   : > { %v2353_v31 = vpop.f32.mrf.mxu0 }
 0x22a   : > { %v11085_v5 = vadd.f32 %v2367_v2, %v2353_v31  ;;  %v11109_v31 = vperm.slane %v1432_v16, 2 }
 0x22e   : > { %v2509_v43 = vpop.f32.mrf.mxu3 }
 0x22f   : > { %v2381_v38 = vpop.f32.mrf.mxu2  ;;  %v2481_v33 = vpop.f32.mrf.mxu1 }
 0x230   : > { %v11087_v21 = vadd.f32 %v2395_v59, %v2381_v38  ;;  %v11111_v38 = vperm.slane %v1432_v16, 3 }
 0x231   : > { %v2355_v7 = vpop.f32.mrf.mxu0 }
 0x232   : > { %v11089_v8 = vadd.f32 %v2369_v6, %v2355_v7 }
 0x237   : > { %v2383_v0 = vpop.f32.mrf.mxu2 }
 0x238   : > { %v11091_v12 = vadd.f32 %v2397_v11, %v2383_v0 }
 0x239   : > { %v2409_v27 = vpop.f32.mrf.mxu0 }
 0x23a   : > { %v11093_v29 = vadd.f32 %v2423_v49, %v2409_v27 }
 0x23f   : > { %v2437_v35 = vpop.f32.mrf.mxu2 }
 0x240   : > { %v11095_v10 = vadd.f32 %v2451_v9, %v2437_v35 }
 0x241   : > { %v2411_v13 = vpop.f32.mrf.mxu0 }
 0x242   : > { %v11097_v17 = vadd.f32 %v2425_v34, %v2411_v13 }
 0x247   : > { %v2439_v28 = vpop.f32.mrf.mxu2  ;;  %v2535_v40 = vpop.f32.mrf.mxu1 }
 0x248   : > { %v11099_v50 = vadd.f32 %v2453_v14, %v2439_v28 }
 0x249   : > { %v2465_v18 = vpop.f32.mrf.mxu0  ;;  %v2563_v59 = vpop.f32.mrf.mxu3 }
 0x24a   : > { %v2480_v48 = vadd.f32 %v2479_v20, %v2465_v18 }
 0x24c   : > { %v2568_v51 = vadd.f32 %v2480_v48, %v11101_v23 }
 0x24f   : > { %v2493_v4 = vpop.f32.mrf.mxu2  ;;  %v2537_v20 = vpop.f32.mrf.mxu1 }
 0x250   : > { %v2508_v25 = vadd.f32 %v2507_v3, %v2493_v4 }
 0x251   : > { %v2467_v30 = vpop.f32.mrf.mxu0 }
 0x252   : > { %v2569_v41 = vadd.f32 %v2508_v25, %v11103_v24  ;;  %v2482_v19 = vadd.f32 %v2481_v33, %v2467_v30  ;;  %v2565_v25 = vpop.f32.mrf.mxu3 }
 0x254   : > { %v2576_v42 = vpack.c.bf16 %v2569_v41, %v2568_v51  ;;  %v2572_v58 = vadd.f32 %v2482_v19, %v11101_v23 }
 0x256   : > { %v2600_v45 = vrot.slane %v2576_v42, 4  ;;  %v2580_v36 = vunpack.c.l.bf16 %v2576_v42 }
 0x257   : > { %v2495_v22 = vpop.f32.mrf.mxu2 }
 0x258   : > { %v2604_v26 = vunpack.c.l.bf16 %v2600_v45  ;;  %v2510_v44 = vadd.f32 %v2509_v43, %v2495_v22  ;;  %v2582_v46 = vmul.f32 0.5, %v2580_v36 }
 0x25a   : > { %v2573_v54 = vadd.f32 %v2510_v44, %v11103_v24  ;;  %v2606_v53 = vmul.f32 0.5, %v2604_v26  ;;  %v2584_v15 = vpack.c.bf16 %v2582_v46, %v2582_v46 }
 0x25c   : > { %v2578_v55 = vpack.c.bf16 %v2573_v54, %v2572_v58  ;;  %v2608_v32 = vpack.c.bf16 %v2606_v53, %v2606_v53  ;;  %v2586_v1 = vunpack.c.l.bf16 %v2584_v15 }
 0x25e   : > { %v2601_v61 = vrot.slane %v2578_v55, 4  ;;  %v2581_v52 = vunpack.c.l.bf16 %v2578_v55  ;;  %v2610_v63 = vunpack.c.l.bf16 %v2608_v32 }
 0x260   : > { %v2605_v56 = vunpack.c.l.bf16 %v2601_v61  ;;  %v2583_v39 = vmul.f32 0.5, %v2581_v52  ;;  %10225 = vtanh.f32 %v2610_v63  ;;  %v1454_v52 = vld [vmem:[#allocation6] sm:$0xff] }
 0x261   : > { %10227 = vtanh.f32 %v2586_v1 }
 0x262   : > { %v2607_v57 = vmul.f32 0.5, %v2605_v56  ;;  %v2585_v2 = vpack.c.bf16 %v2583_v39, %v2583_v39 }
 0x264   : > { %v2609_v47 = vpack.c.bf16 %v2607_v57, %v2607_v57  ;;  %v2587_v9 = vunpack.c.l.bf16 %v2585_v2 }
 0x266   : > { %v2611_v11 = vunpack.c.l.bf16 %v2609_v47  ;;  %v10226_v49 = vpop.eup %10225 }
 0x267   : > { %v10228_v27 = vpop.eup %10227  ;;  %v2614_v13 = vpack.c.bf16 %v10226_v49, %v10226_v49 }
 0x268   : > { %10229 = vtanh.f32 %v2611_v11  ;;  %v2590_v18 = vpack.c.bf16 %v10228_v27, %v10228_v27 }
 0x269   : > { %v2521_v37 = vpop.f32.mrf.mxu0  ;;  %10231 = vtanh.f32 %v2587_v9  ;;  %v2616_v4 = vunpack.c.l.bf16 %v2614_v13  ;;  %v1455_v13 = vld [vmem:[#allocation6 + $0x8] sm:$0xff] }
 0x26a   : > { %v2536_v6 = vadd.f32 %v2535_v40, %v2521_v37  ;;  %v2592_v42 = vunpack.c.l.bf16 %v2590_v18 }
 0x26b   : > { %v2618_v26 = vmul.f32 0.5, %v2616_v4 }
 0x26c   : > { %v2570_v35 = vadd.f32 %v2536_v6, %v11109_v31  ;;  %v2594_v54 = vmul.f32 0.5, %v2592_v42 }
 0x26d   : > { %v2620_v56 = vadd.f32 0.5, %v2618_v26 }
 0x26e   : > { %v10230_v33 = vpop.eup %10229  ;;  %v2596_v1 = vadd.f32 0.5, %v2594_v54 }
 0x26f   : > { %v2549_v7 = vpop.f32.mrf.mxu2  ;;  %v10232_v22 = vpop.eup %10231  ;;  %v2615_v44 = vpack.c.bf16 %v10230_v33, %v10230_v33  ;;  %v2654_v40 = vmul.f32 %v2620_v56, %v1454_v52 }
 0x270   : > { %v2564_v0 = vadd.f32 %v2563_v59, %v2549_v7  ;;  %v2591_v55 = vpack.c.bf16 %v10232_v22, %v10232_v22 }
 0x271   : > { %v2523_v14 = vpop.f32.mrf.mxu0  ;;  %v2617_v63 = vunpack.c.l.bf16 %v2615_v44 }
 0x272   : > { %v2571_v34 = vadd.f32 %v2564_v0, %v11111_v38  ;;  %v2538_v48 = vadd.f32 %v2537_v20, %v2523_v14  ;;  %v2593_v37 = vunpack.c.l.bf16 %v2591_v55 }
 0x273   : > { %v2619_v59 = vmul.f32 0.5, %v2617_v63 }
 0x274   : > { %v2577_v28 = vpack.c.bf16 %v2571_v34, %v2570_v35  ;;  %v2574_v45 = vadd.f32 %v2538_v48, %v11109_v31  ;;  %v2595_v49 = vmul.f32 0.5, %v2593_v37 }
 0x275   : > { %v2621_v35 = vadd.f32 0.5, %v2619_v59 }
 0x276   : > { %v2622_v3 = vunpack.c.l.bf16 %v2577_v28  ;;  %v2632_v16 = vrot.slane %v2577_v28, 4  ;;  %v2597_v28 = vadd.f32 0.5, %v2595_v49 }
 0x277   : > { %v2551_v51 = vpop.f32.mrf.mxu2 }
 0x278   : > { %10233 = vtanh.f32 %v2622_v3  ;;  %v2636_v41 = vunpack.c.l.bf16 %v2632_v16  ;;  %v2566_v30 = vadd.f32 %v2565_v25, %v2551_v51  ;;  %v2655_v3 = vmul.f32 %v2621_v35, %v1455_v13 }
 0x27a   : > { %v2638_v43 = vmul.f32 0.5, %v2636_v41  ;;  %v2575_v19 = vadd.f32 %v2566_v30, %v11111_v38 }
 0x27c   : > { %v2640_v36 = vpack.c.bf16 %v2638_v43, %v2638_v43  ;;  %v2579_v58 = vpack.c.bf16 %v2575_v19, %v2574_v45 }
 0x27e   : > { %v10234_v53 = vpop.eup %10233  ;;  %v2642_v46 = vunpack.c.l.bf16 %v2640_v36  ;;  %v2623_v61 = vunpack.c.l.bf16 %v2579_v58  ;;  %v2633_v32 = vrot.slane %v2579_v58, 4 }
 0x27f   : > { %v2626_v15 = vpack.c.bf16 %v10234_v53, %v10234_v53 }
 0x280   : > { %10235 = vtanh.f32 %v2642_v46  ;;  %v2637_v57 = vunpack.c.l.bf16 %v2633_v32 }
 0x281   : > { %v2628_v39 = vunpack.c.l.bf16 %v2626_v15  ;;  %10237 = vtanh.f32 %v2623_v61 }
 0x282   : > { %v2639_v47 = vmul.f32 0.5, %v2637_v57 }
 0x283   : > { %v2656_v2 = vmul.f32 %v2628_v39, %v2596_v1 }
 0x284   : > { %v2641_v6 = vpack.c.bf16 %v2639_v47, %v2639_v47 }
 0x285   : > { %v11117_v11 = vadd.f32 %v2656_v2, %v2654_v40 }
 0x286   : > { %v10236_v7 = vpop.eup %10235  ;;  %v2643_v0 = vunpack.c.l.bf16 %v2641_v6 }
 0x287   : > { %v10238_v9 = vpop.eup %10237  ;;  %v2646_v27 = vpack.c.bf16 %v10236_v7, %v10236_v7  ;;  %10239 = vtanh.f32 %v11117_v11 }
 0x288   : > { %v2627_v34 = vpack.c.bf16 %v10238_v9, %v10238_v9  ;;  %10241 = vtanh.f32 %v2643_v0 }
 0x289   : > { %v2648_v14 = vunpack.c.l.bf16 %v2646_v27 }
 0x28a   : > { %v2629_v18 = vunpack.c.l.bf16 %v2627_v34 }
 0x28b   : > { %v2650_v20 = vmul.f32 0.5, %v2648_v14 }
 0x28c   : > { %v2657_v16 = vmul.f32 %v2629_v18, %v2597_v28 }
 0x28d   : > { %v10240_v48 = vpop.eup %10239  ;;  %v2652_v4 = vadd.f32 0.5, %v2650_v20 }
 0x28e   : > { %v10242_v25 = vpop.eup %10241  ;;  %v11120_v51 = vadd.f32 %v2657_v16, %v2655_v3 }
 0x28f   : > { %v11122_v41 = vmul.f32 %v10240_v48, %v2652_v4  ;;  %v2647_v30 = vpack.c.bf16 %v10242_v25, %v10242_v25 }
 0x290   : > { %10243 = vtanh.f32 %v11120_v51 }
 0x291   : > { %v2649_v33 = vunpack.c.l.bf16 %v2647_v30 }
 0x293   : > { %v2651_v42 = vmul.f32 0.5, %v2649_v33  ;;  %2668 = sbr.rel (%p7770_p1) target bundleno = 830 (0x33e), region = 80 }
 0x295   : > { %v2653_v43 = vadd.f32 0.5, %v2651_v42 }
 0x296   : > { %v10244_v45 = vpop.eup %10243 }
 0x297   : > { %v11125_v19 = vmul.f32 %v10244_v45, %v2653_v43 }
 0x298   : > { %v9685_v22 = vld [vmem:[#allocation16 + $0x38] sm:$0xff]  ;;  %v9684_v44 = vld [vmem:[#allocation16 + $0x30] sm:$0xff]  ;;  %v9683_v36 = vld [vmem:[#allocation16 + $0x28] sm:$0xff]  ;;  %v2669_v46 = vmax.f32 %v11122_v41, 0.0  ;;  %v2754_v56 = vlaneseq }
 0x299   : > { %v2670_v26 = vmax.f32 %v11125_v19, 0.0  ;;  %2740 = vmatpush.bf16.msra.mxu0 %v9685_v22  ;;  %v9682_v58 = vld [vmem:[#allocation16 + $0x20] sm:$0xff]  ;;  %v9681_v54 = vld [vmem:[#allocation16 + $0x18] sm:$0xff]  ;;  %v9680_v53 = vld [vmem:[#allocation16 + $0x10] sm:$0xff] }
 0x29a   : > { %v9679_v55 = vld [vmem:[#allocation16 + $0x8] sm:$0xff]  ;;  %v9678_v61 = vld [vmem:[#allocation16] sm:$0xff]  ;;  %v2755_v15 = vshrl.u32 %v2754_v56, 7 }
 0x29b   : > { %2762 = vst [vmem:[#allocation18 + $0x8] sm:$0xff] %v2670_v26  ;;  %v2671_v32 = vpack.c.bf16 %v2670_v26, %v2669_v46  ;;  %v10245_v52 = vld [vmem:[%s11663_s6] ss:$0 sm:$0xff] }
 0x29c   : > { %vm2757_vm0 = vcmp.lt.s32.totalorder %v2755_v15, 2 }
 0x29d   : > { %2741 = vmatpush.bf16.msra.mxu0 %v9684_v44 }
 0x2a1   : > { %2742 = vmatpush.bf16.msra.mxu0 %v9683_v36 }
 0x2a5   : > { %2743 = vmatpush.bf16.msra.mxu0 %v9682_v58 }
 0x2a9   : > { %2744 = vmatpush.bf16.msra.mxu0 %v9681_v54 }
 0x2ad   : > { %2745 = vmatpush.bf16.msra.mxu0 %v9680_v53 }
 0x2b1   : > { %2746 = vmatpush.bf16.msra.mxu0 %v9679_v55 }
 0x2b5   : > { %2747 = vmatpush.bf16.msra.mxu0 %v9678_v61 }
 0x2b8   : > { %2748 = vmatmul.bf16.vlgmr.msra.gmra.mxu0 %v2671_v32 }
 0x335   : > { %v2749_v63 = vpop.f32.mrf.mxu0 }
 0x336   : > { %v2750_v57 = vadd.f32 %v10245_v52, %v2749_v63 }
 0x338   : > { %v2759_v1 = vsel %vm2757_vm0, %v2750_v57, %v2669_v46 }
 0x339   : > { %2761 = vst [vmem:[#allocation18] sm:$0xff] %v2759_v1 }
 0x33d   : > { %v2751_v39 = vpop.f32.mrf.mxu0 }
 0x33e PF: > { %v8029_v37 = vld [vmem:[#allocation12 + $0x1c0] sm:$0xf]  ;;  %v9742_v6 = vld [vmem:[#allocation12 + $0x1c4] sm:$0xf]  ;;  %s3971_s19 = sadd.s32 1, %s11083_s9 }
 0x33f   : > { %v9746_v47 = vld [vmem:[#allocation12 + $0x1dc] sm:$0xf0]  ;;  %v8031_v7 = vld [vmem:[#allocation12 + $0x1e0] sm:$0xf0]  ;;  %p8315_p3 = scmp.ne.s32.totalorder %s3971_s19, 7 }
 0x340   : > { %v8285_v40 = vld [vmem:[#allocation12 + $0x3c0] sm:$0xf]  ;;  %v8030_v2 = vor.u32 %v9746_v47, %v8029_v37  ;;  %v8034_v0 = vor.u32 %v9742_v6, %v8031_v7  ;;  %v9806_v9 = vld [vmem:[#allocation12 + $0x3c4] sm:$0xf] }
 0x341   : > { %v9810_v59 = vld [vmem:[#allocation12 + $0x3dc] sm:$0xf0]  ;;  %v8287_v27 = vld [vmem:[#allocation12 + $0x3e0] sm:$0xf0] }
 0x342   : > { %v8286_v49 = vor.u32 %v9810_v59, %v8285_v40  ;;  %v7997_v35 = vld [vmem:[#allocation12 + $0x180] sm:$0xf]  ;;  %3651 = vmatpush.bf16.msra.mxu0 %v8030_v2  ;;  %v8290_v34 = vor.u32 %v9806_v9, %v8287_v27  ;;  %3679 = vmatpush.bf16.msra.mxu2 %v8034_v0  ;;  %v9734_v3 = vld [vmem:[#allocation12 + $0x184] sm:$0xf] }
 0x343   : > { %v9738_v13 = vld [vmem:[#allocation12 + $0x19c] sm:$0xf0]  ;;  %v7999_v16 = vld [vmem:[#allocation12 + $0x1a0] sm:$0xf0] }
 0x344   : > { %v8253_v14 = vld [vmem:[#allocation12 + $0x380] sm:$0xf]  ;;  %3665 = vmatpush.bf16.msra.mxu1 %v8286_v49  ;;  %v7998_v18 = vor.u32 %v9738_v13, %v7997_v35  ;;  %v9798_v48 = vld [vmem:[#allocation12 + $0x384] sm:$0xf]  ;;  %3693 = vmatpush.bf16.msra.mxu3 %v8290_v34  ;;  %v8002_v4 = vor.u32 %v9734_v3, %v7999_v16 }
 0x345   : > { %v9802_v28 = vld [vmem:[#allocation12 + $0x39c] sm:$0xf0]  ;;  %v8255_v25 = vld [vmem:[#allocation12 + $0x3a0] sm:$0xf0] }
 0x346   : > { %v8254_v20 = vor.u32 %v9802_v28, %v8253_v14  ;;  %v7965_v30 = vld [vmem:[#allocation12 + $0x140] sm:$0xf]  ;;  %v8258_v42 = vor.u32 %v9798_v48, %v8255_v25  ;;  %v9726_v22 = vld [vmem:[#allocation12 + $0x144] sm:$0xf]  ;;  %3652 = vmatpush.bf16.msra.mxu0 %v7998_v18  ;;  %3680 = vmatpush.bf16.msra.mxu2 %v8002_v4 }
 0x347   : > { %v9730_v33 = vld [vmem:[#allocation12 + $0x15c] sm:$0xf0]  ;;  %v7967_v44 = vld [vmem:[#allocation12 + $0x160] sm:$0xf0] }
 0x348   : > { %v8221_v43 = vld [vmem:[#allocation12 + $0x340] sm:$0xf]  ;;  %v7966_v26 = vor.u32 %v9730_v33, %v7965_v30  ;;  %v9790_v36 = vld [vmem:[#allocation12 + $0x344] sm:$0xf]  ;;  %3666 = vmatpush.bf16.msra.mxu1 %v8254_v20  ;;  %v7970_v53 = vor.u32 %v9726_v22, %v7967_v44  ;;  %3694 = vmatpush.bf16.msra.mxu3 %v8258_v42 }
 0x349   : > { %v9794_v45 = vld [vmem:[#allocation12 + $0x35c] sm:$0xf0]  ;;  %v8223_v58 = vld [vmem:[#allocation12 + $0x360] sm:$0xf0] }
 0x34a   : > { %v8222_v54 = vor.u32 %v9794_v45, %v8221_v43  ;;  %v7933_v55 = vld [vmem:[#allocation12 + $0x100] sm:$0xf]  ;;  %v8226_v32 = vor.u32 %v9790_v36, %v8223_v58  ;;  %v9718_v15 = vld [vmem:[#allocation12 + $0x104] sm:$0xf]  ;;  %3653 = vmatpush.bf16.msra.mxu0 %v7966_v26  ;;  %3681 = vmatpush.bf16.msra.mxu2 %v7970_v53 }
 0x34b   : > { %v9722_v46 = vld [vmem:[#allocation12 + $0x11c] sm:$0xf0]  ;;  %v7935_v52 = vld [vmem:[#allocation12 + $0x120] sm:$0xf0] }
 0x34c   : > { %v8189_v61 = vld [vmem:[#allocation12 + $0x300] sm:$0xf]  ;;  %v9782_v63 = vld [vmem:[#allocation12 + $0x304] sm:$0xf]  ;;  %v7934_v1 = vor.u32 %v9722_v46, %v7933_v55  ;;  %3667 = vmatpush.bf16.msra.mxu1 %v8222_v54  ;;  %v7938_v37 = vor.u32 %v9718_v15, %v7935_v52  ;;  %3695 = vmatpush.bf16.msra.mxu3 %v8226_v32 }
 0x34d   : > { %v9786_v56 = vld [vmem:[#allocation12 + $0x31c] sm:$0xf0]  ;;  %v8191_v57 = vld [vmem:[#allocation12 + $0x320] sm:$0xf0] }
 0x34e   : > { %v8190_v39 = vor.u32 %v9786_v56, %v8189_v61  ;;  %v7901_v47 = vld [vmem:[#allocation12 + $0xc0] sm:$0xf]  ;;  %v8194_v59 = vor.u32 %v9782_v63, %v8191_v57  ;;  %v9710_v7 = vld [vmem:[#allocation12 + $0xc4] sm:$0xf]  ;;  %3654 = vmatpush.bf16.msra.mxu0 %v7934_v1  ;;  %3682 = vmatpush.bf16.msra.mxu2 %v7938_v37  ;;  %v8037_v37 = vld [vmem:[#allocation12 + $0x1c8] sm:$0xf] }
 0x34f   : > { %v9714_v40 = vld [vmem:[#allocation12 + $0xdc] sm:$0xf0]  ;;  %v7903_v49 = vld [vmem:[#allocation12 + $0xe0] sm:$0xf0] }
 0x350   : > { %v8157_v2 = vld [vmem:[#allocation12 + $0x2c0] sm:$0xf]  ;;  %v9774_v0 = vld [vmem:[#allocation12 + $0x2c4] sm:$0xf]  ;;  %v7902_v27 = vor.u32 %v9714_v40, %v7901_v47  ;;  %3668 = vmatpush.bf16.msra.mxu1 %v8190_v39  ;;  %v7906_v34 = vor.u32 %v9710_v7, %v7903_v49  ;;  %3696 = vmatpush.bf16.msra.mxu3 %v8194_v59  ;;  %v9747_v47 = vld [vmem:[#allocation12 + $0x1e4] sm:$0xf0] }
 0x351   : > { %v9778_v6 = vld [vmem:[#allocation12 + $0x2dc] sm:$0xf0]  ;;  %v8159_v9 = vld [vmem:[#allocation12 + $0x2e0] sm:$0xf0]  ;;  %v8293_v40 = vld [vmem:[#allocation12 + $0x3c8] sm:$0xf] }
 0x352   : > { %v8158_v35 = vor.u32 %v9778_v6, %v8157_v2  ;;  %v7869_v13 = vld [vmem:[#allocation12 + $0x80] sm:$0xf]  ;;  %v8162_v18 = vor.u32 %v9774_v0, %v8159_v9  ;;  %v9702_v3 = vld [vmem:[#allocation12 + $0x84] sm:$0xf]  ;;  %3655 = vmatpush.bf16.msra.mxu0 %v7902_v27  ;;  %3683 = vmatpush.bf16.msra.mxu2 %v7906_v34  ;;  %v9811_v2 = vld [vmem:[#allocation12 + $0x3e4] sm:$0xf0] }
 0x353   : > { %v9706_v14 = vld [vmem:[#allocation12 + $0x9c] sm:$0xf0]  ;;  %v7871_v16 = vld [vmem:[#allocation12 + $0xa0] sm:$0xf0]  ;;  %v9743_v6 = vld [vmem:[#allocation12 + $0x1cc] sm:$0xf] }
 0x354   : > { %v8125_v28 = vld [vmem:[#allocation12 + $0x280] sm:$0xf]  ;;  %v9766_v48 = vld [vmem:[#allocation12 + $0x284] sm:$0xf]  ;;  %v7870_v25 = vor.u32 %v9706_v14, %v7869_v13  ;;  %3669 = vmatpush.bf16.msra.mxu1 %v8158_v35  ;;  %v7874_v33 = vor.u32 %v9702_v3, %v7871_v16  ;;  %3697 = vmatpush.bf16.msra.mxu3 %v8162_v18  ;;  %v8039_v7 = vld [vmem:[#allocation12 + $0x1e8] sm:$0xf0]  ;;  %v8038_v14 = vor.u32 %v9747_v47, %v8037_v37 }
 0x355   : > { %v9770_v20 = vld [vmem:[#allocation12 + $0x29c] sm:$0xf0]  ;;  %v8127_v4 = vld [vmem:[#allocation12 + $0x2a0] sm:$0xf0]  ;;  %v9807_v49 = vld [vmem:[#allocation12 + $0x3cc] sm:$0xf]  ;;  %v8294_v3 = vor.u32 %v9811_v2, %v8293_v40  ;;  %v8042_v16 = vor.u32 %v9743_v6, %v8039_v7 }
 0x356   : > { %v8126_v30 = vor.u32 %v9770_v20, %v8125_v28  ;;  %v7837_v42 = vld [vmem:[#allocation12 + $0x40] sm:$0xf]  ;;  %v8130_v22 = vor.u32 %v9766_v48, %v8127_v4  ;;  %v9694_v44 = vld [vmem:[#allocation12 + $0x44] sm:$0xf]  ;;  %3656 = vmatpush.bf16.msra.mxu0 %v7870_v25  ;;  %3684 = vmatpush.bf16.msra.mxu2 %v7874_v33  ;;  %v8295_v27 = vld [vmem:[#allocation12 + $0x3e8] sm:$0xf0] }
 0x357   : > { %v9698_v43 = vld [vmem:[#allocation12 + $0x5c] sm:$0xf0]  ;;  %v7839_v36 = vld [vmem:[#allocation12 + $0x60] sm:$0xf0]  ;;  %v8005_v35 = vld [vmem:[#allocation12 + $0x188] sm:$0xf] }
 0x358   : > { %v8093_v45 = vld [vmem:[#allocation12 + $0x240] sm:$0xf]  ;;  %v9758_v58 = vld [vmem:[#allocation12 + $0x244] sm:$0xf]  ;;  %v7838_v53 = vor.u32 %v9698_v43, %v7837_v42  ;;  %3670 = vmatpush.bf16.msra.mxu1 %v8126_v30  ;;  %v7842_v56 = vor.u32 %v9694_v44, %v7839_v36  ;;  %3698 = vmatpush.bf16.msra.mxu3 %v8130_v22  ;;  %v9739_v34 = vld [vmem:[#allocation12 + $0x1a4] sm:$0xf0]  ;;  %v8298_v30 = vor.u32 %v9807_v49, %v8295_v27 }
 0x359   : > { %v9762_v26 = vld [vmem:[#allocation12 + $0x25c] sm:$0xf0]  ;;  %v8095_v54 = vld [vmem:[#allocation12 + $0x260] sm:$0xf0]  ;;  %v8261_v28 = vld [vmem:[#allocation12 + $0x388] sm:$0xf]  ;;  %v8006_v36 = vor.u32 %v9739_v34, %v8005_v35 }
 0x35a   : > { %v7805_v55 = vld [vmem:[#allocation12] sm:$0xf]  ;;  %v8094_v32 = vor.u32 %v9762_v26, %v8093_v45  ;;  %v9686_v52 = vld [vmem:[#allocation12 + $0x4] sm:$0xf]  ;;  %v8098_v57 = vor.u32 %v9758_v58, %v8095_v54  ;;  %3657 = vmatpush.bf16.msra.mxu0 %v7838_v53  ;;  %3685 = vmatpush.bf16.msra.mxu2 %v7842_v56  ;;  %v9803_v18 = vld [vmem:[#allocation12 + $0x3a4] sm:$0xf0] }
 0x35b   : > { %v9690_v46 = vld [vmem:[#allocation12 + $0x1c] sm:$0xf0]  ;;  %v7807_v63 = vld [vmem:[#allocation12 + $0x20] sm:$0xf0]  ;;  %v9735_v20 = vld [vmem:[#allocation12 + $0x18c] sm:$0xf] }
 0x35c   : > { %v8061_v61 = vld [vmem:[#allocation12 + $0x200] sm:$0xf]  ;;  %v9750_v1 = vld [vmem:[#allocation12 + $0x204] sm:$0xf]  ;;  %v7806_v59 = vor.u32 %v9690_v46, %v7805_v55  ;;  %3671 = vmatpush.bf16.msra.mxu1 %v8094_v32  ;;  %v7810_v9 = vor.u32 %v9686_v52, %v7807_v63  ;;  %3699 = vmatpush.bf16.msra.mxu3 %v8098_v57  ;;  %v8007_v48 = vld [vmem:[#allocation12 + $0x1a8] sm:$0xf0]  ;;  %v8262_v55 = vor.u32 %v9803_v18, %v8261_v28 }
 0x35d   : > { %v9754_v15 = vld [vmem:[#allocation12 + $0x21c] sm:$0xf0]  ;;  %v8063_v39 = vld [vmem:[#allocation12 + $0x220] sm:$0xf0]  ;;  %v9799_v4 = vld [vmem:[#allocation12 + $0x38c] sm:$0xf]  ;;  %v8010_v46 = vor.u32 %v9735_v20, %v8007_v48 }
 0x35e   : > { %v8062_v0 = vor.u32 %v9754_v15, %v8061_v61  ;;  %v8066_v13 = vor.u32 %v9750_v1, %v8063_v39  ;;  %v8263_v25 = vld [vmem:[#allocation12 + $0x3a8] sm:$0xf0]  ;;  %3658 = vmatpush.bf16.msra.mxu0 %v7806_v59  ;;  %v11133_v33 = vld [vmem:[#allocation12 + $0x148] sm:$0xf]  ;;  %3686 = vmatpush.bf16.msra.mxu2 %v7810_v9  ;;  %v2763_v27 = vld [vmem:[#allocation2 + $0x80] sm:$0xff] }
 0x35f   : > { %v11135_v42 = vld [vmem:[#allocation12 + $0x164] sm:$0xf0]  ;;  %v11141_v22 = vld [vmem:[#allocation12 + $0x14c] sm:$0xf]  ;;  %v8266_v15 = vor.u32 %v9799_v4, %v8263_v25  ;;  %v2764_v35 = vld [vmem:[#allocation2 + $0x88] sm:$0xff]  ;;  %v2771_v20 = vadd.f32 %v2763_v27, %v11085_v5 }
 0x360   : > { %v11137_v43 = vld [vmem:[#allocation12 + $0x348] sm:$0xf]  ;;  %3672 = vmatpush.bf16.msra.mxu1 %v8062_v0  ;;  %v11143_v26 = vld [vmem:[#allocation12 + $0x168] sm:$0xf0]  ;;  %3700 = vmatpush.bf16.msra.mxu3 %v8066_v13  ;;  %v7974_v1 = vor.u32 %v11135_v42, %v11133_v33  ;;  %v2767_v18 = vld [vmem:[#allocation2 + $0x60] sm:$0xff] }
 0x361   : > { %v11139_v45 = vld [vmem:[#allocation12 + $0x364] sm:$0xf0]  ;;  %v11145_v44 = vld [vmem:[#allocation12 + $0x34c] sm:$0xf]  ;;  %v7978_v6 = vor.u32 %v11141_v22, %v11143_v26  ;;  %v2768_v48 = vld [vmem:[#allocation2 + $0xf0] sm:$0xff]  ;;  %v2775_v42 = vadd.f32 %v2767_v18, %v11089_v8 }
 0x362   : > { %3707 = vmatpush.bf16.msrb.mxu0 %v8038_v14  ;;  %v11147_v58 = vld [vmem:[#allocation12 + $0x368] sm:$0xf0]  ;;  %v11149_v54 = vld [vmem:[#allocation12 + $0x108] sm:$0xf]  ;;  %3735 = vmatpush.bf16.msrb.mxu2 %v8042_v16  ;;  %v8230_v39 = vor.u32 %v11139_v45, %v11137_v43  ;;  %v2765_v14 = vld [vmem:[#allocation2 + $0xe8] sm:$0xff] }
 0x363   : > { %v11151_v53 = vld [vmem:[#allocation12 + $0x124] sm:$0xf0]  ;;  %v11157_v56 = vld [vmem:[#allocation12 + $0x10c] sm:$0xf]  ;;  %v8234_v7 = vor.u32 %v11145_v44, %v11147_v58  ;;  %v2769_v4 = vld [vmem:[#allocation2 + $0x8] sm:$0xff] }
 0x364   : > { %3721 = vmatpush.bf16.msrb.mxu1 %v8294_v3  ;;  %v11153_v61 = vld [vmem:[#allocation12 + $0x308] sm:$0xf]  ;;  %3749 = vmatpush.bf16.msrb.mxu3 %v8298_v30  ;;  %v11159_v52 = vld [vmem:[#allocation12 + $0x128] sm:$0xf0]  ;;  %v7942_v49 = vor.u32 %v11151_v53, %v11149_v54  ;;  %v2772_v3 = vadd.f32 %v2764_v35, %v11087_v21  ;;  %v2773_v30 = vadd.f32 %v2765_v14, %v11093_v29 }
 0x365   : > { %v11155_v32 = vld [vmem:[#allocation12 + $0x324] sm:$0xf0]  ;;  %v11161_v63 = vld [vmem:[#allocation12 + $0x30c] sm:$0xf]  ;;  %v7946_v34 = vor.u32 %v11157_v56, %v11159_v52  ;;  %v2776_v21 = vadd.f32 %v2768_v48, %v11091_v12  ;;  %v2777_v22 = vadd.f32 %v2769_v4, %v11097_v17 }
 0x366   : > { %v11163_v57 = vld [vmem:[#allocation12 + $0x328] sm:$0xf0]  ;;  %v11169_v37 = vld [vmem:[#allocation12 + $0xc8] sm:$0xf]  ;;  %3708 = vmatpush.bf16.msrb.mxu0 %v8006_v36  ;;  %v8198_v0 = vor.u32 %v11155_v32, %v11153_v61  ;;  %3736 = vmatpush.bf16.msrb.mxu2 %v8010_v46  ;;  %v2779_v44 = vpack.c.bf16 %v2772_v3, %v2771_v20 }
 0x367   : > { %v11171_v47 = vld [vmem:[#allocation12 + $0xe4] sm:$0xf0]  ;;  %v11177_v59 = vld [vmem:[#allocation12 + $0xcc] sm:$0xf]  ;;  %v8202_v16 = vor.u32 %v11161_v63, %v11163_v57  ;;  %v2781_v17 = vpack.c.bf16 %v2776_v21, %v2775_v42  ;;  %v2870_v42 = vpack.c.bf16 %v11125_v19, %v11125_v19 }
 0x368   : > { %v11173_v40 = vld [vmem:[#allocation12 + $0x2c8] sm:$0xf]  ;;  %v11187_v9 = vld [vmem:[#allocation12 + $0xe8] sm:$0xf0]  ;;  %3722 = vmatpush.bf16.msrb.mxu1 %v8262_v55  ;;  %3750 = vmatpush.bf16.msrb.mxu3 %v8266_v15  ;;  %v7910_v29 = vor.u32 %v11171_v47, %v11169_v37  ;;  %v2803_v53 = vrot.slane %v2779_v44, 4 }
 0x369   : > { %v11175_v2 = vld [vmem:[#allocation12 + $0x2e4] sm:$0xf0]  ;;  %v11191_v13 = vld [vmem:[#allocation12 + $0x2cc] sm:$0xf]  ;;  %v2784_v52 = vunpack.c.l.bf16 %v2781_v17  ;;  %v2804_v57 = vrot.slane %v2781_v17, 4 }
 0x36a   : > { %v2766_v28 = vld [vmem:[#allocation2 + $0xb8] sm:$0xff]  ;;  %3709 = vmatpush.bf16.msrb.mxu0 %v7974_v1  ;;  %v8166_v8 = vor.u32 %v11175_v2, %v11173_v40  ;;  %3737 = vmatpush.bf16.msrb.mxu2 %v7978_v6  ;;  %v2807_v1 = vunpack.c.l.bf16 %v2803_v53 }
 0x36b   : > { %v2770_v25 = vld [vmem:[#allocation2 + $0x78] sm:$0xff]  ;;  %v2774_v33 = vadd.f32 %v2766_v28, %v11095_v10  ;;  %v7914_v10 = vor.u32 %v11177_v59, %v11187_v9  ;;  %v2786_v6 = vmul.f32 0.5, %v2784_v52  ;;  %v2808_v9 = vunpack.c.l.bf16 %v2804_v57 }
 0x36c   : > { %v11200_v43 = vld [vmem:[#allocation12 + $0x2e8] sm:$0xf0]  ;;  %v11202_v45 = vld [vmem:[#allocation12 + $0x88] sm:$0xf]  ;;  %v2778_v26 = vadd.f32 %v2770_v25, %v11099_v50  ;;  %3723 = vmatpush.bf16.msrb.mxu1 %v8230_v39  ;;  %v2783_v50 = vunpack.c.l.bf16 %v2779_v44  ;;  %3751 = vmatpush.bf16.msrb.mxu3 %v8234_v7  ;;  %v2809_v27 = vmul.f32 0.5, %v2807_v1 }
 0x36d   : > { %v11204_v5 = vld [vmem:[#allocation12 + $0xa4] sm:$0xf0]  ;;  %v2780_v36 = vpack.c.bf16 %v2774_v33, %v2773_v30  ;;  %v8170_v55 = vor.u32 %v11191_v13, %v11200_v43  ;;  %v9703_v56 = vld [vmem:[#allocation12 + $0x8c] sm:$0xf]  ;;  %v2788_v28 = vpack.c.bf16 %v2786_v6, %v2786_v6  ;;  %v2810_v18 = vmul.f32 0.5, %v2808_v9 }
 0x36e   : > { %v11215_v58 = vld [vmem:[#allocation12 + $0x288] sm:$0xf]  ;;  %v2782_v54 = vpack.c.bf16 %v2778_v26, %v2777_v22  ;;  %v7878_v46 = vor.u32 %v11204_v5, %v11202_v45  ;;  %v7879_v15 = vld [vmem:[#allocation12 + $0xa8] sm:$0xf0]  ;;  %v2785_v63 = vmul.f32 0.5, %v2783_v50  ;;  %3710 = vmatpush.bf16.msrb.mxu0 %v7942_v49  ;;  %3738 = vmatpush.bf16.msrb.mxu2 %v7946_v34  ;;  %v2811_v20 = vpack.c.bf16 %v2809_v27, %v2809_v27 }
 0x36f   : > { %v9771_v12 = vld [vmem:[#allocation12 + $0x2a4] sm:$0xf0]  ;;  %v2825_v61 = vunpack.c.l.bf16 %v2780_v36  ;;  %v2835_v32 = vrot.slane %v2780_v36, 4  ;;  %v9767_v2 = vld [vmem:[#allocation12 + $0x28c] sm:$0xf]  ;;  %v7882_v35 = vor.u32 %v9703_v56, %v7879_v15  ;;  %v2790_v48 = vunpack.c.l.bf16 %v2788_v28 }
 0x370   : > { %v8134_v39 = vor.u32 %v9771_v12, %v11215_v58  ;;  %v2826_v37 = vunpack.c.l.bf16 %v2782_v54  ;;  %v2836_v47 = vrot.slane %v2782_v54, 4  ;;  %3724 = vmatpush.bf16.msrb.mxu1 %v8198_v0  ;;  %v8135_v59 = vld [vmem:[#allocation12 + $0x2a8] sm:$0xf0]  ;;  %v2787_v7 = vpack.c.bf16 %v2785_v63, %v2785_v63  ;;  %3752 = vmatpush.bf16.msrb.mxu3 %v8202_v16  ;;  %v9699_v19 = vld [vmem:[#allocation12 + $0x64] sm:$0xf0] }
 0x371   : > { %v2839_v40 = vunpack.c.l.bf16 %v2835_v32  ;;  %10246 = vtanh.f32 %v2825_v61  ;;  %v8138_v3 = vor.u32 %v9767_v2, %v8135_v59  ;;  %v2812_v4 = vpack.c.bf16 %v2810_v18, %v2810_v18  ;;  %v9763_v58 = vld [vmem:[#allocation12 + $0x264] sm:$0xf0]  ;;  %v9695_v12 = vld [vmem:[#allocation12 + $0x4c] sm:$0xf] }
 0x372   : > { %v2840_v13 = vunpack.c.l.bf16 %v2836_v47  ;;  %v2789_v49 = vunpack.c.l.bf16 %v2787_v7  ;;  %3711 = vmatpush.bf16.msrb.mxu0 %v7910_v29  ;;  %10248 = vtanh.f32 %v2826_v37  ;;  %3739 = vmatpush.bf16.msrb.mxu2 %v7914_v10  ;;  %v2813_v25 = vunpack.c.l.bf16 %v2811_v20  ;;  %v7845_v29 = vld [vmem:[#allocation12 + $0x48] sm:$0xf]  ;;  %v7847_v17 = vld [vmem:[#allocation12 + $0x68] sm:$0xf0] }
 0x373   : > { %v2841_v14 = vmul.f32 0.5, %v2839_v40  ;;  %v2869_v33 = vpack.c.bf16 %v11122_v41, %v11122_v41  ;;  %v2814_v43 = vunpack.c.l.bf16 %v2812_v4  ;;  %v2880_v22 = vunpack.c.l.b16 %v2870_v42  ;;  %v9759_v61 = vld [vmem:[#allocation12 + $0x24c] sm:$0xf]  ;;  %v7813_v56 = vld [vmem:[#allocation12 + $0x8] sm:$0xf] }
 0x374   : > { %v2842_v0 = vmul.f32 0.5, %v2840_v13  ;;  %3725 = vmatpush.bf16.msrb.mxu1 %v8166_v8  ;;  %10250 = vtanh.f32 %v2789_v49  ;;  %3753 = vmatpush.bf16.msrb.mxu3 %v8170_v55  ;;  %v8101_v8 = vld [vmem:[#allocation12 + $0x248] sm:$0xf]  ;;  %v7846_v36 = vor.u32 %v9699_v19, %v7845_v29  ;;  %v8103_v32 = vld [vmem:[#allocation12 + $0x268] sm:$0xf0] }
 0x375   : > { %v2843_v34 = vpack.c.bf16 %v2841_v14, %v2841_v14  ;;  %10252 = vtanh.f32 %v2790_v48  ;;  %v2879_v21 = vunpack.c.l.b16 %v2869_v33  ;;  %v8102_v55 = vor.u32 %v9763_v58, %v8101_v8  ;;  %v9691_v1 = vld [vmem:[#allocation12 + $0x24] sm:$0xf0]  ;;  %v9687_v6 = vld [vmem:[#allocation12 + $0xc] sm:$0xf]  ;;  %v8301_v48 = vld [vmem:[#allocation12 + $0x3d0] sm:$0xf] }
 0x376   : > { %v2844_v16 = vpack.c.bf16 %v2842_v0, %v2842_v0  ;;  %3712 = vmatpush.bf16.msrb.mxu0 %v7878_v46  ;;  %10254 = vtanh.f32 %v2813_v25  ;;  %3740 = vmatpush.bf16.msrb.mxu2 %v7882_v35  ;;  %v7850_v46 = vor.u32 %v9695_v12, %v7847_v17  ;;  %v8106_v57 = vor.u32 %v9759_v61, %v8103_v32  ;;  %v9755_v37 = vld [vmem:[#allocation12 + $0x224] sm:$0xf0]  ;;  %v7815_v7 = vld [vmem:[#allocation12 + $0x28] sm:$0xf0]  ;;  %v9812_v4 = vld [vmem:[#allocation12 + $0x3ec] sm:$0xf0] }
 0x377   : > { %v2845_v30 = vunpack.c.l.bf16 %v2843_v34  ;;  %v10247_v45 = vpop.eup %10246  ;;  %10256 = vtanh.f32 %v2814_v43  ;;  %v11226_v44 = vpack.c.b16 %v2880_v22, %v2879_v21  ;;  %v7814_v2 = vor.u32 %v9691_v1, %v7813_v56  ;;  %v9751_v9 = vld [vmem:[#allocation12 + $0x20c] sm:$0xf]  ;;  %v8303_v21 = vld [vmem:[#allocation12 + $0x3f0] sm:$0xf0]  ;;  %v8269_v8 = vld [vmem:[#allocation12 + $0x390] sm:$0xf] }
 0x378   : > { %v2846_v5 = vunpack.c.l.bf16 %v2844_v16  ;;  %3726 = vmatpush.bf16.msrb.mxu1 %v8134_v39  ;;  %v10249_v26 = vpop.eup %10248  ;;  %3754 = vmatpush.bf16.msrb.mxu3 %v8138_v3  ;;  %v2829_v50 = vpack.c.bf16 %v10247_v45, %v10247_v45  ;;  %v8069_v39 = vld [vmem:[#allocation12 + $0x208] sm:$0xf]  ;;  %v7818_v28 = vor.u32 %v9687_v6, %v7815_v7  ;;  %v8071_v49 = vld [vmem:[#allocation12 + $0x228] sm:$0xf0]  ;;  %v8302_v45 = vor.u32 %v9812_v4, %v8301_v48  ;;  %v8237_v56 = vld [vmem:[#allocation12 + $0x350] sm:$0xf] }
 0x379   : > { %10258 = vtanh.f32 %v2845_v30  ;;  %3701 = vmatmul.bf16.vlgmr.msra.gmra.mxu3 %v11226_v44  ;;  %3673 = vmatmul.bf16.vlgmr.msra.gmra.mxu1 %v11226_v44  ;;  %v2830_v53 = vpack.c.bf16 %v10249_v26, %v10249_v26  ;;  %v8070_v59 = vor.u32 %v9755_v37, %v8069_v39  ;;  %v8074_v34 = vor.u32 %v9751_v9, %v8071_v49  ;;  %v9792_v1 = vld [vmem:[#allocation12 + $0x354] sm:$0xf]  ;;  %v8173_v7 = vld [vmem:[#allocation12 + $0x2d0] sm:$0xf] }
 0x37a   : > { %v10251_v41 = vpop.eup %10250  ;;  %10260 = vtanh.f32 %v2846_v5  ;;  %3713 = vmatpush.bf16.msrb.mxu0 %v7846_v36  ;;  %3741 = vmatpush.bf16.msrb.mxu2 %v7850_v46  ;;  %v2831_v3 = vunpack.c.l.bf16 %v2829_v50  ;;  %v9808_v5 = vld [vmem:[#allocation12 + $0x3d4] sm:$0xf]  ;;  %v9780_v9 = vld [vmem:[#allocation12 + $0x2ec] sm:$0xf0] }
 0x37b   : > { %v2793_v10 = vpack.c.bf16 %v10251_v41, %v10251_v41  ;;  %v10253_v54 = vpop.eup %10252  ;;  %v2832_v0 = vunpack.c.l.bf16 %v2830_v53  ;;  %v8306_v19 = vor.u32 %v9808_v5, %v8303_v21  ;;  %v9800_v53 = vld [vmem:[#allocation12 + $0x394] sm:$0xf]  ;;  %v8174_v49 = vor.u32 %v9780_v9, %v8173_v7  ;;  %v8277_v7 = vld [vmem:[#allocation12 + $0x398] sm:$0xf] }
 0x37c   : > { %v10255_v15 = vpop.eup %10254  ;;  %v2794_v52 = vpack.c.bf16 %v10253_v54, %v10253_v54  ;;  %3727 = vmatpush.bf16.msrb.mxu1 %v8102_v55  ;;  %3755 = vmatpush.bf16.msrb.mxu3 %v8106_v57  ;;  %v8271_v55 = vld [vmem:[#allocation12 + $0x3b0] sm:$0xf0]  ;;  %v9805_v9 = vld [vmem:[#allocation12 + $0x3b4] sm:$0xf0] }
 0x37d   : > { %v2795_v63 = vunpack.c.l.bf16 %v2793_v10  ;;  %v10257_v47 = vpop.eup %10256  ;;  %v2817_v40 = vpack.c.bf16 %v10255_v15, %v10255_v15  ;;  %v9804_v10 = vld [vmem:[#allocation12 + $0x3ac] sm:$0xf0]  ;;  %v8274_v61 = vor.u32 %v9800_v53, %v8271_v55  ;;  %v8239_v39 = vld [vmem:[#allocation12 + $0x370] sm:$0xf0] }
 0x37e   : > { %v2796_v35 = vunpack.c.l.bf16 %v2794_v52  ;;  %v2818_v14 = vpack.c.bf16 %v10257_v47, %v10257_v47  ;;  %3714 = vmatpush.bf16.msrb.mxu0 %v7814_v2  ;;  %3742 = vmatpush.bf16.msrb.mxu2 %v7818_v28  ;;  %v8270_v50 = vor.u32 %v9804_v10, %v8269_v8  ;;  %v9796_v15 = vld [vmem:[#allocation12 + $0x36c] sm:$0xf0]  ;;  %v9784_v2 = vld [vmem:[#allocation12 + $0x314] sm:$0xf] }
 0x37f   : > { %v10259_v27 = vpop.eup %10258  ;;  %v2797_v13 = vmul.f32 0.5, %v2795_v63  ;;  %v2819_v20 = vunpack.c.l.bf16 %v2817_v40  ;;  %v8238_v57 = vor.u32 %v9796_v15, %v8237_v56  ;;  %v8205_v47 = vld [vmem:[#allocation12 + $0x310] sm:$0xf]  ;;  %v8143_v21 = vld [vmem:[#allocation12 + $0x2b0] sm:$0xf0] }
 0x380   : > { %v10261_v18 = vpop.eup %10260  ;;  %v2798_v25 = vmul.f32 0.5, %v2796_v35  ;;  %v2820_v30 = vunpack.c.l.bf16 %v2818_v14  ;;  %v2849_v33 = vpack.c.bf16 %v10259_v27, %v10259_v27  ;;  %3728 = vmatpush.bf16.msrb.mxu1 %v8070_v59  ;;  %3756 = vmatpush.bf16.msrb.mxu3 %v8074_v34  ;;  %v8207_v59 = vld [vmem:[#allocation12 + $0x330] sm:$0xf0]  ;;  %v8013_v8 = vld [vmem:[#allocation12 + $0x190] sm:$0xf] }
 0x381   : > { %v2799_v16 = vadd.f32 0.5, %v2797_v13  ;;  %v2821_v42 = vmul.f32 0.5, %v2819_v20  ;;  %v2850_v43 = vpack.c.bf16 %v10261_v18, %v10261_v18  ;;  %v8210_v35 = vor.u32 %v9784_v2, %v8207_v59  ;;  %v9776_v13 = vld [vmem:[#allocation12 + $0x2d4] sm:$0xf]  ;;  %v9740_v10 = vld [vmem:[#allocation12 + $0x1ac] sm:$0xf0] }
 0x382   : > { %v2800_v22 = vadd.f32 0.5, %v2798_v25  ;;  %v2822_v26 = vmul.f32 0.5, %v2820_v30  ;;  %v2851_v58 = vunpack.c.l.bf16 %v2849_v33  ;;  %v8175_v14 = vld [vmem:[#allocation12 + $0x2f0] sm:$0xf0]  ;;  %v8045_v25 = vld [vmem:[#allocation12 + $0x1d0] sm:$0xf]  ;;  %v8014_v15 = vor.u32 %v9740_v10, %v8013_v8 }
 0x383   : > { %v2823_v41 = vadd.f32 0.5, %v2821_v42  ;;  %v2859_v29 = vmul.f32 %v2831_v3, %v2799_v16  ;;  %v2852_v17 = vunpack.c.l.bf16 %v2850_v43  ;;  %v8141_v3 = vld [vmem:[#allocation12 + $0x290] sm:$0xf]  ;;  %v8178_v48 = vor.u32 %v9776_v13, %v8175_v14  ;;  %v9744_v33 = vld [vmem:[#allocation12 + $0x1d4] sm:$0xf] }
 0x384   : > { %3777 = vmatpush.bf16.msra.mxu1 %v8302_v45  ;;  %v2824_v36 = vadd.f32 0.5, %v2822_v26  ;;  %v2860_v12 = vmul.f32 %v2832_v0, %v2800_v22  ;;  %3805 = vmatpush.bf16.msra.mxu3 %v8306_v19  ;;  %v2853_v52 = vmul.f32 0.5, %v2851_v58  ;;  %v9772_v0 = vld [vmem:[#allocation12 + $0x2ac] sm:$0xf0]  ;;  %v8047_v42 = vld [vmem:[#allocation12 + $0x1f0] sm:$0xf0] }
 0x385   : > { %v2857_v54 = vmul.f32 %v2823_v41, %v11045_v60  ;;  %v2854_v37 = vmul.f32 0.5, %v2852_v17  ;;  %v8242_v60 = vor.u32 %v9792_v1, %v8239_v39  ;;  %v9748_v16 = vld [vmem:[#allocation12 + $0x1ec] sm:$0xf0]  ;;  %v8142_v43 = vor.u32 %v9772_v0, %v8141_v3  ;;  %v9768_v45 = vld [vmem:[#allocation12 + $0x294] sm:$0xf] }
 0x386   : > { %v2858_v46 = vmul.f32 %v2824_v36, %v11053_v62  ;;  %v9788_v62 = vld [vmem:[#allocation12 + $0x32c] sm:$0xf0]  ;;  %v2855_v6 = vadd.f32 0.5, %v2853_v52  ;;  %v8050_v19 = vor.u32 %v9744_v33, %v8047_v42  ;;  %v9736_v58 = vld [vmem:[#allocation12 + $0x194] sm:$0xf]  ;;  %v8146_v17 = vor.u32 %v9768_v45, %v8143_v21 }
 0x387   : > { %v11232_v32 = vadd.f32 %v2859_v29, %v2857_v54  ;;  %v8206_v40 = vor.u32 %v9788_v62, %v8205_v47  ;;  %v2856_v27 = vadd.f32 0.5, %v2854_v37  ;;  %v8109_v22 = vld [vmem:[#allocation12 + $0x250] sm:$0xf]  ;;  %v8046_v29 = vor.u32 %v9748_v16, %v8045_v25  ;;  %v8111_v53 = vld [vmem:[#allocation12 + $0x270] sm:$0xf0] }
 0x388   : > { %3778 = vmatpush.bf16.msra.mxu1 %v8270_v50  ;;  %v11234_v63 = vadd.f32 %v2860_v12, %v2858_v46  ;;  %3806 = vmatpush.bf16.msra.mxu3 %v8274_v61  ;;  %v9764_v26 = vld [vmem:[#allocation12 + $0x26c] sm:$0xf0]  ;;  %v8015_v12 = vld [vmem:[#allocation12 + $0x1b0] sm:$0xf0]  ;;  %v8309_v61 = vld [vmem:[#allocation12 + $0x3d8] sm:$0xf]  ;;  %v8278_v3 = vor.u32 %v9805_v9, %v8277_v7 }
 0x389   : > { %10262 = vtanh.f32 %v11232_v32  ;;  %3757 = vmatmul.bf16.vlgmr.msrb.gmra.mxu3 %v11226_v44  ;;  %3729 = vmatmul.bf16.vlgmr.msrb.gmra.mxu1 %v11226_v44  ;;  %v8110_v54 = vor.u32 %v9764_v26, %v8109_v22  ;;  %v9760_v50 = vld [vmem:[#allocation12 + $0x254] sm:$0xf]  ;;  %v8077_v55 = vld [vmem:[#allocation12 + $0x210] sm:$0xf]  ;;  %v9813_v56 = vld [vmem:[#allocation12 + $0x3f4] sm:$0xf0]  ;;  %v8018_v52 = vor.u32 %v9736_v58, %v8015_v12 }
 0x38a   : > { %10264 = vtanh.f32 %v11234_v63  ;;  %v9756_v46 = vld [vmem:[#allocation12 + $0x22c] sm:$0xf0]  ;;  %v9728_v39 = vld [vmem:[#allocation12 + $0x154] sm:$0xf]  ;;  %v8310_v2 = vor.u32 %v9813_v56, %v8309_v61  ;;  %v9809_v59 = vld [vmem:[#allocation12 + $0x3dc] sm:$0xf] }
 0x38b   : > { %v9732_v1 = vld [vmem:[#allocation12 + $0x16c] sm:$0xf0]  ;;  %v7983_v37 = vld [vmem:[#allocation12 + $0x170] sm:$0xf0]  ;;  %v8078_v47 = vor.u32 %v9756_v46, %v8077_v55  ;;  %v9801_v0 = vld [vmem:[#allocation12 + $0x39c] sm:$0xf] }
 0x38c   : > { %3779 = vmatpush.bf16.msra.mxu1 %v8238_v57  ;;  %3807 = vmatpush.bf16.msra.mxu3 %v8242_v60  ;;  %v7981_v57 = vld [vmem:[#allocation12 + $0x150] sm:$0xf]  ;;  %v8114_v60 = vor.u32 %v9760_v50, %v8111_v53  ;;  %v9752_v62 = vld [vmem:[#allocation12 + $0x214] sm:$0xf]  ;;  %v9793_v21 = vld [vmem:[#allocation12 + $0x35c] sm:$0xf] }
 0x38d   : > { %v7949_v13 = vld [vmem:[#allocation12 + $0x110] sm:$0xf]  ;;  %v9712_v42 = vld [vmem:[#allocation12 + $0xd4] sm:$0xf]  ;;  %v8247_v22 = vld [vmem:[#allocation12 + $0x378] sm:$0xf0] }
 0x38e   : > { %v9724_v14 = vld [vmem:[#allocation12 + $0x12c] sm:$0xf0]  ;;  %v8213_v26 = vld [vmem:[#allocation12 + $0x318] sm:$0xf]  ;;  %v9704_v58 = vld [vmem:[#allocation12 + $0x94] sm:$0xf] }
 0x38f   : > { %v10263_v28 = vpop.eup %10262  ;;  %v7950_v25 = vor.u32 %v9724_v14, %v7949_v13  ;;  %v9716_v33 = vld [vmem:[#allocation12 + $0xec] sm:$0xf0]  ;;  %v7887_v12 = vld [vmem:[#allocation12 + $0xb0] sm:$0xf0]  ;;  %v9785_v50 = vld [vmem:[#allocation12 + $0x31c] sm:$0xf] }
 0x390   : > { %3780 = vmatpush.bf16.msra.mxu1 %v8206_v40  ;;  %v10265_v18 = vpop.eup %10264  ;;  %v2865_v20 = vmul.f32 %v10263_v28, %v2855_v6  ;;  %3808 = vmatpush.bf16.msra.mxu3 %v8210_v35  ;;  %v8079_v40 = vld [vmem:[#allocation12 + $0x230] sm:$0xf0]  ;;  %v8311_v6 = vld [vmem:[#allocation12 + $0x3f8] sm:$0xf0]  ;;  %v7986_v35 = vor.u32 %v9728_v39, %v7983_v37  ;;  %v7885_v8 = vld [vmem:[#allocation12 + $0x90] sm:$0xf]  ;;  %v7890_v56 = vor.u32 %v9704_v58, %v7887_v12 }
 0x391   : > { %v2866_v34 = vmul.f32 %v10265_v18, %v2856_v27  ;;  %v7982_v27 = vor.u32 %v9732_v1, %v7981_v57  ;;  %v9720_v28 = vld [vmem:[#allocation12 + $0x114] sm:$0xf]  ;;  %v8082_v18 = vor.u32 %v9752_v62, %v8079_v40  ;;  %v9708_v10 = vld [vmem:[#allocation12 + $0xac] sm:$0xf0]  ;;  %v8215_v53 = vld [vmem:[#allocation12 + $0x338] sm:$0xf0] }
 0x392   : > { %v2867_v4 = vpack.c.bf16 %v2865_v20, %v2865_v20  ;;  %v8314_v20 = vor.u32 %v9809_v59, %v8311_v6  ;;  %v8181_v55 = vld [vmem:[#allocation12 + $0x2d8] sm:$0xf]  ;;  %v7886_v61 = vor.u32 %v9708_v10, %v7885_v8  ;;  %v9696_v57 = vld [vmem:[#allocation12 + $0x54] sm:$0xf]  ;;  %v8218_v39 = vor.u32 %v9785_v50, %v8215_v53  ;;  %v7821_v6 = vld [vmem:[#allocation12 + $0x10] sm:$0xf] }
 0x393   : > { %v2868_v30 = vpack.c.bf16 %v2866_v34, %v2866_v34  ;;  %v8279_v34 = vld [vmem:[#allocation12 + $0x3b8] sm:$0xf0]  ;;  %v9781_v46 = vld [vmem:[#allocation12 + $0x2f4] sm:$0xf0]  ;;  %v7855_v1 = vld [vmem:[#allocation12 + $0x70] sm:$0xf0] }
 0x394   : > { %3781 = vmatpush.bf16.msra.mxu1 %v8174_v49  ;;  %v2873_v5 = vunpack.c.l.b16 %v2867_v4  ;;  %3809 = vmatpush.bf16.msra.mxu3 %v8178_v48  ;;  %v7951_v49 = vld [vmem:[#allocation12 + $0x130] sm:$0xf0]  ;;  %v8245_v48 = vld [vmem:[#allocation12 + $0x358] sm:$0xf]  ;;  %v8282_v45 = vor.u32 %v9801_v0, %v8279_v34  ;;  %v8182_v37 = vor.u32 %v9781_v46, %v8181_v55  ;;  %v7858_v59 = vor.u32 %v9696_v57, %v7855_v1  ;;  %v9692_v7 = vld [vmem:[#allocation12 + $0x2c] sm:$0xf0] }
 0x395   : > { %v2874_v41 = vunpack.c.l.b16 %v2868_v30  ;;  %v9797_v4 = vld [vmem:[#allocation12 + $0x374] sm:$0xf0]  ;;  %v7954_v16 = vor.u32 %v9720_v28, %v7951_v49  ;;  %v7917_v30 = vld [vmem:[#allocation12 + $0xd0] sm:$0xf]  ;;  %v9688_v9 = vld [vmem:[#allocation12 + $0x14] sm:$0xf] }
 0x396   : > { %v8149_v62 = vld [vmem:[#allocation12 + $0x298] sm:$0xf]  ;;  %v9745_v14 = vld [vmem:[#allocation12 + $0x1dc] sm:$0xf] }
 0x397   : > { %v11240_v36 = vpack.c.b16 %v2874_v41, %v2873_v5  ;;  %v8246_v5 = vor.u32 %v9797_v4, %v8245_v48  ;;  %v9789_v41 = vld [vmem:[#allocation12 + $0x334] sm:$0xf0]  ;;  %v8055_v28 = vld [vmem:[#allocation12 + $0x1f8] sm:$0xf0]  ;;  %v7822_v48 = vor.u32 %v9692_v7, %v7821_v6 }
 0x398   : > { %3782 = vmatpush.bf16.msra.mxu1 %v8142_v43  ;;  %3810 = vmatpush.bf16.msra.mxu3 %v8146_v17  ;;  %v7919_v43 = vld [vmem:[#allocation12 + $0xf0] sm:$0xf0]  ;;  %v8250_v17 = vor.u32 %v9793_v21, %v8247_v22  ;;  %v9773_v40 = vld [vmem:[#allocation12 + $0x2b4] sm:$0xf0]  ;;  %v9761_v21 = vld [vmem:[#allocation12 + $0x25c] sm:$0xf] }
 0x399   : > { %3687 = vmatmul.bf16.vlgmr.msra.gmra.mxu2 %v11240_v36  ;;  %3659 = vmatmul.bf16.vlgmr.msra.gmra.mxu0 %v11240_v36  ;;  %v9749_v13 = vld [vmem:[#allocation12 + $0x1f4] sm:$0xf0]  ;;  %v8119_v22 = vld [vmem:[#allocation12 + $0x278] sm:$0xf0] }
 0x39a   : > { %3763 = vmatpush.bf16.msra.mxu0 %v8046_v29  ;;  %3791 = vmatpush.bf16.msra.mxu2 %v8050_v19  ;;  %v7918_v29 = vor.u32 %v9716_v33, %v7917_v30  ;;  %v7922_v19 = vor.u32 %v9712_v42, %v7919_v43  ;;  %v8117_v0 = vld [vmem:[#allocation12 + $0x258] sm:$0xf]  ;;  %v9737_v42 = vld [vmem:[#allocation12 + $0x19c] sm:$0xf] }
 0x39b   : > { %v9765_v34 = vld [vmem:[#allocation12 + $0x274] sm:$0xf0]  ;;  %v8023_v43 = vld [vmem:[#allocation12 + $0x1b8] sm:$0xf0] }
 0x39c   : > { %3783 = vmatpush.bf16.msra.mxu1 %v8110_v54  ;;  %3811 = vmatpush.bf16.msra.mxu3 %v8114_v60  ;;  %v8214_v54 = vor.u32 %v9789_v41, %v8213_v26  ;;  %v9777_v60 = vld [vmem:[#allocation12 + $0x2dc] sm:$0xf]  ;;  %v8021_v30 = vld [vmem:[#allocation12 + $0x198] sm:$0xf] }
 0x39d   : > { %v9741_v33 = vld [vmem:[#allocation12 + $0x1b4] sm:$0xf0]  ;;  %v9729_v58 = vld [vmem:[#allocation12 + $0x15c] sm:$0xf] }
 0x39e   : > { %3764 = vmatpush.bf16.msra.mxu0 %v8014_v15  ;;  %3792 = vmatpush.bf16.msra.mxu2 %v8018_v52  ;;  %v7853_v15 = vld [vmem:[#allocation12 + $0x50] sm:$0xf]  ;;  %v8085_v26 = vld [vmem:[#allocation12 + $0x218] sm:$0xf]  ;;  %v7991_v12 = vld [vmem:[#allocation12 + $0x178] sm:$0xf0] }
 0x39f   : > { %v9700_v52 = vld [vmem:[#allocation12 + $0x6c] sm:$0xf0]  ;;  %v9757_v41 = vld [vmem:[#allocation12 + $0x234] sm:$0xf0]  ;;  %v9753_v50 = vld [vmem:[#allocation12 + $0x21c] sm:$0xf]  ;;  %v7994_v46 = vor.u32 %v9729_v58, %v7991_v12 }
 0x3a0   : > { %3784 = vmatpush.bf16.msra.mxu1 %v8078_v47  ;;  %3812 = vmatpush.bf16.msra.mxu3 %v8082_v18  ;;  %v8183_v47 = vld [vmem:[#allocation12 + $0x2f8] sm:$0xf0]  ;;  %v8150_v18 = vor.u32 %v9773_v40, %v8149_v62  ;;  %v7989_v8 = vld [vmem:[#allocation12 + $0x158] sm:$0xf] }
 0x3a1   : > { %v8186_v49 = vor.u32 %v9777_v60, %v8183_v47  ;;  %v9733_v10 = vld [vmem:[#allocation12 + $0x174] sm:$0xf0]  ;;  %v8087_v53 = vld [vmem:[#allocation12 + $0x238] sm:$0xf0] }
 0x3a2   : > { %3765 = vmatpush.bf16.msra.mxu0 %v7982_v27  ;;  %3793 = vmatpush.bf16.msra.mxu2 %v7986_v35  ;;  %v7823_v27 = vld [vmem:[#allocation12 + $0x30] sm:$0xf0]  ;;  %v8053_v35 = vld [vmem:[#allocation12 + $0x1d8] sm:$0xf]  ;;  %v7990_v55 = vor.u32 %v9733_v10, %v7989_v8  ;;  %v8090_v57 = vor.u32 %v9753_v50, %v8087_v53  ;;  %v9713_v47 = vld [vmem:[#allocation12 + $0xdc] sm:$0xf] }
 0x3a3   : > { %3785 = vmatmul.bf16.vlgmr.msra.gmra.mxu1 %v11226_v44  ;;  %3813 = vmatmul.bf16.vlgmr.msra.gmra.mxu3 %v11226_v44  ;;  %v7826_v4 = vor.u32 %v9688_v9, %v7823_v27  ;;  %v9717_v60 = vld [vmem:[#allocation12 + $0xf4] sm:$0xf0]  ;;  %v7927_v62 = vld [vmem:[#allocation12 + $0xf8] sm:$0xf0] }
 0x3a4   : > { %3833 = vmatpush.bf16.msrb.mxu1 %v8310_v2  ;;  %3861 = vmatpush.bf16.msrb.mxu3 %v8314_v20  ;;  %v7854_v2 = vor.u32 %v9700_v52, %v7853_v15  ;;  %v9769_v20 = vld [vmem:[#allocation12 + $0x29c] sm:$0xf]  ;;  %v9709_v6 = vld [vmem:[#allocation12 + $0xb4] sm:$0xf0] }
 0x3a5   : > { %v9721_v15 = vld [vmem:[#allocation12 + $0x11c] sm:$0xf] }
 0x3a6   : > { %3766 = vmatpush.bf16.msra.mxu0 %v7950_v25  ;;  %3794 = vmatpush.bf16.msra.mxu2 %v7954_v16  ;;  %v8054_v25 = vor.u32 %v9749_v13, %v8053_v35  ;;  %v8058_v16 = vor.u32 %v9745_v14, %v8055_v28  ;;  %v7959_v52 = vld [vmem:[#allocation12 + $0x138] sm:$0xf0]  ;;  %v7861_v13 = vld [vmem:[#allocation12 + $0x58] sm:$0xf] }
 0x3a7   : > { %v9705_v7 = vld [vmem:[#allocation12 + $0x9c] sm:$0xf]  ;;  %v9701_v14 = vld [vmem:[#allocation12 + $0x74] sm:$0xf0] }
 0x3a8   : > { %3834 = vmatpush.bf16.msrb.mxu1 %v8278_v3  ;;  %3862 = vmatpush.bf16.msrb.mxu3 %v8282_v45  ;;  %v8151_v3 = vld [vmem:[#allocation12 + $0x2b8] sm:$0xf0] }
 0x3a9   : > { %3743 = vmatmul.bf16.vlgmr.msrb.gmra.mxu2 %v11240_v36  ;;  %3715 = vmatmul.bf16.vlgmr.msrb.gmra.mxu0 %v11240_v36  ;;  %v8154_v45 = vor.u32 %v9769_v20, %v8151_v3  ;;  %v7895_v9 = vld [vmem:[#allocation12 + $0xb8] sm:$0xf0]  ;;  %v7829_v3 = vld [vmem:[#allocation12 + $0x18] sm:$0xf] }
 0x3aa   : > { %3767 = vmatpush.bf16.msra.mxu0 %v7918_v29  ;;  %3795 = vmatpush.bf16.msra.mxu2 %v7922_v19  ;;  %v8022_v29 = vor.u32 %v9741_v33, %v8021_v30  ;;  %v8026_v19 = vor.u32 %v9737_v42, %v8023_v43  ;;  %v7898_v35 = vor.u32 %v9705_v7, %v7895_v9  ;;  %v9697_v28 = vld [vmem:[#allocation12 + $0x5c] sm:$0xf] }
 0x3ac   : > { %3835 = vmatpush.bf16.msrb.mxu1 %v8246_v5  ;;  %3863 = vmatpush.bf16.msrb.mxu3 %v8250_v17  ;;  %v8118_v5 = vor.u32 %v9765_v34, %v8117_v0  ;;  %v8122_v17 = vor.u32 %v9761_v21, %v8119_v22  ;;  %v9693_v0 = vld [vmem:[#allocation12 + $0x34] sm:$0xf0]  ;;  %v9689_v34 = vld [vmem:[#allocation12 + $0x1c] sm:$0xf] }
 0x3ae   : > { %3768 = vmatpush.bf16.msra.mxu0 %v7886_v61  ;;  %3796 = vmatpush.bf16.msra.mxu2 %v7890_v56  ;;  %v7957_v61 = vld [vmem:[#allocation12 + $0x118] sm:$0xf] }
 0x3af   : > { %v9725_v56 = vld [vmem:[#allocation12 + $0x134] sm:$0xf0] }
 0x3b0   : > { %3836 = vmatpush.bf16.msrb.mxu1 %v8214_v54  ;;  %3864 = vmatpush.bf16.msrb.mxu3 %v8218_v39  ;;  %v8086_v54 = vor.u32 %v9757_v41, %v8085_v26  ;;  %v7958_v1 = vor.u32 %v9725_v56, %v7957_v61  ;;  %v7962_v39 = vor.u32 %v9721_v15, %v7959_v52 }
 0x3b2   : > { %3769 = vmatpush.bf16.msra.mxu0 %v7854_v2  ;;  %3797 = vmatpush.bf16.msra.mxu2 %v7858_v59  ;;  %v7930_v2 = vor.u32 %v9713_v47, %v7927_v62  ;;  %v7893_v59 = vld [vmem:[#allocation12 + $0x98] sm:$0xf] }
 0x3b3   : > { %v7894_v27 = vor.u32 %v9709_v6, %v7893_v59 }
 0x3b4   : > { %3837 = vmatpush.bf16.msrb.mxu1 %v8182_v37  ;;  %3865 = vmatpush.bf16.msrb.mxu3 %v8186_v49  ;;  %v7925_v37 = vld [vmem:[#allocation12 + $0xd8] sm:$0xf]  ;;  %v7863_v49 = vld [vmem:[#allocation12 + $0x78] sm:$0xf0] }
 0x3b5   : > { %v7926_v40 = vor.u32 %v9717_v60, %v7925_v37  ;;  %v7866_v20 = vor.u32 %v9697_v28, %v7863_v49 }
 0x3b6   : > { %3770 = vmatpush.bf16.msra.mxu0 %v7822_v48  ;;  %3798 = vmatpush.bf16.msra.mxu2 %v7826_v4  ;;  %v7831_v48 = vld [vmem:[#allocation12 + $0x38] sm:$0xf0] }
 0x3b7   : > { %v7834_v4 = vor.u32 %v9689_v34, %v7831_v48 }
 0x3b8   : > { %3838 = vmatpush.bf16.msrb.mxu1 %v8150_v18  ;;  %3866 = vmatpush.bf16.msrb.mxu3 %v8154_v45  ;;  %v7862_v18 = vor.u32 %v9701_v14, %v7861_v13 }
 0x3b9   : > { %3799 = vmatmul.bf16.vlgmr.msra.gmra.mxu2 %v11240_v36  ;;  %3771 = vmatmul.bf16.vlgmr.msra.gmra.mxu0 %v11240_v36 }
 0x3ba   : > { %3819 = vmatpush.bf16.msrb.mxu0 %v8054_v25  ;;  %3847 = vmatpush.bf16.msrb.mxu2 %v8058_v16 }
 0x3bc   : > { %3839 = vmatpush.bf16.msrb.mxu1 %v8118_v5  ;;  %3867 = vmatpush.bf16.msrb.mxu3 %v8122_v17 }
 0x3be   : > { %3820 = vmatpush.bf16.msrb.mxu0 %v8022_v29  ;;  %3848 = vmatpush.bf16.msrb.mxu2 %v8026_v19 }
 0x3c0   : > { %3840 = vmatpush.bf16.msrb.mxu1 %v8086_v54  ;;  %3868 = vmatpush.bf16.msrb.mxu3 %v8090_v57 }
 0x3c2   : > { %3821 = vmatpush.bf16.msrb.mxu0 %v7990_v55  ;;  %3849 = vmatpush.bf16.msrb.mxu2 %v7994_v46 }
 0x3c3   : > { %3841 = vmatmul.bf16.vlgmr.msrb.gmra.mxu1 %v11226_v44  ;;  %3869 = vmatmul.bf16.vlgmr.msrb.gmra.mxu3 %v11226_v44  ;;  %v7830_v44 = vor.u32 %v9693_v0, %v7829_v3 }
 0x3c6   : > { %3822 = vmatpush.bf16.msrb.mxu0 %v7958_v1  ;;  %3850 = vmatpush.bf16.msrb.mxu2 %v7962_v39 }
 0x3ca   : > { %3823 = vmatpush.bf16.msrb.mxu0 %v7926_v40  ;;  %3851 = vmatpush.bf16.msrb.mxu2 %v7930_v2 }
 0x3ce   : > { %3824 = vmatpush.bf16.msrb.mxu0 %v7894_v27  ;;  %3852 = vmatpush.bf16.msrb.mxu2 %v7898_v35 }
 0x3d2   : > { %3825 = vmatpush.bf16.msrb.mxu0 %v7862_v18  ;;  %3853 = vmatpush.bf16.msrb.mxu2 %v7866_v20 }
 0x3d6   : > { %3826 = vmatpush.bf16.msrb.mxu0 %v7830_v44  ;;  %3854 = vmatpush.bf16.msrb.mxu2 %v7834_v4 }
 0x3d9   : > { %3827 = vmatmul.bf16.vlgmr.msrb.gmra.mxu0 %v11240_v36  ;;  %3855 = vmatmul.bf16.vlgmr.msrb.gmra.mxu2 %v11240_v36 }
 0x3f6   : > { %v3674_v25 = vpop.f32.mrf.mxu1 }
 0x3fc   : > { %v3702_v16 = vpop.f32.mrf.mxu3 }
 0x3fe   : > { %v3676_v42 = vpop.f32.mrf.mxu1 }
 0x404   : > { %v3704_v45 = vpop.f32.mrf.mxu3 }
 0x406   : > { %v3730_v26 = vpop.f32.mrf.mxu1 }
 0x40c   : > { %v3758_v29 = vpop.f32.mrf.mxu3 }
 0x40e   : > { %v3732_v10 = vpop.f32.mrf.mxu1 }
 0x414   : > { %v3760_v54 = vpop.f32.mrf.mxu3 }
 0x416   : > { %v3660_v30 = vpop.f32.mrf.mxu0 }
 0x417   : > { %v11255_v33 = vadd.f32 %v3674_v25, %v3660_v30 }
 0x41c   : > { %v3688_v43 = vpop.f32.mrf.mxu2 }
 0x41d   : > { %v11257_v5 = vadd.f32 %v3702_v16, %v3688_v43 }
 0x41e   : > { %v3662_v21 = vpop.f32.mrf.mxu0 }
 0x41f   : > { %v11259_v22 = vadd.f32 %v3676_v42, %v3662_v21 }
 0x420   : > { %v3786_v55 = vpop.f32.mrf.mxu1 }
 0x424   : > { %v3690_v41 = vpop.f32.mrf.mxu2 }
 0x425   : > { %v11261_v19 = vadd.f32 %v3704_v45, %v3690_v41 }
 0x426   : > { %v3716_v36 = vpop.f32.mrf.mxu0  ;;  %v3814_v56 = vpop.f32.mrf.mxu3 }
 0x427   : > { %v11263_v8 = vadd.f32 %v3730_v26, %v3716_v36 }
 0x428   : > { %v3788_v37 = vpop.f32.mrf.mxu1 }
 0x42c   : > { %v3744_v58 = vpop.f32.mrf.mxu2 }
 0x42d   : > { %v11265_v12 = vadd.f32 %v3758_v29, %v3744_v58 }
 0x42e   : > { %v3718_v17 = vpop.f32.mrf.mxu0  ;;  %v3816_v40 = vpop.f32.mrf.mxu3 }
 0x42f   : > { %v11267_v50 = vadd.f32 %v3732_v10, %v3718_v17 }
 0x434   : > { %v3746_v53 = vpop.f32.mrf.mxu2 }
 0x435   : > { %v11269_v46 = vadd.f32 %v3760_v54, %v3746_v53 }
 0x436   : > { %v3772_v61 = vpop.f32.mrf.mxu0 }
 0x437   : > { %v3787_v15 = vadd.f32 %v3786_v55, %v3772_v61 }
 0x439   : > { %v3875_v57 = vadd.f32 %v3787_v15, %v11101_v23 }
 0x43c   : > { %v3800_v52 = vpop.f32.mrf.mxu2 }
 0x43d   : > { %v3815_v1 = vadd.f32 %v3814_v56, %v3800_v52 }
 0x43e   : > { %v3774_v39 = vpop.f32.mrf.mxu0 }
 0x43f   : > { %v3876_v60 = vadd.f32 %v3815_v1, %v11103_v24  ;;  %v3789_v62 = vadd.f32 %v3788_v37, %v3774_v39 }
 0x440   : > { %v3842_v16 = vpop.f32.mrf.mxu1 }
 0x441   : > { %v3883_v47 = vpack.c.bf16 %v3876_v60, %v3875_v57  ;;  %v3879_v7 = vadd.f32 %v3789_v62, %v11101_v23 }
 0x443   : > { %v3907_v2 = vrot.slane %v3883_v47, 4  ;;  %v3887_v27 = vunpack.c.l.bf16 %v3883_v47 }
 0x444   : > { %v3802_v59 = vpop.f32.mrf.mxu2 }
 0x445   : > { %v3911_v6 = vunpack.c.l.bf16 %v3907_v2  ;;  %v3817_v9 = vadd.f32 %v3816_v40, %v3802_v59  ;;  %v3889_v28 = vmul.f32 0.5, %v3887_v27 }
 0x446   : > { %v3870_v42 = vpop.f32.mrf.mxu3 }
 0x447   : > { %v3880_v35 = vadd.f32 %v3817_v9, %v11103_v24  ;;  %v3913_v13 = vmul.f32 0.5, %v3911_v6  ;;  %v3891_v3 = vpack.c.bf16 %v3889_v28, %v3889_v28 }
 0x448   : > { %v3844_v55 = vpop.f32.mrf.mxu1 }
 0x449   : > { %v3885_v14 = vpack.c.bf16 %v3880_v35, %v3879_v7  ;;  %v3915_v18 = vpack.c.bf16 %v3913_v13, %v3913_v13  ;;  %v3893_v44 = vunpack.c.l.bf16 %v3891_v3 }
 0x44b   : > { %v3908_v49 = vrot.slane %v3885_v14, 4  ;;  %v3888_v0 = vunpack.c.l.bf16 %v3885_v14  ;;  %v3917_v34 = vunpack.c.l.bf16 %v3915_v18 }
 0x44d   : > { %v3912_v20 = vunpack.c.l.bf16 %v3908_v49  ;;  %v3890_v4 = vmul.f32 0.5, %v3888_v0  ;;  %10266 = vtanh.f32 %v3917_v34 }
 0x44e   : > { %10268 = vtanh.f32 %v3893_v44  ;;  %v3872_v15 = vpop.f32.mrf.mxu3 }
 0x44f   : > { %v3914_v48 = vmul.f32 0.5, %v3912_v20  ;;  %v3892_v45 = vpack.c.bf16 %v3890_v4, %v3890_v4 }
 0x451   : > { %v3916_v30 = vpack.c.bf16 %v3914_v48, %v3914_v48  ;;  %v3894_v10 = vunpack.c.l.bf16 %v3892_v45 }
 0x453   : > { %v3918_v21 = vunpack.c.l.bf16 %v3916_v30  ;;  %v10267_v41 = vpop.eup %10266 }
 0x454   : > { %v10269_v58 = vpop.eup %10268  ;;  %v3921_v54 = vpack.c.bf16 %v10267_v41, %v10267_v41 }
 0x455   : > { %10270 = vtanh.f32 %v3918_v21  ;;  %v3897_v56 = vpack.c.bf16 %v10269_v58, %v10269_v58 }
 0x456   : > { %v3828_v25 = vpop.f32.mrf.mxu0  ;;  %10272 = vtanh.f32 %v3894_v10  ;;  %v3923_v39 = vunpack.c.l.bf16 %v3921_v54 }
 0x457   : > { %v3843_v43 = vadd.f32 %v3842_v16, %v3828_v25  ;;  %v3899_v40 = vunpack.c.l.bf16 %v3897_v56 }
 0x458   : > { %v3925_v9 = vmul.f32 0.5, %v3923_v39 }
 0x459   : > { %v3877_v29 = vadd.f32 %v3843_v43, %v11109_v31  ;;  %v3901_v14 = vmul.f32 0.5, %v3899_v40 }
 0x45a   : > { %v3927_v0 = vadd.f32 0.5, %v3925_v9 }
 0x45b   : > { %v10271_v62 = vpop.eup %10270  ;;  %v3903_v4 = vadd.f32 0.5, %v3901_v14 }
 0x45c   : > { %v3856_v26 = vpop.f32.mrf.mxu2  ;;  %v10273_v7 = vpop.eup %10272  ;;  %v3922_v27 = vpack.c.bf16 %v10271_v62, %v10271_v62 }
 0x45d   : > { %v3871_v36 = vadd.f32 %v3870_v42, %v3856_v26  ;;  %v3898_v49 = vpack.c.bf16 %v10273_v7, %v10273_v7  ;;  %v3961_v42 = vmul.f32 %v3927_v0, %v11117_v11 }
 0x45e   : > { %v3830_v53 = vpop.f32.mrf.mxu0  ;;  %v3924_v48 = vunpack.c.l.bf16 %v3922_v27 }
 0x45f   : > { %v3878_v17 = vadd.f32 %v3871_v36, %v11111_v38  ;;  %v3845_v1 = vadd.f32 %v3844_v55, %v3830_v53  ;;  %v3900_v16 = vunpack.c.l.bf16 %v3898_v49 }
 0x460   : > { %v3926_v45 = vmul.f32 0.5, %v3924_v48 }
 0x461   : > { %v3884_v61 = vpack.c.bf16 %v3878_v17, %v3877_v29  ;;  %v3881_v59 = vadd.f32 %v3845_v1, %v11109_v31  ;;  %v3902_v29 = vmul.f32 0.5, %v3900_v16 }
 0x462   : > { %v3928_v17 = vadd.f32 0.5, %v3926_v45 }
 0x463   : > { %v3929_v52 = vunpack.c.l.bf16 %v3884_v61  ;;  %v3939_v57 = vrot.slane %v3884_v61, 4  ;;  %v3904_v55 = vadd.f32 0.5, %v3902_v29 }
 0x464   : > { %v3858_v37 = vpop.f32.mrf.mxu2  ;;  %v3962_v11 = vmul.f32 %v3928_v17, %v11120_v51 }
 0x465   : > { %10274 = vtanh.f32 %v3929_v52  ;;  %v3943_v60 = vunpack.c.l.bf16 %v3939_v57  ;;  %v3873_v47 = vadd.f32 %v3872_v15, %v3858_v37 }
 0x467   : > { %v3945_v2 = vmul.f32 0.5, %v3943_v60  ;;  %v3882_v6 = vadd.f32 %v3873_v47, %v11111_v38 }
 0x469   : > { %v3947_v35 = vpack.c.bf16 %v3945_v2, %v3945_v2  ;;  %v3886_v13 = vpack.c.bf16 %v3882_v6, %v3881_v59 }
 0x46b   : > { %v10275_v28 = vpop.eup %10274  ;;  %v3949_v18 = vunpack.c.l.bf16 %v3947_v35  ;;  %v3930_v20 = vunpack.c.l.bf16 %v3886_v13  ;;  %v3940_v3 = vrot.slane %v3886_v13, 4 }
 0x46c   : > { %v3933_v34 = vpack.c.bf16 %v10275_v28, %v10275_v28 }
 0x46d   : > { %10276 = vtanh.f32 %v3949_v18  ;;  %v3944_v44 = vunpack.c.l.bf16 %v3940_v3 }
 0x46e   : > { %v3935_v25 = vunpack.c.l.bf16 %v3933_v34  ;;  %10278 = vtanh.f32 %v3930_v20 }
 0x46f   : > { %v3946_v30 = vmul.f32 0.5, %v3944_v44 }
 0x470   : > { %v3963_v43 = vmul.f32 %v3935_v25, %v3903_v4 }
 0x471   : > { %v3948_v21 = vpack.c.bf16 %v3946_v30, %v3946_v30 }
 0x472   : > { %v11280_v26 = vadd.f32 %v3963_v43, %v3961_v42 }
 0x473   : > { %v10277_v41 = vpop.eup %10276  ;;  %v3950_v36 = vunpack.c.l.bf16 %v3948_v21 }
 0x474   : > { %v10279_v10 = vpop.eup %10278  ;;  %v3953_v58 = vpack.c.bf16 %v10277_v41, %v10277_v41  ;;  %10280 = vtanh.f32 %v11280_v26 }
 0x475   : > { %v3934_v54 = vpack.c.bf16 %v10279_v10, %v10279_v10  ;;  %10282 = vtanh.f32 %v3950_v36 }
 0x476   : > { %v3955_v53 = vunpack.c.l.bf16 %v3953_v58 }
 0x477   : > { %v3936_v61 = vunpack.c.l.bf16 %v3934_v54 }
 0x478   : > { %v3957_v56 = vmul.f32 0.5, %v3955_v53 }
 0x479   : > { %v3964_v15 = vmul.f32 %v3936_v61, %v3904_v55 }
 0x47a   : > { %v10281_v52 = vpop.eup %10280  ;;  %v3959_v57 = vadd.f32 0.5, %v3957_v56 }
 0x47b   : > { %v10283_v1 = vpop.eup %10282  ;;  %v11284_v39 = vadd.f32 %v3964_v15, %v3962_v11 }
 0x47c   : > { %v11286_v37 = vmul.f32 %v10281_v52, %v3959_v57  ;;  %v3954_v60 = vpack.c.bf16 %v10283_v1, %v10283_v1 }
 0x47d   : > { %10284 = vtanh.f32 %v11284_v39 }
 0x47e   : > { %v3956_v47 = vunpack.c.l.bf16 %v3954_v60 }
 0x480   : > { %v3958_v62 = vmul.f32 0.5, %v3956_v47  ;;  %3975 = sbr.rel (%p8315_p3) target bundleno = 1323 (0x52b), region = 84 }
 0x482   : > { %v3960_v40 = vadd.f32 0.5, %v3958_v62 }
 0x483   : > { %v10285_v2 = vpop.eup %10284 }
 0x484   : > { %v11289_v59 = vmul.f32 %v10285_v2, %v3960_v40 }
 0x485   : > { %v9821_v51 = vld [vmem:[#allocation16 + $0x38] sm:$0xff]  ;;  %v9820_v7 = vld [vmem:[#allocation16 + $0x30] sm:$0xff]  ;;  %v9819_v9 = vld [vmem:[#allocation16 + $0x28] sm:$0xff]  ;;  %v3976_v28 = vmax.f32 %v11286_v37, 0.0  ;;  %v4061_v20 = vlaneseq }
 0x486   : > { %v3977_v6 = vmax.f32 %v11289_v59, 0.0  ;;  %4047 = vmatpush.bf16.msra.mxu0 %v9821_v51  ;;  %v9818_v27 = vld [vmem:[#allocation16 + $0x20] sm:$0xff]  ;;  %v9817_v35 = vld [vmem:[#allocation16 + $0x18] sm:$0xff]  ;;  %v9816_v13 = vld [vmem:[#allocation16 + $0x10] sm:$0xff] }
 0x487   : > { %v9815_v14 = vld [vmem:[#allocation16 + $0x8] sm:$0xff]  ;;  %v9814_v49 = vld [vmem:[#allocation16] sm:$0xff]  ;;  %v4062_v3 = vshrl.u32 %v4061_v20, 7 }
 0x488   : > { %4069 = vst [vmem:[#allocation18 + $0x8] sm:$0xff] %v3977_v6  ;;  %v3978_v18 = vpack.c.bf16 %v3977_v6, %v3976_v28  ;;  %v10286_v0 = vld [vmem:[%s11663_s6] ss:$0 sm:$0xff] }
 0x489   : > { %vm4064_vm1 = vcmp.lt.s32.totalorder %v4062_v3, 2 }
 0x48a   : > { %4048 = vmatpush.bf16.msra.mxu0 %v9820_v7 }
 0x48e   : > { %4049 = vmatpush.bf16.msra.mxu0 %v9819_v9 }
 0x492   : > { %4050 = vmatpush.bf16.msra.mxu0 %v9818_v27 }
 0x496   : > { %4051 = vmatpush.bf16.msra.mxu0 %v9817_v35 }
 0x49a   : > { %4052 = vmatpush.bf16.msra.mxu0 %v9816_v13 }
 0x49e   : > { %4053 = vmatpush.bf16.msra.mxu0 %v9815_v14 }
 0x4a2   : > { %4054 = vmatpush.bf16.msra.mxu0 %v9814_v49 }
 0x4a5   : > { %4055 = vmatmul.bf16.vlgmr.msra.gmra.mxu0 %v3978_v18 }
 0x522   : > { %v4056_v34 = vpop.f32.mrf.mxu0 }
 0x523   : > { %v4057_v48 = vadd.f32 %v10286_v0, %v4056_v34 }
 0x525   : > { %v4066_v44 = vsel %vm4064_vm1, %v4057_v48, %v3976_v28 }
 0x526   : > { %4068 = vst [vmem:[#allocation18] sm:$0xff] %v4066_v44 }
 0x52a   : > { %v4058_v4 = vpop.f32.mrf.mxu0 }
 0x52b PF: > { %v8574_v25 = vld [vmem:[#allocation12 + $0x1c0] sm:$0xf]  ;;  %v9878_v45 = vld [vmem:[#allocation12 + $0x1c4] sm:$0xf]  ;;  %s5278_s21 = sadd.s32 2, %s11083_s9 }
 0x52c   : > { %v9882_v16 = vld [vmem:[#allocation12 + $0x1dc] sm:$0xf0]  ;;  %v8576_v21 = vld [vmem:[#allocation12 + $0x1e0] sm:$0xf0]  ;;  %p8860_p4 = scmp.ne.s32.totalorder %s5278_s21, 7 }
 0x52d   : > { %v8830_v30 = vld [vmem:[#allocation12 + $0x3c0] sm:$0xf]  ;;  %v8575_v42 = vor.u32 %v9882_v16, %v8574_v25  ;;  %v8579_v29 = vor.u32 %v9878_v45, %v8576_v21  ;;  %v9942_v36 = vld [vmem:[#allocation12 + $0x3c4] sm:$0xf] }
 0x52e   : > { %v9946_v43 = vld [vmem:[#allocation12 + $0x3dc] sm:$0xf0]  ;;  %v8832_v10 = vld [vmem:[#allocation12 + $0x3e0] sm:$0xf0] }
 0x52f   : > { %v8831_v41 = vor.u32 %v9946_v43, %v8830_v30  ;;  %v8542_v58 = vld [vmem:[#allocation12 + $0x180] sm:$0xf]  ;;  %4958 = vmatpush.bf16.msra.mxu0 %v8575_v42  ;;  %v8835_v17 = vor.u32 %v9942_v36, %v8832_v10  ;;  %4986 = vmatpush.bf16.msra.mxu2 %v8579_v29  ;;  %v9870_v11 = vld [vmem:[#allocation12 + $0x184] sm:$0xf] }
 0x530   : > { %v9874_v54 = vld [vmem:[#allocation12 + $0x19c] sm:$0xf0]  ;;  %v8544_v15 = vld [vmem:[#allocation12 + $0x1a0] sm:$0xf0] }
 0x531   : > { %v8798_v53 = vld [vmem:[#allocation12 + $0x380] sm:$0xf]  ;;  %4972 = vmatpush.bf16.msra.mxu1 %v8831_v41  ;;  %v8543_v61 = vor.u32 %v9874_v54, %v8542_v58  ;;  %v9934_v52 = vld [vmem:[#allocation12 + $0x384] sm:$0xf]  ;;  %5000 = vmatpush.bf16.msra.mxu3 %v8835_v17  ;;  %v8547_v57 = vor.u32 %v9870_v11, %v8544_v15 }
 0x532   : > { %v9938_v55 = vld [vmem:[#allocation12 + $0x39c] sm:$0xf0]  ;;  %v8800_v1 = vld [vmem:[#allocation12 + $0x3a0] sm:$0xf0] }
 0x533   : > { %v8799_v56 = vor.u32 %v9938_v55, %v8798_v53  ;;  %v8510_v60 = vld [vmem:[#allocation12 + $0x140] sm:$0xf]  ;;  %v8803_v62 = vor.u32 %v9934_v52, %v8800_v1  ;;  %v9862_v51 = vld [vmem:[#allocation12 + $0x144] sm:$0xf]  ;;  %4959 = vmatpush.bf16.msra.mxu0 %v8543_v61  ;;  %4987 = vmatpush.bf16.msra.mxu2 %v8547_v57 }
 0x534   : > { %v9866_v47 = vld [vmem:[#allocation12 + $0x15c] sm:$0xf0]  ;;  %v8512_v7 = vld [vmem:[#allocation12 + $0x160] sm:$0xf0] }
 0x535   : > { %v8766_v40 = vld [vmem:[#allocation12 + $0x340] sm:$0xf]  ;;  %v8511_v6 = vor.u32 %v9866_v47, %v8510_v60  ;;  %v9926_v9 = vld [vmem:[#allocation12 + $0x344] sm:$0xf]  ;;  %4973 = vmatpush.bf16.msra.mxu1 %v8799_v56  ;;  %v8515_v13 = vor.u32 %v9862_v51, %v8512_v7  ;;  %5001 = vmatpush.bf16.msra.mxu3 %v8803_v62 }
 0x536   : > { %v9930_v2 = vld [vmem:[#allocation12 + $0x35c] sm:$0xf0]  ;;  %v8768_v27 = vld [vmem:[#allocation12 + $0x360] sm:$0xf0] }
 0x537   : > { %v8767_v35 = vor.u32 %v9930_v2, %v8766_v40  ;;  %v8478_v14 = vld [vmem:[#allocation12 + $0x100] sm:$0xf]  ;;  %v8771_v18 = vor.u32 %v9926_v9, %v8768_v27  ;;  %v9854_v3 = vld [vmem:[#allocation12 + $0x104] sm:$0xf]  ;;  %4960 = vmatpush.bf16.msra.mxu0 %v8511_v6  ;;  %4988 = vmatpush.bf16.msra.mxu2 %v8515_v13 }
 0x538   : > { %v9858_v28 = vld [vmem:[#allocation12 + $0x11c] sm:$0xf0]  ;;  %v8480_v0 = vld [vmem:[#allocation12 + $0x120] sm:$0xf0] }
 0x539   : > { %v8734_v49 = vld [vmem:[#allocation12 + $0x300] sm:$0xf]  ;;  %v9918_v34 = vld [vmem:[#allocation12 + $0x304] sm:$0xf]  ;;  %v8479_v44 = vor.u32 %v9858_v28, %v8478_v14  ;;  %4974 = vmatpush.bf16.msra.mxu1 %v8767_v35  ;;  %v8483_v25 = vor.u32 %v9854_v3, %v8480_v0  ;;  %5002 = vmatpush.bf16.msra.mxu3 %v8771_v18 }
 0x53a   : > { %v9922_v20 = vld [vmem:[#allocation12 + $0x31c] sm:$0xf0]  ;;  %v8736_v48 = vld [vmem:[#allocation12 + $0x320] sm:$0xf0] }
 0x53b   : > { %v8735_v4 = vor.u32 %v9922_v20, %v8734_v49  ;;  %v8446_v16 = vld [vmem:[#allocation12 + $0xc0] sm:$0xf]  ;;  %v8739_v43 = vor.u32 %v9918_v34, %v8736_v48  ;;  %v9846_v21 = vld [vmem:[#allocation12 + $0xc4] sm:$0xf]  ;;  %4961 = vmatpush.bf16.msra.mxu0 %v8479_v44  ;;  %4989 = vmatpush.bf16.msra.mxu2 %v8483_v25  ;;  %v8582_v25 = vld [vmem:[#allocation12 + $0x1c8] sm:$0xf] }
 0x53c   : > { %v9850_v30 = vld [vmem:[#allocation12 + $0xdc] sm:$0xf0]  ;;  %v8448_v41 = vld [vmem:[#allocation12 + $0xe0] sm:$0xf0] }
 0x53d   : > { %v8702_v42 = vld [vmem:[#allocation12 + $0x2c0] sm:$0xf]  ;;  %v9910_v29 = vld [vmem:[#allocation12 + $0x2c4] sm:$0xf]  ;;  %v8447_v10 = vor.u32 %v9850_v30, %v8446_v16  ;;  %4975 = vmatpush.bf16.msra.mxu1 %v8735_v4  ;;  %v8451_v17 = vor.u32 %v9846_v21, %v8448_v41  ;;  %5003 = vmatpush.bf16.msra.mxu3 %v8739_v43  ;;  %v9883_v16 = vld [vmem:[#allocation12 + $0x1e4] sm:$0xf0] }
 0x53e   : > { %v9914_v45 = vld [vmem:[#allocation12 + $0x2dc] sm:$0xf0]  ;;  %v8704_v36 = vld [vmem:[#allocation12 + $0x2e0] sm:$0xf0]  ;;  %v8838_v30 = vld [vmem:[#allocation12 + $0x3c8] sm:$0xf] }
 0x53f   : > { %v8703_v58 = vor.u32 %v9914_v45, %v8702_v42  ;;  %v8414_v54 = vld [vmem:[#allocation12 + $0x80] sm:$0xf]  ;;  %v8707_v61 = vor.u32 %v9910_v29, %v8704_v36  ;;  %v9838_v11 = vld [vmem:[#allocation12 + $0x84] sm:$0xf]  ;;  %4962 = vmatpush.bf16.msra.mxu0 %v8447_v10  ;;  %4990 = vmatpush.bf16.msra.mxu2 %v8451_v17  ;;  %v9947_v42 = vld [vmem:[#allocation12 + $0x3e4] sm:$0xf0] }
 0x540   : > { %v9842_v53 = vld [vmem:[#allocation12 + $0x9c] sm:$0xf0]  ;;  %v8416_v15 = vld [vmem:[#allocation12 + $0xa0] sm:$0xf0]  ;;  %v9879_v45 = vld [vmem:[#allocation12 + $0x1cc] sm:$0xf] }
 0x541   : > { %v8670_v55 = vld [vmem:[#allocation12 + $0x280] sm:$0xf]  ;;  %v9902_v52 = vld [vmem:[#allocation12 + $0x284] sm:$0xf]  ;;  %v8415_v1 = vor.u32 %v9842_v53, %v8414_v54  ;;  %4976 = vmatpush.bf16.msra.mxu1 %v8703_v58  ;;  %v8419_v47 = vor.u32 %v9838_v11, %v8416_v15  ;;  %5004 = vmatpush.bf16.msra.mxu3 %v8707_v61  ;;  %v8584_v21 = vld [vmem:[#allocation12 + $0x1e8] sm:$0xf0]  ;;  %v8583_v53 = vor.u32 %v9883_v16, %v8582_v25 }
 0x542   : > { %v9906_v56 = vld [vmem:[#allocation12 + $0x29c] sm:$0xf0]  ;;  %v8672_v57 = vld [vmem:[#allocation12 + $0x2a0] sm:$0xf0]  ;;  %v9943_v41 = vld [vmem:[#allocation12 + $0x3cc] sm:$0xf]  ;;  %v8839_v11 = vor.u32 %v9947_v42, %v8838_v30  ;;  %v8587_v15 = vor.u32 %v9879_v45, %v8584_v21 }
 0x543   : > { %v8671_v60 = vor.u32 %v9906_v56, %v8670_v55  ;;  %v8382_v62 = vld [vmem:[#allocation12 + $0x40] sm:$0xf]  ;;  %v8675_v51 = vor.u32 %v9902_v52, %v8672_v57  ;;  %v9830_v7 = vld [vmem:[#allocation12 + $0x44] sm:$0xf]  ;;  %4963 = vmatpush.bf16.msra.mxu0 %v8415_v1  ;;  %4991 = vmatpush.bf16.msra.mxu2 %v8419_v47  ;;  %v8840_v10 = vld [vmem:[#allocation12 + $0x3e8] sm:$0xf0] }
 0x544   : > { %v9834_v40 = vld [vmem:[#allocation12 + $0x5c] sm:$0xf0]  ;;  %v8384_v9 = vld [vmem:[#allocation12 + $0x60] sm:$0xf0]  ;;  %v8550_v58 = vld [vmem:[#allocation12 + $0x188] sm:$0xf] }
 0x545   : > { %v8638_v2 = vld [vmem:[#allocation12 + $0x240] sm:$0xf]  ;;  %v9894_v27 = vld [vmem:[#allocation12 + $0x244] sm:$0xf]  ;;  %v8383_v13 = vor.u32 %v9834_v40, %v8382_v62  ;;  %4977 = vmatpush.bf16.msra.mxu1 %v8671_v60  ;;  %v8387_v20 = vor.u32 %v9830_v7, %v8384_v9  ;;  %5005 = vmatpush.bf16.msra.mxu3 %v8675_v51  ;;  %v9875_v17 = vld [vmem:[#allocation12 + $0x1a4] sm:$0xf0]  ;;  %v8843_v60 = vor.u32 %v9943_v41, %v8840_v10 }
 0x546   : > { %v9898_v6 = vld [vmem:[#allocation12 + $0x25c] sm:$0xf0]  ;;  %v8640_v35 = vld [vmem:[#allocation12 + $0x260] sm:$0xf0]  ;;  %v8806_v55 = vld [vmem:[#allocation12 + $0x388] sm:$0xf]  ;;  %v8551_v9 = vor.u32 %v9875_v17, %v8550_v58 }
 0x547   : > { %v8350_v14 = vld [vmem:[#allocation12] sm:$0xf]  ;;  %v8639_v18 = vor.u32 %v9898_v6, %v8638_v2  ;;  %v9822_v0 = vld [vmem:[#allocation12 + $0x4] sm:$0xf]  ;;  %v8643_v48 = vor.u32 %v9894_v27, %v8640_v35  ;;  %4964 = vmatpush.bf16.msra.mxu0 %v8383_v13  ;;  %4992 = vmatpush.bf16.msra.mxu2 %v8387_v20  ;;  %v9939_v61 = vld [vmem:[#allocation12 + $0x3a4] sm:$0xf0] }
 0x548   : > { %v9826_v28 = vld [vmem:[#allocation12 + $0x1c] sm:$0xf0]  ;;  %v8352_v34 = vld [vmem:[#allocation12 + $0x20] sm:$0xf0]  ;;  %v9871_v56 = vld [vmem:[#allocation12 + $0x18c] sm:$0xf] }
 0x549   : > { %v8606_v49 = vld [vmem:[#allocation12 + $0x200] sm:$0xf]  ;;  %v9886_v44 = vld [vmem:[#allocation12 + $0x204] sm:$0xf]  ;;  %v8351_v43 = vor.u32 %v9826_v28, %v8350_v14  ;;  %4978 = vmatpush.bf16.msra.mxu1 %v8639_v18  ;;  %v8355_v36 = vor.u32 %v9822_v0, %v8352_v34  ;;  %5006 = vmatpush.bf16.msra.mxu3 %v8643_v48  ;;  %v8552_v52 = vld [vmem:[#allocation12 + $0x1a8] sm:$0xf0]  ;;  %v8807_v14 = vor.u32 %v9939_v61, %v8806_v55 }
 0x54a   : > { %v9890_v3 = vld [vmem:[#allocation12 + $0x21c] sm:$0xf0]  ;;  %v8608_v4 = vld [vmem:[#allocation12 + $0x220] sm:$0xf0]  ;;  %v9935_v57 = vld [vmem:[#allocation12 + $0x38c] sm:$0xf]  ;;  %v8555_v28 = vor.u32 %v9871_v56, %v8552_v52 }
 0x54b   : > { %v8607_v29 = vor.u32 %v9890_v3, %v8606_v49  ;;  %v8611_v54 = vor.u32 %v9886_v44, %v8608_v4  ;;  %v8808_v1 = vld [vmem:[#allocation12 + $0x3a8] sm:$0xf0]  ;;  %4965 = vmatpush.bf16.msra.mxu0 %v8351_v43  ;;  %v11298_v47 = vld [vmem:[#allocation12 + $0x148] sm:$0xf]  ;;  %4993 = vmatpush.bf16.msra.mxu2 %v8355_v36  ;;  %v4073_v55 = vld [vmem:[#allocation2 + $0xc8] sm:$0xff] }
 0x54c   : > { %v11300_v62 = vld [vmem:[#allocation12 + $0x164] sm:$0xf0]  ;;  %v11306_v51 = vld [vmem:[#allocation12 + $0x14c] sm:$0xf]  ;;  %v8811_v3 = vor.u32 %v9935_v57, %v8808_v1  ;;  %v4074_v61 = vld [vmem:[#allocation2 + $0xe0] sm:$0xff] }
 0x54d   : > { %v11302_v40 = vld [vmem:[#allocation12 + $0x348] sm:$0xf]  ;;  %4979 = vmatpush.bf16.msra.mxu1 %v8607_v29  ;;  %v11308_v6 = vld [vmem:[#allocation12 + $0x168] sm:$0xf0]  ;;  %5007 = vmatpush.bf16.msra.mxu3 %v8611_v54  ;;  %v8519_v44 = vor.u32 %v11300_v62, %v11298_v47  ;;  %v4075_v52 = vld [vmem:[#allocation2 + $0x90] sm:$0xff]  ;;  %v4081_v47 = vadd.f32 %v4073_v55, %v11265_v12  ;;  %v4082_v62 = vadd.f32 %v4074_v61, %v11259_v22 }
 0x54e   : > { %v11304_v2 = vld [vmem:[#allocation12 + $0x364] sm:$0xf0]  ;;  %v11310_v7 = vld [vmem:[#allocation12 + $0x34c] sm:$0xf]  ;;  %v8523_v45 = vor.u32 %v11306_v51, %v11308_v6  ;;  %v4076_v57 = vld [vmem:[#allocation2 + $0x70] sm:$0xff] }
 0x54f   : > { %5014 = vmatpush.bf16.msrb.mxu0 %v8583_v53  ;;  %v11312_v27 = vld [vmem:[#allocation12 + $0x368] sm:$0xf0]  ;;  %v11314_v35 = vld [vmem:[#allocation12 + $0x108] sm:$0xf]  ;;  %5042 = vmatpush.bf16.msrb.mxu2 %v8587_v15  ;;  %v8775_v4 = vor.u32 %v11304_v2, %v11302_v40  ;;  %v4072_v53 = vld [vmem:[#allocation2 + $0x40] sm:$0xff]  ;;  %v4084_v51 = vadd.f32 %v4076_v57, %v11267_v50 }
 0x550   : > { %v11316_v13 = vld [vmem:[#allocation12 + $0x124] sm:$0xf0]  ;;  %v11322_v20 = vld [vmem:[#allocation12 + $0x10c] sm:$0xf]  ;;  %v8779_v21 = vor.u32 %v11310_v7, %v11312_v27  ;;  %v4077_v1 = vld [vmem:[#allocation2 + $0xc0] sm:$0xff] }
 0x551   : > { %5028 = vmatpush.bf16.msrb.mxu1 %v8839_v11  ;;  %v11318_v49 = vld [vmem:[#allocation12 + $0x308] sm:$0xf]  ;;  %5056 = vmatpush.bf16.msrb.mxu3 %v8843_v60  ;;  %v11324_v0 = vld [vmem:[#allocation12 + $0x128] sm:$0xf0]  ;;  %v8487_v41 = vor.u32 %v11316_v13, %v11314_v35  ;;  %v4080_v60 = vadd.f32 %v4072_v53, %v11263_v8  ;;  %v4085_v6 = vadd.f32 %v4077_v1, %v11269_v46 }
 0x552   : > { %v11320_v18 = vld [vmem:[#allocation12 + $0x324] sm:$0xf0]  ;;  %v11326_v34 = vld [vmem:[#allocation12 + $0x30c] sm:$0xf]  ;;  %v8491_v17 = vor.u32 %v11322_v20, %v11324_v0 }
 0x553   : > { %v11328_v48 = vld [vmem:[#allocation12 + $0x328] sm:$0xf0]  ;;  %v11334_v25 = vld [vmem:[#allocation12 + $0xc8] sm:$0xf]  ;;  %5015 = vmatpush.bf16.msrb.mxu0 %v8551_v9  ;;  %v8743_v29 = vor.u32 %v11320_v18, %v11318_v49  ;;  %5043 = vmatpush.bf16.msrb.mxu2 %v8555_v28  ;;  %v4087_v9 = vpack.c.bf16 %v4081_v47, %v4080_v60  ;;  %v4089_v35 = vpack.c.bf16 %v4085_v6, %v4084_v51 }
 0x554   : > { %v11336_v16 = vld [vmem:[#allocation12 + $0xe4] sm:$0xf0]  ;;  %v11342_v43 = vld [vmem:[#allocation12 + $0xcc] sm:$0xf]  ;;  %v8747_v15 = vor.u32 %v11326_v34, %v11328_v48  ;;  %v4176_v47 = vpack.c.bf16 %v11286_v37, %v11286_v37 }
 0x555   : > { %v11338_v30 = vld [vmem:[#allocation12 + $0x2c8] sm:$0xf]  ;;  %v11352_v36 = vld [vmem:[#allocation12 + $0xe8] sm:$0xf0]  ;;  %5029 = vmatpush.bf16.msrb.mxu1 %v8807_v14  ;;  %5057 = vmatpush.bf16.msrb.mxu3 %v8811_v3  ;;  %v8455_v8 = vor.u32 %v11336_v16, %v11334_v25  ;;  %v4132_v49 = vunpack.c.l.bf16 %v4087_v9  ;;  %v4142_v18 = vrot.slane %v4087_v9, 4  ;;  %v4133_v25 = vunpack.c.l.bf16 %v4089_v35 }
 0x556   : > { %v11340_v42 = vld [vmem:[#allocation12 + $0x2e4] sm:$0xf0]  ;;  %v11356_v54 = vld [vmem:[#allocation12 + $0x2cc] sm:$0xf]  ;;  %v8459_v12 = vor.u32 %v11342_v43, %v11352_v36  ;;  %v4143_v16 = vrot.slane %v4089_v35, 4 }
 0x557   : > { %v4070_v10 = vld [vmem:[#allocation2 + $0x38] sm:$0xff]  ;;  %5016 = vmatpush.bf16.msrb.mxu0 %v8519_v44  ;;  %v8711_v22 = vor.u32 %v11340_v42, %v11338_v30  ;;  %5044 = vmatpush.bf16.msrb.mxu2 %v8523_v45  ;;  %v4146_v30 = vunpack.c.l.bf16 %v4142_v18  ;;  %10287 = vtanh.f32 %v4132_v49 }
 0x558   : > { %v4071_v58 = vld [vmem:[#allocation2 + $0x58] sm:$0xff]  ;;  %v4078_v56 = vadd.f32 %v4070_v10, %v11255_v33  ;;  %10289 = vtanh.f32 %v4133_v25 }
 0x559   : > { %v4079_v11 = vadd.f32 %v4071_v58, %v11257_v5  ;;  %v11365_v40 = vld [vmem:[#allocation12 + $0x2e8] sm:$0xf0]  ;;  %v11367_v2 = vld [vmem:[#allocation12 + $0x88] sm:$0xf]  ;;  %v4083_v5 = vadd.f32 %v4075_v52, %v11261_v19  ;;  %5030 = vmatpush.bf16.msrb.mxu1 %v8775_v4  ;;  %5058 = vmatpush.bf16.msrb.mxu3 %v8779_v21  ;;  %v4148_v53 = vmul.f32 0.5, %v4146_v30 }
 0x55a   : > { %v11369_v33 = vld [vmem:[#allocation12 + $0xa4] sm:$0xf0]  ;;  %v8715_v14 = vor.u32 %v11356_v54, %v11365_v40  ;;  %v9839_v20 = vld [vmem:[#allocation12 + $0x8c] sm:$0xf]  ;;  %v4147_v54 = vunpack.c.l.bf16 %v4143_v16 }
 0x55b   : > { %v4086_v7 = vpack.c.bf16 %v4079_v11, %v4078_v56  ;;  %v11380_v27 = vld [vmem:[#allocation12 + $0x288] sm:$0xf]  ;;  %v4088_v50 = vpack.c.bf16 %v4083_v5, %v4082_v62  ;;  %v8423_v28 = vor.u32 %v11369_v33, %v11367_v2  ;;  %v8424_v3 = vld [vmem:[#allocation12 + $0xa8] sm:$0xf0]  ;;  %5017 = vmatpush.bf16.msrb.mxu0 %v8487_v41  ;;  %5045 = vmatpush.bf16.msrb.mxu2 %v8491_v17  ;;  %v4186_v5 = vunpack.c.l.b16 %v4176_v47 }
 0x55c   : > { %v9907_v19 = vld [vmem:[#allocation12 + $0x2a4] sm:$0xf0]  ;;  %v9903_v42 = vld [vmem:[#allocation12 + $0x28c] sm:$0xf]  ;;  %v8427_v58 = vor.u32 %v9839_v20, %v8424_v3  ;;  %v4150_v17 = vpack.c.bf16 %v4148_v53, %v4148_v53  ;;  %v4177_v62 = vpack.c.bf16 %v11289_v59, %v11289_v59 }
 0x55d   : > { %v4090_v46 = vunpack.c.l.bf16 %v4086_v7  ;;  %v4110_v13 = vrot.slane %v4086_v7, 4  ;;  %v4091_v0 = vunpack.c.l.bf16 %v4088_v50  ;;  %v4111_v48 = vrot.slane %v4088_v50, 4  ;;  %5031 = vmatpush.bf16.msrb.mxu1 %v8743_v29  ;;  %v8680_v43 = vld [vmem:[#allocation12 + $0x2a8] sm:$0xf0]  ;;  %5059 = vmatpush.bf16.msrb.mxu3 %v8747_v15  ;;  %v10288_v2 = vpop.eup %10287  ;;  %v9835_v59 = vld [vmem:[#allocation12 + $0x64] sm:$0xf0] }
 0x55e   : > { %v8679_v4 = vor.u32 %v9907_v19, %v11380_v27  ;;  %v8683_v11 = vor.u32 %v9903_v42, %v8680_v43  ;;  %v4149_v29 = vmul.f32 0.5, %v4147_v54  ;;  %v4152_v60 = vunpack.c.l.bf16 %v4150_v17  ;;  %v10290_v6 = vpop.eup %10289  ;;  %v9899_v27 = vld [vmem:[#allocation12 + $0x264] sm:$0xf0]  ;;  %v9831_v19 = vld [vmem:[#allocation12 + $0x4c] sm:$0xf] }
 0x55f   : > { %v4092_v34 = vmul.f32 0.5, %v4090_v46  ;;  %v4114_v44 = vunpack.c.l.bf16 %v4110_v13  ;;  %v4093_v45 = vmul.f32 0.5, %v4091_v0  ;;  %v4115_v36 = vunpack.c.l.bf16 %v4111_v48  ;;  %5018 = vmatpush.bf16.msrb.mxu0 %v8455_v8  ;;  %5046 = vmatpush.bf16.msrb.mxu2 %v8459_v12  ;;  %v8390_v8 = vld [vmem:[#allocation12 + $0x48] sm:$0xf]  ;;  %v8392_v50 = vld [vmem:[#allocation12 + $0x68] sm:$0xf0] }
 0x560   : > { %v4151_v15 = vpack.c.bf16 %v4149_v29, %v4149_v29  ;;  %v4187_v51 = vunpack.c.l.b16 %v4177_v62  ;;  %v8391_v9 = vor.u32 %v9835_v59, %v8390_v8  ;;  %v4136_v46 = vpack.c.bf16 %v10288_v2, %v10288_v2  ;;  %v9895_v49 = vld [vmem:[#allocation12 + $0x24c] sm:$0xf]  ;;  %v8358_v20 = vld [vmem:[#allocation12 + $0x8] sm:$0xf] }
 0x561   : > { %v4094_v21 = vpack.c.bf16 %v4092_v34, %v4092_v34  ;;  %v4116_v10 = vmul.f32 0.5, %v4114_v44  ;;  %v4095_v55 = vpack.c.bf16 %v4093_v45, %v4093_v45  ;;  %v4117_v61 = vmul.f32 0.5, %v4115_v36  ;;  %5032 = vmatpush.bf16.msrb.mxu1 %v8711_v22  ;;  %5060 = vmatpush.bf16.msrb.mxu3 %v8715_v14  ;;  %v8646_v22 = vld [vmem:[#allocation12 + $0x248] sm:$0xf]  ;;  %v8648_v18 = vld [vmem:[#allocation12 + $0x268] sm:$0xf0] }
 0x562   : > { %v4153_v33 = vunpack.c.l.bf16 %v4151_v15  ;;  %v11391_v7 = vpack.c.b16 %v4187_v51, %v4186_v5  ;;  %v4137_v13 = vpack.c.bf16 %v10290_v6, %v10290_v6  ;;  %v8647_v14 = vor.u32 %v9899_v27, %v8646_v22  ;;  %v9827_v44 = vld [vmem:[#allocation12 + $0x24] sm:$0xf0]  ;;  %v9823_v45 = vld [vmem:[#allocation12 + $0xc] sm:$0xf]  ;;  %v8848_v5 = vld [vmem:[#allocation12 + $0x3f0] sm:$0xf0] }
 0x563   : > { %v4096_v41 = vunpack.c.l.bf16 %v4094_v21  ;;  %v4118_v56 = vpack.c.bf16 %v4116_v10, %v4116_v10  ;;  %v4097_v52 = vunpack.c.l.bf16 %v4095_v55  ;;  %v4119_v57 = vpack.c.bf16 %v4117_v61, %v4117_v61  ;;  %5019 = vmatpush.bf16.msrb.mxu0 %v8423_v28  ;;  %5047 = vmatpush.bf16.msrb.mxu2 %v8427_v58  ;;  %v9891_v25 = vld [vmem:[#allocation12 + $0x224] sm:$0xf0]  ;;  %v8360_v21 = vld [vmem:[#allocation12 + $0x28] sm:$0xf0]  ;;  %v8814_v22 = vld [vmem:[#allocation12 + $0x390] sm:$0xf] }
 0x564   : > { %5008 = vmatmul.bf16.vlgmr.msra.gmra.mxu3 %v11391_v7  ;;  %4980 = vmatmul.bf16.vlgmr.msra.gmra.mxu1 %v11391_v7  ;;  %v8395_v28 = vor.u32 %v9831_v19, %v8392_v50  ;;  %v8651_v48 = vor.u32 %v9895_v49, %v8648_v18  ;;  %v8359_v42 = vor.u32 %v9827_v44, %v8358_v20  ;;  %v9887_v36 = vld [vmem:[#allocation12 + $0x20c] sm:$0xf]  ;;  %v4139_v29 = vunpack.c.l.bf16 %v4137_v13  ;;  %v9936_v13 = vld [vmem:[#allocation12 + $0x394] sm:$0xf]  ;;  %v8782_v20 = vld [vmem:[#allocation12 + $0x350] sm:$0xf] }
 0x565   : > { %10291 = vtanh.f32 %v4096_v41  ;;  %v4120_v1 = vunpack.c.l.bf16 %v4118_v56  ;;  %v4121_v40 = vunpack.c.l.bf16 %v4119_v57  ;;  %5033 = vmatpush.bf16.msrb.mxu1 %v8679_v4  ;;  %5061 = vmatpush.bf16.msrb.mxu3 %v8683_v11  ;;  %v8614_v4 = vld [vmem:[#allocation12 + $0x208] sm:$0xf]  ;;  %v8363_v55 = vor.u32 %v9823_v45, %v8360_v21  ;;  %v8616_v41 = vld [vmem:[#allocation12 + $0x228] sm:$0xf0]  ;;  %v9948_v57 = vld [vmem:[#allocation12 + $0x3ec] sm:$0xf0] }
 0x566   : > { %10293 = vtanh.f32 %v4097_v52  ;;  %v8615_v43 = vor.u32 %v9891_v25, %v8614_v4  ;;  %v4138_v11 = vunpack.c.l.bf16 %v4136_v46  ;;  %v8619_v17 = vor.u32 %v9887_v36, %v8616_v41  ;;  %v8846_v52 = vld [vmem:[#allocation12 + $0x3d0] sm:$0xf]  ;;  %v9928_v44 = vld [vmem:[#allocation12 + $0x354] sm:$0xf] }
 0x567   : > { %10295 = vtanh.f32 %v4120_v1  ;;  %5020 = vmatpush.bf16.msrb.mxu0 %v8391_v9  ;;  %5048 = vmatpush.bf16.msrb.mxu2 %v8395_v28  ;;  %v8847_v2 = vor.u32 %v9948_v57, %v8846_v52  ;;  %v8784_v4 = vld [vmem:[#allocation12 + $0x370] sm:$0xf0]  ;;  %v8718_v21 = vld [vmem:[#allocation12 + $0x2d0] sm:$0xf] }
 0x568   : > { %10297 = vtanh.f32 %v4121_v40  ;;  %v9916_v36 = vld [vmem:[#allocation12 + $0x2ec] sm:$0xf0] }
 0x569   : > { %10299 = vtanh.f32 %v4152_v60  ;;  %5034 = vmatpush.bf16.msrb.mxu1 %v8647_v14  ;;  %5062 = vmatpush.bf16.msrb.mxu3 %v8651_v48  ;;  %v8816_v14 = vld [vmem:[#allocation12 + $0x3b0] sm:$0xf0]  ;;  %v8719_v41 = vor.u32 %v9916_v36, %v8718_v21  ;;  %v8822_v21 = vld [vmem:[#allocation12 + $0x398] sm:$0xf] }
 0x56a   : > { %10301 = vtanh.f32 %v4153_v33  ;;  %v9944_v33 = vld [vmem:[#allocation12 + $0x3d4] sm:$0xf]  ;;  %v8819_v49 = vor.u32 %v9936_v13, %v8816_v14  ;;  %v8622_v14 = vld [vmem:[#allocation12 + $0x210] sm:$0xf]  ;;  %v9941_v36 = vld [vmem:[#allocation12 + $0x3b4] sm:$0xf0] }
 0x56b   : > { %v10292_v37 = vpop.eup %10291  ;;  %5021 = vmatpush.bf16.msrb.mxu0 %v8359_v42  ;;  %5049 = vmatpush.bf16.msrb.mxu2 %v8363_v55  ;;  %v8851_v59 = vor.u32 %v9944_v33, %v8848_v5  ;;  %v9920_v42 = vld [vmem:[#allocation12 + $0x314] sm:$0xf] }
 0x56c   : > { %v4100_v12 = vpack.c.bf16 %v10292_v37, %v10292_v37  ;;  %v10294_v35 = vpop.eup %10293  ;;  %v8688_v5 = vld [vmem:[#allocation12 + $0x2b0] sm:$0xf0] }
 0x56d   : > { %v10296_v3 = vpop.eup %10295  ;;  %v4101_v0 = vpack.c.bf16 %v10294_v35, %v10294_v35  ;;  %5035 = vmatpush.bf16.msrb.mxu1 %v8615_v43  ;;  %5063 = vmatpush.bf16.msrb.mxu3 %v8619_v17  ;;  %v8752_v43 = vld [vmem:[#allocation12 + $0x330] sm:$0xf0] }
 0x56e   : > { %v4102_v34 = vunpack.c.l.bf16 %v4100_v12  ;;  %v10298_v16 = vpop.eup %10297  ;;  %v4124_v30 = vpack.c.bf16 %v10296_v3, %v10296_v3  ;;  %v9940_v12 = vld [vmem:[#allocation12 + $0x3ac] sm:$0xf0]  ;;  %v8656_v13 = vld [vmem:[#allocation12 + $0x270] sm:$0xf0] }
 0x56f   : > { %v10300_v10 = vpop.eup %10299  ;;  %v4103_v58 = vunpack.c.l.bf16 %v4101_v0  ;;  %v4125_v53 = vpack.c.bf16 %v10298_v16, %v10298_v16  ;;  %v8815_v46 = vor.u32 %v9940_v12, %v8814_v22  ;;  %v9932_v3 = vld [vmem:[#allocation12 + $0x36c] sm:$0xf0] }
 0x570   : > { %v4104_v54 = vmul.f32 0.5, %v4102_v34  ;;  %v10302_v61 = vpop.eup %10301  ;;  %v4126_v56 = vunpack.c.l.bf16 %v4124_v30  ;;  %v4156_v47 = vpack.c.bf16 %v10300_v10, %v10300_v10  ;;  %v8783_v48 = vor.u32 %v9932_v3, %v8782_v20  ;;  %v8750_v16 = vld [vmem:[#allocation12 + $0x310] sm:$0xf]  ;;  %v9949_v20 = vld [vmem:[#allocation12 + $0x3f4] sm:$0xf0] }
 0x571   : > { %v4105_v1 = vmul.f32 0.5, %v4103_v58  ;;  %v4127_v60 = vunpack.c.l.bf16 %v4125_v53  ;;  %v4157_v40 = vpack.c.bf16 %v10302_v61, %v10302_v61  ;;  %5084 = vmatpush.bf16.msra.mxu1 %v8847_v2  ;;  %5112 = vmatpush.bf16.msra.mxu3 %v8851_v59  ;;  %v8755_v58 = vor.u32 %v9920_v42, %v8752_v43  ;;  %v8720_v53 = vld [vmem:[#allocation12 + $0x2f0] sm:$0xf0]  ;;  %v8558_v22 = vld [vmem:[#allocation12 + $0x190] sm:$0xf] }
 0x572   : > { %v4106_v15 = vadd.f32 0.5, %v4104_v54  ;;  %v4128_v62 = vmul.f32 0.5, %v4126_v56  ;;  %v4158_v27 = vunpack.c.l.bf16 %v4156_v47  ;;  %v9912_v54 = vld [vmem:[#allocation12 + $0x2d4] sm:$0xf]  ;;  %v9876_v12 = vld [vmem:[#allocation12 + $0x1ac] sm:$0xf0] }
 0x573   : > { %v4107_v51 = vadd.f32 0.5, %v4105_v1  ;;  %v4129_v6 = vmul.f32 0.5, %v4127_v60  ;;  %v4159_v50 = vunpack.c.l.bf16 %v4157_v40  ;;  %v8723_v52 = vor.u32 %v9912_v54, %v8720_v53  ;;  %v8590_v1 = vld [vmem:[#allocation12 + $0x1d0] sm:$0xf]  ;;  %v9880_v47 = vld [vmem:[#allocation12 + $0x1d4] sm:$0xf] }
 0x574   : > { %v4130_v37 = vadd.f32 0.5, %v4128_v62  ;;  %v4166_v8 = vmul.f32 %v4138_v11, %v4106_v15  ;;  %v4160_v0 = vmul.f32 0.5, %v4158_v27  ;;  %5064 = vmatmul.bf16.vlgmr.msrb.gmra.mxu3 %v11391_v7  ;;  %5036 = vmatmul.bf16.vlgmr.msrb.gmra.mxu1 %v11391_v7  ;;  %v8686_v11 = vld [vmem:[#allocation12 + $0x290] sm:$0xf]  ;;  %v8592_v62 = vld [vmem:[#allocation12 + $0x1f0] sm:$0xf0]  ;;  %v8559_v3 = vor.u32 %v9876_v12, %v8558_v22 }
 0x575   : > { %v4131_v9 = vadd.f32 0.5, %v4129_v6  ;;  %v4167_v19 = vmul.f32 %v4139_v29, %v4107_v51  ;;  %5085 = vmatpush.bf16.msra.mxu1 %v8815_v46  ;;  %v4161_v25 = vmul.f32 0.5, %v4159_v50  ;;  %5113 = vmatpush.bf16.msra.mxu3 %v8819_v49  ;;  %v9908_v29 = vld [vmem:[#allocation12 + $0x2ac] sm:$0xf0]  ;;  %v9904_v2 = vld [vmem:[#allocation12 + $0x294] sm:$0xf]  ;;  %v8595_v59 = vor.u32 %v9880_v47, %v8592_v62 }
 0x576   : > { %v4164_v35 = vmul.f32 %v4130_v37, %v11232_v32  ;;  %v8787_v32 = vor.u32 %v9928_v44, %v8784_v4  ;;  %v4162_v45 = vadd.f32 0.5, %v4160_v0  ;;  %v9884_v15 = vld [vmem:[#allocation12 + $0x1ec] sm:$0xf0]  ;;  %v8687_v40 = vor.u32 %v9908_v29, %v8686_v11  ;;  %v9872_v27 = vld [vmem:[#allocation12 + $0x194] sm:$0xf] }
 0x577   : > { %v4165_v28 = vmul.f32 %v4131_v9, %v11234_v63  ;;  %v9924_v63 = vld [vmem:[#allocation12 + $0x32c] sm:$0xf0]  ;;  %v4163_v10 = vadd.f32 0.5, %v4161_v25  ;;  %v8691_v50 = vor.u32 %v9904_v2, %v8688_v5  ;;  %v9896_v46 = vld [vmem:[#allocation12 + $0x254] sm:$0xf]  ;;  %v8823_v11 = vor.u32 %v9941_v36, %v8822_v21 }
 0x578   : > { %v11397_v18 = vadd.f32 %v4166_v8, %v4164_v35  ;;  %v8751_v30 = vor.u32 %v9924_v63, %v8750_v16  ;;  %v8654_v51 = vld [vmem:[#allocation12 + $0x250] sm:$0xf]  ;;  %v8591_v8 = vor.u32 %v9884_v15, %v8590_v1  ;;  %v8854_v49 = vld [vmem:[#allocation12 + $0x3d8] sm:$0xf]  ;;  %v9864_v4 = vld [vmem:[#allocation12 + $0x154] sm:$0xf] }
 0x579   : > { %v11399_v34 = vadd.f32 %v4167_v19, %v4165_v28  ;;  %5086 = vmatpush.bf16.msra.mxu1 %v8783_v48  ;;  %5114 = vmatpush.bf16.msra.mxu3 %v8787_v32  ;;  %v9900_v6 = vld [vmem:[#allocation12 + $0x26c] sm:$0xf0]  ;;  %v8560_v19 = vld [vmem:[#allocation12 + $0x1b0] sm:$0xf0]  ;;  %v8659_v32 = vor.u32 %v9896_v46, %v8656_v13  ;;  %v8855_v42 = vor.u32 %v9949_v20, %v8854_v49  ;;  %v9945_v43 = vld [vmem:[#allocation12 + $0x3dc] sm:$0xf] }
 0x57a   : > { %10303 = vtanh.f32 %v11397_v18  ;;  %v8655_v35 = vor.u32 %v9900_v6, %v8654_v51  ;;  %v9892_v28 = vld [vmem:[#allocation12 + $0x22c] sm:$0xf0]  ;;  %v8563_v0 = vor.u32 %v9872_v27, %v8560_v19  ;;  %v8528_v25 = vld [vmem:[#allocation12 + $0x170] sm:$0xf0]  ;;  %v9937_v29 = vld [vmem:[#allocation12 + $0x39c] sm:$0xf] }
 0x57b   : > { %10305 = vtanh.f32 %v11399_v34  ;;  %v8526_v48 = vld [vmem:[#allocation12 + $0x150] sm:$0xf]  ;;  %v8623_v16 = vor.u32 %v9892_v28, %v8622_v14  ;;  %v9888_v63 = vld [vmem:[#allocation12 + $0x214] sm:$0xf]  ;;  %v9929_v5 = vld [vmem:[#allocation12 + $0x35c] sm:$0xf] }
 0x57c   : > { %v9868_v44 = vld [vmem:[#allocation12 + $0x16c] sm:$0xf0]  ;;  %v9848_v62 = vld [vmem:[#allocation12 + $0xd4] sm:$0xf]  ;;  %v8792_v51 = vld [vmem:[#allocation12 + $0x378] sm:$0xf0] }
 0x57d   : > { %5087 = vmatpush.bf16.msra.mxu1 %v8751_v30  ;;  %5115 = vmatpush.bf16.msra.mxu3 %v8755_v58  ;;  %v8624_v30 = vld [vmem:[#allocation12 + $0x230] sm:$0xf0]  ;;  %v8531_v58 = vor.u32 %v9864_v4, %v8528_v25  ;;  %v8494_v54 = vld [vmem:[#allocation12 + $0x110] sm:$0xf]  ;;  %v8758_v6 = vld [vmem:[#allocation12 + $0x318] sm:$0xf] }
 0x57e   : > { %v9860_v53 = vld [vmem:[#allocation12 + $0x12c] sm:$0xf0]  ;;  %v9840_v27 = vld [vmem:[#allocation12 + $0x94] sm:$0xf]  ;;  %v9921_v46 = vld [vmem:[#allocation12 + $0x31c] sm:$0xf] }
 0x57f   : > { %v8495_v1 = vor.u32 %v9860_v53, %v8494_v54  ;;  %v9852_v47 = vld [vmem:[#allocation12 + $0xec] sm:$0xf0]  ;;  %v8432_v19 = vld [vmem:[#allocation12 + $0xb0] sm:$0xf0]  ;;  %v8760_v13 = vld [vmem:[#allocation12 + $0x338] sm:$0xf0] }
 0x580   : > { %v10304_v55 = vpop.eup %10303  ;;  %v8430_v22 = vld [vmem:[#allocation12 + $0x90] sm:$0xf]  ;;  %v8726_v14 = vld [vmem:[#allocation12 + $0x2d8] sm:$0xf]  ;;  %v8435_v20 = vor.u32 %v9840_v27, %v8432_v19  ;;  %v8763_v4 = vor.u32 %v9921_v46, %v8760_v13  ;;  %v9824_v36 = vld [vmem:[#allocation12 + $0x14] sm:$0xf] }
 0x581   : > { %v10306_v61 = vpop.eup %10305  ;;  %v4172_v56 = vmul.f32 %v10304_v55, %v4162_v45  ;;  %5088 = vmatpush.bf16.msra.mxu1 %v8719_v41  ;;  %5116 = vmatpush.bf16.msra.mxu3 %v8723_v52  ;;  %v8856_v45 = vld [vmem:[#allocation12 + $0x3f8] sm:$0xf0]  ;;  %v9856_v55 = vld [vmem:[#allocation12 + $0x114] sm:$0xf]  ;;  %v8790_v52 = vld [vmem:[#allocation12 + $0x358] sm:$0xf] }
 0x582   : > { %v4173_v17 = vmul.f32 %v10306_v61, %v4163_v10  ;;  %v8527_v10 = vor.u32 %v9868_v44, %v8526_v48  ;;  %v8496_v41 = vld [vmem:[#allocation12 + $0x130] sm:$0xf0]  ;;  %v8627_v61 = vor.u32 %v9888_v63, %v8624_v30  ;;  %v9844_v12 = vld [vmem:[#allocation12 + $0xac] sm:$0xf0]  ;;  %v9917_v28 = vld [vmem:[#allocation12 + $0x2f4] sm:$0xf0] }
 0x583   : > { %v4174_v57 = vpack.c.bf16 %v4172_v56, %v4172_v56  ;;  %v8859_v56 = vor.u32 %v9945_v43, %v8856_v45  ;;  %v8499_v15 = vor.u32 %v9856_v55, %v8496_v41  ;;  %v8431_v49 = vor.u32 %v9844_v12, %v8430_v22  ;;  %v9832_v48 = vld [vmem:[#allocation12 + $0x54] sm:$0xf]  ;;  %v8694_v63 = vld [vmem:[#allocation12 + $0x298] sm:$0xf]  ;;  %v8366_v45 = vld [vmem:[#allocation12 + $0x10] sm:$0xf] }
 0x584   : > { %v4175_v60 = vpack.c.bf16 %v4173_v17, %v4173_v17  ;;  %v8824_v17 = vld [vmem:[#allocation12 + $0x3b8] sm:$0xf0]  ;;  %v8400_v44 = vld [vmem:[#allocation12 + $0x70] sm:$0xf0]  ;;  %v8727_v25 = vor.u32 %v9917_v28, %v8726_v14  ;;  %v9909_v30 = vld [vmem:[#allocation12 + $0x2b4] sm:$0xf0] }
 0x585   : > { %v4180_v33 = vunpack.c.l.b16 %v4174_v57  ;;  %5089 = vmatpush.bf16.msra.mxu1 %v8687_v40  ;;  %5117 = vmatpush.bf16.msra.mxu3 %v8691_v50  ;;  %v9933_v57 = vld [vmem:[#allocation12 + $0x374] sm:$0xf0]  ;;  %v8464_v40 = vld [vmem:[#allocation12 + $0xf0] sm:$0xf0]  ;;  %v8827_v2 = vor.u32 %v9937_v29, %v8824_v17  ;;  %v8795_v50 = vor.u32 %v9929_v5, %v8792_v51  ;;  %v8403_v43 = vor.u32 %v9832_v48, %v8400_v44  ;;  %v9828_v21 = vld [vmem:[#allocation12 + $0x2c] sm:$0xf0] }
 0x586   : > { %v4181_v37 = vunpack.c.l.b16 %v4175_v60  ;;  %v8462_v60 = vld [vmem:[#allocation12 + $0xd0] sm:$0xf]  ;;  %v9885_v54 = vld [vmem:[#allocation12 + $0x1f4] sm:$0xf0]  ;;  %v9881_v53 = vld [vmem:[#allocation12 + $0x1dc] sm:$0xf] }
 0x587   : > { %v8600_v55 = vld [vmem:[#allocation12 + $0x1f8] sm:$0xf0]  ;;  %v8662_v29 = vld [vmem:[#allocation12 + $0x258] sm:$0xf] }
 0x588   : > { %v11405_v9 = vpack.c.b16 %v4181_v37, %v4180_v33  ;;  %v8791_v33 = vor.u32 %v9933_v57, %v8790_v52  ;;  %v9925_v37 = vld [vmem:[#allocation12 + $0x334] sm:$0xf0]  ;;  %v8367_v52 = vor.u32 %v9828_v21, %v8366_v45  ;;  %v9897_v5 = vld [vmem:[#allocation12 + $0x25c] sm:$0xf] }
 0x589   : > { %5090 = vmatpush.bf16.msra.mxu1 %v8655_v35  ;;  %5118 = vmatpush.bf16.msra.mxu3 %v8659_v32  ;;  %v8759_v35 = vor.u32 %v9925_v37, %v8758_v6  ;;  %v9913_v32 = vld [vmem:[#allocation12 + $0x2dc] sm:$0xf]  ;;  %v9901_v17 = vld [vmem:[#allocation12 + $0x274] sm:$0xf0] }
 0x58a   : > { %4994 = vmatmul.bf16.vlgmr.msra.gmra.mxu2 %v11405_v9  ;;  %4966 = vmatmul.bf16.vlgmr.msra.gmra.mxu0 %v11405_v9  ;;  %v8664_v51 = vld [vmem:[#allocation12 + $0x278] sm:$0xf0]  ;;  %v8630_v6 = vld [vmem:[#allocation12 + $0x218] sm:$0xf] }
 0x58b   : > { %5070 = vmatpush.bf16.msra.mxu0 %v8591_v8  ;;  %5098 = vmatpush.bf16.msra.mxu2 %v8595_v59  ;;  %v8463_v8 = vor.u32 %v9852_v47, %v8462_v60  ;;  %v8467_v59 = vor.u32 %v9848_v62, %v8464_v40  ;;  %v8566_v60 = vld [vmem:[#allocation12 + $0x198] sm:$0xf]  ;;  %v9873_v62 = vld [vmem:[#allocation12 + $0x19c] sm:$0xf] }
 0x58c   : > { %v9877_v47 = vld [vmem:[#allocation12 + $0x1b4] sm:$0xf0]  ;;  %v8568_v40 = vld [vmem:[#allocation12 + $0x1b8] sm:$0xf0] }
 0x58d   : > { %5091 = vmatpush.bf16.msra.mxu1 %v8623_v16  ;;  %5119 = vmatpush.bf16.msra.mxu3 %v8627_v61  ;;  %v8728_v16 = vld [vmem:[#allocation12 + $0x2f8] sm:$0xf0]  ;;  %v8695_v61 = vor.u32 %v9909_v30, %v8694_v63  ;;  %v9893_v37 = vld [vmem:[#allocation12 + $0x234] sm:$0xf0] }
 0x58e   : > { %v8731_v41 = vor.u32 %v9913_v32, %v8728_v16  ;;  %v8534_v22 = vld [vmem:[#allocation12 + $0x158] sm:$0xf]  ;;  %v9865_v27 = vld [vmem:[#allocation12 + $0x15c] sm:$0xf] }
 0x58f   : > { %5071 = vmatpush.bf16.msra.mxu0 %v8559_v3  ;;  %5099 = vmatpush.bf16.msra.mxu2 %v8563_v0  ;;  %v8398_v3 = vld [vmem:[#allocation12 + $0x50] sm:$0xf]  ;;  %v9869_v12 = vld [vmem:[#allocation12 + $0x174] sm:$0xf0]  ;;  %v8536_v19 = vld [vmem:[#allocation12 + $0x178] sm:$0xf0] }
 0x590   : > { %5092 = vmatmul.bf16.vlgmr.msra.gmra.mxu1 %v11391_v7  ;;  %5120 = vmatmul.bf16.vlgmr.msra.gmra.mxu3 %v11391_v7  ;;  %v9836_v0 = vld [vmem:[#allocation12 + $0x6c] sm:$0xf0]  ;;  %v9889_v46 = vld [vmem:[#allocation12 + $0x21c] sm:$0xf]  ;;  %v8535_v14 = vor.u32 %v9869_v12, %v8534_v22  ;;  %v8539_v28 = vor.u32 %v9865_v27, %v8536_v19  ;;  %v9853_v32 = vld [vmem:[#allocation12 + $0xf4] sm:$0xf0] }
 0x591   : > { %5140 = vmatpush.bf16.msrb.mxu1 %v8855_v42  ;;  %5168 = vmatpush.bf16.msrb.mxu3 %v8859_v56  ;;  %v8399_v42 = vor.u32 %v9836_v0, %v8398_v3  ;;  %v9905_v56 = vld [vmem:[#allocation12 + $0x29c] sm:$0xf]  ;;  %v9845_v45 = vld [vmem:[#allocation12 + $0xb4] sm:$0xf0] }
 0x592   : > { %v8632_v13 = vld [vmem:[#allocation12 + $0x238] sm:$0xf0] }
 0x593   : > { %5072 = vmatpush.bf16.msra.mxu0 %v8527_v10  ;;  %5100 = vmatpush.bf16.msra.mxu2 %v8531_v58  ;;  %v8368_v10 = vld [vmem:[#allocation12 + $0x30] sm:$0xf0]  ;;  %v8598_v58 = vld [vmem:[#allocation12 + $0x1d8] sm:$0xf]  ;;  %v9857_v3 = vld [vmem:[#allocation12 + $0x11c] sm:$0xf]  ;;  %v8635_v48 = vor.u32 %v9889_v46, %v8632_v13 }
 0x594   : > { %v8371_v57 = vor.u32 %v9824_v36, %v8368_v10  ;;  %v8504_v0 = vld [vmem:[#allocation12 + $0x138] sm:$0xf0] }
 0x595   : > { %5141 = vmatpush.bf16.msrb.mxu1 %v8823_v11  ;;  %5169 = vmatpush.bf16.msrb.mxu3 %v8827_v2  ;;  %v8696_v11 = vld [vmem:[#allocation12 + $0x2b8] sm:$0xf0] }
 0x596   : > { %v8699_v2 = vor.u32 %v9905_v56, %v8696_v11  ;;  %v9849_v16 = vld [vmem:[#allocation12 + $0xdc] sm:$0xf]  ;;  %v8374_v11 = vld [vmem:[#allocation12 + $0x18] sm:$0xf] }
 0x597   : > { %5073 = vmatpush.bf16.msra.mxu0 %v8495_v1  ;;  %5101 = vmatpush.bf16.msra.mxu2 %v8499_v15  ;;  %v8599_v1 = vor.u32 %v9885_v54, %v8598_v58  ;;  %v8603_v15 = vor.u32 %v9881_v53, %v8600_v55  ;;  %v8472_v63 = vld [vmem:[#allocation12 + $0xf8] sm:$0xf0]  ;;  %v8406_v54 = vld [vmem:[#allocation12 + $0x58] sm:$0xf] }
 0x598   : > { %v9841_v21 = vld [vmem:[#allocation12 + $0x9c] sm:$0xf]  ;;  %v9837_v53 = vld [vmem:[#allocation12 + $0x74] sm:$0xf0] }
 0x599   : > { %5142 = vmatpush.bf16.msrb.mxu1 %v8791_v33  ;;  %5170 = vmatpush.bf16.msrb.mxu3 %v8795_v50  ;;  %v8663_v33 = vor.u32 %v9901_v17, %v8662_v29  ;;  %v8667_v50 = vor.u32 %v9897_v5, %v8664_v51  ;;  %v8440_v36 = vld [vmem:[#allocation12 + $0xb8] sm:$0xf0]  ;;  %v9829_v29 = vld [vmem:[#allocation12 + $0x34] sm:$0xf0] }
 0x59a   : > { %5050 = vmatmul.bf16.vlgmr.msrb.gmra.mxu2 %v11405_v9  ;;  %5022 = vmatmul.bf16.vlgmr.msrb.gmra.mxu0 %v11405_v9  ;;  %v8443_v58 = vor.u32 %v9841_v21, %v8440_v36  ;;  %v9833_v55 = vld [vmem:[#allocation12 + $0x5c] sm:$0xf] }
 0x59b   : > { %5074 = vmatpush.bf16.msra.mxu0 %v8463_v8  ;;  %5102 = vmatpush.bf16.msra.mxu2 %v8467_v59  ;;  %v8567_v8 = vor.u32 %v9877_v47, %v8566_v60  ;;  %v8571_v59 = vor.u32 %v9873_v62, %v8568_v40  ;;  %v9825_v17 = vld [vmem:[#allocation12 + $0x1c] sm:$0xf] }
 0x59d   : > { %5143 = vmatpush.bf16.msrb.mxu1 %v8759_v35  ;;  %5171 = vmatpush.bf16.msrb.mxu3 %v8763_v4  ;;  %v8631_v35 = vor.u32 %v9893_v37, %v8630_v6  ;;  %v8507_v4 = vor.u32 %v9857_v3, %v8504_v0 }
 0x59f   : > { %5075 = vmatpush.bf16.msra.mxu0 %v8431_v49  ;;  %5103 = vmatpush.bf16.msra.mxu2 %v8435_v20  ;;  %v8502_v49 = vld [vmem:[#allocation12 + $0x118] sm:$0xf] }
 0x5a0   : > { %v9861_v20 = vld [vmem:[#allocation12 + $0x134] sm:$0xf0] }
 0x5a1   : > { %5144 = vmatpush.bf16.msrb.mxu1 %v8727_v25  ;;  %5172 = vmatpush.bf16.msrb.mxu3 %v8731_v41  ;;  %v8503_v44 = vor.u32 %v9861_v20, %v8502_v49  ;;  %v8470_v25 = vld [vmem:[#allocation12 + $0xd8] sm:$0xf]  ;;  %v8408_v41 = vld [vmem:[#allocation12 + $0x78] sm:$0xf0] }
 0x5a2   : > { %v8471_v30 = vor.u32 %v9853_v32, %v8470_v25  ;;  %v8411_v56 = vor.u32 %v9833_v55, %v8408_v41 }
 0x5a3   : > { %5076 = vmatpush.bf16.msra.mxu0 %v8399_v42  ;;  %5104 = vmatpush.bf16.msra.mxu2 %v8403_v43  ;;  %v8475_v42 = vor.u32 %v9849_v16, %v8472_v63  ;;  %v8438_v43 = vld [vmem:[#allocation12 + $0x98] sm:$0xf] }
 0x5a4   : > { %v8439_v10 = vor.u32 %v9845_v45, %v8438_v43 }
 0x5a5   : > { %5145 = vmatpush.bf16.msrb.mxu1 %v8695_v61  ;;  %5173 = vmatpush.bf16.msrb.mxu3 %v8699_v2  ;;  %v8407_v61 = vor.u32 %v9837_v53, %v8406_v54 }
 0x5a7   : > { %5077 = vmatpush.bf16.msra.mxu0 %v8367_v52  ;;  %5105 = vmatpush.bf16.msra.mxu2 %v8371_v57  ;;  %v8376_v52 = vld [vmem:[#allocation12 + $0x38] sm:$0xf0] }
 0x5a8   : > { %v8379_v57 = vor.u32 %v9825_v17, %v8376_v52 }
 0x5a9   : > { %5146 = vmatpush.bf16.msrb.mxu1 %v8663_v33  ;;  %5174 = vmatpush.bf16.msrb.mxu3 %v8667_v50 }
 0x5aa   : > { %5106 = vmatmul.bf16.vlgmr.msra.gmra.mxu2 %v11405_v9  ;;  %5078 = vmatmul.bf16.vlgmr.msra.gmra.mxu0 %v11405_v9 }
 0x5ab   : > { %5126 = vmatpush.bf16.msrb.mxu0 %v8599_v1  ;;  %5154 = vmatpush.bf16.msrb.mxu2 %v8603_v15 }
 0x5ad   : > { %5147 = vmatpush.bf16.msrb.mxu1 %v8631_v35  ;;  %5175 = vmatpush.bf16.msrb.mxu3 %v8635_v48 }
 0x5af   : > { %5127 = vmatpush.bf16.msrb.mxu0 %v8567_v8  ;;  %5155 = vmatpush.bf16.msrb.mxu2 %v8571_v59 }
 0x5b0   : > { %5148 = vmatmul.bf16.vlgmr.msrb.gmra.mxu1 %v11391_v7  ;;  %5176 = vmatmul.bf16.vlgmr.msrb.gmra.mxu3 %v11391_v7  ;;  %v8375_v7 = vor.u32 %v9829_v29, %v8374_v11 }
 0x5b3   : > { %5128 = vmatpush.bf16.msrb.mxu0 %v8535_v14  ;;  %5156 = vmatpush.bf16.msrb.mxu2 %v8539_v28 }
 0x5b7   : > { %5129 = vmatpush.bf16.msrb.mxu0 %v8503_v44  ;;  %5157 = vmatpush.bf16.msrb.mxu2 %v8507_v4 }
 0x5bb   : > { %5130 = vmatpush.bf16.msrb.mxu0 %v8471_v30  ;;  %5158 = vmatpush.bf16.msrb.mxu2 %v8475_v42 }
 0x5bf   : > { %5131 = vmatpush.bf16.msrb.mxu0 %v8439_v10  ;;  %5159 = vmatpush.bf16.msrb.mxu2 %v8443_v58 }
 0x5c3   : > { %5132 = vmatpush.bf16.msrb.mxu0 %v8407_v61  ;;  %5160 = vmatpush.bf16.msrb.mxu2 %v8411_v56 }
 0x5c7   : > { %5133 = vmatpush.bf16.msrb.mxu0 %v8375_v7  ;;  %5161 = vmatpush.bf16.msrb.mxu2 %v8379_v57 }
 0x5ca   : > { %5134 = vmatmul.bf16.vlgmr.msrb.gmra.mxu0 %v11405_v9  ;;  %5162 = vmatmul.bf16.vlgmr.msrb.gmra.mxu2 %v11405_v9 }
 0x5e1   : > { %v4981_v1 = vpop.f32.mrf.mxu1 }
 0x5e7   : > { %v5009_v15 = vpop.f32.mrf.mxu3 }
 0x5e9   : > { %v4983_v62 = vpop.f32.mrf.mxu1 }
 0x5ef   : > { %v5011_v2 = vpop.f32.mrf.mxu3 }
 0x5f1   : > { %v5037_v6 = vpop.f32.mrf.mxu1 }
 0x5f7   : > { %v5065_v8 = vpop.f32.mrf.mxu3 }
 0x5f9   : > { %v5039_v12 = vpop.f32.mrf.mxu1 }
 0x5ff   : > { %v5067_v35 = vpop.f32.mrf.mxu3 }
 0x607   : > { %v4967_v60 = vpop.f32.mrf.mxu0 }
 0x608   : > { %v11420_v47 = vadd.f32 %v4981_v1, %v4967_v60 }
 0x60d   : > { %v4995_v40 = vpop.f32.mrf.mxu2  ;;  %v5093_v14 = vpop.f32.mrf.mxu1 }
 0x60e   : > { %v11422_v33 = vadd.f32 %v5009_v15, %v4995_v40 }
 0x60f   : > { %v4969_v5 = vpop.f32.mrf.mxu0 }
 0x610   : > { %v11424_v51 = vadd.f32 %v4983_v62, %v4969_v5 }
 0x613   : > { %v5121_v20 = vpop.f32.mrf.mxu3 }
 0x615   : > { %v4997_v37 = vpop.f32.mrf.mxu2  ;;  %v5095_v25 = vpop.f32.mrf.mxu1 }
 0x616   : > { %v11426_v59 = vadd.f32 %v5011_v2, %v4997_v37 }
 0x617   : > { %v5023_v9 = vpop.f32.mrf.mxu0 }
 0x618   : > { %v11428_v22 = vadd.f32 %v5037_v6, %v5023_v9 }
 0x61b   : > { %v5123_v30 = vpop.f32.mrf.mxu3 }
 0x61d   : > { %v5051_v27 = vpop.f32.mrf.mxu2 }
 0x61e   : > { %v11430_v19 = vadd.f32 %v5065_v8, %v5051_v27 }
 0x61f   : > { %v5025_v50 = vpop.f32.mrf.mxu0 }
 0x620   : > { %v11432_v46 = vadd.f32 %v5039_v12, %v5025_v50 }
 0x625   : > { %v5053_v13 = vpop.f32.mrf.mxu2 }
 0x626   : > { %v11434_v28 = vadd.f32 %v5067_v35, %v5053_v13 }
 0x627   : > { %v5079_v49 = vpop.f32.mrf.mxu0 }
 0x628   : > { %v5094_v3 = vadd.f32 %v5093_v14, %v5079_v49 }
 0x62a   : > { %v5182_v48 = vadd.f32 %v5094_v3, %v11101_v23 }
 0x62d   : > { %v5107_v0 = vpop.f32.mrf.mxu2  ;;  %v5149_v15 = vpop.f32.mrf.mxu1 }
 0x62e   : > { %v5122_v44 = vadd.f32 %v5121_v20, %v5107_v0 }
 0x62f   : > { %v5081_v4 = vpop.f32.mrf.mxu0 }
 0x630   : > { %v5183_v32 = vadd.f32 %v5122_v44, %v11103_v24  ;;  %v5096_v63 = vadd.f32 %v5095_v25, %v5081_v4 }
 0x632   : > { %v5190_v16 = vpack.c.bf16 %v5183_v32, %v5182_v48  ;;  %v5186_v21 = vadd.f32 %v5096_v63, %v11101_v23 }
 0x633   : > { %v5177_v62 = vpop.f32.mrf.mxu3 }
 0x634   : > { %v5214_v42 = vrot.slane %v5190_v16, 4  ;;  %v5194_v10 = vunpack.c.l.bf16 %v5190_v16 }
 0x635   : > { %v5109_v43 = vpop.f32.mrf.mxu2  ;;  %v5151_v14 = vpop.f32.mrf.mxu1 }
 0x636   : > { %v5218_v45 = vunpack.c.l.bf16 %v5214_v42  ;;  %v5124_v36 = vadd.f32 %v5123_v30, %v5109_v43  ;;  %v5196_v55 = vmul.f32 0.5, %v5194_v10 }
 0x638   : > { %v5187_v58 = vadd.f32 %v5124_v36, %v11103_v24  ;;  %v5220_v54 = vmul.f32 0.5, %v5218_v45  ;;  %v5198_v11 = vpack.c.bf16 %v5196_v55, %v5196_v55 }
 0x63a   : > { %v5192_v53 = vpack.c.bf16 %v5187_v58, %v5186_v21  ;;  %v5222_v61 = vpack.c.bf16 %v5220_v54, %v5220_v54  ;;  %v5200_v7 = vunpack.c.l.bf16 %v5198_v11 }
 0x63b   : > { %v5179_v3 = vpop.f32.mrf.mxu3 }
 0x63c   : > { %v5215_v41 = vrot.slane %v5192_v53, 4  ;;  %v5195_v29 = vunpack.c.l.bf16 %v5192_v53  ;;  %v5224_v17 = vunpack.c.l.bf16 %v5222_v61 }
 0x63e   : > { %v5219_v56 = vunpack.c.l.bf16 %v5215_v41  ;;  %v5197_v57 = vmul.f32 0.5, %v5195_v29  ;;  %10307 = vtanh.f32 %v5224_v17 }
 0x63f   : > { %10309 = vtanh.f32 %v5200_v7 }
 0x640   : > { %v5221_v52 = vmul.f32 0.5, %v5219_v56  ;;  %v5199_v2 = vpack.c.bf16 %v5197_v57, %v5197_v57 }
 0x642   : > { %v5223_v60 = vpack.c.bf16 %v5221_v52, %v5221_v52  ;;  %v5201_v12 = vunpack.c.l.bf16 %v5199_v2 }
 0x644   : > { %v5225_v5 = vunpack.c.l.bf16 %v5223_v60  ;;  %v10308_v37 = vpop.eup %10307 }
 0x645   : > { %v10310_v27 = vpop.eup %10309  ;;  %v5228_v35 = vpack.c.bf16 %v10308_v37, %v10308_v37 }
 0x646   : > { %10311 = vtanh.f32 %v5225_v5  ;;  %v5204_v20 = vpack.c.bf16 %v10310_v27, %v10310_v27 }
 0x647   : > { %v5135_v1 = vpop.f32.mrf.mxu0  ;;  %10313 = vtanh.f32 %v5201_v12  ;;  %v5230_v4 = vunpack.c.l.bf16 %v5228_v35 }
 0x648   : > { %v5150_v40 = vadd.f32 %v5149_v15, %v5135_v1  ;;  %v5206_v30 = vunpack.c.l.bf16 %v5204_v20 }
 0x649   : > { %v5232_v36 = vmul.f32 0.5, %v5230_v4 }
 0x64a   : > { %v5184_v8 = vadd.f32 %v5150_v40, %v11109_v31  ;;  %v5208_v53 = vmul.f32 0.5, %v5206_v30 }
 0x64b   : > { %v5234_v29 = vadd.f32 0.5, %v5232_v36 }
 0x64c   : > { %v10312_v63 = vpop.eup %10311  ;;  %v5210_v57 = vadd.f32 0.5, %v5208_v53 }
 0x64d   : > { %v5163_v6 = vpop.f32.mrf.mxu2  ;;  %v10314_v21 = vpop.eup %10313  ;;  %v5229_v10 = vpack.c.bf16 %v10312_v63, %v10312_v63 }
 0x64e   : > { %v5178_v9 = vadd.f32 %v5177_v62, %v5163_v6  ;;  %v5205_v41 = vpack.c.bf16 %v10314_v21, %v10314_v21  ;;  %v5268_v62 = vmul.f32 %v5234_v29, %v11280_v26 }
 0x64f   : > { %v5137_v13 = vpop.f32.mrf.mxu0  ;;  %v5231_v52 = vunpack.c.l.bf16 %v5229_v10 }
 0x650   : > { %v5185_v50 = vadd.f32 %v5178_v9, %v11111_v38  ;;  %v5152_v44 = vadd.f32 %v5151_v14, %v5137_v13  ;;  %v5207_v15 = vunpack.c.l.bf16 %v5205_v41 }
 0x651   : > { %v5233_v2 = vmul.f32 0.5, %v5231_v52 }
 0x652   : > { %v5191_v49 = vpack.c.bf16 %v5185_v50, %v5184_v8  ;;  %v5188_v43 = vadd.f32 %v5152_v44, %v11109_v31  ;;  %v5209_v8 = vmul.f32 0.5, %v5207_v15 }
 0x653   : > { %v5235_v50 = vadd.f32 0.5, %v5233_v2 }
 0x654   : > { %v5236_v0 = vunpack.c.l.bf16 %v5191_v49  ;;  %v5246_v48 = vrot.slane %v5191_v49, 4  ;;  %v5211_v14 = vadd.f32 0.5, %v5209_v8 }
 0x655   : > { %v5165_v25 = vpop.f32.mrf.mxu2  ;;  %v5269_v26 = vmul.f32 %v5235_v50, %v11284_v39 }
 0x656   : > { %10315 = vtanh.f32 %v5236_v0  ;;  %v5250_v32 = vunpack.c.l.bf16 %v5246_v48  ;;  %v5180_v16 = vadd.f32 %v5179_v3, %v5165_v25 }
 0x658   : > { %v5252_v42 = vmul.f32 0.5, %v5250_v32  ;;  %v5189_v45 = vadd.f32 %v5180_v16, %v11111_v38 }
 0x65a   : > { %v5254_v58 = vpack.c.bf16 %v5252_v42, %v5252_v42  ;;  %v5193_v54 = vpack.c.bf16 %v5189_v45, %v5188_v43 }
 0x65c   : > { %v10316_v55 = vpop.eup %10315  ;;  %v5256_v61 = vunpack.c.l.bf16 %v5254_v58  ;;  %v5237_v56 = vunpack.c.l.bf16 %v5193_v54  ;;  %v5247_v11 = vrot.slane %v5193_v54, 4 }
 0x65d   : > { %v5240_v17 = vpack.c.bf16 %v10316_v55, %v10316_v55 }
 0x65e   : > { %10317 = vtanh.f32 %v5256_v61  ;;  %v5251_v7 = vunpack.c.l.bf16 %v5247_v11 }
 0x65f   : > { %v5242_v1 = vunpack.c.l.bf16 %v5240_v17  ;;  %10319 = vtanh.f32 %v5237_v56 }
 0x660   : > { %v5253_v60 = vmul.f32 0.5, %v5251_v7 }
 0x661   : > { %v5270_v40 = vmul.f32 %v5242_v1, %v5210_v57 }
 0x662   : > { %v5255_v5 = vpack.c.bf16 %v5253_v60, %v5253_v60 }
 0x663   : > { %v11445_v6 = vadd.f32 %v5270_v40, %v5268_v62 }
 0x664   : > { %v10318_v37 = vpop.eup %10317  ;;  %v5257_v9 = vunpack.c.l.bf16 %v5255_v5 }
 0x665   : > { %v10320_v12 = vpop.eup %10319  ;;  %v5260_v27 = vpack.c.bf16 %v10318_v37, %v10318_v37  ;;  %10321 = vtanh.f32 %v11445_v6 }
 0x666   : > { %v5241_v35 = vpack.c.bf16 %v10320_v12, %v10320_v12  ;;  %10323 = vtanh.f32 %v5257_v9 }
 0x667   : > { %v5262_v13 = vunpack.c.l.bf16 %v5260_v27 }
 0x668   : > { %v5243_v49 = vunpack.c.l.bf16 %v5241_v35 }
 0x669   : > { %v5264_v20 = vmul.f32 0.5, %v5262_v13 }
 0x66a   : > { %v5271_v3 = vmul.f32 %v5243_v49, %v5211_v14 }
 0x66b   : > { %v10322_v0 = vpop.eup %10321  ;;  %v5266_v48 = vadd.f32 0.5, %v5264_v20 }
 0x66c   : > { %v10324_v44 = vpop.eup %10323  ;;  %v11449_v4 = vadd.f32 %v5271_v3, %v5269_v26 }
 0x66d   : > { %v11451_v25 = vmul.f32 %v10322_v0, %v5266_v48  ;;  %v5261_v32 = vpack.c.bf16 %v10324_v44, %v10324_v44 }
 0x66e   : > { %10325 = vtanh.f32 %v11449_v4 }
 0x66f   : > { %v5263_v16 = vunpack.c.l.bf16 %v5261_v32 }
 0x671   : > { %v5265_v63 = vmul.f32 0.5, %v5263_v16  ;;  %5282 = sbr.rel (%p8860_p4) target bundleno = 1820 (0x71c), region = 88 }
 0x673   : > { %v5267_v30 = vadd.f32 0.5, %v5265_v63 }
 0x674   : > { %v10326_v42 = vpop.eup %10325 }
 0x675   : > { %v11454_v43 = vmul.f32 %v10326_v42, %v5267_v30 }
 0x676   : > { %v9957_v39 = vld [vmem:[#allocation16 + $0x38] sm:$0xff]  ;;  %v9956_v21 = vld [vmem:[#allocation16 + $0x30] sm:$0xff]  ;;  %v9955_v36 = vld [vmem:[#allocation16 + $0x28] sm:$0xff]  ;;  %v5283_v55 = vmax.f32 %v11451_v25, 0.0  ;;  %v5368_v56 = vlaneseq }
 0x677   : > { %v5284_v45 = vmax.f32 %v11454_v43, 0.0  ;;  %5354 = vmatpush.bf16.msra.mxu0 %v9957_v39  ;;  %v9954_v10 = vld [vmem:[#allocation16 + $0x20] sm:$0xff]  ;;  %v9953_v58 = vld [vmem:[#allocation16 + $0x18] sm:$0xff]  ;;  %v9952_v54 = vld [vmem:[#allocation16 + $0x10] sm:$0xff] }
 0x678   : > { %v9951_v53 = vld [vmem:[#allocation16 + $0x8] sm:$0xff]  ;;  %v9950_v41 = vld [vmem:[#allocation16] sm:$0xff]  ;;  %v5369_v11 = vshrl.u32 %v5368_v56, 7 }
 0x679   : > { %5376 = vst [vmem:[#allocation18 + $0x8] sm:$0xff] %v5284_v45  ;;  %v5285_v61 = vpack.c.bf16 %v5284_v45, %v5283_v55  ;;  %v10327_v29 = vld [vmem:[%s11663_s6] ss:$0 sm:$0xff] }
 0x67a   : > { %vm5371_vm2 = vcmp.lt.s32.totalorder %v5369_v11, 2 }
 0x67b   : > { %5355 = vmatpush.bf16.msra.mxu0 %v9956_v21 }
 0x67f   : > { %5356 = vmatpush.bf16.msra.mxu0 %v9955_v36 }
 0x683   : > { %5357 = vmatpush.bf16.msra.mxu0 %v9954_v10 }
 0x687   : > { %5358 = vmatpush.bf16.msra.mxu0 %v9953_v58 }
 0x68b   : > { %5359 = vmatpush.bf16.msra.mxu0 %v9952_v54 }
 0x68f   : > { %5360 = vmatpush.bf16.msra.mxu0 %v9951_v53 }
 0x693   : > { %5361 = vmatpush.bf16.msra.mxu0 %v9950_v41 }
 0x696   : > { %5362 = vmatmul.bf16.vlgmr.msra.gmra.mxu0 %v5285_v61 }
 0x713   : > { %v5363_v17 = vpop.f32.mrf.mxu0 }
 0x714   : > { %v5364_v52 = vadd.f32 %v10327_v29, %v5363_v17 }
 0x716   : > { %v5373_v7 = vsel %vm5371_vm2, %v5364_v52, %v5283_v55 }
 0x717   : > { %5375 = vst [vmem:[#allocation18] sm:$0xff] %v5373_v7 }
 0x71b   : > { %v5365_v57 = vpop.f32.mrf.mxu0 }
 0x71c PF: > { %v9119_v1 = vld [vmem:[#allocation12 + $0x1c0] sm:$0xf]  ;;  %v10014_v2 = vld [vmem:[#allocation12 + $0x1c4] sm:$0xf]  ;;  %s6585_s29 = sadd.s32 3, %s11083_s9 }
 0x71d   : > { %v10018_v15 = vld [vmem:[#allocation12 + $0x1dc] sm:$0xf0]  ;;  %v9121_v5 = vld [vmem:[#allocation12 + $0x1e0] sm:$0xf0]  ;;  %p9405_p12 = scmp.ne.s32.totalorder %s6585_s29, 7 }
 0x71e   : > { %v9375_v60 = vld [vmem:[#allocation12 + $0x3c0] sm:$0xf]  ;;  %v9120_v62 = vor.u32 %v10018_v15, %v9119_v1  ;;  %v9124_v8 = vor.u32 %v10014_v2, %v9121_v5  ;;  %v10078_v9 = vld [vmem:[#allocation12 + $0x3c4] sm:$0xf] }
 0x71f   : > { %v10082_v40 = vld [vmem:[#allocation12 + $0x3dc] sm:$0xf0]  ;;  %v9377_v12 = vld [vmem:[#allocation12 + $0x3e0] sm:$0xf0] }
 0x720   : > { %v9376_v37 = vor.u32 %v10082_v40, %v9375_v60  ;;  %v9087_v27 = vld [vmem:[#allocation12 + $0x180] sm:$0xf]  ;;  %6265 = vmatpush.bf16.msra.mxu0 %v9120_v62  ;;  %v9380_v50 = vor.u32 %v10078_v9, %v9377_v12  ;;  %6293 = vmatpush.bf16.msra.mxu2 %v9124_v8  ;;  %v10006_v26 = vld [vmem:[#allocation12 + $0x184] sm:$0xf] }
 0x721   : > { %v10010_v35 = vld [vmem:[#allocation12 + $0x19c] sm:$0xf0]  ;;  %v9089_v3 = vld [vmem:[#allocation12 + $0x1a0] sm:$0xf0] }
 0x722   : > { %v9343_v13 = vld [vmem:[#allocation12 + $0x380] sm:$0xf]  ;;  %6279 = vmatpush.bf16.msra.mxu1 %v9376_v37  ;;  %v9088_v49 = vor.u32 %v10010_v35, %v9087_v27  ;;  %v10070_v0 = vld [vmem:[#allocation12 + $0x384] sm:$0xf]  ;;  %6307 = vmatpush.bf16.msra.mxu3 %v9380_v50  ;;  %v9092_v48 = vor.u32 %v10006_v26, %v9089_v3 }
 0x723   : > { %v10074_v14 = vld [vmem:[#allocation12 + $0x39c] sm:$0xf0]  ;;  %v9345_v44 = vld [vmem:[#allocation12 + $0x3a0] sm:$0xf0] }
 0x724   : > { %v9344_v20 = vor.u32 %v10074_v14, %v9343_v13  ;;  %v9055_v32 = vld [vmem:[#allocation12 + $0x140] sm:$0xf]  ;;  %v9348_v63 = vor.u32 %v10070_v0, %v9345_v44  ;;  %v9998_v39 = vld [vmem:[#allocation12 + $0x144] sm:$0xf]  ;;  %6266 = vmatpush.bf16.msra.mxu0 %v9088_v49  ;;  %6294 = vmatpush.bf16.msra.mxu2 %v9092_v48 }
 0x725   : > { %v10002_v16 = vld [vmem:[#allocation12 + $0x15c] sm:$0xf0]  ;;  %v9057_v21 = vld [vmem:[#allocation12 + $0x160] sm:$0xf0] }
 0x726   : > { %v9311_v30 = vld [vmem:[#allocation12 + $0x340] sm:$0xf]  ;;  %v9056_v45 = vor.u32 %v10002_v16, %v9055_v32  ;;  %v10062_v36 = vld [vmem:[#allocation12 + $0x344] sm:$0xf]  ;;  %6280 = vmatpush.bf16.msra.mxu1 %v9344_v20  ;;  %v9060_v54 = vor.u32 %v9998_v39, %v9057_v21  ;;  %6308 = vmatpush.bf16.msra.mxu3 %v9348_v63 }
 0x727   : > { %v10066_v42 = vld [vmem:[#allocation12 + $0x35c] sm:$0xf0]  ;;  %v9313_v10 = vld [vmem:[#allocation12 + $0x360] sm:$0xf0] }
 0x728   : > { %v9312_v58 = vor.u32 %v10066_v42, %v9311_v30  ;;  %v9023_v53 = vld [vmem:[#allocation12 + $0x100] sm:$0xf]  ;;  %v9316_v61 = vor.u32 %v10062_v36, %v9313_v10  ;;  %v9990_v11 = vld [vmem:[#allocation12 + $0x104] sm:$0xf]  ;;  %6267 = vmatpush.bf16.msra.mxu0 %v9056_v45  ;;  %6295 = vmatpush.bf16.msra.mxu2 %v9060_v54 }
 0x729   : > { %v9994_v55 = vld [vmem:[#allocation12 + $0x11c] sm:$0xf0]  ;;  %v9025_v29 = vld [vmem:[#allocation12 + $0x120] sm:$0xf0] }
 0x72a   : > { %v9279_v41 = vld [vmem:[#allocation12 + $0x300] sm:$0xf]  ;;  %v10054_v17 = vld [vmem:[#allocation12 + $0x304] sm:$0xf]  ;;  %v9024_v7 = vor.u32 %v9994_v55, %v9023_v53  ;;  %6281 = vmatpush.bf16.msra.mxu1 %v9312_v58  ;;  %v9028_v1 = vor.u32 %v9990_v11, %v9025_v29  ;;  %6309 = vmatpush.bf16.msra.mxu3 %v9316_v61 }
 0x72b   : > { %v10058_v56 = vld [vmem:[#allocation12 + $0x31c] sm:$0xf0]  ;;  %v9281_v52 = vld [vmem:[#allocation12 + $0x320] sm:$0xf0] }
 0x72c   : > { %v9280_v57 = vor.u32 %v10058_v56, %v9279_v41  ;;  %v8991_v15 = vld [vmem:[#allocation12 + $0xc0] sm:$0xf]  ;;  %v9284_v40 = vor.u32 %v10054_v17, %v9281_v52  ;;  %v9982_v5 = vld [vmem:[#allocation12 + $0xc4] sm:$0xf]  ;;  %6268 = vmatpush.bf16.msra.mxu0 %v9024_v7  ;;  %6296 = vmatpush.bf16.msra.mxu2 %v9028_v1  ;;  %v9127_v1 = vld [vmem:[#allocation12 + $0x1c8] sm:$0xf] }
 0x72d   : > { %v9986_v60 = vld [vmem:[#allocation12 + $0xdc] sm:$0xf0]  ;;  %v8993_v37 = vld [vmem:[#allocation12 + $0xe0] sm:$0xf0] }
 0x72e   : > { %v9247_v62 = vld [vmem:[#allocation12 + $0x2c0] sm:$0xf]  ;;  %v10046_v8 = vld [vmem:[#allocation12 + $0x2c4] sm:$0xf]  ;;  %v8992_v12 = vor.u32 %v9986_v60, %v8991_v15  ;;  %6282 = vmatpush.bf16.msra.mxu1 %v9280_v57  ;;  %v8996_v50 = vor.u32 %v9982_v5, %v8993_v37  ;;  %6310 = vmatpush.bf16.msra.mxu3 %v9284_v40  ;;  %v10019_v15 = vld [vmem:[#allocation12 + $0x1e4] sm:$0xf0] }
 0x72f   : > { %v10050_v2 = vld [vmem:[#allocation12 + $0x2dc] sm:$0xf0]  ;;  %v9249_v9 = vld [vmem:[#allocation12 + $0x2e0] sm:$0xf0]  ;;  %v9383_v60 = vld [vmem:[#allocation12 + $0x3c8] sm:$0xf] }
 0x730   : > { %v9248_v27 = vor.u32 %v10050_v2, %v9247_v62  ;;  %v8959_v35 = vld [vmem:[#allocation12 + $0x80] sm:$0xf]  ;;  %v9252_v49 = vor.u32 %v10046_v8, %v9249_v9  ;;  %v9974_v26 = vld [vmem:[#allocation12 + $0x84] sm:$0xf]  ;;  %6269 = vmatpush.bf16.msra.mxu0 %v8992_v12  ;;  %6297 = vmatpush.bf16.msra.mxu2 %v8996_v50  ;;  %v10083_v62 = vld [vmem:[#allocation12 + $0x3e4] sm:$0xf0] }
 0x731   : > { %v9978_v13 = vld [vmem:[#allocation12 + $0x9c] sm:$0xf0]  ;;  %v8961_v3 = vld [vmem:[#allocation12 + $0xa0] sm:$0xf0]  ;;  %v10015_v2 = vld [vmem:[#allocation12 + $0x1cc] sm:$0xf] }
 0x732   : > { %v9215_v14 = vld [vmem:[#allocation12 + $0x280] sm:$0xf]  ;;  %v10038_v0 = vld [vmem:[#allocation12 + $0x284] sm:$0xf]  ;;  %v8960_v44 = vor.u32 %v9978_v13, %v8959_v35  ;;  %6283 = vmatpush.bf16.msra.mxu1 %v9248_v27  ;;  %v8964_v16 = vor.u32 %v9974_v26, %v8961_v3  ;;  %6311 = vmatpush.bf16.msra.mxu3 %v9252_v49  ;;  %v9129_v5 = vld [vmem:[#allocation12 + $0x1e8] sm:$0xf0]  ;;  %v9128_v13 = vor.u32 %v10019_v15, %v9127_v1 }
 0x733   : > { %v10042_v20 = vld [vmem:[#allocation12 + $0x29c] sm:$0xf0]  ;;  %v9217_v48 = vld [vmem:[#allocation12 + $0x2a0] sm:$0xf0]  ;;  %v10079_v37 = vld [vmem:[#allocation12 + $0x3cc] sm:$0xf]  ;;  %v9384_v26 = vor.u32 %v10083_v62, %v9383_v60  ;;  %v9132_v3 = vor.u32 %v10015_v2, %v9129_v5 }
 0x734   : > { %v9216_v32 = vor.u32 %v10042_v20, %v9215_v14  ;;  %v8927_v63 = vld [vmem:[#allocation12 + $0x40] sm:$0xf]  ;;  %v9220_v39 = vor.u32 %v10038_v0, %v9217_v48  ;;  %v9966_v21 = vld [vmem:[#allocation12 + $0x44] sm:$0xf]  ;;  %6270 = vmatpush.bf16.msra.mxu0 %v8960_v44  ;;  %6298 = vmatpush.bf16.msra.mxu2 %v8964_v16  ;;  %v9385_v12 = vld [vmem:[#allocation12 + $0x3e8] sm:$0xf0] }
 0x735   : > { %v9970_v30 = vld [vmem:[#allocation12 + $0x5c] sm:$0xf0]  ;;  %v8929_v36 = vld [vmem:[#allocation12 + $0x60] sm:$0xf0]  ;;  %v9095_v27 = vld [vmem:[#allocation12 + $0x188] sm:$0xf] }
 0x736   : > { %v9183_v42 = vld [vmem:[#allocation12 + $0x240] sm:$0xf]  ;;  %v10030_v10 = vld [vmem:[#allocation12 + $0x244] sm:$0xf]  ;;  %v8928_v54 = vor.u32 %v9970_v30, %v8927_v63  ;;  %6284 = vmatpush.bf16.msra.mxu1 %v9216_v32  ;;  %v8932_v56 = vor.u32 %v9966_v21, %v8929_v36  ;;  %6312 = vmatpush.bf16.msra.mxu3 %v9220_v39  ;;  %v10011_v50 = vld [vmem:[#allocation12 + $0x1a4] sm:$0xf0]  ;;  %v9388_v32 = vor.u32 %v10079_v37, %v9385_v12 }
 0x737   : > { %v10034_v45 = vld [vmem:[#allocation12 + $0x25c] sm:$0xf0]  ;;  %v9185_v58 = vld [vmem:[#allocation12 + $0x260] sm:$0xf0]  ;;  %v9351_v14 = vld [vmem:[#allocation12 + $0x388] sm:$0xf]  ;;  %v9096_v36 = vor.u32 %v10011_v50, %v9095_v27 }
 0x738   : > { %v8895_v53 = vld [vmem:[#allocation12] sm:$0xf]  ;;  %v9184_v61 = vor.u32 %v10034_v45, %v9183_v42  ;;  %v9958_v29 = vld [vmem:[#allocation12 + $0x4] sm:$0xf]  ;;  %v9188_v52 = vor.u32 %v10030_v10, %v9185_v58  ;;  %6271 = vmatpush.bf16.msra.mxu0 %v8928_v54  ;;  %6299 = vmatpush.bf16.msra.mxu2 %v8932_v56  ;;  %v10075_v49 = vld [vmem:[#allocation12 + $0x3a4] sm:$0xf0] }
 0x739   : > { %v9962_v55 = vld [vmem:[#allocation12 + $0x1c] sm:$0xf0]  ;;  %v8897_v17 = vld [vmem:[#allocation12 + $0x20] sm:$0xf0]  ;;  %v10007_v20 = vld [vmem:[#allocation12 + $0x18c] sm:$0xf] }
 0x73a   : > { %v9151_v41 = vld [vmem:[#allocation12 + $0x200] sm:$0xf]  ;;  %v10022_v7 = vld [vmem:[#allocation12 + $0x204] sm:$0xf]  ;;  %v8896_v40 = vor.u32 %v9962_v55, %v8895_v53  ;;  %6285 = vmatpush.bf16.msra.mxu1 %v9184_v61  ;;  %v8900_v9 = vor.u32 %v9958_v29, %v8897_v17  ;;  %6313 = vmatpush.bf16.msra.mxu3 %v9188_v52  ;;  %v9097_v0 = vld [vmem:[#allocation12 + $0x1a8] sm:$0xf0]  ;;  %v9352_v53 = vor.u32 %v10075_v49, %v9351_v14 }
 0x73b   : > { %v10026_v11 = vld [vmem:[#allocation12 + $0x21c] sm:$0xf0]  ;;  %v9153_v57 = vld [vmem:[#allocation12 + $0x220] sm:$0xf0]  ;;  %v10071_v48 = vld [vmem:[#allocation12 + $0x38c] sm:$0xf]  ;;  %v9100_v55 = vor.u32 %v10007_v20, %v9097_v0 }
 0x73c   : > { %v9152_v8 = vor.u32 %v10026_v11, %v9151_v41  ;;  %v9156_v35 = vor.u32 %v10022_v7, %v9153_v57  ;;  %v9353_v44 = vld [vmem:[#allocation12 + $0x3a8] sm:$0xf0]  ;;  %6272 = vmatpush.bf16.msra.mxu0 %v8896_v40  ;;  %v11463_v16 = vld [vmem:[#allocation12 + $0x148] sm:$0xf]  ;;  %6300 = vmatpush.bf16.msra.mxu2 %v8900_v9  ;;  %v5377_v12 = vld [vmem:[#allocation2 + $0xa8] sm:$0xff] }
 0x73d   : > { %v11465_v63 = vld [vmem:[#allocation12 + $0x164] sm:$0xf0]  ;;  %v11471_v39 = vld [vmem:[#allocation12 + $0x14c] sm:$0xf]  ;;  %v9356_v11 = vor.u32 %v10071_v48, %v9353_v44  ;;  %v5378_v27 = vld [vmem:[#allocation2 + $0xd0] sm:$0xff]  ;;  %v5385_v20 = vadd.f32 %v5377_v12, %v11420_v47 }
 0x73e   : > { %v11467_v30 = vld [vmem:[#allocation12 + $0x348] sm:$0xf]  ;;  %6286 = vmatpush.bf16.msra.mxu1 %v9152_v8  ;;  %v11473_v45 = vld [vmem:[#allocation12 + $0x168] sm:$0xf0]  ;;  %6314 = vmatpush.bf16.msra.mxu3 %v9156_v35  ;;  %v9064_v7 = vor.u32 %v11465_v63, %v11463_v16  ;;  %v5380_v14 = vld [vmem:[#allocation2 + $0x28] sm:$0xff] }
 0x73f   : > { %v11469_v42 = vld [vmem:[#allocation12 + $0x364] sm:$0xf0]  ;;  %v11475_v21 = vld [vmem:[#allocation12 + $0x34c] sm:$0xf]  ;;  %v9068_v2 = vor.u32 %v11471_v39, %v11473_v45  ;;  %v5381_v49 = vld [vmem:[#allocation2 + $0xa0] sm:$0xff]  ;;  %v5388_v16 = vadd.f32 %v5380_v14, %v11430_v19 }
 0x740   : > { %6321 = vmatpush.bf16.msrb.mxu0 %v9128_v13  ;;  %v11477_v10 = vld [vmem:[#allocation12 + $0x368] sm:$0xf0]  ;;  %v11479_v58 = vld [vmem:[#allocation12 + $0x108] sm:$0xf]  ;;  %6349 = vmatpush.bf16.msrb.mxu2 %v9132_v3  ;;  %v9320_v57 = vor.u32 %v11469_v42, %v11467_v30  ;;  %v5379_v13 = vld [vmem:[#allocation2 + $0x10] sm:$0xff]  ;;  %v5389_v63 = vadd.f32 %v5381_v49, %v11424_v51 }
 0x741   : > { %v11481_v54 = vld [vmem:[#allocation12 + $0x124] sm:$0xf0]  ;;  %v11487_v56 = vld [vmem:[#allocation12 + $0x10c] sm:$0xf]  ;;  %v9324_v5 = vor.u32 %v11475_v21, %v11477_v10  ;;  %v5383_v48 = vld [vmem:[#allocation2 + $0x20] sm:$0xff] }
 0x742   : > { %6335 = vmatpush.bf16.msrb.mxu1 %v9384_v26  ;;  %v11483_v41 = vld [vmem:[#allocation12 + $0x308] sm:$0xf]  ;;  %6363 = vmatpush.bf16.msrb.mxu3 %v9388_v32  ;;  %v11489_v29 = vld [vmem:[#allocation12 + $0x128] sm:$0xf0]  ;;  %v9032_v37 = vor.u32 %v11481_v54, %v11479_v58  ;;  %v5386_v26 = vadd.f32 %v5378_v27, %v11422_v33  ;;  %v5387_v32 = vadd.f32 %v5379_v13, %v11428_v22 }
 0x743   : > { %v11485_v61 = vld [vmem:[#allocation12 + $0x324] sm:$0xf0]  ;;  %v11491_v17 = vld [vmem:[#allocation12 + $0x30c] sm:$0xf]  ;;  %v9036_v50 = vor.u32 %v11487_v56, %v11489_v29  ;;  %v5391_v39 = vadd.f32 %v5383_v48, %v11432_v46 }
 0x744   : > { %v11493_v52 = vld [vmem:[#allocation12 + $0x328] sm:$0xf0]  ;;  %v11499_v1 = vld [vmem:[#allocation12 + $0xc8] sm:$0xf]  ;;  %6322 = vmatpush.bf16.msrb.mxu0 %v9096_v36  ;;  %v9288_v8 = vor.u32 %v11485_v61, %v11483_v41  ;;  %6350 = vmatpush.bf16.msrb.mxu2 %v9100_v55  ;;  %v5393_v21 = vpack.c.bf16 %v5386_v26, %v5385_v20  ;;  %v5394_v36 = vpack.c.bf16 %v5388_v16, %v5387_v32 }
 0x745   : > { %v11501_v15 = vld [vmem:[#allocation12 + $0xe4] sm:$0xf0]  ;;  %v11507_v40 = vld [vmem:[#allocation12 + $0xcc] sm:$0xf]  ;;  %v9292_v3 = vor.u32 %v11491_v17, %v11493_v52  ;;  %v5483_v16 = vpack.c.bf16 %v11451_v25, %v11451_v25 }
 0x746   : > { %v11503_v60 = vld [vmem:[#allocation12 + $0x2c8] sm:$0xf]  ;;  %v11517_v9 = vld [vmem:[#allocation12 + $0xe8] sm:$0xf0]  ;;  %6336 = vmatpush.bf16.msrb.mxu1 %v9352_v53  ;;  %6364 = vmatpush.bf16.msrb.mxu3 %v9356_v11  ;;  %v9000_v22 = vor.u32 %v11501_v15, %v11499_v1  ;;  %v5417_v54 = vrot.slane %v5393_v21, 4  ;;  %v5439_v41 = vunpack.c.l.bf16 %v5394_v36  ;;  %v5449_v61 = vrot.slane %v5394_v36, 4 }
 0x747   : > { %v11505_v62 = vld [vmem:[#allocation12 + $0x2e4] sm:$0xf0]  ;;  %v11521_v35 = vld [vmem:[#allocation12 + $0x2cc] sm:$0xf]  ;;  %v9004_v19 = vor.u32 %v11507_v40, %v11517_v9 }
 0x748   : > { %v5382_v0 = vld [vmem:[#allocation2 + $0xf8] sm:$0xff]  ;;  %6323 = vmatpush.bf16.msrb.mxu0 %v9064_v7  ;;  %v9256_v51 = vor.u32 %v11505_v62, %v11503_v60  ;;  %6351 = vmatpush.bf16.msrb.mxu2 %v9068_v2  ;;  %v5421_v7 = vunpack.c.l.bf16 %v5417_v54  ;;  %v5453_v60 = vunpack.c.l.bf16 %v5449_v61  ;;  %10328 = vtanh.f32 %v5439_v41 }
 0x749   : > { %v5384_v44 = vld [vmem:[#allocation2 + $0x98] sm:$0xff]  ;;  %v5390_v33 = vadd.f32 %v5382_v0, %v11426_v59 }
 0x74a   : > { %v11530_v30 = vld [vmem:[#allocation12 + $0x2e8] sm:$0xf0]  ;;  %v11532_v42 = vld [vmem:[#allocation12 + $0x88] sm:$0xf]  ;;  %v5392_v45 = vadd.f32 %v5384_v44, %v11434_v28  ;;  %6337 = vmatpush.bf16.msrb.mxu1 %v9320_v57  ;;  %v5397_v28 = vunpack.c.l.bf16 %v5393_v21  ;;  %6365 = vmatpush.bf16.msrb.mxu3 %v9324_v5  ;;  %v5423_v12 = vmul.f32 0.5, %v5421_v7  ;;  %v5455_v13 = vmul.f32 0.5, %v5453_v60 }
 0x74b   : > { %v11534_v47 = vld [vmem:[#allocation12 + $0xa4] sm:$0xf0]  ;;  %v5395_v46 = vpack.c.bf16 %v5390_v33, %v5389_v63  ;;  %v9260_v53 = vor.u32 %v11521_v35, %v11530_v30  ;;  %v9975_v56 = vld [vmem:[#allocation12 + $0x8c] sm:$0xf]  ;;  %v5484_v63 = vpack.c.bf16 %v11454_v43, %v11454_v43  ;;  %v5493_v33 = vunpack.c.l.b16 %v5483_v16 }
 0x74c   : > { %v11545_v10 = vld [vmem:[#allocation12 + $0x288] sm:$0xf]  ;;  %v5396_v58 = vpack.c.bf16 %v5392_v45, %v5391_v39  ;;  %v8968_v55 = vor.u32 %v11534_v47, %v11532_v42  ;;  %v8969_v11 = vld [vmem:[#allocation12 + $0xa8] sm:$0xf0]  ;;  %v5399_v17 = vmul.f32 0.5, %v5397_v28  ;;  %6324 = vmatpush.bf16.msrb.mxu0 %v9032_v37  ;;  %6352 = vmatpush.bf16.msrb.mxu2 %v9036_v50  ;;  %v5425_v20 = vpack.c.bf16 %v5423_v12, %v5423_v12 }
 0x74d   : > { %v10043_v59 = vld [vmem:[#allocation12 + $0x2a4] sm:$0xf0]  ;;  %v5398_v29 = vunpack.c.l.bf16 %v5395_v46  ;;  %v5418_v52 = vrot.slane %v5395_v46, 4  ;;  %v10039_v62 = vld [vmem:[#allocation12 + $0x28c] sm:$0xf]  ;;  %v8972_v27 = vor.u32 %v9975_v56, %v8969_v11  ;;  %v5457_v50 = vpack.c.bf16 %v5455_v13, %v5455_v13 }
 0x74e   : > { %v9224_v57 = vor.u32 %v10043_v59, %v11545_v10  ;;  %v5440_v1 = vunpack.c.l.bf16 %v5396_v58  ;;  %v5450_v15 = vrot.slane %v5396_v58, 4  ;;  %6338 = vmatpush.bf16.msrb.mxu1 %v9288_v8  ;;  %v9225_v40 = vld [vmem:[#allocation12 + $0x2a8] sm:$0xf0]  ;;  %v5401_v5 = vpack.c.bf16 %v5399_v17, %v5399_v17  ;;  %6366 = vmatpush.bf16.msrb.mxu3 %v9292_v3  ;;  %v10329_v42 = vpop.eup %10328  ;;  %v9971_v43 = vld [vmem:[#allocation12 + $0x64] sm:$0xf0] }
 0x74f   : > { %v5400_v2 = vmul.f32 0.5, %v5398_v29  ;;  %v5422_v9 = vunpack.c.l.bf16 %v5418_v52  ;;  %v9228_v26 = vor.u32 %v10039_v62, %v9225_v40  ;;  %v5427_v44 = vunpack.c.l.bf16 %v5425_v20  ;;  %v10035_v10 = vld [vmem:[#allocation12 + $0x264] sm:$0xf0]  ;;  %v9967_v59 = vld [vmem:[#allocation12 + $0x4c] sm:$0xf] }
 0x750   : > { %v5454_v35 = vunpack.c.l.bf16 %v5450_v15  ;;  %v5403_v37 = vunpack.c.l.bf16 %v5401_v5  ;;  %6325 = vmatpush.bf16.msrb.mxu0 %v9000_v22  ;;  %10330 = vtanh.f32 %v5440_v1  ;;  %6353 = vmatpush.bf16.msrb.mxu2 %v9004_v19  ;;  %v5459_v32 = vunpack.c.l.bf16 %v5457_v50  ;;  %v8935_v22 = vld [vmem:[#allocation12 + $0x48] sm:$0xf]  ;;  %v8937_v46 = vld [vmem:[#allocation12 + $0x68] sm:$0xf0] }
 0x751   : > { %v5402_v14 = vpack.c.bf16 %v5400_v2, %v5400_v2  ;;  %v5424_v49 = vmul.f32 0.5, %v5422_v9  ;;  %v5494_v39 = vunpack.c.l.b16 %v5484_v63  ;;  %v8936_v36 = vor.u32 %v9971_v43, %v8935_v22  ;;  %v10031_v41 = vld [vmem:[#allocation12 + $0x24c] sm:$0xf]  ;;  %v8903_v56 = vld [vmem:[#allocation12 + $0x8] sm:$0xf] }
 0x752   : > { %v5456_v8 = vmul.f32 0.5, %v5454_v35  ;;  %6339 = vmatpush.bf16.msrb.mxu1 %v9256_v51  ;;  %10332 = vtanh.f32 %v5403_v37  ;;  %6367 = vmatpush.bf16.msrb.mxu3 %v9260_v53  ;;  %v9191_v51 = vld [vmem:[#allocation12 + $0x248] sm:$0xf]  ;;  %v5443_v28 = vpack.c.bf16 %v10329_v42, %v10329_v42  ;;  %v9193_v61 = vld [vmem:[#allocation12 + $0x268] sm:$0xf0] }
 0x753   : > { %v5404_v0 = vunpack.c.l.bf16 %v5402_v14  ;;  %v5426_v48 = vpack.c.bf16 %v5424_v49, %v5424_v49  ;;  %v11556_v21 = vpack.c.b16 %v5494_v39, %v5493_v33  ;;  %v9192_v53 = vor.u32 %v10035_v10, %v9191_v51  ;;  %v9963_v7 = vld [vmem:[#allocation12 + $0x24] sm:$0xf0]  ;;  %v9959_v2 = vld [vmem:[#allocation12 + $0xc] sm:$0xf]  ;;  %v9393_v33 = vld [vmem:[#allocation12 + $0x3f0] sm:$0xf0] }
 0x754   : > { %v5458_v3 = vpack.c.bf16 %v5456_v8, %v5456_v8  ;;  %6326 = vmatpush.bf16.msrb.mxu0 %v8968_v55  ;;  %6354 = vmatpush.bf16.msrb.mxu2 %v8972_v27  ;;  %v8940_v55 = vor.u32 %v9967_v59, %v8937_v46  ;;  %v9196_v52 = vor.u32 %v10031_v41, %v9193_v61  ;;  %v10027_v1 = vld [vmem:[#allocation12 + $0x224] sm:$0xf0]  ;;  %v8905_v5 = vld [vmem:[#allocation12 + $0x28] sm:$0xf0]  ;;  %v9359_v51 = vld [vmem:[#allocation12 + $0x390] sm:$0xf] }
 0x755   : > { %10334 = vtanh.f32 %v5404_v0  ;;  %v5428_v30 = vunpack.c.l.bf16 %v5426_v48  ;;  %6315 = vmatmul.bf16.vlgmr.msra.gmra.mxu3 %v11556_v21  ;;  %6287 = vmatmul.bf16.vlgmr.msra.gmra.mxu1 %v11556_v21  ;;  %v8904_v62 = vor.u32 %v9963_v7, %v8903_v56  ;;  %v10023_v9 = vld [vmem:[#allocation12 + $0x20c] sm:$0xf]  ;;  %v8908_v14 = vor.u32 %v9959_v2, %v8905_v5  ;;  %v9391_v0 = vld [vmem:[#allocation12 + $0x3d0] sm:$0xf]  ;;  %v10064_v7 = vld [vmem:[#allocation12 + $0x354] sm:$0xf] }
 0x756   : > { %10336 = vtanh.f32 %v5427_v44  ;;  %v5460_v47 = vunpack.c.l.bf16 %v5458_v3  ;;  %6340 = vmatpush.bf16.msrb.mxu1 %v9224_v57  ;;  %v10331_v45 = vpop.eup %10330  ;;  %6368 = vmatpush.bf16.msrb.mxu3 %v9228_v26  ;;  %v9159_v57 = vld [vmem:[#allocation12 + $0x208] sm:$0xf]  ;;  %v9161_v37 = vld [vmem:[#allocation12 + $0x228] sm:$0xf0]  ;;  %v5445_v26 = vunpack.c.l.bf16 %v5443_v28  ;;  %v10084_v48 = vld [vmem:[#allocation12 + $0x3ec] sm:$0xf0] }
 0x757   : > { %10338 = vtanh.f32 %v5428_v30  ;;  %v5444_v54 = vpack.c.bf16 %v10331_v45, %v10331_v45  ;;  %v9160_v40 = vor.u32 %v10027_v1, %v9159_v57  ;;  %v9164_v50 = vor.u32 %v10023_v9, %v9161_v37  ;;  %v9327_v56 = vld [vmem:[#allocation12 + $0x350] sm:$0xf]  ;;  %v9329_v57 = vld [vmem:[#allocation12 + $0x370] sm:$0xf0] }
 0x758   : > { %10340 = vtanh.f32 %v5459_v32  ;;  %v10333_v25 = vpop.eup %10332  ;;  %6327 = vmatpush.bf16.msrb.mxu0 %v8936_v36  ;;  %6355 = vmatpush.bf16.msrb.mxu2 %v8940_v55  ;;  %v9392_v42 = vor.u32 %v10084_v48, %v9391_v0  ;;  %v9263_v5 = vld [vmem:[#allocation12 + $0x2d0] sm:$0xf] }
 0x759   : > { %10342 = vtanh.f32 %v5460_v47  ;;  %v5407_v19 = vpack.c.bf16 %v10333_v25, %v10333_v25  ;;  %v5446_v8 = vunpack.c.l.bf16 %v5444_v54  ;;  %v10080_v47 = vld [vmem:[#allocation12 + $0x3d4] sm:$0xf]  ;;  %v10052_v9 = vld [vmem:[#allocation12 + $0x2ec] sm:$0xf0] }
 0x75a   : > { %6341 = vmatpush.bf16.msrb.mxu1 %v9192_v53  ;;  %6369 = vmatpush.bf16.msrb.mxu3 %v9196_v52  ;;  %v9396_v43 = vor.u32 %v10080_v47, %v9393_v33  ;;  %v10072_v54 = vld [vmem:[#allocation12 + $0x394] sm:$0xf]  ;;  %v9264_v37 = vor.u32 %v10052_v9, %v9263_v5  ;;  %v9367_v5 = vld [vmem:[#allocation12 + $0x398] sm:$0xf] }
 0x75b   : > { %v10335_v58 = vpop.eup %10334  ;;  %v5409_v17 = vunpack.c.l.bf16 %v5407_v19  ;;  %v10076_v19 = vld [vmem:[#allocation12 + $0x3ac] sm:$0xf0]  ;;  %v9361_v53 = vld [vmem:[#allocation12 + $0x3b0] sm:$0xf0]  ;;  %v10077_v9 = vld [vmem:[#allocation12 + $0x3b4] sm:$0xf0] }
 0x75c   : > { %v10337_v11 = vpop.eup %10336  ;;  %v5408_v29 = vpack.c.bf16 %v10335_v58, %v10335_v58  ;;  %6328 = vmatpush.bf16.msrb.mxu0 %v8904_v62  ;;  %6356 = vmatpush.bf16.msrb.mxu2 %v8908_v14  ;;  %v9360_v28 = vor.u32 %v10076_v19, %v9359_v51  ;;  %v9364_v41 = vor.u32 %v10072_v54, %v9361_v53  ;;  %v10056_v62 = vld [vmem:[#allocation12 + $0x314] sm:$0xf]  ;;  %v9103_v51 = vld [vmem:[#allocation12 + $0x190] sm:$0xf] }
 0x75d   : > { %v10339_v15 = vpop.eup %10338  ;;  %v5431_v60 = vpack.c.bf16 %v10337_v11, %v10337_v11  ;;  %v5411_v35 = vmul.f32 0.5, %v5409_v17  ;;  %v10068_v11 = vld [vmem:[#allocation12 + $0x36c] sm:$0xf0]  ;;  %v9233_v33 = vld [vmem:[#allocation12 + $0x2b0] sm:$0xf0] }
 0x75e   : > { %v10341_v12 = vpop.eup %10340  ;;  %v5410_v27 = vunpack.c.l.bf16 %v5408_v29  ;;  %v5432_v13 = vpack.c.bf16 %v10339_v15, %v10339_v15  ;;  %6342 = vmatpush.bf16.msrb.mxu1 %v9160_v40  ;;  %6370 = vmatpush.bf16.msrb.mxu3 %v9164_v50  ;;  %v9328_v52 = vor.u32 %v10068_v11, %v9327_v56  ;;  %v9295_v15 = vld [vmem:[#allocation12 + $0x310] sm:$0xf]  ;;  %v9297_v40 = vld [vmem:[#allocation12 + $0x330] sm:$0xf0]  ;;  %v10085_v56 = vld [vmem:[#allocation12 + $0x3f4] sm:$0xf0] }
 0x75f   : > { %v10343_v49 = vpop.eup %10342  ;;  %v5433_v20 = vunpack.c.l.bf16 %v5431_v60  ;;  %v5413_v3 = vadd.f32 0.5, %v5411_v35  ;;  %v5463_v16 = vpack.c.bf16 %v10341_v12, %v10341_v12  ;;  %v10048_v35 = vld [vmem:[#allocation12 + $0x2d4] sm:$0xf]  ;;  %v10012_v19 = vld [vmem:[#allocation12 + $0x1ac] sm:$0xf0] }
 0x760   : > { %v5412_v44 = vmul.f32 0.5, %v5410_v27  ;;  %v5434_v32 = vunpack.c.l.bf16 %v5432_v13  ;;  %v5464_v30 = vpack.c.bf16 %v10343_v49, %v10343_v49  ;;  %v9300_v27 = vor.u32 %v10056_v62, %v9297_v40  ;;  %v9265_v13 = vld [vmem:[#allocation12 + $0x2f0] sm:$0xf0]  ;;  %v9167_v53 = vld [vmem:[#allocation12 + $0x210] sm:$0xf] }
 0x761   : > { %v5435_v63 = vmul.f32 0.5, %v5433_v20  ;;  %v5473_v22 = vmul.f32 %v5445_v26, %v5413_v3  ;;  %v5465_v10 = vunpack.c.l.bf16 %v5463_v16  ;;  %v9231_v26 = vld [vmem:[#allocation12 + $0x290] sm:$0xf]  ;;  %v9268_v0 = vor.u32 %v10048_v35, %v9265_v13  ;;  %v10016_v16 = vld [vmem:[#allocation12 + $0x1d4] sm:$0xf] }
 0x762   : > { %v5414_v39 = vadd.f32 0.5, %v5412_v44  ;;  %v5436_v45 = vmul.f32 0.5, %v5434_v32  ;;  %6391 = vmatpush.bf16.msra.mxu1 %v9392_v42  ;;  %v5466_v46 = vunpack.c.l.bf16 %v5464_v30  ;;  %6419 = vmatpush.bf16.msra.mxu3 %v9396_v43  ;;  %v9135_v44 = vld [vmem:[#allocation12 + $0x1d0] sm:$0xf]  ;;  %v10040_v42 = vld [vmem:[#allocation12 + $0x294] sm:$0xf]  ;;  %v9104_v11 = vor.u32 %v10012_v19, %v9103_v51 }
 0x763   : > { %v5437_v25 = vadd.f32 0.5, %v5435_v63  ;;  %v5467_v29 = vmul.f32 0.5, %v5465_v10  ;;  %v10020_v3 = vld [vmem:[#allocation12 + $0x1ec] sm:$0xf0]  ;;  %v9137_v63 = vld [vmem:[#allocation12 + $0x1f0] sm:$0xf0] }
 0x764   : > { %v5438_v36 = vadd.f32 0.5, %v5436_v45  ;;  %v5474_v59 = vmul.f32 %v5446_v8, %v5414_v39  ;;  %v5468_v1 = vmul.f32 0.5, %v5466_v46  ;;  %v10044_v8 = vld [vmem:[#allocation12 + $0x2ac] sm:$0xf0]  ;;  %v9140_v43 = vor.u32 %v10016_v16, %v9137_v63  ;;  %v10008_v10 = vld [vmem:[#allocation12 + $0x194] sm:$0xf] }
 0x765   : > { %v5471_v58 = vmul.f32 %v5437_v25, %v11397_v18  ;;  %v9332_v18 = vor.u32 %v10064_v7, %v9329_v57  ;;  %6371 = vmatmul.bf16.vlgmr.msrb.gmra.mxu3 %v11556_v21  ;;  %6343 = vmatmul.bf16.vlgmr.msrb.gmra.mxu1 %v11556_v21  ;;  %v5469_v2 = vadd.f32 0.5, %v5467_v29  ;;  %v9232_v30 = vor.u32 %v10044_v8, %v9231_v26  ;;  %v9199_v39 = vld [vmem:[#allocation12 + $0x250] sm:$0xf]  ;;  %v9201_v54 = vld [vmem:[#allocation12 + $0x270] sm:$0xf0] }
 0x766   : > { %v5472_v55 = vmul.f32 %v5438_v36, %v11399_v34  ;;  %6392 = vmatpush.bf16.msra.mxu1 %v9360_v28  ;;  %6420 = vmatpush.bf16.msra.mxu3 %v9364_v41  ;;  %v10060_v34 = vld [vmem:[#allocation12 + $0x32c] sm:$0xf0]  ;;  %v5470_v12 = vadd.f32 0.5, %v5468_v1  ;;  %v9236_v46 = vor.u32 %v10040_v42, %v9233_v33  ;;  %v10032_v28 = vld [vmem:[#allocation12 + $0x254] sm:$0xf]  ;;  %v9368_v26 = vor.u32 %v10077_v9, %v9367_v5 }
 0x767   : > { %v11562_v61 = vadd.f32 %v5473_v22, %v5471_v58  ;;  %v9296_v60 = vor.u32 %v10060_v34, %v9295_v15  ;;  %v10036_v45 = vld [vmem:[#allocation12 + $0x26c] sm:$0xf0]  ;;  %v9136_v22 = vor.u32 %v10020_v3, %v9135_v44  ;;  %v9399_v41 = vld [vmem:[#allocation12 + $0x3d8] sm:$0xf]  ;;  %v10000_v57 = vld [vmem:[#allocation12 + $0x154] sm:$0xf] }
 0x768   : > { %v11564_v17 = vadd.f32 %v5474_v59, %v5472_v55  ;;  %v9105_v59 = vld [vmem:[#allocation12 + $0x1b0] sm:$0xf0]  ;;  %v9200_v58 = vor.u32 %v10036_v45, %v9199_v39  ;;  %v10028_v55 = vld [vmem:[#allocation12 + $0x22c] sm:$0xf0]  ;;  %v9400_v62 = vor.u32 %v10085_v56, %v9399_v41  ;;  %v10081_v40 = vld [vmem:[#allocation12 + $0x3dc] sm:$0xf] }
 0x769   : > { %10344 = vtanh.f32 %v11562_v61  ;;  %v9108_v29 = vor.u32 %v10008_v10, %v9105_v59  ;;  %v10004_v7 = vld [vmem:[#allocation12 + $0x16c] sm:$0xf0]  ;;  %v9073_v1 = vld [vmem:[#allocation12 + $0x170] sm:$0xf0]  ;;  %v9168_v15 = vor.u32 %v10028_v55, %v9167_v53  ;;  %v10073_v8 = vld [vmem:[#allocation12 + $0x39c] sm:$0xf] }
 0x76a   : > { %10346 = vtanh.f32 %v11564_v17  ;;  %6393 = vmatpush.bf16.msra.mxu1 %v9328_v52  ;;  %6421 = vmatpush.bf16.msra.mxu3 %v9332_v18  ;;  %v9071_v52 = vld [vmem:[#allocation12 + $0x150] sm:$0xf]  ;;  %v9204_v18 = vor.u32 %v10032_v28, %v9201_v54  ;;  %v10024_v34 = vld [vmem:[#allocation12 + $0x214] sm:$0xf]  ;;  %v10065_v33 = vld [vmem:[#allocation12 + $0x35c] sm:$0xf] }
 0x76b   : > { %v9039_v35 = vld [vmem:[#allocation12 + $0x110] sm:$0xf]  ;;  %v9984_v63 = vld [vmem:[#allocation12 + $0xd4] sm:$0xf]  ;;  %v9337_v39 = vld [vmem:[#allocation12 + $0x378] sm:$0xf0] }
 0x76c   : > { %v9996_v13 = vld [vmem:[#allocation12 + $0x12c] sm:$0xf0]  ;;  %v9303_v45 = vld [vmem:[#allocation12 + $0x318] sm:$0xf]  ;;  %v9976_v10 = vld [vmem:[#allocation12 + $0x94] sm:$0xf] }
 0x76d   : > { %v9040_v44 = vor.u32 %v9996_v13, %v9039_v35  ;;  %v9988_v16 = vld [vmem:[#allocation12 + $0xec] sm:$0xf0]  ;;  %v8977_v59 = vld [vmem:[#allocation12 + $0xb0] sm:$0xf0]  ;;  %v10057_v28 = vld [vmem:[#allocation12 + $0x31c] sm:$0xf] }
 0x76e   : > { %6394 = vmatpush.bf16.msra.mxu1 %v9296_v60  ;;  %6422 = vmatpush.bf16.msra.mxu3 %v9300_v27  ;;  %v9169_v60 = vld [vmem:[#allocation12 + $0x230] sm:$0xf0]  ;;  %v9076_v27 = vor.u32 %v10000_v57, %v9073_v1  ;;  %v8975_v51 = vld [vmem:[#allocation12 + $0x90] sm:$0xf]  ;;  %v9305_v54 = vld [vmem:[#allocation12 + $0x338] sm:$0xf0]  ;;  %v8980_v56 = vor.u32 %v9976_v10, %v8977_v59 }
 0x76f   : > { %v10345_v14 = vpop.eup %10344  ;;  %v9980_v19 = vld [vmem:[#allocation12 + $0xac] sm:$0xf0]  ;;  %v9271_v53 = vld [vmem:[#allocation12 + $0x2d8] sm:$0xf]  ;;  %v9308_v57 = vor.u32 %v10057_v28, %v9305_v54  ;;  %v9960_v9 = vld [vmem:[#allocation12 + $0x14] sm:$0xf] }
 0x770   : > { %v10347_v49 = vpop.eup %10346  ;;  %v5479_v20 = vmul.f32 %v10345_v14, %v5469_v2  ;;  %v9401_v2 = vld [vmem:[#allocation12 + $0x3f8] sm:$0xf0]  ;;  %v9992_v14 = vld [vmem:[#allocation12 + $0x114] sm:$0xf]  ;;  %v10053_v55 = vld [vmem:[#allocation12 + $0x2f4] sm:$0xf0]  ;;  %v8976_v41 = vor.u32 %v9980_v19, %v8975_v51 }
 0x771   : > { %v5480_v50 = vmul.f32 %v10347_v49, %v5470_v12  ;;  %v9072_v12 = vor.u32 %v10004_v7, %v9071_v52  ;;  %v9172_v49 = vor.u32 %v10024_v34, %v9169_v60  ;;  %v9968_v52 = vld [vmem:[#allocation12 + $0x54] sm:$0xf]  ;;  %v9272_v1 = vor.u32 %v10053_v55, %v9271_v53  ;;  %v9239_v34 = vld [vmem:[#allocation12 + $0x298] sm:$0xf]  ;;  %v9964_v5 = vld [vmem:[#allocation12 + $0x2c] sm:$0xf0] }
 0x772   : > { %v5481_v48 = vpack.c.bf16 %v5479_v20, %v5479_v20  ;;  %6395 = vmatpush.bf16.msra.mxu1 %v9264_v37  ;;  %6423 = vmatpush.bf16.msra.mxu3 %v9268_v0  ;;  %v9041_v37 = vld [vmem:[#allocation12 + $0x130] sm:$0xf0]  ;;  %v9404_v20 = vor.u32 %v10081_v40, %v9401_v2  ;;  %v9335_v0 = vld [vmem:[#allocation12 + $0x358] sm:$0xf]  ;;  %v8911_v2 = vld [vmem:[#allocation12 + $0x10] sm:$0xf] }
 0x773   : > { %v5482_v32 = vpack.c.bf16 %v5480_v50, %v5480_v50  ;;  %v9369_v50 = vld [vmem:[#allocation12 + $0x3b8] sm:$0xf0]  ;;  %v9044_v3 = vor.u32 %v9992_v14, %v9041_v37  ;;  %v8945_v7 = vld [vmem:[#allocation12 + $0x70] sm:$0xf0]  ;;  %v10045_v60 = vld [vmem:[#allocation12 + $0x2b4] sm:$0xf0] }
 0x774   : > { %v5487_v47 = vunpack.c.l.b16 %v5481_v48  ;;  %v10069_v48 = vld [vmem:[#allocation12 + $0x374] sm:$0xf0]  ;;  %v9372_v42 = vor.u32 %v10073_v8, %v9369_v50  ;;  %v8948_v40 = vor.u32 %v9968_v52, %v8945_v7  ;;  %v10017_v13 = vld [vmem:[#allocation12 + $0x1dc] sm:$0xf] }
 0x775   : > { %v5488_v25 = vunpack.c.l.b16 %v5482_v32  ;;  %v9007_v32 = vld [vmem:[#allocation12 + $0xd0] sm:$0xf]  ;;  %v10021_v35 = vld [vmem:[#allocation12 + $0x1f4] sm:$0xf0]  ;;  %v9145_v14 = vld [vmem:[#allocation12 + $0x1f8] sm:$0xf0] }
 0x776   : > { %6396 = vmatpush.bf16.msra.mxu1 %v9232_v30  ;;  %6424 = vmatpush.bf16.msra.mxu3 %v9236_v46  ;;  %v9009_v30 = vld [vmem:[#allocation12 + $0xf0] sm:$0xf0]  ;;  %v9340_v46 = vor.u32 %v10065_v33, %v9337_v39  ;;  %v9207_v8 = vld [vmem:[#allocation12 + $0x258] sm:$0xf]  ;;  %v10033_v33 = vld [vmem:[#allocation12 + $0x25c] sm:$0xf] }
 0x777   : > { %v11570_v36 = vpack.c.b16 %v5488_v25, %v5487_v47  ;;  %v9336_v47 = vor.u32 %v10069_v48, %v9335_v0  ;;  %v10061_v25 = vld [vmem:[#allocation12 + $0x334] sm:$0xf0]  ;;  %v8912_v0 = vor.u32 %v9964_v5, %v8911_v2  ;;  %v9209_v39 = vld [vmem:[#allocation12 + $0x278] sm:$0xf0] }
 0x778   : > { %v10037_v50 = vld [vmem:[#allocation12 + $0x274] sm:$0xf0]  ;;  %v10001_v10 = vld [vmem:[#allocation12 + $0x15c] sm:$0xf] }
 0x779   : > { %6301 = vmatmul.bf16.vlgmr.msra.gmra.mxu2 %v11570_v36  ;;  %6273 = vmatmul.bf16.vlgmr.msra.gmra.mxu0 %v11570_v36  ;;  %v9079_v51 = vld [vmem:[#allocation12 + $0x158] sm:$0xf]  ;;  %v9081_v59 = vld [vmem:[#allocation12 + $0x178] sm:$0xf0] }
 0x77a   : > { %6377 = vmatpush.bf16.msra.mxu0 %v9136_v22  ;;  %6405 = vmatpush.bf16.msra.mxu2 %v9140_v43  ;;  %v9008_v22 = vor.u32 %v9988_v16, %v9007_v32  ;;  %v9012_v43 = vor.u32 %v9984_v63, %v9009_v30  ;;  %v9111_v32 = vld [vmem:[#allocation12 + $0x198] sm:$0xf]  ;;  %v10009_v63 = vld [vmem:[#allocation12 + $0x19c] sm:$0xf]  ;;  %v9084_v55 = vor.u32 %v10001_v10, %v9081_v59 }
 0x77b   : > { %6397 = vmatpush.bf16.msra.mxu1 %v9200_v58  ;;  %6425 = vmatpush.bf16.msra.mxu3 %v9204_v18  ;;  %v9304_v58 = vor.u32 %v10061_v25, %v9303_v45  ;;  %v10049_v18 = vld [vmem:[#allocation12 + $0x2dc] sm:$0xf]  ;;  %v10013_v16 = vld [vmem:[#allocation12 + $0x1b4] sm:$0xf0] }
 0x77c   : > { %v9113_v30 = vld [vmem:[#allocation12 + $0x1b8] sm:$0xf0]  ;;  %v9175_v45 = vld [vmem:[#allocation12 + $0x218] sm:$0xf] }
 0x77d   : > { %v10029_v25 = vld [vmem:[#allocation12 + $0x234] sm:$0xf0]  ;;  %v10025_v28 = vld [vmem:[#allocation12 + $0x21c] sm:$0xf] }
 0x77e   : > { %6378 = vmatpush.bf16.msra.mxu0 %v9104_v11  ;;  %6406 = vmatpush.bf16.msra.mxu2 %v9108_v29  ;;  %v8943_v11 = vld [vmem:[#allocation12 + $0x50] sm:$0xf]  ;;  %v10005_v19 = vld [vmem:[#allocation12 + $0x174] sm:$0xf0]  ;;  %v9177_v54 = vld [vmem:[#allocation12 + $0x238] sm:$0xf0] }
 0x77f   : > { %6398 = vmatpush.bf16.msra.mxu1 %v9168_v15  ;;  %6426 = vmatpush.bf16.msra.mxu3 %v9172_v49  ;;  %v9972_v29 = vld [vmem:[#allocation12 + $0x6c] sm:$0xf0]  ;;  %v9273_v15 = vld [vmem:[#allocation12 + $0x2f8] sm:$0xf0]  ;;  %v9240_v49 = vor.u32 %v10045_v60, %v9239_v34  ;;  %v9080_v53 = vor.u32 %v10005_v19, %v9079_v51  ;;  %v9180_v52 = vor.u32 %v10025_v28, %v9177_v54  ;;  %v9981_v2 = vld [vmem:[#allocation12 + $0xb4] sm:$0xf0] }
 0x780   : > { %v9276_v37 = vor.u32 %v10049_v18, %v9273_v15  ;;  %v9989_v18 = vld [vmem:[#allocation12 + $0xf4] sm:$0xf0]  ;;  %v9985_v15 = vld [vmem:[#allocation12 + $0xdc] sm:$0xf] }
 0x781   : > { %v9017_v34 = vld [vmem:[#allocation12 + $0xf8] sm:$0xf0] }
 0x782   : > { %6379 = vmatpush.bf16.msra.mxu0 %v9072_v12  ;;  %6407 = vmatpush.bf16.msra.mxu2 %v9076_v27  ;;  %v8913_v12 = vld [vmem:[#allocation12 + $0x30] sm:$0xf0]  ;;  %v9143_v27 = vld [vmem:[#allocation12 + $0x1d8] sm:$0xf]  ;;  %v9977_v5 = vld [vmem:[#allocation12 + $0x9c] sm:$0xf] }
 0x783   : > { %6447 = vmatpush.bf16.msrb.mxu1 %v9400_v62  ;;  %6475 = vmatpush.bf16.msrb.mxu3 %v9404_v20  ;;  %v8944_v62 = vor.u32 %v9972_v29, %v8943_v11  ;;  %v10041_v20 = vld [vmem:[#allocation12 + $0x29c] sm:$0xf]  ;;  %v8916_v48 = vor.u32 %v9960_v9, %v8913_v12 }
 0x784   : > { %6399 = vmatmul.bf16.vlgmr.msra.gmra.mxu1 %v11556_v21  ;;  %6427 = vmatmul.bf16.vlgmr.msra.gmra.mxu3 %v11556_v21  ;;  %v9993_v11 = vld [vmem:[#allocation12 + $0x11c] sm:$0xf] }
 0x785   : > { %v9049_v29 = vld [vmem:[#allocation12 + $0x138] sm:$0xf0] }
 0x786   : > { %6380 = vmatpush.bf16.msra.mxu0 %v9040_v44  ;;  %6408 = vmatpush.bf16.msra.mxu2 %v9044_v3  ;;  %v9144_v44 = vor.u32 %v10021_v35, %v9143_v27  ;;  %v9148_v3 = vor.u32 %v10017_v13, %v9145_v14  ;;  %v8985_v9 = vld [vmem:[#allocation12 + $0xb8] sm:$0xf0]  ;;  %v8951_v35 = vld [vmem:[#allocation12 + $0x58] sm:$0xf] }
 0x787   : > { %6448 = vmatpush.bf16.msrb.mxu1 %v9368_v26  ;;  %6476 = vmatpush.bf16.msrb.mxu3 %v9372_v42  ;;  %v9241_v26 = vld [vmem:[#allocation12 + $0x2b8] sm:$0xf0]  ;;  %v8988_v27 = vor.u32 %v9977_v5, %v8985_v9  ;;  %v9973_v13 = vld [vmem:[#allocation12 + $0x74] sm:$0xf0] }
 0x788   : > { %v9244_v42 = vor.u32 %v10041_v20, %v9241_v26  ;;  %v9969_v14 = vld [vmem:[#allocation12 + $0x5c] sm:$0xf]  ;;  %v8919_v26 = vld [vmem:[#allocation12 + $0x18] sm:$0xf] }
 0x789   : > { %6357 = vmatmul.bf16.vlgmr.msrb.gmra.mxu2 %v11570_v36  ;;  %6329 = vmatmul.bf16.vlgmr.msrb.gmra.mxu0 %v11570_v36 }
 0x78a   : > { %6381 = vmatpush.bf16.msra.mxu0 %v9008_v22  ;;  %6409 = vmatpush.bf16.msra.mxu2 %v9012_v43  ;;  %v9112_v22 = vor.u32 %v10013_v16, %v9111_v32  ;;  %v9116_v43 = vor.u32 %v10009_v63, %v9113_v30 }
 0x78b   : > { %6449 = vmatpush.bf16.msrb.mxu1 %v9336_v47  ;;  %6477 = vmatpush.bf16.msrb.mxu3 %v9340_v46  ;;  %v9208_v47 = vor.u32 %v10037_v50, %v9207_v8  ;;  %v9212_v46 = vor.u32 %v10033_v33, %v9209_v39  ;;  %v9965_v8 = vld [vmem:[#allocation12 + $0x34] sm:$0xf0]  ;;  %v9961_v50 = vld [vmem:[#allocation12 + $0x1c] sm:$0xf] }
 0x78e   : > { %6382 = vmatpush.bf16.msra.mxu0 %v8976_v41  ;;  %6410 = vmatpush.bf16.msra.mxu2 %v8980_v56  ;;  %v9047_v41 = vld [vmem:[#allocation12 + $0x118] sm:$0xf] }
 0x78f   : > { %6450 = vmatpush.bf16.msrb.mxu1 %v9304_v58  ;;  %6478 = vmatpush.bf16.msrb.mxu3 %v9308_v57  ;;  %v9176_v58 = vor.u32 %v10029_v25, %v9175_v45  ;;  %v9997_v56 = vld [vmem:[#allocation12 + $0x134] sm:$0xf0]  ;;  %v9052_v57 = vor.u32 %v9993_v11, %v9049_v29 }
 0x790   : > { %v9048_v7 = vor.u32 %v9997_v56, %v9047_v41 }
 0x792   : > { %6383 = vmatpush.bf16.msra.mxu0 %v8944_v62  ;;  %6411 = vmatpush.bf16.msra.mxu2 %v8948_v40  ;;  %v9020_v62 = vor.u32 %v9985_v15, %v9017_v34  ;;  %v8983_v40 = vld [vmem:[#allocation12 + $0x98] sm:$0xf] }
 0x793   : > { %6451 = vmatpush.bf16.msrb.mxu1 %v9272_v1  ;;  %6479 = vmatpush.bf16.msrb.mxu3 %v9276_v37  ;;  %v9015_v1 = vld [vmem:[#allocation12 + $0xd8] sm:$0xf]  ;;  %v8984_v12 = vor.u32 %v9981_v2, %v8983_v40  ;;  %v8953_v37 = vld [vmem:[#allocation12 + $0x78] sm:$0xf0] }
 0x794   : > { %v9016_v60 = vor.u32 %v9989_v18, %v9015_v1  ;;  %v8956_v20 = vor.u32 %v9969_v14, %v8953_v37 }
 0x796   : > { %6384 = vmatpush.bf16.msra.mxu0 %v8912_v0  ;;  %6412 = vmatpush.bf16.msra.mxu2 %v8916_v48  ;;  %v8921_v0 = vld [vmem:[#allocation12 + $0x38] sm:$0xf0] }
 0x797   : > { %6452 = vmatpush.bf16.msrb.mxu1 %v9240_v49  ;;  %6480 = vmatpush.bf16.msrb.mxu3 %v9244_v42  ;;  %v8952_v49 = vor.u32 %v9973_v13, %v8951_v35  ;;  %v8924_v48 = vor.u32 %v9961_v50, %v8921_v0 }
 0x799   : > { %6413 = vmatmul.bf16.vlgmr.msra.gmra.mxu2 %v11570_v36  ;;  %6385 = vmatmul.bf16.vlgmr.msra.gmra.mxu0 %v11570_v36 }
 0x79a   : > { %6433 = vmatpush.bf16.msrb.mxu0 %v9144_v44  ;;  %6461 = vmatpush.bf16.msrb.mxu2 %v9148_v3 }
 0x79b   : > { %6453 = vmatpush.bf16.msrb.mxu1 %v9208_v47  ;;  %6481 = vmatpush.bf16.msrb.mxu3 %v9212_v46 }
 0x79e   : > { %6434 = vmatpush.bf16.msrb.mxu0 %v9112_v22  ;;  %6462 = vmatpush.bf16.msrb.mxu2 %v9116_v43 }
 0x79f   : > { %6454 = vmatpush.bf16.msrb.mxu1 %v9176_v58  ;;  %6482 = vmatpush.bf16.msrb.mxu3 %v9180_v52 }
 0x7a2   : > { %6435 = vmatpush.bf16.msrb.mxu0 %v9080_v53  ;;  %6463 = vmatpush.bf16.msrb.mxu2 %v9084_v55 }
 0x7a3   : > { %6455 = vmatmul.bf16.vlgmr.msrb.gmra.mxu1 %v11556_v21  ;;  %6483 = vmatmul.bf16.vlgmr.msrb.gmra.mxu3 %v11556_v21  ;;  %v8920_v21 = vor.u32 %v9965_v8, %v8919_v26 }
 0x7a6   : > { %6436 = vmatpush.bf16.msrb.mxu0 %v9048_v7  ;;  %6464 = vmatpush.bf16.msrb.mxu2 %v9052_v57 }
 0x7aa   : > { %6437 = vmatpush.bf16.msrb.mxu0 %v9016_v60  ;;  %6465 = vmatpush.bf16.msrb.mxu2 %v9020_v62 }
 0x7ae   : > { %6438 = vmatpush.bf16.msrb.mxu0 %v8984_v12  ;;  %6466 = vmatpush.bf16.msrb.mxu2 %v8988_v27 }
 0x7b2   : > { %6439 = vmatpush.bf16.msrb.mxu0 %v8952_v49  ;;  %6467 = vmatpush.bf16.msrb.mxu2 %v8956_v20 }
 0x7b6   : > { %6440 = vmatpush.bf16.msrb.mxu0 %v8920_v21  ;;  %6468 = vmatpush.bf16.msrb.mxu2 %v8924_v48 }
 0x7b9   : > { %6441 = vmatmul.bf16.vlgmr.msrb.gmra.mxu0 %v11570_v36  ;;  %6469 = vmatmul.bf16.vlgmr.msrb.gmra.mxu2 %v11570_v36 }
 0x7d2   : > { %v6288_v44 = vpop.f32.mrf.mxu1 }
 0x7d8   : > { %v6316_v3 = vpop.f32.mrf.mxu3 }
 0x7da   : > { %v6290_v63 = vpop.f32.mrf.mxu1 }
 0x7e0   : > { %v6318_v42 = vpop.f32.mrf.mxu3 }
 0x7e2   : > { %v6344_v45 = vpop.f32.mrf.mxu1 }
 0x7e8   : > { %v6372_v22 = vpop.f32.mrf.mxu3 }
 0x7ea   : > { %v6346_v19 = vpop.f32.mrf.mxu1 }
 0x7f0   : > { %v6374_v58 = vpop.f32.mrf.mxu3 }
 0x7f6   : > { %v6274_v32 = vpop.f32.mrf.mxu0 }
 0x7f7   : > { %v11585_v16 = vadd.f32 %v6288_v44, %v6274_v32 }
 0x7fc   : > { %v6302_v30 = vpop.f32.mrf.mxu2 }
 0x7fd   : > { %v11587_v47 = vadd.f32 %v6316_v3, %v6302_v30 }
 0x7fe   : > { %v6276_v33 = vpop.f32.mrf.mxu0 }
 0x7ff   : > { %v11589_v39 = vadd.f32 %v6290_v63, %v6276_v33 }
 0x801   : > { %v6400_v53 = vpop.f32.mrf.mxu1 }
 0x804   : > { %v6304_v25 = vpop.f32.mrf.mxu2 }
 0x805   : > { %v11591_v43 = vadd.f32 %v6318_v42, %v6304_v25 }
 0x806   : > { %v6330_v36 = vpop.f32.mrf.mxu0 }
 0x807   : > { %v11593_v51 = vadd.f32 %v6344_v45, %v6330_v36  ;;  %v6428_v56 = vpop.f32.mrf.mxu3 }
 0x809   : > { %v6402_v1 = vpop.f32.mrf.mxu1 }
 0x80c   : > { %v6358_v10 = vpop.f32.mrf.mxu2 }
 0x80d   : > { %v11595_v59 = vadd.f32 %v6372_v22, %v6358_v10 }
 0x80e   : > { %v6332_v46 = vpop.f32.mrf.mxu0 }
 0x80f   : > { %v11597_v28 = vadd.f32 %v6346_v19, %v6332_v46  ;;  %v6430_v60 = vpop.f32.mrf.mxu3 }
 0x814   : > { %v6360_v54 = vpop.f32.mrf.mxu2 }
 0x815   : > { %v11599_v55 = vadd.f32 %v6374_v58, %v6360_v54 }
 0x816   : > { %v6386_v41 = vpop.f32.mrf.mxu0 }
 0x817   : > { %v6401_v11 = vadd.f32 %v6400_v53, %v6386_v41 }
 0x819   : > { %v6489_v52 = vadd.f32 %v6401_v11, %v11101_v23 }
 0x81c   : > { %v6414_v29 = vpop.f32.mrf.mxu2 }
 0x81d   : > { %v6429_v7 = vadd.f32 %v6428_v56, %v6414_v29 }
 0x81e   : > { %v6388_v57 = vpop.f32.mrf.mxu0 }
 0x81f   : > { %v6490_v18 = vadd.f32 %v6429_v7, %v11103_v24  ;;  %v6403_v34 = vadd.f32 %v6402_v1, %v6388_v57 }
 0x820   : > { %v6456_v3 = vpop.f32.mrf.mxu1 }
 0x821   : > { %v6497_v15 = vpack.c.bf16 %v6490_v18, %v6489_v52  ;;  %v6493_v5 = vadd.f32 %v6403_v34, %v11101_v23 }
 0x823   : > { %v6521_v62 = vrot.slane %v6497_v15, 4  ;;  %v6501_v12 = vunpack.c.l.bf16 %v6497_v15 }
 0x824   : > { %v6416_v40 = vpop.f32.mrf.mxu2 }
 0x825   : > { %v6525_v2 = vunpack.c.l.bf16 %v6521_v62  ;;  %v6431_v9 = vadd.f32 %v6430_v60, %v6416_v40  ;;  %v6503_v14 = vmul.f32 0.5, %v6501_v12 }
 0x826   : > { %v6484_v32 = vpop.f32.mrf.mxu3 }
 0x827   : > { %v6494_v27 = vadd.f32 %v6431_v9, %v11103_v24  ;;  %v6527_v35 = vmul.f32 0.5, %v6525_v2  ;;  %v6505_v26 = vpack.c.bf16 %v6503_v14, %v6503_v14 }
 0x828   : > { %v6458_v58 = vpop.f32.mrf.mxu1 }
 0x829   : > { %v6499_v13 = vpack.c.bf16 %v6494_v27, %v6493_v5  ;;  %v6529_v49 = vpack.c.bf16 %v6527_v35, %v6527_v35  ;;  %v6507_v21 = vunpack.c.l.bf16 %v6505_v26 }
 0x82b   : > { %v6522_v37 = vrot.slane %v6499_v13, 4  ;;  %v6502_v8 = vunpack.c.l.bf16 %v6499_v13  ;;  %v6531_v50 = vunpack.c.l.bf16 %v6529_v49 }
 0x82d   : > { %v6526_v20 = vunpack.c.l.bf16 %v6522_v37  ;;  %v6504_v48 = vmul.f32 0.5, %v6502_v8  ;;  %10348 = vtanh.f32 %v6531_v50 }
 0x82e   : > { %10350 = vtanh.f32 %v6507_v21  ;;  %v6486_v41 = vpop.f32.mrf.mxu3 }
 0x82f   : > { %v6528_v0 = vmul.f32 0.5, %v6526_v20  ;;  %v6506_v24 = vpack.c.bf16 %v6504_v48, %v6504_v48 }
 0x831   : > { %v6530_v23 = vpack.c.bf16 %v6528_v0, %v6528_v0  ;;  %v6508_v22 = vunpack.c.l.bf16 %v6506_v24 }
 0x833   : > { %v6532_v30 = vunpack.c.l.bf16 %v6530_v23  ;;  %v10349_v33 = vpop.eup %10348 }
 0x834   : > { %v10351_v36 = vpop.eup %10350  ;;  %v6535_v10 = vpack.c.bf16 %v10349_v33, %v10349_v33 }
 0x835   : > { %10352 = vtanh.f32 %v6532_v30  ;;  %v6511_v53 = vpack.c.bf16 %v10351_v36, %v10351_v36 }
 0x836   : > { %v6442_v44 = vpop.f32.mrf.mxu0  ;;  %10354 = vtanh.f32 %v6508_v22  ;;  %v6537_v52 = vunpack.c.l.bf16 %v6535_v10 }
 0x837   : > { %v6457_v63 = vadd.f32 %v6456_v3, %v6442_v44  ;;  %v6513_v15 = vunpack.c.l.bf16 %v6511_v53 }
 0x838   : > { %v6539_v2 = vmul.f32 0.5, %v6537_v52 }
 0x839   : > { %v6491_v45 = vadd.f32 %v6457_v63, %v11109_v31  ;;  %v6515_v27 = vmul.f32 0.5, %v6513_v15 }
 0x83a   : > { %v6541_v20 = vadd.f32 0.5, %v6539_v2 }
 0x83b   : > { %v10353_v18 = vpop.eup %10352  ;;  %v6517_v0 = vadd.f32 0.5, %v6515_v27 }
 0x83c   : > { %v6470_v42 = vpop.f32.mrf.mxu2  ;;  %v10355_v40 = vpop.eup %10354  ;;  %v6536_v5 = vpack.c.bf16 %v10353_v18, %v10353_v18  ;;  %v6575_v48 = vmul.f32 %v6541_v20, %v11445_v6 }
 0x83d   : > { %v6485_v25 = vadd.f32 %v6484_v32, %v6470_v42  ;;  %v6512_v13 = vpack.c.bf16 %v10355_v40, %v10355_v40 }
 0x83e   : > { %v6444_v46 = vpop.f32.mrf.mxu0  ;;  %v6538_v8 = vunpack.c.l.bf16 %v6536_v5 }
 0x83f   : > { %v6492_v19 = vadd.f32 %v6485_v25, %v11111_v38  ;;  %v6459_v29 = vadd.f32 %v6458_v58, %v6444_v46 }
 0x840   : > { %v6540_v3 = vmul.f32 0.5, %v6538_v8 }
 0x841   : > { %v6498_v54 = vpack.c.bf16 %v6492_v19, %v6491_v45  ;;  %v6495_v60 = vadd.f32 %v6459_v29, %v11109_v31 }
 0x842   : > { %v6542_v45 = vadd.f32 0.5, %v6540_v3 }
 0x843   : > { %v6543_v56 = vunpack.c.l.bf16 %v6498_v54  ;;  %v6553_v11 = vrot.slane %v6498_v54, 4 }
 0x844   : > { %v6472_v7 = vpop.f32.mrf.mxu2  ;;  %v6576_v6 = vmul.f32 %v6542_v45, %v11449_v4 }
 0x845   : > { %10356 = vtanh.f32 %v6543_v56  ;;  %v6557_v57 = vunpack.c.l.bf16 %v6553_v11  ;;  %v6487_v1 = vadd.f32 %v6486_v41, %v6472_v7 }
 0x847   : > { %v6559_v34 = vmul.f32 0.5, %v6557_v57  ;;  %v6496_v62 = vadd.f32 %v6487_v1, %v11111_v38  ;;  %v6514_v38 = vunpack.c.l.bf16 %v6512_v13 }
 0x849   : > { %v6561_v9 = vpack.c.bf16 %v6559_v34, %v6559_v34  ;;  %v6500_v12 = vpack.c.bf16 %v6496_v62, %v6495_v60  ;;  %v6516_v24 = vmul.f32 0.5, %v6514_v38 }
 0x84b   : > { %v10357_v35 = vpop.eup %10356  ;;  %v6563_v14 = vunpack.c.l.bf16 %v6561_v9  ;;  %v6544_v37 = vunpack.c.l.bf16 %v6500_v12  ;;  %v6554_v49 = vrot.slane %v6500_v12, 4  ;;  %v6518_v36 = vadd.f32 0.5, %v6516_v24 }
 0x84c   : > { %v6547_v26 = vpack.c.bf16 %v10357_v35, %v10357_v35 }
 0x84d   : > { %10358 = vtanh.f32 %v6563_v14  ;;  %v6558_v50 = vunpack.c.l.bf16 %v6554_v49 }
 0x84e   : > { %v6549_v31 = vunpack.c.l.bf16 %v6547_v26  ;;  %10360 = vtanh.f32 %v6544_v37 }
 0x84f   : > { %v6560_v21 = vmul.f32 0.5, %v6558_v50 }
 0x850   : > { %v6577_v44 = vmul.f32 %v6549_v31, %v6517_v0 }
 0x851   : > { %v6562_v23 = vpack.c.bf16 %v6560_v21, %v6560_v21 }
 0x852   : > { %v11610_v32 = vadd.f32 %v6577_v44, %v6575_v48 }
 0x853   : > { %v10359_v63 = vpop.eup %10358  ;;  %v6564_v30 = vunpack.c.l.bf16 %v6562_v23 }
 0x854   : > { %v10361_v42 = vpop.eup %10360  ;;  %v6567_v33 = vpack.c.bf16 %v10359_v63, %v10359_v63  ;;  %10362 = vtanh.f32 %v11610_v32 }
 0x855   : > { %v6548_v25 = vpack.c.bf16 %v10361_v42, %v10361_v42  ;;  %10364 = vtanh.f32 %v6564_v30 }
 0x856   : > { %v6569_v22 = vunpack.c.l.bf16 %v6567_v33 }
 0x857   : > { %v6550_v19 = vunpack.c.l.bf16 %v6548_v25 }
 0x858   : > { %v6571_v10 = vmul.f32 0.5, %v6569_v22 }
 0x859   : > { %v6578_v46 = vmul.f32 %v6550_v19, %v6518_v36 }
 0x85a   : > { %v10363_v58 = vpop.eup %10362  ;;  %v6573_v54 = vadd.f32 0.5, %v6571_v10 }
 0x85b   : > { %v10365_v53 = vpop.eup %10364  ;;  %v11614_v41 = vadd.f32 %v6578_v46, %v6576_v6 }
 0x85c   : > { %v6583_v56 = vmul.f32 %v10363_v58, %v6573_v54  ;;  %v6568_v11 = vpack.c.bf16 %v10365_v53, %v10365_v53 }
 0x85d   : > { %10366 = vtanh.f32 %v11614_v41 }
 0x85e   : > { %v6570_v29 = vunpack.c.l.bf16 %v6568_v11 }
 0x860   : > { %v6572_v52 = vmul.f32 0.5, %v6570_v29  ;;  %6589 = sbr.rel (%p9405_p12) target bundleno = 2315 (0x90b), region = 92 }
 0x862   : > { %v6574_v7 = vadd.f32 0.5, %v6572_v52 }
 0x863   : > { %v10367_v57 = vpop.eup %10366 }
 0x864   : > { %v6584_v1 = vmul.f32 %v10367_v57, %v6574_v7 }
 0x865   : > { %v10093_v4 = vld [vmem:[#allocation16 + $0x38] sm:$0xff]  ;;  %v10092_v15 = vld [vmem:[#allocation16 + $0x30] sm:$0xff]  ;;  %v10091_v34 = vld [vmem:[#allocation16 + $0x28] sm:$0xff]  ;;  %v6590_v5 = vmax.f32 %v6583_v56, 0.0  ;;  %v6675_v27 = vlaneseq }
 0x866   : > { %v6591_v18 = vmax.f32 %v6584_v1, 0.0  ;;  %6661 = vmatpush.bf16.msra.mxu0 %v10093_v4  ;;  %v10090_v60 = vld [vmem:[#allocation16 + $0x20] sm:$0xff]  ;;  %v10089_v62 = vld [vmem:[#allocation16 + $0x18] sm:$0xff]  ;;  %v10088_v40 = vld [vmem:[#allocation16 + $0x10] sm:$0xff] }
 0x867   : > { %v10087_v2 = vld [vmem:[#allocation16 + $0x8] sm:$0xff]  ;;  %v10086_v9 = vld [vmem:[#allocation16] sm:$0xff]  ;;  %v6676_v35 = vshrl.u32 %v6675_v27, 7 }
 0x868   : > { %6683 = vst [vmem:[#allocation18 + $0x8] sm:$0xff] %v6591_v18  ;;  %v6592_v12 = vpack.c.bf16 %v6591_v18, %v6590_v5  ;;  %v10368_v13 = vld [vmem:[%s11663_s6] ss:$0 sm:$0xff] }
 0x869   : > { %vm6678_vm3 = vcmp.lt.s32.totalorder %v6676_v35, 2 }
 0x86a   : > { %6662 = vmatpush.bf16.msra.mxu0 %v10092_v15 }
 0x86e   : > { %6663 = vmatpush.bf16.msra.mxu0 %v10091_v34 }
 0x872   : > { %6664 = vmatpush.bf16.msra.mxu0 %v10090_v60 }
 0x876   : > { %6665 = vmatpush.bf16.msra.mxu0 %v10089_v62 }
 0x87a   : > { %6666 = vmatpush.bf16.msra.mxu0 %v10088_v40 }
 0x87e   : > { %6667 = vmatpush.bf16.msra.mxu0 %v10087_v2 }
 0x882   : > { %6668 = vmatpush.bf16.msra.mxu0 %v10086_v9 }
 0x885   : > { %6669 = vmatmul.bf16.vlgmr.msra.gmra.mxu0 %v6592_v12 }
 0x902   : > { %v6670_v14 = vpop.f32.mrf.mxu0 }
 0x903   : > { %v6671_v37 = vadd.f32 %v10368_v13, %v6670_v14 }
 0x905   : > { %v6680_v49 = vsel %vm6678_vm3, %v6671_v37, %v6590_v5 }
 0x906   : > { %6682 = vst [vmem:[#allocation18] sm:$0xff] %v6680_v49 }
 0x90a   : > { %v6672_v20 = vpop.f32.mrf.mxu0 }
 0x90b PF: > { %6684 = vst [vmem:[#allocation3] sm:$0xff] %v11585_v16  ;;  %p10154_p13 = scmp.eq.s32.totalorder %s10710_s8, 1  ;;  %s6705_s14 = sshll.u32 %s11664_s7, 4  ;;  %s6706_s14 = int_to_ptr.hbm [resolvable:$true] %s6705_s14 }
 0x90c   : > { %6685 = vst [vmem:[#allocation3 + $0x8] sm:$0xff] %v11587_v47  ;;  %s10643_s24 = smov [#allocation18]   ;;  %s10644_s27 = smov 128  }
 0x90d   : > { %6686 = vst [vmem:[#allocation3 + $0x28] sm:$0xff] %v11593_v51  ;;  %s6703_s17 = sshll.u32 %s10643_s24, 4  ;;  %s10645_s9 = smov 8   ;;  %s6704_s17 = int_to_ptr.vmem [resolvable:$true] %s6703_s17 }
 0x90e   : > { %6687 = vst [vmem:[#allocation3 + $0x38] sm:$0xff] %v11595_v59  ;;  %10120 = dma.vmem_to_hbm [thread:$0]  (%p10154_p13), %s6704_s17, 256, %s6706_s14, [#allocation9], %s10644_s27, %s10644_s27, %s10645_s9  }
 0x90f   : > { %6688 = vst [vmem:[#allocation3 + $0x10] sm:$0xff] %v11589_v39 }
 0x910   : > { %6689 = vst [vmem:[#allocation3 + $0x30] sm:$0xff] %v11591_v43 }
 0x911   : > { %6690 = vst [vmem:[#allocation3 + $0x18] sm:$0xff] %v11597_v28 }
 0x912   : > { %6691 = vst [vmem:[#allocation3 + $0x20] sm:$0xff] %v11599_v55 }
 0x913   : > { %6692 = vst [vmem:[#allocation4] sm:$0xff] %v11562_v61 }
 0x914   : > { %6693 = vst [vmem:[#allocation4 + $0x8] sm:$0xff] %v11564_v17 }
 0x915   : > { %6694 = vst [vmem:[#allocation5] sm:$0xff] %v6583_v56 }
 0x916   : > { %6695 = vst [vmem:[#allocation5 + $0x8] sm:$0xff] %v6584_v1 }
 0x917   : > { %6696 = vst [vmem:[#allocation6] sm:$0xff] %v11610_v32 }
 0x918   : > { %6697 = vst [vmem:[#allocation6 + $0x8] sm:$0xff] %v11614_v41 }
 0x919   : > { %10610 = dma.done.wait (%p10154_p13), [#allocation9], 256  }
 0x91a   : > { %10612 = vsyncadd (%p10154_p13), [#allocation9], 4294967040 }
 0x91b PF: > { %p21_p0 = scmp.ge.s32.totalorder %s10751_s23, 4   ;;  %s11669_s24 = smov %s10619_s25 }
 0x91c   : > { %s11670_s25 = smov %s10623_s26  ;;  %s11671_s26 = smov %s10762_s10 }
 0x91d   : > { %s11672_s27 = smov %s10751_s23  ;;  %23 = sbr.rel (!%p21_p0) target bundleno = 7 (0x7), region = 125 }
 0x922   :  { %6722 = vsyncpa [#allocation8], 1 }
 0x923   :  { %6724 = vsyncpa [#allocation8 + $0x1], 1 }
 0x924   :  { %6725 = vsyncpa [#allocation11], 1 }
 0x925   :  { %6726 = vsyncpa [#allocation14], 1 }
 0x926   :  { %6727 = vsyncpa [#allocation17], 1 }
 0x927   :  { %6728 = vsyncpa [#allocation9], 1 }
 0x928   :  { %6730 = vsyncpa [#allocation9 + $0x1], 1 }

</bundles_post_ra>
